<compile_context>
chip_gen: v7x
topology: tpu7x:2x2x1
jax: 0.10.0
libtpu: 0.0.40
codegen_flags: <defaults>
</compile_context>

<pallas_src>
import functools

import jax
import jax.numpy as jnp
import numpy as np
from jax.experimental import pallas as pl
from jax.experimental.pallas import tpu as pltpu


def _mish_fast(x):
    # mish(x) = x * tanh(softplus(x)) = x * (u^2 - 1) / (u^2 + 1), u = 1 + e^x.
    # Clamp before exp to stay finite in f32; approx reciprocal runs on the EUP.
    u = 1.0 + jnp.exp(jnp.minimum(x, 20.0))
    u2 = u * u
    return x * (u2 - 1.0) * pl.reciprocal(u2 + 1.0, approx=True)


def channel_mix_kernel(x_ref, prev_ref, wkvr_ref, bkvr_ref, ww_ref, bw_ref,
                       o_ref, *, hidden):
    x = x_ref[...]                                  # (TT, C) bf16
    tt, c = x.shape
    half = c // 2

    # Fused ZeroPad2d((0, 0, 1, -1)) time shift on the first C//2 channels:
    # row i takes row i-1 (row 0 takes this tile's boundary row).  Static
    # 128-lane column split; only the shifted half is copied.
    prev = prev_ref[...]                            # (1, C) bf16
    x_lo = x[:, :half]
    x_hi = x[:, half:]
    shifted_lo = jnp.concatenate([prev[:, :half], x_lo[: tt - 1, :]], axis=0)
    xs = jnp.concatenate([shifted_lo, x_hi], axis=1)          # (TT, C) bf16

    # One fused MXU call for the K/V/R projections, f32 accumulation.
    kvr = jnp.dot(xs, wkvr_ref[...],
                  preferred_element_type=jnp.float32) + bkvr_ref[...]
    k = kvr[:, :hidden]
    v = kvr[:, hidden:2 * hidden]
    r = kvr[:, 2 * hidden:]

    kv = (_mish_fast(k) * v).astype(jnp.bfloat16)
    wkv = jnp.dot(kv, ww_ref[...],
                  preferred_element_type=jnp.float32) + bw_ref[...]

    o_ref[...] = (jax.nn.sigmoid(r) * wkv).astype(o_ref.dtype)


def rwkv_channel_mix(x, params, *, time_tile=256):
    """x: (B, T, C) float32. params: dict of transposed Linear weights/biases."""
    B, T, C = x.shape
    H = params["wk"].shape[1]

    tt = int(time_tile)
    assert tt % 16 == 0, "time_tile must be a multiple of 16 (bf16 sublane pack)"
    nT = pl.cdiv(T, tt)

    # bf16 activations through HBM (matmul runs in bf16 anyway).
    xb = x.astype(jnp.bfloat16)

    # boundary[b, t] = x[b, t*tt - 1] (zeros for t == 0): the single previous
    # token each tile needs for the time shift.  Stored as (B, nT, 1, C) so a
    # (1, C) per-step block satisfies the (8,128)/full-dim layout rule.
    zero_row = jnp.zeros((B, 1, C), jnp.bfloat16)
    if nT > 1:
        tail = xb[:, tt - 1:(nT - 1) * tt:tt, :]               # (B, nT-1, C)
        boundary = jnp.concatenate([zero_row, tail], axis=1)   # (B, nT, C)
    else:
        boundary = zero_row
    boundary = boundary.reshape(B, nT, 1, C)

    # Fused bf16 weights for the MXU, f32 biases.
    wkvr = jnp.concatenate(
        [params["wk"], params["wv"], params["wr"]], axis=1).astype(jnp.bfloat16)
    bkvr = jnp.concatenate(
        [params["bk"], params["bv"], params["br"]], axis=1).astype(jnp.float32)
    ww = params["ww"].astype(jnp.bfloat16)
    bw = params["bw"].astype(jnp.float32)

    def _nbytes(a):
        return a.size * a.dtype.itemsize

    weight_bytes = sum(_nbytes(a) for a in (wkvr, bkvr, ww, bw))   # single-buffered
    tile_bytes = tt * C * (2 + 4)                    # bf16 in tile + f32 out tile
    inter_bytes = (tt * (2 * H + C) * 4              # fused kvr f32
                   + tt * H * 2                      # kv bf16
                   + tt * C * (2 + 4))               # xs bf16 + wkv f32
    est = weight_bytes + 2 * tile_bytes + 4 * C + inter_bytes + (8 << 20)
    try:
        vmem_cap = pltpu.get_tpu_info().vmem_capacity_bytes
    except Exception:
        vmem_cap = 128 << 20
    vmem_limit = int(min(0.75 * vmem_cap, max(est, 32 << 20)))

    resident = lambda b, t: (0, 0)                   # block index never changes
    single = pl.Buffered(1)                          # resident -> no double buffer

    out = pl.pallas_call(
        functools.partial(channel_mix_kernel, hidden=H),
        out_shape=jax.ShapeDtypeStruct((B, T, C), x.dtype),
        grid_spec=pltpu.PrefetchScalarGridSpec(
            num_scalar_prefetch=0,
            grid=(B, nT),
            in_specs=[
                pl.BlockSpec((None, tt, C), lambda b, t: (b, t, 0)),          # x slab
                pl.BlockSpec((None, None, 1, C), lambda b, t: (b, t, 0, 0)),  # boundary
                pl.BlockSpec((C, 2 * H + C), resident, pipeline_mode=single), # fused KVR W
                pl.BlockSpec((1, 2 * H + C), resident, pipeline_mode=single), # fused KVR b
                pl.BlockSpec((H, C), resident, pipeline_mode=single),         # out-proj W
                pl.BlockSpec((1, C), resident, pipeline_mode=single),         # out-proj b
            ],
            out_specs=pl.BlockSpec((None, tt, C), lambda b, t: (b, t, 0)),
        ),
        compiler_params=pltpu.CompilerParams(
            dimension_semantics=("parallel", "parallel"),
            vmem_limit_bytes=vmem_limit),
    )(xb, boundary, wkvr, bkvr, ww, bw)

    return out


def reference(x, params):
    """Pure-JAX f32 reference matching the PyTorch module."""
    B, T, C = x.shape
    half = C // 2
    dot = functools.partial(jnp.matmul, precision=jax.lax.Precision.HIGHEST)
    shifted = jnp.pad(x[:, :, :half], ((0, 0), (1, 0), (0, 0)))[:, :T, :]
    xs = jnp.concatenate([shifted, x[:, :, half:]], axis=-1)
    k = dot(xs, params["wk"]) + params["bk"][0]
    v = dot(xs, params["wv"]) + params["bv"][0]
    r = dot(xs, params["wr"]) + params["br"][0]
    mish = k * jnp.tanh(jax.nn.softplus(k))
    wkv = dot(mish * v, params["ww"]) + params["bw"][0]
    return jax.nn.sigmoid(r) * wkv


def init_params(key, n_embd, n_ffn):
    # nn.Linear stores W as (out, in); we keep transposed (in, out) copies.
    ks = jax.random.split(key, 8)
    s_in = 1.0 / np.sqrt(n_embd)
    s_hid = 1.0 / np.sqrt(n_ffn)
    return {
        "wk": jax.random.uniform(ks[0], (n_embd, n_ffn), jnp.float32, -s_in, s_in),
        "bk": jax.random.uniform(ks[1], (1, n_ffn), jnp.float32, -s_in, s_in),
        "wv": jax.random.uniform(ks[2], (n_embd, n_ffn), jnp.float32, -s_in, s_in),
        "bv": jax.random.uniform(ks[3], (1, n_ffn), jnp.float32, -s_in, s_in),
        "wr": jax.random.uniform(ks[4], (n_embd, n_embd), jnp.float32, -s_in, s_in),
        "br": jax.random.uniform(ks[5], (1, n_embd), jnp.float32, -s_in, s_in),
        "ww": jax.random.uniform(ks[6], (n_ffn, n_embd), jnp.float32, -s_hid, s_hid),
        "bw": jax.random.uniform(ks[7], (1, n_embd), jnp.float32, -s_hid, s_hid),
    }


if __name__ == "__main__":
    # n_embd=256 (lane-dense), n_ffn=512.  T=500 exercises both the boundary
    # row between time tiles (nT=2) and the masked partial last tile.
    B, T, C, H = 2, 500, 256, 512

    key = jax.random.PRNGKey(0)
    kx, kp = jax.random.split(key)
    x = jax.random.normal(kx, (B, T, C), jnp.float32)
    params = init_params(kp, C, H)

    out = jax.block_until_ready(rwkv_channel_mix(x, params, time_tile=256))
    ref = jax.block_until_ready(reference(x, params))

    # bf16 activations + bf16 MXU weights with f32 accumulation vs. an f32
    # reference -> correspondingly loose tolerance.
    np.testing.assert_allclose(np.asarray(out), np.asarray(ref), rtol=5e-2, atol=5e-2)
    print("KERNEL_OK")
</pallas_src>

<mosaic_0001>
module attributes {stable_mosaic.version = 11 : i64} {
  func.func @channel_mix_kernel(%arg0: i32, %arg1: i32, %arg2: memref<1x256x256xbf16, #tpu.memory_space<vmem>>, %arg3: memref<1x1x1x256xbf16, #tpu.memory_space<vmem>>, %arg4: memref<256x1280xbf16, #tpu.memory_space<vmem>>, %arg5: memref<1x1280xf32, #tpu.memory_space<vmem>>, %arg6: memref<512x256xbf16, #tpu.memory_space<vmem>>, %arg7: memref<1x256xf32, #tpu.memory_space<vmem>>, %arg8: memref<1x256x256xf32, #tpu.memory_space<vmem>>) attributes {dimension_semantics = [#tpu.dimension_semantics<parallel>, #tpu.dimension_semantics<parallel>], iteration_bounds = array<i64: 2, 2>, scalar_prefetch = 0 : i64, scratch_operands = 0 : i64, tpu.core_type = #tpu.core_type<tc>, window_params = [{transform_indices = @transform_0, window_bounds = array<i64: 1, 256, 256>}, {transform_indices = @transform_1, window_bounds = array<i64: 1, 1, 1, 256>}, {pipeline_mode = #tpu.pipeline_mode<synchronous>, transform_indices = @transform_2, window_bounds = array<i64: 256, 1280>}, {pipeline_mode = #tpu.pipeline_mode<synchronous>, transform_indices = @transform_3, window_bounds = array<i64: 1, 1280>}, {pipeline_mode = #tpu.pipeline_mode<synchronous>, transform_indices = @transform_4, window_bounds = array<i64: 512, 256>}, {pipeline_mode = #tpu.pipeline_mode<synchronous>, transform_indices = @transform_5, window_bounds = array<i64: 1, 256>}, {transform_indices = @transform_6, window_bounds = array<i64: 1, 256, 256>}]} {
    %c0 = arith.constant 0 : index
    %c0_0 = arith.constant 0 : index
    %c0_1 = arith.constant 0 : index
    %0 = vector.load %arg2[%c0, %c0_0, %c0_1] : memref<1x256x256xbf16, #tpu.memory_space<vmem>>, vector<1x256x256xbf16>
    %1 = vector.shape_cast %0 : vector<1x256x256xbf16> to vector<256x256xbf16>
    %c0_2 = arith.constant 0 : index
    %c0_3 = arith.constant 0 : index
    %c0_4 = arith.constant 0 : index
    %c0_5 = arith.constant 0 : index
    %2 = vector.load %arg3[%c0_2, %c0_3, %c0_4, %c0_5] : memref<1x1x1x256xbf16, #tpu.memory_space<vmem>>, vector<1x1x1x256xbf16>
    %3 = vector.shape_cast %2 : vector<1x1x1x256xbf16> to vector<1x256xbf16>
    %4 = vector.extract_strided_slice %1 {offsets = [0, 0], sizes = [256, 128], strides = [1, 1]} : vector<256x256xbf16> to vector<256x128xbf16>
    %5 = vector.extract_strided_slice %1 {offsets = [0, 128], sizes = [256, 128], strides = [1, 1]} : vector<256x256xbf16> to vector<256x128xbf16>
    %6 = vector.extract_strided_slice %3 {offsets = [0, 0], sizes = [1, 128], strides = [1, 1]} : vector<1x256xbf16> to vector<1x128xbf16>
    %7 = vector.extract_strided_slice %4 {offsets = [0, 0], sizes = [255, 128], strides = [1, 1]} : vector<256x128xbf16> to vector<255x128xbf16>
    %8 = tpu.concatenate %6, %7 in 0 : vector<1x128xbf16>, vector<255x128xbf16> -> vector<256x128xbf16>
    %9 = tpu.concatenate %8, %5 in 1 : vector<256x128xbf16>, vector<256x128xbf16> -> vector<256x256xbf16>
    %c0_6 = arith.constant 0 : index
    %c0_7 = arith.constant 0 : index
    %10 = vector.load %arg4[%c0_6, %c0_7] : memref<256x1280xbf16, #tpu.memory_space<vmem>>, vector<256x1280xbf16>
    %cst = arith.constant dense<0.000000e+00> : vector<256x1280xf32>
    %11 = tpu.matmul %9, %10, %cst {dimension_numbers = #tpu.dot_dimension_numbers<[1], [0], [0], [1], [0, 0, 1, 1], [], []>} : vector<256x256xbf16>, vector<256x1280xbf16>, vector<256x1280xf32> -> vector<256x1280xf32>
    %c0_8 = arith.constant 0 : index
    %c0_9 = arith.constant 0 : index
    %12 = vector.load %arg5[%c0_8, %c0_9] : memref<1x1280xf32, #tpu.memory_space<vmem>>, vector<1x1280xf32>
    %13 = vector.broadcast %12 : vector<1x1280xf32> to vector<256x1280xf32>
    %14 = arith.addf %11, %13 : vector<256x1280xf32>
    %15 = vector.extract_strided_slice %14 {offsets = [0, 0], sizes = [256, 512], strides = [1, 1]} : vector<256x1280xf32> to vector<256x512xf32>
    %16 = vector.extract_strided_slice %14 {offsets = [0, 512], sizes = [256, 512], strides = [1, 1]} : vector<256x1280xf32> to vector<256x512xf32>
    %17 = vector.extract_strided_slice %14 {offsets = [0, 1024], sizes = [256, 256], strides = [1, 1]} : vector<256x1280xf32> to vector<256x256xf32>
    %cst_10 = arith.constant 2.000000e+01 : f32
    %18 = vector.broadcast %cst_10 : f32 to vector<256x512xf32>
    %19 = arith.minimumf %15, %18 : vector<256x512xf32>
    %20 = math.exp %19 : vector<256x512xf32>
    %cst_11 = arith.constant 1.000000e+00 : f32
    %21 = vector.broadcast %cst_11 : f32 to vector<256x512xf32>
    %22 = arith.addf %21, %20 : vector<256x512xf32>
    %23 = arith.mulf %22, %22 : vector<256x512xf32>
    %cst_12 = arith.constant 1.000000e+00 : f32
    %24 = vector.broadcast %cst_12 : f32 to vector<256x512xf32>
    %25 = arith.subf %23, %24 : vector<256x512xf32>
    %26 = arith.mulf %15, %25 : vector<256x512xf32>
    %cst_13 = arith.constant 1.000000e+00 : f32
    %27 = vector.broadcast %cst_13 : f32 to vector<256x512xf32>
    %28 = arith.addf %23, %27 : vector<256x512xf32>
    %29 = tpu.reciprocal %28 {approx = true} : vector<256x512xf32> -> vector<256x512xf32>
    %30 = arith.mulf %26, %29 : vector<256x512xf32>
    %31 = arith.mulf %30, %16 : vector<256x512xf32>
    %32 = arith.truncf %31 : vector<256x512xf32> to vector<256x512xbf16>
    %c0_14 = arith.constant 0 : index
    %c0_15 = arith.constant 0 : index
    %33 = vector.load %arg6[%c0_14, %c0_15] : memref<512x256xbf16, #tpu.memory_space<vmem>>, vector<512x256xbf16>
    %cst_16 = arith.constant dense<0.000000e+00> : vector<256x256xf32>
    %34 = tpu.matmul %32, %33, %cst_16 {dimension_numbers = #tpu.dot_dimension_numbers<[1], [0], [0], [1], [0, 0, 1, 1], [], []>} : vector<256x512xbf16>, vector<512x256xbf16>, vector<256x256xf32> -> vector<256x256xf32>
    %c0_17 = arith.constant 0 : index
    %c0_18 = arith.constant 0 : index
    %35 = vector.load %arg7[%c0_17, %c0_18] : memref<1x256xf32, #tpu.memory_space<vmem>>, vector<1x256xf32>
    %36 = vector.broadcast %35 : vector<1x256xf32> to vector<256x256xf32>
    %37 = arith.addf %34, %36 : vector<256x256xf32>
    %38 = arith.negf %17 : vector<256x256xf32>
    %39 = math.exp %38 : vector<256x256xf32>
    %cst_19 = arith.constant 1.000000e+00 : f32
    %40 = vector.broadcast %cst_19 : f32 to vector<256x256xf32>
    %41 = arith.addf %40, %39 : vector<256x256xf32>
    %42 = arith.divf %40, %41 : vector<256x256xf32>
    %43 = arith.mulf %42, %37 : vector<256x256xf32>
    %c0_20 = arith.constant 0 : index
    %c0_21 = arith.constant 0 : index
    %c0_22 = arith.constant 0 : index
    %44 = vector.load %arg8[%c0_20, %c0_21, %c0_22] : memref<1x256x256xf32, #tpu.memory_space<vmem>>, vector<1x256x256xf32>
    %45 = vector.shape_cast %44 : vector<1x256x256xf32> to vector<256x256xf32>
    %46 = vector.shape_cast %43 : vector<256x256xf32> to vector<1x256x256xf32>
    tpu.vector_store %arg8[%c0_20, %c0_21, %c0_22], %46 {strides = array<i32>} : memref<1x256x256xf32, #tpu.memory_space<vmem>>, vector<1x256x256xf32>,
    return
  }
  func.func @transform_0(%arg0: i32, %arg1: i32) -> (i32, i32, i32) {
    %c0_i32 = arith.constant 0 : i32
    %c0_i32_0 = arith.constant 0 : i32
    return %arg0, %arg1, %c0_i32 : i32, i32, i32
  }
  func.func @transform_1(%arg0: i32, %arg1: i32) -> (i32, i32, i32, i32) {
    %c0_i32 = arith.constant 0 : i32
    %c0_i32_0 = arith.constant 0 : i32
    %c0_i32_1 = arith.constant 0 : i32
    return %arg0, %arg1, %c0_i32, %c0_i32_0 : i32, i32, i32, i32
  }
  func.func @transform_2(%arg0: i32, %arg1: i32) -> (i32, i32) {
    %c0_i32 = arith.constant 0 : i32
    %c0_i32_0 = arith.constant 0 : i32
    %c0_i32_1 = arith.constant 0 : i32
    return %c0_i32, %c0_i32_0 : i32, i32
  }
  func.func @transform_3(%arg0: i32, %arg1: i32) -> (i32, i32) {
    %c0_i32 = arith.constant 0 : i32
    %c0_i32_0 = arith.constant 0 : i32
    %c0_i32_1 = arith.constant 0 : i32
    return %c0_i32, %c0_i32_0 : i32, i32
  }
  func.func @transform_4(%arg0: i32, %arg1: i32) -> (i32, i32) {
    %c0_i32 = arith.constant 0 : i32
    %c0_i32_0 = arith.constant 0 : i32
    %c0_i32_1 = arith.constant 0 : i32
    return %c0_i32, %c0_i32_0 : i32, i32
  }
  func.func @transform_5(%arg0: i32, %arg1: i32) -> (i32, i32) {
    %c0_i32 = arith.constant 0 : i32
    %c0_i32_0 = arith.constant 0 : i32
    %c0_i32_1 = arith.constant 0 : i32
    return %c0_i32, %c0_i32_0 : i32, i32
  }
  func.func @transform_6(%arg0: i32, %arg1: i32) -> (i32, i32, i32) {
    %c0_i32 = arith.constant 0 : i32
    %c0_i32_0 = arith.constant 0 : i32
    return %arg0, %arg1, %c0_i32 : i32, i32, i32
  }
}

</mosaic_0001>

<bundles_post_ra>
// kernel: tpu_custom_call.1
= control target key start
LH: loop header
LB: loop body
LE: loop exit
PB: predicated region body
PF: predicated region fallthrough
CT: control target
= control target key end

     0   :  { %s7837_s21 = smov 0   ;;  %s7839_s22 = smov 0   ;;  %s12308_s0 = inlined_call_operand.vmem [shape: bf16[2,500,256], index: 0, kind: input, shape index: {}]   ;;  %s12309_s1 = inlined_call_operand.vmem [shape: bf16[2,2,1,256], index: 1, kind: input, shape index: {}]   ;;  %s12310_s2 = inlined_call_operand.vmem [shape: bf16[256,1280], index: 2, kind: input, shape index: {}]   ;;  %s12311_s3 = inlined_call_operand.vmem [shape: f32[1,1280], index: 3, kind: input, shape index: {}]   ;;  %s12312_s4 = inlined_call_operand.vmem [shape: bf16[512,256], index: 4, kind: input, shape index: {}]   ;;  %s12313_s5 = inlined_call_operand.vmem [shape: f32[1,256], index: 5, kind: input, shape index: {}]   ;;  %s12314_s6 = inlined_call_operand.vmem [shape: f32[2,500,256], index: 6, kind: output, shape index: {}]  }
   0x1   :  { %s7841_s23 = smov 0   ;;  %s7843_s24 = smov 0  }
   0x2   :  { %s7845_s25 = smov 0   ;;  %s7847_s26 = smov 0  }
   0x3   :  { %s7849_s27 = smov 0  }
   0x4 LB: > { %s25_s28 = sadd.s32 1, %s7760_s25  ;;  %s28_s29 = sadd.s32 1, %s7764_s26  ;;  %s7768_s27 = sphi %s7849_s27, %s16_s27   ;;  %s7764_s26 = sphi %s7847_s26, %s13200_s26   ;;  %s7760_s25 = sphi %s7845_s25, %s13199_s25   ;;  %s7756_s24 = sphi %s7843_s24, %s13198_s24   ;;  %s7752_s23 = sphi %s7841_s23, %s13197_s23   ;;  %s7748_s22 = sphi %s7839_s22, %s13196_s22   ;;  %s7744_s21 = sphi %s7837_s21, %s13195_s21  }
   0x5   : > { %p26_p0 = scmp.ge.s32.totalorder %s25_s28, 2  ;;  %s5737_s30 = sadd.s32 4294967295, %s7768_s27  }
   0x6   : > { %p187_p1 = scmp.ne.s32.totalorder %s7748_s22, %s7744_s21  ;;  %p188_p2 = scmp.eq.s32.totalorder %s5737_s30, 3 }
   0x7   : > { %s13202_s28 = smov (%p26_p0, %s25_s28), 0  ;;  %s13204_s29 = smov (!%p26_p0, %s28_s29), %s7764_s26 }
   0x8   : > { %12348 = sst [smem:[#allocation3_spill]] %s13202_s28  ;;  %s173_s7 = ssub.s32 %s7760_s25, %s13202_s28 }
   0x9   : > { %p30_p3 = scmp.ge.s32.totalorder %s13204_s29, 2  ;;  %p5741_p4 = scmp.ge.s32.totalorder %s7768_s27, 1 }
   0xa   : > { %p7883_p5 = por %p188_p2, %p187_p1  ;;  %p259_p6 = scmp.lt.s32.totalorder %s7768_s27, 5 }
   0xb   : > { %s13206_s29 = smov (%p30_p3, %s13204_s29), 0  ;;  %s177_s11 = sadd.s32 1, %s7748_s22 }
   0xc   : > { %12350 = sst [smem:[#allocation4_spill]] %s13206_s29  ;;  %p260_p7 = pnand %p5741_p4, %p259_p6 }
   0xd   : > { %s172_s9 = ssub.s32 %s7764_s26, %s13206_s29 }
   0xe   : > { %s174_s10 = sor.u32 %s173_s7, %s172_s9  ;;  %263 = sbr.rel (%p260_p7) target bundleno = 1232 (0x4d0), region = 44 }
   0xf   : > { %p175_p8 = scmp.eq.s32.totalorder %s174_s10, 0 }
  0x11   : > { %s7894_s12 = scalar_select %p175_p8, %s7748_s22, %s177_s11  }
  0x15   : > { %v6501_v0 = vld [vmem:[%s12310_s2 + $0x4] ss:$40 sps:$4 sm:$0xff]   ;;  %s7900_s15 = sshll.u32 %s7752_s23, 5  ;;  %v6503_v1 = vld [vmem:[%s12310_s2] ss:$40 sps:$4 sm:$0xff]   ;;  %p312_p9 = scmp.lt.s32.totalorder %s7756_s24, 1 }
  0x16   : > { %1679 = vmatprep.subr.bf16.mxu0 %v6501_v0  ;;  %v6504_v2 = vld [vmem:[%s12310_s2 + $0x54] ss:$40 sps:$4 sm:$0xff]   ;;  %v6506_v3 = vld [vmem:[%s12310_s2 + $0x50] ss:$40 sps:$4 sm:$0xff]   ;;  %p314_p10 = scmp.lt.s32.totalorder %s7900_s15, 62  ;;  %p329_p11 = scmp.lt.s32.totalorder %s7752_s23, 1 }
  0x17   : > { %1680 = vmatpush1.bf16.msra.mxu0 %v6503_v1  ;;  %v6507_v4 = vld [vmem:[%s12310_s2 + $0xa4] ss:$40 sps:$4 sm:$0xff]   ;;  %s7917_s10 = scalar_select %p312_p9, %s7756_s24, 1  ;;  %v6509_v5 = vld [vmem:[%s12310_s2 + $0xa0] ss:$40 sps:$4 sm:$0xff]   ;;  %vm598_vm1 = vcmask 1040384  }
  0x18   : > { %1681 = vmatprep.subr.bf16.mxu0 %v6504_v2  ;;  %s315_s14 = scalar_select %p314_p10, %s7900_s15, 62  ;;  %v6510_v6 = vld [vmem:[%s12310_s2 + $0xf4] ss:$40 sps:$4 sm:$0xff]   ;;  %v6512_v7 = vld [vmem:[%s12310_s2 + $0xf0] ss:$40 sps:$4 sm:$0xff]  }
  0x19   : > { %s6379_s18 = smul.u32 126, %s7917_s10  ;;  %v6513_v8 = vld [vmem:[%s12310_s2 + $0x144] ss:$40 sps:$4 sm:$0xff]   ;;  %v6515_v9 = vld [vmem:[%s12310_s2 + $0x140] ss:$40 sps:$4 sm:$0xff]   ;;  %s5747_s9 = sshll.u32 %s7917_s10, 2 }
  0x1a   : > { %s5744_s30 = sshll.u32 %s315_s14, 1  ;;  %v6516_v10 = vld [vmem:[%s12310_s2 + $0x194] ss:$40 sps:$4 sm:$0xff]   ;;  %v6518_v11 = vld [vmem:[%s12310_s2 + $0x190] ss:$40 sps:$4 sm:$0xff]   ;;  %s303_s16 = sand.u32 1, %s7744_s21  }
  0x1b   : > { %1682 = vmatpush1.bf16.msra.mxu0 %v6506_v3  ;;  %s318_s11 = sadd.s32 %s6379_s18, %s5744_s30  ;;  %v6519_v12 = vld [vmem:[%s12310_s2 + $0x1e4] ss:$40 sps:$4 sm:$0xff]   ;;  %v6521_v14 = vld [vmem:[%s12310_s2 + $0x1e0] ss:$40 sps:$4 sm:$0xff]   ;;  %v6522_v15 = vld [vmem:[%s12310_s2 + $0x234] ss:$40 sps:$4 sm:$0xff]  }
  0x1c   : > { %1683 = vmatprep.subr.bf16.mxu0 %v6507_v4  ;;  %s5745_s28 = sshll.u32 %s318_s11, 2  ;;  %v7960_v16 = vld [vmem:[%s12310_s2 + $0x8] ss:$40 sps:$4 sm:$0xff]   ;;  %v7965_v17 = vld [vmem:[%s12310_s2 + $0xc] ss:$40 sps:$4 sm:$0xff]   ;;  %s11841_s19 = sshll.u32 %s303_s16, 9 }
  0x1d   : > { %s7948_s29 = scalar_lea.vmem %s12308_s0, %s5745_s28  ;;  %6219 = vmatprep.subr.bf16.mxu1 %v7965_v17  ;;  %v6524_v18 = vld [vmem:[%s12310_s2 + $0x230] ss:$40 sps:$4 sm:$0xff]   ;;  %v7979_v20 = vld [vmem:[%s12310_s2 + $0x5c] ss:$40 sps:$4 sm:$0xff]   ;;  %v6527_v22 = vld [vmem:[%s12310_s2 + $0x280] ss:$40 sps:$4 sm:$0xff]  }
  0x1e   : > { %v6551_v13 = vld [vmem:[%s7948_s29 + $0x4] ss:$8 sps:$4 sm:$0xff]   ;;  %v7974_v19 = vld [vmem:[%s12310_s2 + $0x58] ss:$40 sps:$4 sm:$0xff]   ;;  %6235 = vmatpush1.bf16.msra.mxu1 %v7960_v16  ;;  %v7997_v24 = vld [vmem:[%s12310_s2 + $0xa8] ss:$40 sps:$4 sm:$0xff]  }
  0x1f   : > { %1684 = vmatpush1.bf16.msra.mxu0 %v6509_v5  ;;  %1711 = vmatprep.mubr.bf16.mxu0 %v6551_v13  ;;  %v6525_v21 = vld [vmem:[%s12310_s2 + $0x284] ss:$40 sps:$4 sm:$0xff]   ;;  %v6528_v25 = vld [vmem:[%s12310_s2 + $0x2d4] ss:$40 sps:$4 sm:$0xff]   ;;  %v6530_v27 = vld [vmem:[%s12310_s2 + $0x2d0] ss:$40 sps:$4 sm:$0xff]  }
  0x20   : > { %1685 = vmatprep.subr.bf16.mxu0 %v6510_v6  ;;  %6220 = vmatprep.subr.bf16.mxu1 %v7979_v20  ;;  %v7992_v23 = vld [vmem:[%s12310_s2 + $0xac] ss:$40 sps:$4 sm:$0xff]   ;;  %v8007_v26 = vld [vmem:[%s12310_s2 + $0xfc] ss:$40 sps:$4 sm:$0xff]   ;;  %v8015_v28 = vld [vmem:[%s12310_s2 + $0xf8] ss:$40 sps:$4 sm:$0xff]  }
  0x21   : > { %v6531_v29 = vld [vmem:[%s12310_s2 + $0x324] ss:$40 sps:$4 sm:$0xff]   ;;  %v6533_v31 = vld [vmem:[%s12310_s2 + $0x320] ss:$40 sps:$4 sm:$0xff]   ;;  %v6534_v32 = vld [vmem:[%s12310_s2 + $0x374] ss:$40 sps:$4 sm:$0xff]  }
  0x22   : > { %6236 = vmatpush1.bf16.msra.mxu1 %v7974_v19  ;;  %v8024_v30 = vld [vmem:[%s12310_s2 + $0x14c] ss:$40 sps:$4 sm:$0xff]   ;;  %v8036_v33 = vld [vmem:[%s12310_s2 + $0x148] ss:$40 sps:$4 sm:$0xff]   ;;  %v8042_v34 = vld [vmem:[%s12310_s2 + $0x19c] ss:$40 sps:$4 sm:$0xff]  }
  0x23   : > { %1686 = vmatpush1.bf16.msra.mxu0 %v6512_v7  ;;  %6221 = vmatprep.subr.bf16.mxu1 %v7992_v23  ;;  %v6536_v35 = vld [vmem:[%s12310_s2 + $0x370] ss:$40 sps:$4 sm:$0xff]   ;;  %v6537_v36 = vld [vmem:[%s12310_s2 + $0x3c4] ss:$40 sps:$4 sm:$0xff]   ;;  %v6539_v39 = vld [vmem:[%s12310_s2 + $0x3c0] ss:$40 sps:$4 sm:$0xff]  }
  0x24   : > { %1687 = vmatprep.subr.bf16.mxu0 %v6513_v8  ;;  %v8055_v37 = vld [vmem:[%s12310_s2 + $0x198] ss:$40 sps:$4 sm:$0xff]   ;;  %v8061_v38 = vld [vmem:[%s12310_s2 + $0x1ec] ss:$40 sps:$4 sm:$0xff]   ;;  %s330_s17 = scalar_select %p329_p11, %s7752_s23, 1 }
  0x25   : > { %v6549_v40 = vld [vmem:[%s7948_s29] ss:$8 sps:$4 sm:$0xff]   ;;  %v8076_v42 = vld [vmem:[%s7948_s29 + $0x84] ss:$8 sps:$4 sm:$0xff]   ;;  %v6540_v43 = vld [vmem:[%s12310_s2 + $0x414] ss:$40 sps:$4 sm:$0xff]  }
  0x26   : > { %6237 = vmatpush1.bf16.msra.mxu1 %v7997_v24  ;;  %v8072_v41 = vld [vmem:[%s12310_s2 + $0x1e8] ss:$40 sps:$4 sm:$0xff]   ;;  %v8085_v44 = vld [vmem:[%s12310_s2 + $0x23c] ss:$40 sps:$4 sm:$0xff]   ;;  %1984 = vmatprep.mubr.bf16.mxu1 %v8076_v42  ;;  %s5746_s30 = sshll.u32 %s330_s17, 1  ;;  %v456_v46 = vshrl.u32 %v6549_v40, 16 }
  0x27   : > { %1688 = vmatpush1.bf16.msra.mxu0 %v6515_v9  ;;  %6222 = vmatprep.subr.bf16.mxu1 %v8007_v26  ;;  %v6542_v45 = vld [vmem:[%s12310_s2 + $0x410] ss:$40 sps:$4 sm:$0xff]   ;;  %v6543_v48 = vld [vmem:[%s12310_s2 + $0x464] ss:$40 sps:$4 sm:$0xff]   ;;  %s333_s20 = sadd.s32 %s5747_s9, %s5746_s30  ;;  %v6545_v50 = vld [vmem:[%s12310_s2 + $0x460] ss:$40 sps:$4 sm:$0xff]  }
  0x28   : > { %1689 = vmatprep.subr.bf16.mxu0 %v6516_v10  ;;  %v8095_v47 = vld [vmem:[%s12310_s2 + $0x238] ss:$40 sps:$4 sm:$0xff]   ;;  %v8105_v49 = vld [vmem:[%s12310_s2 + $0x28c] ss:$40 sps:$4 sm:$0xff]   ;;  %v459_v51 = vshll.u32 %v6549_v40, 16  ;;  %v458_v52 = vrot.slane %v456_v46, 7  ;;  %s334_s28 = scalar_lea.vmem %s12309_s1, %s333_s20 }
  0x29   : > { %v6555_v53 = vld [vmem:[%s7948_s29 + $0x10] ss:$8 sps:$4 sm:$0xff]   ;;  %v6546_v55 = vld [vmem:[%s12310_s2 + $0x4b4] ss:$40 sps:$4 sm:$0xff]   ;;  %vm454_vm0 = vsmask.f32 256 }
  0x2a   : > { %6238 = vmatpush1.bf16.msra.mxu1 %v8015_v28  ;;  %v8115_v54 = vld [vmem:[%s12310_s2 + $0x288] ss:$40 sps:$4 sm:$0xff]   ;;  %v8127_v56 = vld [vmem:[%s12310_s2 + $0x2dc] ss:$40 sps:$4 sm:$0xff]   ;;  %v373_v58 = vld [vmem:[%s334_s28] sm:$0x3]  ;;  %v461_v59 = vor.u32 %v459_v51, %v458_v52 }
  0x2b   : > { %1690 = vmatpush1.bf16.msra.mxu0 %v6518_v11  ;;  %6223 = vmatprep.subr.bf16.mxu1 %v8024_v30  ;;  %v6548_v57 = vld [vmem:[%s12310_s2 + $0x4b0] ss:$40 sps:$4 sm:$0xff]   ;;  %v463_v60 = vshrl.u32 %v6555_v53, 16  ;;  %vm599_vm2 = vmand %vm598_vm1, %vm454_vm0  ;;  %v8143_v62 = vld [vmem:[%s12310_s2 + $0x32c] ss:$40 sps:$4 sm:$0xff]   ;;  %v466_v2 = vshll.u32 %v6555_v53, 16 }
  0x2c   : > { %1691 = vmatprep.subr.bf16.mxu0 %v6519_v12  ;;  %v8136_v61 = vld [vmem:[%s12310_s2 + $0x2d8] ss:$40 sps:$4 sm:$0xff]   ;;  %v8146_v63 = vld [vmem:[%s7948_s29 + $0x14] ss:$8 sps:$4 sm:$0xff]   ;;  %v8148_v0 = vsel %vm599_vm2, %v373_v58, %v461_v59  ;;  %v8157_v4 = vld [vmem:[%s12310_s2 + $0x328] ss:$40 sps:$4 sm:$0xff]  }
  0x2d   : > { %12351 = vst [vmem:[#allocation5_spill] sm:$0xff] %v8148_v0  ;;  %v465_v1 = vrot.slane %v463_v60, 7  ;;  %v6561_v3 = vld [vmem:[%s7948_s29 + $0x20] ss:$8 sps:$4 sm:$0xff]   ;;  %v8162_v5 = vld [vmem:[%s12310_s2 + $0x37c] ss:$40 sps:$4 sm:$0xff]  }
  0x2e   : > { %6239 = vmatpush1.bf16.msra.mxu1 %v8036_v33  ;;  %v8165_v6 = vld [vmem:[%s7948_s29 + $0xc0] ss:$8 sps:$4 sm:$0xff]   ;;  %v471_v8 = vshrl.u32 %v6561_v3, 16  ;;  %v6642_v9 = vld [vmem:[%s7948_s29 + $0xd0] ss:$8 sps:$4 sm:$0xff]   ;;  %s11858_s21 = scalar_lea.vmem [#allocation2], %s11841_s19  }
  0x2f   : > { %1692 = vmatpush1.bf16.msra.mxu0 %v6521_v14  ;;  %6224 = vmatprep.subr.bf16.mxu1 %v8042_v34  ;;  %v468_v7 = vor.u32 %v466_v2, %v465_v1  ;;  %v8176_v10 = vld [vmem:[%s12310_s2 + $0x378] ss:$40 sps:$4 sm:$0xff]   ;;  %v8181_v11 = vld [vmem:[%s12310_s2 + $0x3cc] ss:$40 sps:$4 sm:$0xff]   ;;  %v551_v13 = vshrl.u32 %v8165_v6, 16  ;;  %v559_v14 = vshrl.u32 %v6642_v9, 16 }
  0x30   : > { %1693 = vmatprep.subr.bf16.mxu0 %v6522_v15  ;;  %v8184_v12 = vld [vmem:[%s7948_s29 + $0x24] ss:$8 sps:$4 sm:$0xff]   ;;  %v562_v15 = vshll.u32 %v6642_v9, 16  ;;  %v8249_v60 = vld [vmem:[%s7948_s29 + $0x70] ss:$8 sps:$4 sm:$0xff]   ;;  %s5418_s30 = ssub.s32 (%p7883_p5), 63, %s7900_s15 }
  0x31   : > { %v6606_v9 = vld [vmem:[%s7948_s29 + $0x90] ss:$8 sps:$4 sm:$0xff]   ;;  %s6216_s9 = sshll.u32 (%p7883_p5), %s7752_s23, 6  ;;  %p5419_p12 = scmp.lt.s32.totalorder (%p7883_p5), %s5418_s30, 32 }
  0x32   : > { %6240 = vmatpush1.bf16.msra.mxu1 %v8055_v37  ;;  %s6380_s28 = smul.u32 (%p7883_p5), 126, %s7756_s24 }
  0x33   : > { %1694 = vmatpush1.bf16.msra.mxu0 %v6524_v18  ;;  %6225 = vmatprep.subr.bf16.mxu1 %v8061_v38  ;;  %v8193_v18 = vrot.slane %v471_v8, 7 }
  0x34   : > { %1695 = vmatprep.subr.bf16.mxu0 %v6525_v21  ;;  %v561_v21 = vrot.slane %v559_v14, 7  ;;  %v8276_v14 = vld [vmem:[%s12310_s2 + $0x4b8] ss:$40 sps:$4 sm:$0xff]   ;;  %s5426_s14 = sadd.s32 (%p7883_p5), %s6380_s28, %s6216_s9 }
  0x35   : > { %s6202_s17 = sshll.u32 (%p7883_p5), %s5426_s14, 3 }
  0x36   : > { %6241 = vmatpush1.bf16.msra.mxu1 %v8072_v41 }
  0x37   : > { %1696 = vmatpush1.bf16.msra.mxu0 %v6527_v22  ;;  %6226 = vmatprep.subr.bf16.mxu1 %v8085_v44  ;;  %v6651_v22 = vld [vmem:[%s7948_s29 + $0xe0] ss:$8 sps:$4 sm:$0xff]  }
  0x38   : > { %1697 = vmatprep.subr.bf16.mxu0 %v6528_v25  ;;  %v8201_v25 = vld [vmem:[%s12310_s2 + $0x3c8] ss:$40 sps:$4 sm:$0xff]  }
  0x3a   : > { %6242 = vmatpush1.bf16.msra.mxu1 %v8095_v47 }
  0x3b   : > { %1698 = vmatpush1.bf16.msra.mxu0 %v6530_v27  ;;  %6227 = vmatprep.subr.bf16.mxu1 %v8105_v49  ;;  %v8209_v27 = vrot.slane %v551_v13, 7 }
  0x3c   : > { %1699 = vmatprep.subr.bf16.mxu0 %v6531_v29  ;;  %v564_v29 = vor.u32 %v562_v15, %v561_v21  ;;  %v511_v15 = vshrl.u32 %v8249_v60, 16 }
  0x3e   : > { %6243 = vmatpush1.bf16.msra.mxu1 %v8115_v54 }
  0x3f   : > { %1700 = vmatpush1.bf16.msra.mxu0 %v6533_v31  ;;  %6228 = vmatprep.subr.bf16.mxu1 %v8127_v56  ;;  %v567_v31 = vshrl.u32 %v6651_v22, 16 }
  0x40   : > { %1701 = vmatprep.subr.bf16.mxu0 %v6534_v32 }
  0x41   : > { %v569_v40 = vrot.slane %v567_v31, 7  ;;  %v527_v31 = vshrl.u32 %v6606_v9, 16 }
  0x42   : > { %6244 = vmatpush1.bf16.msra.mxu1 %v8136_v61 }
  0x43   : > { %1702 = vmatpush1.bf16.msra.mxu0 %v6536_v35  ;;  %6229 = vmatprep.subr.bf16.mxu1 %v8143_v62 }
  0x44   : > { %1703 = vmatprep.subr.bf16.mxu0 %v6537_v36  ;;  %v6597_v36 = vld [vmem:[%s7948_s29 + $0x80] ss:$8 sps:$4 sm:$0xff]  }
  0x45   : > { %v522_v8 = vshll.u32 %v6597_v36, 16 }
  0x46   : > { %6245 = vmatpush1.bf16.msra.mxu1 %v8157_v4 }
  0x47   : > { %1704 = vmatpush1.bf16.msra.mxu0 %v6539_v39  ;;  %6230 = vmatprep.subr.bf16.mxu1 %v8162_v5  ;;  %v8218_v39 = vsel %vm454_vm0, %v8209_v27, %v564_v29 }
  0x48   : > { %1705 = vmatprep.subr.bf16.mxu0 %v6540_v43  ;;  %12353 = vst [vmem:[#allocation7_spill] sm:$0xff] %v8218_v39  ;;  %v6660_v43 = vld [vmem:[%s7948_s29 + $0xf0] ss:$8 sps:$4 sm:$0xff]  }
  0x4a   : > { %6246 = vmatpush1.bf16.msra.mxu1 %v8176_v10 }
  0x4b   : > { %1706 = vmatpush1.bf16.msra.mxu0 %v6542_v45  ;;  %6231 = vmatprep.subr.bf16.mxu1 %v8181_v11  ;;  %v8226_v45 = vld [vmem:[%s12310_s2 + $0x418] ss:$40 sps:$4 sm:$0xff]  }
  0x4c   : > { %1707 = vmatprep.subr.bf16.mxu0 %v6543_v48  ;;  %v575_v48 = vshrl.u32 %v6660_v43, 16 }
  0x4e   : > { %6247 = vmatpush1.bf16.msra.mxu1 %v8201_v25  ;;  %v577_v59 = vrot.slane %v575_v48, 7  ;;  %v6585_v48 = vld [vmem:[%s7948_s29 + $0x60] ss:$8 sps:$4 sm:$0xff]  }
  0x4f   : > { %1708 = vmatpush1.bf16.msra.mxu0 %v6545_v50  ;;  %v578_v50 = vshll.u32 %v6660_v43, 16  ;;  %v530_v43 = vshll.u32 %v6606_v9, 16 }
  0x50   : > { %1709 = vmatprep.subr.bf16.mxu0 %v6546_v55  ;;  %v8241_v55 = vld [vmem:[%s7948_s29 + $0x34] ss:$8 sps:$4 sm:$0xff]  }
  0x51   : > { %v580_v2 = vor.u32 %v578_v50, %v577_v59  ;;  %v6639_v50 = vld [vmem:[%s12310_s2 + $0x68] ss:$40 sps:$4 sm:$0xff]  }
  0x53   : > { %1710 = vmatpush1.bf16.msra.mxu0 %v6548_v57  ;;  %v519_v57 = vshrl.u32 %v6597_v36, 16  ;;  %v8269_v13 = vsel %vm454_vm0, %v569_v40, %v580_v2 }
  0x54   : > { %1872 = vmatprep.subr.bf16.mxu0 %v7965_v17  ;;  %v8190_v17 = vsel %vm454_vm0, %v458_v52, %v468_v7  ;;  %v6573_v52 = vld [vmem:[%s7948_s29 + $0x40] ss:$8 sps:$4 sm:$0xff]   ;;  %12356 = vst [vmem:[#allocation10_spill] sm:$0xff] %v8269_v13 }
  0x55   : > { %12352 = vst [vmem:[#allocation6_spill] sm:$0xff] %v8190_v17  ;;  %v521_v7 = vrot.slane %v519_v57, 7 }
  0x56   : > { %1712 = vmatmul.mubr.bf16.vlgmr.msra.gmra.mrb[0].mxu0 %v8148_v0 }
  0x57   : > { %1873 = vmatpush1.bf16.msra.mxu0 %v7960_v16  ;;  %1721 = vmatprep.mubr.bf16.mxu0 %v8146_v63  ;;  %v6567_v16 = vld [vmem:[%s7948_s29 + $0x30] ss:$8 sps:$4 sm:$0xff]   ;;  %v524_v29 = vor.u32 %v522_v8, %v521_v7 }
  0x58   : > { %1874 = vmatprep.subr.bf16.mxu0 %v7979_v20  ;;  %v474_v20 = vshll.u32 %v6561_v3, 16  ;;  %v479_v32 = vshrl.u32 %v6567_v16, 16 }
  0x5a   : > { %v476_v35 = vor.u32 %v474_v20, %v8193_v18  ;;  %v8234_v51 = vrot.slane %v479_v32, 7  ;;  %v6579_v20 = vld [vmem:[%s7948_s29 + $0x50] ss:$8 sps:$4 sm:$0xff]   ;;  %v8297_v32 = vld [vmem:[%s7948_s29 + $0x94] ss:$8 sps:$4 sm:$0xff]  }
  0x5b   : > { %1875 = vmatpush1.bf16.msra.mxu0 %v7974_v19  ;;  %v8206_v19 = vld [vmem:[%s12310_s2 + $0x41c] ss:$40 sps:$4 sm:$0xff]  }
  0x5c   : > { %1876 = vmatprep.subr.bf16.mxu0 %v7992_v23  ;;  %v570_v23 = vshll.u32 %v6651_v22, 16  ;;  %6232 = vmatprep.subr.bf16.mxu1 %v8206_v19  ;;  %v8238_v53 = vsel %vm454_vm0, %v465_v1, %v476_v35  ;;  %v8255_v1 = vld [vmem:[%s12310_s2 + $0x468] ss:$40 sps:$4 sm:$0xff]   ;;  %v6641_v35 = vld [vmem:[%s12310_s2 + $0x6c] ss:$40 sps:$4 sm:$0xff]  }
  0x5d   : > { %12354 = vst [vmem:[#allocation8_spill] sm:$0xff] %v8238_v53  ;;  %6248 = vmatpush1.bf16.msra.mxu1 %v8226_v45 }
  0x5e   : > { %1722 = vmatmul.mubr.bf16.gmra.mrb[4].mxu0 %v8190_v17  ;;  %v572_v46 = vor.u32 %v570_v23, %v569_v40  ;;  %v8294_v23 = vrot.slane %v511_v15, 7  ;;  %v529_v40 = vrot.slane %v527_v31, 7 }
  0x5f   : > { %1731 = vmatprep.mubr.bf16.mxu0 %v8184_v12  ;;  %1877 = vmatpush1.bf16.msra.mxu0 %v7997_v24  ;;  %v8232_v24 = vld [vmem:[%s12310_s2 + $0x46c] ss:$40 sps:$4 sm:$0xff]  }
  0x60   : > { %1878 = vmatprep.subr.bf16.mxu0 %v8007_v26  ;;  %v482_v26 = vshll.u32 %v6567_v16, 16  ;;  %v8245_v58 = vsel %vm454_vm0, %v561_v21, %v572_v46  ;;  %6233 = vmatprep.subr.bf16.mxu1 %v8232_v24  ;;  %v490_v16 = vshll.u32 %v6573_v52, 16  ;;  %v8289_v21 = vld [vmem:[%s7948_s29 + $0x44] ss:$8 sps:$4 sm:$0xff]   ;;  %v8310_v36 = vsel %vm454_vm0, %v8294_v23, %v524_v29  ;;  %v6615_v46 = vld [vmem:[%s7948_s29 + $0xa0] ss:$8 sps:$4 sm:$0xff]  }
  0x61   : > { %12355 = vst [vmem:[#allocation9_spill] sm:$0xff] %v8245_v58  ;;  %6249 = vmatpush1.bf16.msra.mxu1 %v8255_v1  ;;  %12358 = vst [vmem:[#allocation12_spill] sm:$0xff] %v8310_v36  ;;  %v532_v59 = vor.u32 %v530_v43, %v529_v40  ;;  %v535_v2 = vshrl.u32 %v6615_v46, 16  ;;  %v538_v15 = vshll.u32 %v6615_v46, 16  ;;  %v6657_v46 = vld [vmem:[%s12310_s2 + $0x1a8] ss:$40 sps:$4 sm:$0xff]  }
  0x62   : > { %v484_v3 = vor.u32 %v482_v26, %v8234_v51  ;;  %v6647_v26 = vld [vmem:[%s12310_s2 + $0xbc] ss:$40 sps:$4 sm:$0xff]  }
  0x63   : > { %1879 = vmatpush1.bf16.msra.mxu0 %v8015_v28  ;;  %v8261_v28 = vld [vmem:[%s12310_s2 + $0x4bc] ss:$40 sps:$4 sm:$0xff]   ;;  %v537_v9 = vrot.slane %v535_v2, 7 }
  0x64   : > { %1880 = vmatprep.subr.bf16.mxu0 %v8024_v30  ;;  %v487_v30 = vshrl.u32 %v6573_v52, 16  ;;  %6234 = vmatprep.subr.bf16.mxu1 %v8261_v28  ;;  %v8434_v2 = vld [vmem:[%s7948_s29 + $0xd4] ss:$8 sps:$4 sm:$0xff]  }
  0x65   : > { %6250 = vmatpush1.bf16.msra.mxu1 %v8276_v14  ;;  %v540_v31 = vor.u32 %v538_v15, %v537_v9  ;;  %v8484_v15 = vld [vmem:[%s7948_s29 + $0xf4] ss:$8 sps:$4 sm:$0xff]  }
  0x66   : > { %1732 = vmatmul.mubr.bf16.gmra.mrb[8].mxu0 %v8238_v53  ;;  %v489_v22 = vrot.slane %v487_v30, 7  ;;  %v8333_v30 = vld [vmem:[%s7948_s29 + $0xa4] ss:$8 sps:$4 sm:$0xff]  }
  0x67   : > { %1741 = vmatprep.mubr.bf16.mxu0 %v8241_v55  ;;  %1881 = vmatpush1.bf16.msra.mxu0 %v8036_v33  ;;  %v6638_v33 = vld [vmem:[%s12310_s2 + $0x1c] ss:$40 sps:$4 sm:$0xff]  }
  0x68   : > { %1882 = vmatprep.subr.bf16.mxu0 %v8042_v34  ;;  %v8286_v34 = vsel %vm454_vm0, %v8193_v18, %v484_v3  ;;  %v6636_v18 = vld [vmem:[%s12310_s2 + $0x18] ss:$40 sps:$4 sm:$0xff]   ;;  %2258 = vmatprep.subr.bf16.mxu1 %v6638_v33 }
  0x69   : > { %12357 = vst [vmem:[#allocation11_spill] sm:$0xff] %v8286_v34  ;;  %1985 = vmatmul.mubr.bf16.vlgmr.msra.gmra.mrb[0].mxu1 %v8310_v36  ;;  %v6645_v3 = vld [vmem:[%s12310_s2 + $0xb8] ss:$40 sps:$4 sm:$0xff]  }
  0x6a   : > { %2259 = vmatpush1.bf16.msra.mxu1 %v6636_v18  ;;  %1994 = vmatprep.mubr.bf16.mxu1 %v8297_v32  ;;  %v6624_v33 = vld [vmem:[%s7948_s29 + $0xb0] ss:$8 sps:$4 sm:$0xff]  }
  0x6b   : > { %1883 = vmatpush1.bf16.msra.mxu0 %v8055_v37  ;;  %v495_v37 = vshrl.u32 %v6579_v20, 16  ;;  %2260 = vmatprep.subr.bf16.mxu1 %v6641_v35  ;;  %v543_v18 = vshrl.u32 %v6624_v33, 16  ;;  %v8369_v35 = vld [vmem:[%s7948_s29 + $0xb4] ss:$8 sps:$4 sm:$0xff]   ;;  %v546_v43 = vshll.u32 %v6624_v33, 16 }
  0x6c   : > { %1884 = vmatprep.subr.bf16.mxu0 %v8061_v38  ;;  %v492_v38 = vor.u32 %v490_v16, %v489_v22  ;;  %v8351_v16 = vld [vmem:[%s7948_s29 + $0x64] ss:$8 sps:$4 sm:$0xff]   ;;  %v6702_v33 = vld [vmem:[%s12310_s2 + $0x428] ss:$40 sps:$4 sm:$0xff]  }
  0x6d   : > { %v497_v57 = vrot.slane %v495_v37, 7  ;;  %v6654_v37 = vld [vmem:[%s12310_s2 + $0x158] ss:$40 sps:$4 sm:$0xff]  }
  0x6e   : > { %1742 = vmatmul.mubr.bf16.gmra.mrb[12].mxu0 %v8286_v34  ;;  %v8325_v52 = vsel %vm454_vm0, %v8234_v51, %v492_v38  ;;  %2261 = vmatpush1.bf16.msra.mxu1 %v6639_v50  ;;  %v503_v51 = vshrl.u32 %v6585_v48, 16  ;;  %v545_v38 = vrot.slane %v543_v18, 7  ;;  %v8389_v50 = vld [vmem:[%s7948_s29 + $0x74] ss:$8 sps:$4 sm:$0xff]   ;;  %v6669_v18 = vld [vmem:[%s12310_s2 + $0x10] ss:$40 sps:$4 sm:$0xff]  }
  0x6f   : > { %1751 = vmatprep.mubr.bf16.mxu0 %v8289_v21  ;;  %1885 = vmatpush1.bf16.msra.mxu0 %v8072_v41  ;;  %v498_v41 = vshll.u32 %v6579_v20, 16  ;;  %12359 = vst [vmem:[#allocation13_spill] sm:$0xff] %v8325_v52  ;;  %v6648_v20 = vld [vmem:[%s12310_s2 + $0x108] ss:$40 sps:$4 sm:$0xff]  }
  0x70   : > { %1886 = vmatprep.subr.bf16.mxu0 %v8085_v44  ;;  %v8328_v44 = vld [vmem:[%s7948_s29 + $0x54] ss:$8 sps:$4 sm:$0xff]   ;;  %2262 = vmatprep.subr.bf16.mxu1 %v6647_v26  ;;  %v505_v29 = vrot.slane %v503_v51, 7  ;;  %v8465_v51 = vld [vmem:[%s7948_s29 + $0xe4] ss:$8 sps:$4 sm:$0xff]  }
  0x71   : > { %v500_v8 = vor.u32 %v498_v41, %v497_v57  ;;  %v548_v41 = vor.u32 %v546_v43, %v545_v38  ;;  %v6668_v26 = vld [vmem:[%s12310_s2 + $0x24c] ss:$40 sps:$4 sm:$0xff]  }
  0x72   : > { %2263 = vmatpush1.bf16.msra.mxu1 %v6645_v3  ;;  %v6680_v3 = vld [vmem:[%s12310_s2 + $0x2ec] ss:$40 sps:$4 sm:$0xff]  }
  0x73   : > { %1887 = vmatpush1.bf16.msra.mxu0 %v8095_v47  ;;  %v6650_v47 = vld [vmem:[%s12310_s2 + $0x10c] ss:$40 sps:$4 sm:$0xff]  }
  0x74   : > { %1888 = vmatprep.subr.bf16.mxu0 %v8105_v49  ;;  %v8345_v49 = vsel %vm454_vm0, %v521_v7, %v532_v59  ;;  %2264 = vmatprep.subr.bf16.mxu1 %v6650_v47  ;;  %v6656_v7 = vld [vmem:[%s12310_s2 + $0x15c] ss:$40 sps:$4 sm:$0xff]   ;;  %v6666_v59 = vld [vmem:[%s12310_s2 + $0x248] ss:$40 sps:$4 sm:$0xff]  }
  0x75   : > { %12360 = vst [vmem:[#allocation14_spill] sm:$0xff] %v8345_v49  ;;  %1995 = vmatmul.mubr.bf16.gmra.mrb[4].mxu1 %v8345_v49  ;;  %v6698_v47 = vld [vmem:[%s12310_s2 + $0x3dc] ss:$40 sps:$4 sm:$0xff]  }
  0x76   : > { %1752 = vmatmul.mubr.bf16.gmra.mrb[16].mxu0 %v8325_v52  ;;  %2004 = vmatprep.mubr.bf16.mxu1 %v8333_v30  ;;  %v6689_v43 = vld [vmem:[%s12310_s2 + $0x104] ss:$40 sps:$4 sm:$0xff]  }
  0x77   : > { %1761 = vmatprep.mubr.bf16.mxu0 %v8328_v44  ;;  %1889 = vmatpush1.bf16.msra.mxu0 %v8115_v54  ;;  %v506_v54 = vshll.u32 %v6585_v48, 16  ;;  %v6665_v48 = vld [vmem:[%s12310_s2 + $0x1fc] ss:$40 sps:$4 sm:$0xff]  }
  0x78   : > { %1890 = vmatprep.subr.bf16.mxu0 %v8127_v56  ;;  %v8361_v56 = vsel %vm454_vm0, %v489_v22, %v500_v8  ;;  %2265 = vmatpush1.bf16.msra.mxu1 %v6648_v20  ;;  %v6659_v22 = vld [vmem:[%s12310_s2 + $0x1ac] ss:$40 sps:$4 sm:$0xff]   ;;  %v6696_v8 = vld [vmem:[%s12310_s2 + $0x3d8] ss:$40 sps:$4 sm:$0xff]   ;;  %v6710_v20 = vld [vmem:[%s12310_s2 + $0x47c] ss:$40 sps:$4 sm:$0xff]  }
  0x79   : > { %12361 = vst [vmem:[#allocation15_spill] sm:$0xff] %v8361_v56  ;;  %2266 = vmatprep.subr.bf16.mxu1 %v6656_v7  ;;  %v6716_v7 = vld [vmem:[%s12310_s2 + $0x4cc] ss:$40 sps:$4 sm:$0xff]  }
  0x7b   : > { %1891 = vmatpush1.bf16.msra.mxu0 %v8136_v61  ;;  %v508_v61 = vor.u32 %v506_v54, %v505_v29  ;;  %v6708_v54 = vld [vmem:[%s12310_s2 + $0x478] ss:$40 sps:$4 sm:$0xff]  }
  0x7c   : > { %1892 = vmatprep.subr.bf16.mxu0 %v8143_v62  ;;  %v8377_v62 = vsel %vm454_vm0, %v529_v40, %v540_v31  ;;  %2267 = vmatpush1.bf16.msra.mxu1 %v6654_v37  ;;  %v514_v40 = vshll.u32 %v8249_v60, 16  ;;  %v8509_v31 = vld [vmem:[%s7948_s29 + $0x4] ss:$8 sps:$4 sm:$0xff]  }
  0x7d   : > { %12362 = vst [vmem:[#allocation16_spill] sm:$0xff] %v8377_v62  ;;  %2005 = vmatmul.mubr.bf16.gmra.mrb[8].mxu1 %v8377_v62  ;;  %2268 = vmatprep.subr.bf16.mxu1 %v6659_v22  ;;  %v6677_v37 = vld [vmem:[%s12310_s2 + $0x64] ss:$40 sps:$4 sm:$0xff]   ;;  %v6675_v22 = vld [vmem:[%s12310_s2 + $0x60] ss:$40 sps:$4 sm:$0xff]  }
  0x7e   : > { %1762 = vmatmul.mubr.bf16.gmra.mrb[20].mxu0 %v8361_v56  ;;  %2014 = vmatprep.mubr.bf16.mxu1 %v8369_v35  ;;  %v516_v60 = vor.u32 %v514_v40, %v8294_v23  ;;  %v6674_v23 = vld [vmem:[%s12310_s2 + $0x29c] ss:$40 sps:$4 sm:$0xff]   ;;  %v6699_v40 = vld [vmem:[%s12310_s2 + $0x1a0] ss:$40 sps:$4 sm:$0xff]  }
  0x7f   : > { %1771 = vmatprep.mubr.bf16.mxu0 %v8351_v16  ;;  %1893 = vmatpush1.bf16.msra.mxu0 %v8157_v4  ;;  %v8393_v4 = vsel %vm454_vm0, %v497_v57, %v508_v61  ;;  %v554_v57 = vshll.u32 %v8165_v6, 16  ;;  %v6683_v61 = vld [vmem:[%s12310_s2 + $0xb4] ss:$40 sps:$4 sm:$0xff]  }
  0x80   : > { %1894 = vmatprep.subr.bf16.mxu0 %v8162_v5  ;;  %12363 = vst [vmem:[#allocation17_spill] sm:$0xff] %v8393_v4  ;;  %v6663_v5 = vld [vmem:[%s12310_s2 + $0x1f8] ss:$40 sps:$4 sm:$0xff]   ;;  %2269 = vmatpush1.bf16.msra.mxu1 %v6657_v46  ;;  %v8425_v6 = vsel %vm454_vm0, %v505_v29, %v516_v60  ;;  %v6714_v29 = vld [vmem:[%s12310_s2 + $0x4c8] ss:$40 sps:$4 sm:$0xff]  }
  0x81   : > { %2270 = vmatprep.subr.bf16.mxu1 %v6665_v48  ;;  %12365 = vst [vmem:[#allocation19_spill] sm:$0xff] %v8425_v6  ;;  %v6695_v46 = vld [vmem:[%s12310_s2 + $0x154] ss:$40 sps:$4 sm:$0xff]   ;;  %v6693_v48 = vld [vmem:[%s12310_s2 + $0x150] ss:$40 sps:$4 sm:$0xff]  }
  0x82   : > { %v6713_v60 = vld [vmem:[%s12310_s2 + $0x244] ss:$40 sps:$4 sm:$0xff]  }
  0x83   : > { %1895 = vmatpush1.bf16.msra.mxu0 %v8176_v10  ;;  %v8408_v10 = vsel %vm454_vm0, %v537_v9, %v548_v41  ;;  %v6704_v9 = vld [vmem:[%s12310_s2 + $0x42c] ss:$40 sps:$4 sm:$0xff]  }
  0x84   : > { %1896 = vmatprep.subr.bf16.mxu0 %v8181_v11  ;;  %12364 = vst [vmem:[#allocation18_spill] sm:$0xff] %v8408_v10  ;;  %v8411_v11 = vld [vmem:[%s7948_s29 + $0xc4] ss:$8 sps:$4 sm:$0xff]   ;;  %2271 = vmatpush1.bf16.msra.mxu1 %v6663_v5  ;;  %v6707_v41 = vld [vmem:[%s12310_s2 + $0x1f4] ss:$40 sps:$4 sm:$0xff]  }
  0x85   : > { %2015 = vmatmul.mubr.bf16.gmra.mrb[12].mxu1 %v8408_v10  ;;  %2272 = vmatprep.subr.bf16.mxu1 %v6668_v26  ;;  %v8580_v5 = vld [vmem:[%s7948_s29 + $0x84] ss:$8 sps:$4 sm:$0xff]   ;;  %v6705_v26 = vld [vmem:[%s12310_s2 + $0x1f0] ss:$40 sps:$4 sm:$0xff]  }
  0x86   : > { %1772 = vmatmul.mubr.bf16.gmra.mrb[24].mxu0 %v8393_v4  ;;  %2024 = vmatprep.mubr.bf16.mxu1 %v8411_v11 }
  0x87   : > { %1781 = vmatprep.mubr.bf16.mxu0 %v8389_v50  ;;  %1897 = vmatpush1.bf16.msra.mxu0 %v8201_v25  ;;  %v556_v25 = vor.u32 %v554_v57, %v8209_v27  ;;  %v6711_v57 = vld [vmem:[%s12310_s2 + $0x240] ss:$40 sps:$4 sm:$0xff]  }
  0x88   : > { %1898 = vmatprep.subr.bf16.mxu0 %v8206_v19  ;;  %v6672_v19 = vld [vmem:[%s12310_s2 + $0x298] ss:$40 sps:$4 sm:$0xff]   ;;  %2273 = vmatpush1.bf16.msra.mxu1 %v6666_v59  ;;  %v6719_v59 = vld [vmem:[%s12310_s2 + $0x294] ss:$40 sps:$4 sm:$0xff]  }
  0x89   : > { %2274 = vmatprep.subr.bf16.mxu1 %v6674_v23  ;;  %v8442_v27 = vsel %vm454_vm0, %v545_v38, %v556_v25  ;;  %v6681_v38 = vld [vmem:[%s12310_s2 + $0xb0] ss:$40 sps:$4 sm:$0xff]   ;;  %v6722_v25 = vld [vmem:[%s12310_s2 + $0x2e4] ss:$40 sps:$4 sm:$0xff]  }
  0x8a   : > { %12366 = vst [vmem:[#allocation20_spill] sm:$0xff] %v8442_v27  ;;  %v6717_v23 = vld [vmem:[%s12310_s2 + $0x290] ss:$40 sps:$4 sm:$0xff]  }
  0x8b   : > { %1899 = vmatpush1.bf16.msra.mxu0 %v8226_v45  ;;  %v6671_v45 = vld [vmem:[%s12310_s2 + $0x14] ss:$40 sps:$4 sm:$0xff]  }
  0x8c   : > { %1900 = vmatprep.subr.bf16.mxu0 %v8232_v24  ;;  %v6678_v24 = vld [vmem:[%s12310_s2 + $0x2e8] ss:$40 sps:$4 sm:$0xff]   ;;  %2275 = vmatpush1.bf16.msra.mxu1 %v6672_v19 }
  0x8d   : > { %2025 = vmatmul.mubr.bf16.gmra.mrb[16].mxu1 %v8442_v27  ;;  %2276 = vmatprep.subr.bf16.mxu1 %v6680_v3  ;;  %v6720_v19 = vld [vmem:[%s12310_s2 + $0x2e0] ss:$40 sps:$4 sm:$0xff]   ;;  %v6723_v3 = vld [vmem:[%s12310_s2 + $0x330] ss:$40 sps:$4 sm:$0xff]  }
  0x8e   : > { %1782 = vmatmul.mubr.bf16.gmra.mrb[28].mxu0 %v8425_v6  ;;  %2034 = vmatprep.mubr.bf16.mxu1 %v8434_v2 }
  0x8f   : > { %1791 = vmatprep.mubr.bf16.mxu0 %v8076_v42  ;;  %1901 = vmatpush1.bf16.msra.mxu0 %v8255_v1  ;;  %v6686_v42 = vld [vmem:[%s12310_s2 + $0x33c] ss:$40 sps:$4 sm:$0xff]   ;;  %v6684_v1 = vld [vmem:[%s12310_s2 + $0x338] ss:$40 sps:$4 sm:$0xff]  }
  0x90   : > { %1902 = vmatprep.subr.bf16.mxu0 %v8261_v28  ;;  %v6692_v28 = vld [vmem:[%s12310_s2 + $0x38c] ss:$40 sps:$4 sm:$0xff]   ;;  %2277 = vmatpush1.bf16.msra.mxu1 %v6678_v24  ;;  %v6726_v24 = vld [vmem:[%s12310_s2 + $0x380] ss:$40 sps:$4 sm:$0xff]  }
  0x91   : > { %2278 = vmatprep.subr.bf16.mxu1 %v6686_v42  ;;  %v6729_v42 = vld [vmem:[%s12310_s2 + $0x3d0] ss:$40 sps:$4 sm:$0xff]  }
  0x93   : > { %1903 = vmatpush1.bf16.msra.mxu0 %v8276_v14  ;;  %v6690_v14 = vld [vmem:[%s12310_s2 + $0x388] ss:$40 sps:$4 sm:$0xff]  }
  0x94   : > { %2065 = vmatprep.subr.bf16.mxu0 %v6671_v45  ;;  %2279 = vmatpush1.bf16.msra.mxu1 %v6684_v1  ;;  %v6728_v45 = vld [vmem:[%s12310_s2 + $0x384] ss:$40 sps:$4 sm:$0xff]  }
  0x95   : > { %2035 = vmatmul.mubr.bf16.gmra.mrb[20].mxu1 %v8218_v39  ;;  %2280 = vmatprep.subr.bf16.mxu1 %v6692_v28  ;;  %v6734_v1 = vld [vmem:[%s12310_s2 + $0x424] ss:$40 sps:$4 sm:$0xff]   ;;  %v6732_v28 = vld [vmem:[%s12310_s2 + $0x420] ss:$40 sps:$4 sm:$0xff]  }
  0x96   : > { %1792 = vmatmul.mubr.bf16.gmra.mrb[32].mxu0 %v8310_v36  ;;  %2044 = vmatprep.mubr.bf16.mxu1 %v8465_v51 }
  0x97   : > { %1801 = vmatprep.mubr.bf16.mxu0 %v8297_v32 }
  0x98   : > { %2281 = vmatpush1.bf16.msra.mxu1 %v6690_v14  ;;  %v6735_v14 = vld [vmem:[%s12310_s2 + $0x470] ss:$40 sps:$4 sm:$0xff]  }
  0x99   : > { %2282 = vmatprep.subr.bf16.mxu1 %v6698_v47  ;;  %v6740_v47 = vld [vmem:[%s12310_s2 + $0x4c4] ss:$40 sps:$4 sm:$0xff]  }
  0x9c   : > { %2283 = vmatpush1.bf16.msra.mxu1 %v6696_v8  ;;  %v6738_v8 = vld [vmem:[%s12310_s2 + $0x4c0] ss:$40 sps:$4 sm:$0xff]  }
  0x9d   : > { %2045 = vmatmul.mubr.bf16.gmra.mrb[24].mxu1 %v8245_v58  ;;  %2284 = vmatprep.subr.bf16.mxu1 %v6704_v9  ;;  %v829_v9 = vlaneseq }
  0x9e   : > { %1802 = vmatmul.mubr.bf16.gmra.mrb[36].mxu0 %v8345_v49  ;;  %2054 = vmatprep.mubr.bf16.mxu1 %v8484_v15 }
  0x9f   : > { %1811 = vmatprep.mubr.bf16.mxu0 %v8333_v30 }
  0xa0   : > { %2285 = vmatpush1.bf16.msra.mxu1 %v6702_v33  ;;  %v8665_v33 = vshrl.u32 %v829_v9, 7 }
  0xa1   : > { %2286 = vmatprep.subr.bf16.mxu1 %v6710_v20  ;;  %v7656_v20 = vld [vmem:[%s7948_s29 + $0x24] ss:$8 sps:$4 sm:$0xff]  }
  0xa2   : > { %12367 = vst [vmem:[#allocation21_spill] sm:$0xff] %v8665_v33 }
  0xa4   : > { %2287 = vmatpush1.bf16.msra.mxu1 %v6708_v54  ;;  %v6743_v54 = vld [vmem:[%s12312_s4 + $0x4] ss:$8 sps:$4 sm:$0xff]  }
  0xa5   : > { %2055 = vmatmul.mubr.bf16.gmra.mrb[28].mxu1 %v8269_v13  ;;  %2288 = vmatprep.subr.bf16.mxu1 %v6716_v7  ;;  %v825_v7 = vld [vmem:[%s12311_s3] sm:$0xff] }
  0xa6   : > { %1812 = vmatmul.mubr.bf16.gmra.mrb[40].mxu0 %v8377_v62  ;;  %2290 = vmatprep.mubr.bf16.mxu1 %v8509_v31 }
  0xa7   : > { %1821 = vmatprep.mubr.bf16.mxu0 %v8369_v35 }
  0xa8   : > { %2289 = vmatpush1.bf16.msra.mxu1 %v6714_v29  ;;  %v8683_v29 = vsub.s32 1, %v8665_v33 }
  0xa9   : > { %4512 = vmatprep.subr.bf16.mxu1 %v6743_v54  ;;  %v6750_v54 = vld [vmem:[%s12312_s4 + $0x30] ss:$8 sps:$4 sm:$0xff]  }
  0xaa   : > { %12369 = vst [vmem:[#allocation23_spill] sm:$0xff] %v8683_v29 }
  0xad   : > { %2291 = vmatmul.mubr.bf16.vlgmr.msra.gmra.mrb[32].mxu1 %v8148_v0 }
  0xae   : > { %1822 = vmatmul.mubr.bf16.gmra.mrb[44].mxu0 %v8408_v10  ;;  %2300 = vmatprep.mubr.bf16.mxu1 %v8146_v63 }
  0xaf   : > { %1831 = vmatprep.mubr.bf16.mxu0 %v8411_v11 }
  0xb5   : > { %2301 = vmatmul.mubr.bf16.gmra.mrb[36].mxu1 %v8190_v17 }
  0xb6   : > { %1832 = vmatmul.mubr.bf16.gmra.mrb[48].mxu0 %v8442_v27  ;;  %2310 = vmatprep.mubr.bf16.mxu1 %v8184_v12 }
  0xb7   : > { %1841 = vmatprep.mubr.bf16.mxu0 %v8434_v2 }
  0xbd   : > { %2311 = vmatmul.mubr.bf16.gmra.mrb[40].mxu1 %v8238_v53 }
  0xbe   : > { %1842 = vmatmul.mubr.bf16.gmra.mrb[52].mxu0 %v8218_v39  ;;  %2320 = vmatprep.mubr.bf16.mxu1 %v8241_v55 }
  0xbf   : > { %1851 = vmatprep.mubr.bf16.mxu0 %v8465_v51 }
  0xc5   : > { %2321 = vmatmul.mubr.bf16.gmra.mrb[44].mxu1 %v8286_v34 }
  0xc6   : > { %1852 = vmatmul.mubr.bf16.gmra.mrb[56].mxu0 %v8245_v58  ;;  %2330 = vmatprep.mubr.bf16.mxu1 %v8289_v21 }
  0xc7   : > { %1861 = vmatprep.mubr.bf16.mxu0 %v8484_v15 }
  0xcd   : > { %2331 = vmatmul.mubr.bf16.gmra.mrb[48].mxu1 %v8325_v52 }
  0xce   : > { %1862 = vmatmul.mubr.bf16.gmra.mrb[60].mxu0 %v8269_v13  ;;  %2340 = vmatprep.mubr.bf16.mxu1 %v8328_v44 }
  0xcf   : > { %1904 = vmatprep.mubr.bf16.mxu0 %v8509_v31 }
  0xd5   : > { %2341 = vmatmul.mubr.bf16.gmra.mrb[52].mxu1 %v8361_v56 }
  0xd6   : > { %1905 = vmatmul.mubr.bf16.vlgmr.msra.gmra.mrb[64].mxu0 %v8148_v0  ;;  %2350 = vmatprep.mubr.bf16.mxu1 %v8351_v16 }
  0xd7   : > { %2066 = vmatpush1.bf16.msra.mxu0 %v6669_v18  ;;  %1914 = vmatprep.mubr.bf16.mxu0 %v8146_v63  ;;  %v6687_v63 = vld [vmem:[%s12310_s2 + $0x100] ss:$40 sps:$4 sm:$0xff]  }
  0xd8   : > { %2067 = vmatprep.subr.bf16.mxu0 %v6677_v37 }
  0xdb   : > { %2068 = vmatpush1.bf16.msra.mxu0 %v6675_v22 }
  0xdc   : > { %2069 = vmatprep.subr.bf16.mxu0 %v6683_v61 }
  0xdd   : > { %2351 = vmatmul.mubr.bf16.gmra.mrb[56].mxu1 %v8393_v4 }
  0xde   : > { %1915 = vmatmul.mubr.bf16.gmra.mrb[68].mxu0 %v8190_v17  ;;  %2360 = vmatprep.mubr.bf16.mxu1 %v8389_v50 }
  0xdf   : > { %2070 = vmatpush1.bf16.msra.mxu0 %v6681_v38  ;;  %1924 = vmatprep.mubr.bf16.mxu0 %v8184_v12  ;;  %v6701_v12 = vld [vmem:[%s12310_s2 + $0x1a4] ss:$40 sps:$4 sm:$0xff]  }
  0xe0   : > { %2071 = vmatprep.subr.bf16.mxu0 %v6689_v43 }
  0xe3   : > { %2072 = vmatpush1.bf16.msra.mxu0 %v6687_v63 }
  0xe4   : > { %2073 = vmatprep.subr.bf16.mxu0 %v6695_v46 }
  0xe5   : > { %2361 = vmatmul.mubr.bf16.gmra.mrb[60].mxu1 %v8425_v6 }
  0xe6   : > { %1925 = vmatmul.mubr.bf16.gmra.mrb[72].mxu0 %v8238_v53  ;;  %2370 = vmatprep.mubr.bf16.mxu1 %v8580_v5 }
  0xe7   : > { %2074 = vmatpush1.bf16.msra.mxu0 %v6693_v48  ;;  %1934 = vmatprep.mubr.bf16.mxu0 %v8241_v55 }
  0xe8   : > { %2075 = vmatprep.subr.bf16.mxu0 %v6701_v12  ;;  %v6744_v12 = vld [vmem:[%s12312_s4 + $0x10] ss:$8 sps:$4 sm:$0xff]  }
  0xeb   : > { %2076 = vmatpush1.bf16.msra.mxu0 %v6699_v40  ;;  %v6746_v40 = vld [vmem:[%s12312_s4 + $0x14] ss:$8 sps:$4 sm:$0xff]  }
  0xec   : > { %2077 = vmatprep.subr.bf16.mxu0 %v6707_v41 }
  0xed   : > { %2371 = vmatmul.mubr.bf16.gmra.mrb[64].mxu1 %v8310_v36 }
  0xee   : > { %1935 = vmatmul.mubr.bf16.gmra.mrb[76].mxu0 %v8286_v34  ;;  %2380 = vmatprep.mubr.bf16.mxu1 %v8297_v32  ;;  %v6725_v32 = vld [vmem:[%s12310_s2 + $0x334] ss:$40 sps:$4 sm:$0xff]  }
  0xef   : > { %2078 = vmatpush1.bf16.msra.mxu0 %v6705_v26  ;;  %1944 = vmatprep.mubr.bf16.mxu0 %v8289_v21 }
  0xf0   : > { %2079 = vmatprep.subr.bf16.mxu0 %v6713_v60 }
  0xf3   : > { %2080 = vmatpush1.bf16.msra.mxu0 %v6711_v57 }
  0xf4   : > { %2081 = vmatprep.subr.bf16.mxu0 %v6719_v59 }
  0xf5   : > { %2381 = vmatmul.mubr.bf16.gmra.mrb[68].mxu1 %v8345_v49 }
  0xf6   : > { %1945 = vmatmul.mubr.bf16.gmra.mrb[80].mxu0 %v8325_v52  ;;  %2390 = vmatprep.mubr.bf16.mxu1 %v8333_v30  ;;  %v6731_v30 = vld [vmem:[%s12310_s2 + $0x3d4] ss:$40 sps:$4 sm:$0xff]  }
  0xf7   : > { %2082 = vmatpush1.bf16.msra.mxu0 %v6717_v23  ;;  %1954 = vmatprep.mubr.bf16.mxu0 %v8328_v44 }
  0xf8   : > { %2083 = vmatprep.subr.bf16.mxu0 %v6722_v25 }
  0xfb   : > { %2084 = vmatpush1.bf16.msra.mxu0 %v6720_v19 }
  0xfc   : > { %2085 = vmatprep.subr.bf16.mxu0 %v6725_v32 }
  0xfd   : > { %2391 = vmatmul.mubr.bf16.gmra.mrb[72].mxu1 %v8377_v62 }
  0xfe   : > { %1955 = vmatmul.mubr.bf16.gmra.mrb[84].mxu0 %v8361_v56  ;;  %2400 = vmatprep.mubr.bf16.mxu1 %v8369_v35  ;;  %v6737_v35 = vld [vmem:[%s12310_s2 + $0x474] ss:$40 sps:$4 sm:$0xff]  }
  0xff   : > { %2086 = vmatpush1.bf16.msra.mxu0 %v6723_v3  ;;  %1964 = vmatprep.mubr.bf16.mxu0 %v8351_v16 }
 0x100   : > { %2087 = vmatprep.subr.bf16.mxu0 %v6728_v45 }
 0x103   : > { %2088 = vmatpush1.bf16.msra.mxu0 %v6726_v24 }
 0x104   : > { %2089 = vmatprep.subr.bf16.mxu0 %v6731_v30 }
 0x105   : > { %2401 = vmatmul.mubr.bf16.gmra.mrb[76].mxu1 %v8408_v10 }
 0x106   : > { %1965 = vmatmul.mubr.bf16.gmra.mrb[88].mxu0 %v8393_v4  ;;  %2410 = vmatprep.mubr.bf16.mxu1 %v8411_v11  ;;  %v7655_v11 = vld [vmem:[%s7948_s29 + $0x14] ss:$8 sps:$4 sm:$0xff]  }
 0x107   : > { %2090 = vmatpush1.bf16.msra.mxu0 %v6729_v42  ;;  %1974 = vmatprep.mubr.bf16.mxu0 %v8389_v50  ;;  %v6747_v42 = vld [vmem:[%s12312_s4 + $0x20] ss:$8 sps:$4 sm:$0xff]  }
 0x108   : > { %2091 = vmatprep.subr.bf16.mxu0 %v6734_v1  ;;  %v6749_v1 = vld [vmem:[%s12312_s4 + $0x24] ss:$8 sps:$4 sm:$0xff]  }
 0x10b   : > { %2092 = vmatpush1.bf16.msra.mxu0 %v6732_v28 }
 0x10c   : > { %2093 = vmatprep.subr.bf16.mxu0 %v6737_v35 }
 0x10d   : > { %2411 = vmatmul.mubr.bf16.gmra.mrb[80].mxu1 %v8442_v27 }
 0x10e   : > { %1975 = vmatmul.mubr.bf16.gmra.mrb[92].mxu0 %v8425_v6  ;;  %2420 = vmatprep.mubr.bf16.mxu1 %v8434_v2  ;;  %v6741_v2 = vld [vmem:[%s12312_s4] ss:$8 sps:$4 sm:$0xff]  }
 0x10f   : > { %2094 = vmatpush1.bf16.msra.mxu0 %v6735_v14  ;;  %2097 = vmatprep.mubr.bf16.mxu0 %v8509_v31  ;;  %v8690_v31 = vrot.slane %v825_v7, %v8683_v29 }
 0x110   : > { %2095 = vmatprep.subr.bf16.mxu0 %v6740_v47  ;;  %4513 = vmatpush1.bf16.msra.mxu1 %v6741_v2 }
 0x111   : > { %4514 = vmatprep.subr.bf16.mxu1 %v6746_v40 }
 0x113   : > { %2096 = vmatpush1.bf16.msra.mxu0 %v6738_v8 }
 0x114   : > { %4515 = vmatpush1.bf16.msra.mxu1 %v6744_v12 }
 0x115   : > { %2421 = vmatmul.mubr.bf16.gmra.mrb[84].mxu1 %v8218_v39  ;;  %4516 = vmatprep.subr.bf16.mxu1 %v6749_v1 }
 0x116   : > { %2098 = vmatmul.mubr.bf16.vlgmr.msra.gmra.mrb[96].mxu0 %v8148_v0  ;;  %2430 = vmatprep.mubr.bf16.mxu1 %v8465_v51  ;;  %v8677_v51 = vsub.s32 0, %v8665_v33 }
 0x117   : > { %2107 = vmatprep.mubr.bf16.mxu0 %v7655_v11 }
 0x118   : > { %12368 = vst [vmem:[#allocation22_spill] sm:$0xff] %v8677_v51  ;;  %4517 = vmatpush1.bf16.msra.mxu1 %v6747_v42 }
 0x11d   : > { %2431 = vmatmul.mubr.bf16.gmra.mrb[88].mxu1 %v8245_v58 }
 0x11e   : > { %2108 = vmatmul.mubr.bf16.gmra.mrb[100].mxu0 %v8190_v17  ;;  %2440 = vmatprep.mubr.bf16.mxu1 %v8484_v15  ;;  %v8687_v15 = vrot.slane %v825_v7, %v8677_v51 }
 0x11f   : > { %2117 = vmatprep.mubr.bf16.mxu0 %v7656_v20 }
 0x125   : > { %2441 = vmatmul.mubr.bf16.gmra.mrb[92].mxu1 %v8269_v13 }
 0x126   : > { %2118 = vmatmul.mubr.bf16.gmra.mrb[104].mxu0 %v8238_v53  ;;  %v7662_v53 = vld [vmem:[%s7948_s29 + $0xe4] ss:$8 sps:$4 sm:$0xff]  }
 0x127   : > { %2127 = vmatprep.mubr.bf16.mxu0 %v8241_v55 }
 0x129   : > { %v1713_v18 = vpop.f32.mrb[0].mxu0 }
 0x12a   : > { %v8695_v37 = vadd.f32 %v1713_v18, %v8687_v15  ;;  %v1715_v22 = vpop.f32.mrb[1].mxu0 }
 0x12b   : > { %v8698_v61 = vadd.f32 %v1715_v22, %v8690_v31  ;;  %v1717_v38 = vpop.f32.mrb[2].mxu0 }
 0x12c   : > { %v2644_v43 = vmin.f32 %v8695_v37, 20.0  ;;  %v8702_v63 = vadd.f32 %v1717_v38, %v8687_v15  ;;  %v1719_v46 = vpop.f32.mrb[3].mxu0 }
 0x12d   : > { %v2645_v48 = vmin.f32 %v8698_v61, 20.0  ;;  %v8706_v55 = vadd.f32 %v1719_v46, %v8690_v31 }
 0x12e   : > { %v2772_v41 = vmul.f32 1.442695, %v2644_v43  ;;  %v2648_v26 = vmin.f32 %v8702_v63, 20.0  ;;  %2128 = vmatmul.mubr.bf16.gmra.mrb[108].mxu0 %v8286_v34 }
 0x12f   : > { %v2774_v60 = vmul.f32 1.442695, %v2645_v48  ;;  %v2649_v57 = vmin.f32 %v8706_v55, 20.0  ;;  %2137 = vmatprep.mubr.bf16.mxu0 %v8289_v21 }
 0x130   : > { %6885 = vpow2.f32 %v2772_v41  ;;  %v2780_v59 = vmul.f32 1.442695, %v2648_v26 }
 0x131   : > { %6887 = vpow2.f32 %v2774_v60  ;;  %v2782_v23 = vmul.f32 1.442695, %v2649_v57  ;;  %v1723_v25 = vpop.f32.mrb[4].mxu0 }
 0x132   : > { %6889 = vpow2.f32 %v2780_v59  ;;  %v8719_v19 = vadd.f32 %v1723_v25, %v8687_v15  ;;  %v1725_v32 = vpop.f32.mrb[5].mxu0 }
 0x133   : > { %6891 = vpow2.f32 %v2782_v23  ;;  %v8722_v3 = vadd.f32 %v1725_v32, %v8690_v31  ;;  %v1727_v45 = vpop.f32.mrb[6].mxu0 }
 0x134   : > { %v2652_v24 = vmin.f32 %v8719_v19, 20.0  ;;  %v8726_v21 = vadd.f32 %v1727_v45, %v8687_v15  ;;  %v1729_v30 = vpop.f32.mrb[7].mxu0 }
 0x135   : > { %v2653_v28 = vmin.f32 %v8722_v3, 20.0  ;;  %v8736_v35 = vadd.f32 %v1729_v30, %v8690_v31 }
 0x136   : > { %v2788_v14 = vmul.f32 1.442695, %v2652_v24  ;;  %v2656_v47 = vmin.f32 %v8726_v21, 20.0  ;;  %2138 = vmatmul.mubr.bf16.gmra.mrb[112].mxu0 %v8325_v52 }
 0x137   : > { %v2790_v8 = vmul.f32 1.442695, %v2653_v28  ;;  %v2657_v11 = vmin.f32 %v8736_v35, 20.0  ;;  %2147 = vmatprep.mubr.bf16.mxu0 %v8328_v44  ;;  %v6752_v44 = vld [vmem:[%s12312_s4 + $0x34] ss:$8 sps:$4 sm:$0xff]  }
 0x138   : > { %6893 = vpow2.f32 %v2788_v14  ;;  %v2796_v9 = vmul.f32 1.442695, %v2656_v47  ;;  %4518 = vmatprep.subr.bf16.mxu1 %v6752_v44 }
 0x139   : > { %6895 = vpow2.f32 %v2790_v8  ;;  %v2798_v20 = vmul.f32 1.442695, %v2657_v11  ;;  %v1733_v2 = vpop.f32.mrb[8].mxu0  ;;  %4519 = vmatpush1.bf16.msra.mxu1 %v6750_v54 }
 0x13a   : > { %v6886_v7 = vpop.eup %6885  ;;  %6897 = vpow2.f32 %v2796_v9  ;;  %v8746_v18 = vadd.f32 %v1733_v2, %v8687_v15  ;;  %v1735_v22 = vpop.f32.mrb[9].mxu0 }
 0x13b   : > { %v6888_v38 = vpop.eup %6887  ;;  %v3028_v43 = vadd.f32 1.0, %v6886_v7  ;;  %6899 = vpow2.f32 %v2798_v20  ;;  %v8752_v46 = vadd.f32 %v1735_v22, %v8690_v31  ;;  %v1737_v48 = vpop.f32.mrb[10].mxu0 }
 0x13c   : > { %v6890_v12 = vpop.eup %6889  ;;  %v3029_v40 = vadd.f32 1.0, %v6888_v38  ;;  %v2660_v41 = vmin.f32 %v8746_v18, 20.0  ;;  %v8756_v26 = vadd.f32 %v1737_v48, %v8687_v15  ;;  %v1739_v60 = vpop.f32.mrb[11].mxu0 }
 0x13d   : > { %v6892_v57 = vpop.eup %6891  ;;  %v3156_v59 = vmul.f32 %v3028_v43, %v3028_v43  ;;  %v3032_v23 = vadd.f32 1.0, %v6890_v12  ;;  %v2661_v25 = vmin.f32 %v8752_v46, 20.0  ;;  %v8760_v32 = vadd.f32 %v1739_v60, %v8690_v31 }
 0x13e   : > { %v3157_v45 = vmul.f32 %v3029_v40, %v3029_v40  ;;  %v3033_v24 = vadd.f32 1.0, %v6892_v57  ;;  %v2804_v30 = vmul.f32 1.442695, %v2660_v41  ;;  %v2664_v42 = vmin.f32 %v8756_v26, 20.0  ;;  %2148 = vmatmul.mubr.bf16.gmra.mrb[116].mxu0 %v8361_v56 }
 0x13f   : > { %v5940_v1 = vadd.f32 -1.0, %v3156_v59  ;;  %v3540_v28 = vadd.f32 1.0, %v3156_v59  ;;  %v3160_v14 = vmul.f32 %v3032_v23, %v3032_v23  ;;  %v2806_v47 = vmul.f32 1.442695, %v2661_v25  ;;  %2157 = vmatprep.mubr.bf16.mxu0 %v8351_v16 }
 0x140   : > { %v5941_v8 = vadd.f32 -1.0, %v3157_v45  ;;  %v3541_v11 = vadd.f32 1.0, %v3157_v45  ;;  %v3161_v9 = vmul.f32 %v3033_v24, %v3033_v24  ;;  %6901 = vpow2.f32 %v2804_v30 }
 0x141   : > { %v8766_v20 = vmul.f32 %v5940_v1, %v8695_v37  ;;  %6903 = vrcp.f32 %v3540_v28  ;;  %v5944_v2 = vadd.f32 -1.0, %v3160_v14  ;;  %v3544_v54 = vadd.f32 1.0, %v3160_v14  ;;  %v1743_v7 = vpop.f32.mrb[12].mxu0 }
 0x142   : > { %v6894_v22 = vpop.eup %6893  ;;  %v8769_v44 = vmul.f32 %v5941_v8, %v8698_v61  ;;  %6905 = vrcp.f32 %v3541_v11  ;;  %v5945_v38 = vadd.f32 -1.0, %v3161_v9  ;;  %v3545_v43 = vadd.f32 1.0, %v3161_v9  ;;  %v1745_v48 = vpop.f32.mrb[13].mxu0 }
 0x143   : > { %v6896_v16 = vpop.eup %6895  ;;  %v8772_v12 = vmul.f32 %v5944_v2, %v8702_v63  ;;  %6907 = vrcp.f32 %v3544_v54  ;;  %v3036_v40 = vadd.f32 1.0, %v6894_v22  ;;  %v2812_v37 = vmul.f32 1.442695, %v2664_v42  ;;  %v1747_v41 = vpop.f32.mrb[14].mxu0 }
 0x144   : > { %12370 = vst [vmem:[#allocation24_spill] sm:$0xff] %v8769_v44  ;;  %v6898_v60 = vpop.eup %6897  ;;  %v8775_v57 = vmul.f32 %v5945_v38, %v8706_v55  ;;  %6909 = vrcp.f32 %v3545_v43  ;;  %v3037_v59 = vadd.f32 1.0, %v6896_v16  ;;  %v2665_v61 = vmin.f32 %v8760_v32, 20.0  ;;  %v1749_v23 = vpop.f32.mrb[15].mxu0 }
 0x145   : > { %12371 = vst [vmem:[#allocation25_spill] sm:$0xff] %v8772_v12  ;;  %v6900_v25 = vpop.eup %6899  ;;  %v3164_v45 = vmul.f32 %v3036_v40, %v3036_v40  ;;  %v3040_v24 = vadd.f32 1.0, %v6898_v60  ;;  %6911 = vpow2.f32 %v2806_v47  ;;  %v8779_v63 = vadd.f32 %v1743_v7, %v8687_v15 }
 0x146   : > { %12372 = vst [vmem:[#allocation26_spill] sm:$0xff] %v8775_v57  ;;  %v3165_v30 = vmul.f32 %v3037_v59, %v3037_v59  ;;  %v3041_v1 = vadd.f32 1.0, %v6900_v25  ;;  %6913 = vpow2.f32 %v2812_v37  ;;  %v2814_v42 = vmul.f32 1.442695, %v2665_v61  ;;  %2158 = vmatmul.mubr.bf16.gmra.mrb[120].mxu0 %v8393_v4 }
 0x147   : > { %v5948_v55 = vadd.f32 -1.0, %v3164_v45  ;;  %v3548_v28 = vadd.f32 1.0, %v3164_v45  ;;  %v3168_v14 = vmul.f32 %v3040_v24, %v3040_v24  ;;  %v2668_v8 = vmin.f32 %v8779_v63, 20.0  ;;  %2167 = vmatprep.mubr.bf16.mxu0 %v8389_v50 }
 0x148   : > { %v5949_v11 = vadd.f32 -1.0, %v3165_v30  ;;  %v3549_v9 = vadd.f32 1.0, %v3165_v30  ;;  %v3169_v2 = vmul.f32 %v3041_v1, %v3041_v1  ;;  %6915 = vpow2.f32 %v2814_v42 }
 0x149   : > { %v8785_v47 = vmul.f32 %v5948_v55, %v8719_v19  ;;  %6917 = vrcp.f32 %v3548_v28  ;;  %v5952_v54 = vadd.f32 -1.0, %v3168_v14  ;;  %v3552_v7 = vadd.f32 1.0, %v3168_v14  ;;  %v1753_v22 = vpop.f32.mrb[16].mxu0 }
 0x14a   : > { %v6902_v38 = vpop.eup %6901  ;;  %v8788_v43 = vmul.f32 %v5949_v11, %v8722_v3  ;;  %6919 = vrcp.f32 %v3549_v9  ;;  %v5953_v16 = vadd.f32 -1.0, %v3169_v2  ;;  %v3553_v40 = vadd.f32 1.0, %v3169_v2  ;;  %v1755_v37 = vpop.f32.mrb[17].mxu0 }
 0x14b   : > { %12373 = vst [vmem:[#allocation27_spill] sm:$0xff] %v8785_v47  ;;  %v8790_v50 = vpop.eup %6903  ;;  %v8793_v60 = vmul.f32 %v5952_v54, %v8726_v21  ;;  %6921 = vrcp.f32 %v3552_v7  ;;  %v3044_v19 = vadd.f32 1.0, %v6902_v38  ;;  %v2820_v59 = vmul.f32 1.442695, %v2668_v8  ;;  %v1757_v61 = vpop.f32.mrb[18].mxu0 }
 0x14c   : > { %12374 = vst [vmem:[#allocation28_spill] sm:$0xff] %v8788_v43  ;;  %v8795_v25 = vpop.eup %6905  ;;  %v8798_v45 = vmul.f32 %v5953_v16, %v8736_v35  ;;  %6923 = vrcp.f32 %v3553_v40  ;;  %v8801_v3 = vadd.f32 %v1745_v48, %v8690_v31  ;;  %v8804_v24 = vadd.f32 %v1747_v41, %v8687_v15  ;;  %v1759_v30 = vpop.f32.mrb[19].mxu0  ;;  %v6755_v8 = vld [vmem:[%s12312_s4 + $0x44] ss:$8 sps:$4 sm:$0xff]  }
 0x14d   : > { %12375 = vst [vmem:[#allocation29_spill] sm:$0xff] %v8793_v60  ;;  %12376 = vst [vmem:[#allocation30_spill] sm:$0xff] %v8795_v25  ;;  %v8806_v1 = vpop.eup %6907  ;;  %v3172_v21 = vmul.f32 %v3044_v19, %v3044_v19  ;;  %6925 = vpow2.f32 %v2820_v59  ;;  %v8809_v42 = vadd.f32 %v1749_v23, %v8690_v31  ;;  %v8812_v55 = vadd.f32 %v1753_v22, %v8687_v15  ;;  %v6753_v23 = vld [vmem:[%s12312_s4 + $0x40] ss:$8 sps:$4 sm:$0xff]  }
 0x14e   : > { %12377 = vst [vmem:[#allocation31_spill] sm:$0xff] %v8798_v45  ;;  %12378 = vst [vmem:[#allocation32_spill] sm:$0xff] %v8806_v1  ;;  %v8814_v35 = vpop.eup %6909  ;;  %v2669_v28 = vmin.f32 %v8801_v3, 20.0  ;;  %v2672_v48 = vmin.f32 %v8804_v24, 20.0  ;;  %v8819_v41 = vadd.f32 %v1755_v37, %v8690_v31  ;;  %v8822_v14 = vadd.f32 %v1757_v61, %v8687_v15  ;;  %2168 = vmatmul.mubr.bf16.gmra.mrb[124].mxu0 %v8425_v6 }
 0x14f   : > { %12379 = vst [vmem:[#allocation33_spill] sm:$0xff] %v8814_v35  ;;  %v6912_v11 = vpop.eup %6911  ;;  %v5956_v9 = vadd.f32 -1.0, %v3172_v21  ;;  %v3556_v2 = vadd.f32 1.0, %v3172_v21  ;;  %v2673_v54 = vmin.f32 %v8809_v42, 20.0  ;;  %v2676_v7 = vmin.f32 %v8812_v55, 20.0  ;;  %2177 = vmatprep.mubr.bf16.mxu0 %v8580_v5  ;;  %4520 = vmatprep.subr.bf16.mxu1 %v6755_v8 }
 0x150   : > { %v6914_v22 = vpop.eup %6913  ;;  %v3045_v38 = vadd.f32 1.0, %v6912_v11  ;;  %v2822_v16 = vmul.f32 1.442695, %v2669_v28  ;;  %v2828_v40 = vmul.f32 1.442695, %v2672_v48  ;;  %v2677_v37 = vmin.f32 %v8819_v41, 20.0  ;;  %4521 = vmatpush1.bf16.msra.mxu1 %v6753_v23 }
 0x151   : > { %v8836_v19 = vmul.f32 %v5956_v9, %v8746_v18  ;;  %6927 = vrcp.f32 %v3556_v2  ;;  %v3048_v59 = vadd.f32 1.0, %v6914_v22  ;;  %v2830_v61 = vmul.f32 1.442695, %v2673_v54  ;;  %v1763_v21 = vpop.f32.mrb[20].mxu0 }
 0x152   : > { %v6916_v29 = vpop.eup %6915  ;;  %v3173_v51 = vmul.f32 %v3045_v38, %v3045_v38  ;;  %6929 = vpow2.f32 %v2822_v16  ;;  %v2836_v6 = vmul.f32 1.442695, %v2676_v7  ;;  %v2838_v5 = vmul.f32 1.442695, %v2677_v37  ;;  %v1765_v4 = vpop.f32.mrb[21].mxu0 }
 0x153   : > { %12380 = vst [vmem:[#allocation34_spill] sm:$0xff] %v8836_v19  ;;  %v8838_v11 = vpop.eup %6917  ;;  %v3176_v28 = vmul.f32 %v3048_v59, %v3048_v59  ;;  %v3049_v48 = vadd.f32 1.0, %v6916_v29  ;;  %6931 = vpow2.f32 %v2828_v40  ;;  %v2680_v8 = vmin.f32 %v8822_v14, 20.0  ;;  %v1767_v18 = vpop.f32.mrb[22].mxu0  ;;  %v6756_v7 = vld [vmem:[%s12312_s4 + $0x50] ss:$8 sps:$4 sm:$0xff]  }
 0x154   : > { %12381 = vst [vmem:[#allocation35_spill] sm:$0xff] %v8838_v11  ;;  %v8841_v9 = vpop.eup %6919  ;;  %v5957_v2 = vadd.f32 -1.0, %v3173_v51  ;;  %v3557_v54 = vadd.f32 1.0, %v3173_v51  ;;  %6933 = vpow2.f32 %v2830_v61  ;;  %v8844_v23 = vadd.f32 %v1759_v30, %v8690_v31  ;;  %v1769_v22 = vpop.f32.mrb[23].mxu0  ;;  %v6758_v51 = vld [vmem:[%s12312_s4 + $0x54] ss:$8 sps:$4 sm:$0xff]  }
 0x155   : > { %12382 = vst [vmem:[#allocation36_spill] sm:$0xff] %v8841_v9  ;;  %v8849_v38 = vpop.eup %6921  ;;  %v5960_v29 = vadd.f32 -1.0, %v3176_v28  ;;  %v3560_v16 = vadd.f32 1.0, %v3176_v28  ;;  %v3177_v40 = vmul.f32 %v3049_v48, %v3049_v48  ;;  %6935 = vpow2.f32 %v2836_v6  ;;  %v8854_v37 = vpop.f32.mrb[0].mxu1  ;;  %v7657_v19 = vld [vmem:[%s7948_s29 + $0x94] ss:$8 sps:$4 sm:$0xff]   ;;  %4522 = vmatprep.subr.bf16.mxu1 %v6758_v51 }
 0x156   : > { %12383 = vst [vmem:[#allocation37_spill] sm:$0xff] %v8849_v38  ;;  %v8856_v30 = vpop.eup %6923  ;;  %v8859_v59 = vmul.f32 %v5957_v2, %v8752_v46  ;;  %6937 = vrcp.f32 %v3557_v54  ;;  %v2844_v61 = vmul.f32 1.442695, %v2680_v8  ;;  %v2681_v56 = vmin.f32 %v8844_v23, 20.0  ;;  %2178 = vmatmul.mubr.bf16.gmra.mrb[128].mxu0 %v8310_v36  ;;  %4523 = vmatpush1.bf16.msra.mxu1 %v6756_v7 }
 0x157   : > { %12384 = vst [vmem:[#allocation38_spill] sm:$0xff] %v8856_v30  ;;  %v6926_v28 = vpop.eup %6925  ;;  %v8864_v6 = vmul.f32 %v5960_v29, %v8756_v26  ;;  %6939 = vrcp.f32 %v3560_v16  ;;  %v5961_v48 = vadd.f32 -1.0, %v3177_v40  ;;  %v3561_v52 = vadd.f32 1.0, %v3177_v40  ;;  %2187 = vmatprep.mubr.bf16.mxu0 %v7657_v19  ;;  %v8867_v30 = vpop.f32.mrb[1].mxu1 }
 0x158   : > { %12385 = vst [vmem:[#allocation39_spill] sm:$0xff] %v8859_v59  ;;  %v3052_v46 = vadd.f32 1.0, %v6926_v28  ;;  %6941 = vpow2.f32 %v2838_v5  ;;  %v2846_v2 = vmul.f32 1.442695, %v2681_v56  ;;  %v8870_v8 = vadd.f32 %v1763_v21, %v8687_v15  ;;  %v8872_v54 = vpop.f32.mrb[2].mxu1 }
 0x159   : > { %12386 = vst [vmem:[#allocation40_spill] sm:$0xff] %v8864_v6  ;;  %v8875_v26 = vmul.f32 %v5961_v48, %v8760_v32  ;;  %6943 = vrcp.f32 %v3561_v52  ;;  %v8878_v29 = vadd.f32 %v1765_v4, %v8690_v31  ;;  %v8881_v19 = vadd.f32 %v1767_v18, %v8687_v15  ;;  %v1773_v16 = vpop.f32.mrb[24].mxu0  ;;  %v8883_v40 = vpop.f32.mrb[3].mxu1  ;;  %v6759_v52 = vld [vmem:[%s12312_s4 + $0x60] ss:$8 sps:$4 sm:$0xff]  }
 0x15a   : > { %v3180_v56 = vmul.f32 %v3052_v46, %v3052_v46  ;;  %6945 = vpow2.f32 %v2844_v61  ;;  %v2684_v21 = vmin.f32 %v8870_v8, 20.0  ;;  %v8887_v5 = vadd.f32 %v1769_v22, %v8690_v31  ;;  %v1775_v7 = vpop.f32.mrb[25].mxu0  ;;  %v6761_v4 = vld [vmem:[%s12312_s4 + $0x64] ss:$8 sps:$4 sm:$0xff]   ;;  %v8904_v28 = vpop.f32.mrb[4].mxu1 }
 0x15b   : > { %12387 = vst [vmem:[#allocation41_spill] sm:$0xff] %v8875_v26  ;;  %v8895_v32 = vpop.eup %6927  ;;  %6947 = vpow2.f32 %v2846_v2  ;;  %v2685_v18 = vmin.f32 %v8878_v29, 20.0  ;;  %v2688_v51 = vmin.f32 %v8881_v19, 20.0  ;;  %v8900_v61 = vadd.f32 %v1773_v16, %v8687_v15  ;;  %v8902_v22 = vpop.f32.mrb[26].mxu0  ;;  %4524 = vmatprep.subr.bf16.mxu1 %v6761_v4 }
 0x15c   : > { %12388 = vst [vmem:[#allocation42_spill] sm:$0xff] %v8895_v32  ;;  %v6930_v48 = vpop.eup %6929  ;;  %v5964_v46 = vadd.f32 -1.0, %v3180_v56  ;;  %v3564_v36 = vadd.f32 1.0, %v3180_v56  ;;  %v2852_v26 = vmul.f32 1.442695, %v2684_v21  ;;  %v2689_v6 = vmin.f32 %v8887_v5, 20.0  ;;  %4525 = vmatpush1.bf16.msra.mxu1 %v6759_v52 }
 0x15d   : > { %v8907_v59 = vpop.f32.mrb[27].mxu0  ;;  %v6932_v2 = vpop.eup %6931  ;;  %v3053_v32 = vadd.f32 1.0, %v6930_v48  ;;  %v2854_v45 = vmul.f32 1.442695, %v2685_v18  ;;  %v2860_v38 = vmul.f32 1.442695, %v2688_v51 }
 0x15e   : > { %v2692_v16 = vmin.f32 %v8900_v61, 20.0  ;;  %v6934_v60 = vpop.eup %6933  ;;  %v8911_v9 = vmul.f32 %v5964_v46, %v8779_v63  ;;  %6949 = vrcp.f32 %v3564_v36  ;;  %v3056_v56 = vadd.f32 1.0, %v6932_v2  ;;  %2188 = vmatmul.mubr.bf16.gmra.mrb[132].mxu0 %v8345_v49  ;;  %v8914_v43 = vpop.f32.mrb[5].mxu1  ;;  %v7658_v51 = vld [vmem:[%s7948_s29 + $0xa4] ss:$8 sps:$4 sm:$0xff]  }
 0x15f   : > { %v2862_v21 = vmul.f32 1.442695, %v2689_v6  ;;  %v6936_v4 = vpop.eup %6935  ;;  %v3181_v11 = vmul.f32 %v3053_v32, %v3053_v32  ;;  %v3057_v48 = vadd.f32 1.0, %v6934_v60  ;;  %6951 = vpow2.f32 %v2852_v26  ;;  %2197 = vmatprep.mubr.bf16.mxu0 %v7658_v51  ;;  %v8922_v63 = vpop.f32.mrb[6].mxu1 }
 0x160   : > { %12389 = vst [vmem:[#allocation43_spill] sm:$0xff] %v8911_v9  ;;  %v2868_v18 = vmul.f32 1.442695, %v2692_v16  ;;  %v8917_v47 = vpop.eup %6937  ;;  %v3184_v52 = vmul.f32 %v3056_v56, %v3056_v56  ;;  %v3060_v34 = vadd.f32 1.0, %v6936_v4  ;;  %6953 = vpow2.f32 %v2854_v45 }
 0x161   : > { %12390 = vst [vmem:[#allocation44_spill] sm:$0xff] %v8917_v47  ;;  %v8920_v36 = vadd.f32 %v1775_v7, %v8690_v31  ;;  %v8924_v6 = vpop.eup %6939  ;;  %v5965_v46 = vadd.f32 -1.0, %v3181_v11  ;;  %v3565_v2 = vadd.f32 1.0, %v3181_v11  ;;  %v3185_v32 = vmul.f32 %v3057_v48, %v3057_v48  ;;  %v1783_v60 = vpop.f32.mrb[28].mxu0 }
 0x162   : > { %12391 = vst [vmem:[#allocation45_spill] sm:$0xff] %v8924_v6  ;;  %6955 = vpow2.f32 %v2860_v38  ;;  %v6942_v26 = vpop.eup %6941  ;;  %v5968_v16 = vadd.f32 -1.0, %v3184_v52  ;;  %v3568_v51 = vadd.f32 1.0, %v3184_v52  ;;  %v3188_v49 = vmul.f32 %v3060_v34, %v3060_v34  ;;  %v8926_v56 = vpop.f32.mrb[29].mxu0 }
 0x163   : > { %6957 = vpow2.f32 %v2862_v21  ;;  %v8928_v45 = vpop.eup %6943  ;;  %v8931_v7 = vmul.f32 %v5965_v46, %v8801_v3  ;;  %v5969_v4 = vadd.f32 -1.0, %v3185_v32  ;;  %v3569_v9 = vadd.f32 1.0, %v3185_v32  ;;  %v8933_v6 = vpop.f32.mrb[30].mxu0 }
 0x164   : > { %12392 = vst [vmem:[#allocation46_spill] sm:$0xff] %v8928_v45  ;;  %6959 = vrcp.f32 %v3565_v2  ;;  %v6946_v11 = vpop.eup %6945  ;;  %v8936_v38 = vmul.f32 %v5968_v16, %v8804_v24  ;;  %v5972_v48 = vadd.f32 -1.0, %v3188_v49  ;;  %v3572_v34 = vadd.f32 1.0, %v3188_v49  ;;  %v8938_v21 = vpop.f32.mrb[31].mxu0 }
 0x165   : > { %12393 = vst [vmem:[#allocation47_spill] sm:$0xff] %v8931_v7  ;;  %6961 = vrcp.f32 %v3568_v51  ;;  %v8940_v52 = vpop.f32.mrb[7].mxu1  ;;  %v6948_v45 = vpop.eup %6947  ;;  %v8943_v3 = vmul.f32 %v5969_v4, %v8809_v42  ;;  %v3061_v46 = vadd.f32 1.0, %v6942_v26  ;;  %v3064_v2 = vadd.f32 1.0, %v6946_v11  ;;  %v7659_v42 = vld [vmem:[%s7948_s29 + $0xb4] ss:$8 sps:$4 sm:$0xff]  }
 0x166   : > { %12394 = vst [vmem:[#allocation48_spill] sm:$0xff] %v8936_v38  ;;  %6963 = vrcp.f32 %v3569_v9  ;;  %v8946_v32 = vmul.f32 %v5972_v48, %v8812_v55  ;;  %v3065_v24 = vadd.f32 1.0, %v6948_v45  ;;  %v2693_v16 = vmin.f32 %v8920_v36, 20.0  ;;  %2198 = vmatmul.mubr.bf16.gmra.mrb[136].mxu0 %v8377_v62  ;;  %v8955_v9 = vpop.f32.mrb[8].mxu1 }
 0x167   : > { %12395 = vst [vmem:[#allocation49_spill] sm:$0xff] %v8943_v3  ;;  %6965 = vrcp.f32 %v3572_v34  ;;  %v3189_v49 = vmul.f32 %v3061_v46, %v3061_v46  ;;  %v3192_v51 = vmul.f32 %v3064_v2, %v3064_v2  ;;  %v8952_v38 = vadd.f32 %v8902_v22, %v8687_v15  ;;  %2207 = vmatprep.mubr.bf16.mxu0 %v7659_v42 }
 0x168   : > { %12396 = vst [vmem:[#allocation50_spill] sm:$0xff] %v8946_v32  ;;  %6967 = vpow2.f32 %v2868_v18  ;;  %v8957_v26 = vpop.eup %6949  ;;  %v3193_v55 = vmul.f32 %v3065_v24, %v3065_v24  ;;  %v2870_v4 = vmul.f32 1.442695, %v2693_v16  ;;  %v8961_v45 = vadd.f32 %v8907_v59, %v8690_v31 }
 0x169   : > { %12397 = vst [vmem:[#allocation51_spill] sm:$0xff] %v8957_v26  ;;  %v8964_v11 = vadd.f32 %v1783_v60, %v8687_v15  ;;  %v6952_v18 = vpop.eup %6951  ;;  %v5973_v48 = vadd.f32 -1.0, %v3189_v49  ;;  %v3573_v34 = vadd.f32 1.0, %v3189_v49  ;;  %v5976_v22 = vadd.f32 -1.0, %v3192_v51  ;;  %v8966_v2 = vpop.f32.mrb[32].mxu0 }
 0x16a   : > { %v3576_v46 = vadd.f32 1.0, %v3192_v51  ;;  %v6954_v42 = vpop.eup %6953  ;;  %v5977_v62 = vadd.f32 -1.0, %v3193_v55  ;;  %v3577_v32 = vadd.f32 1.0, %v3193_v55  ;;  %v3068_v3 = vadd.f32 1.0, %v6952_v18  ;;  %v8968_v24 = vpop.f32.mrb[33].mxu0 }
 0x16b   : > { %6969 = vpow2.f32 %v2870_v4  ;;  %v8971_v59 = vmul.f32 %v5973_v48, %v8819_v41  ;;  %v8974_v60 = vmul.f32 %v5976_v22, %v8822_v14  ;;  %v3069_v49 = vadd.f32 1.0, %v6954_v42  ;;  %v8976_v7 = vpop.f32.mrb[34].mxu0 }
 0x16c   : > { %v6956_v16 = vpop.eup %6955  ;;  %6971 = vrcp.f32 %v3573_v34  ;;  %v8979_v26 = vmul.f32 %v5977_v62, %v8844_v23  ;;  %v3196_v55 = vmul.f32 %v3068_v3, %v3068_v3  ;;  %v8981_v18 = vpop.f32.mrb[35].mxu0  ;;  %v2696_v14 = vmin.f32 %v8952_v38, 20.0 }
 0x16d   : > { %12398 = vst [vmem:[#allocation52_spill] sm:$0xff] %v8971_v59  ;;  %12399 = vst [vmem:[#allocation53_spill] sm:$0xff] %v8974_v60  ;;  %v6958_v51 = vpop.eup %6957  ;;  %6973 = vrcp.f32 %v3576_v46  ;;  %v3072_v4 = vadd.f32 1.0, %v6956_v16  ;;  %v3197_v41 = vmul.f32 %v3069_v49, %v3069_v49  ;;  %v2697_v62 = vmin.f32 %v8961_v45, 20.0 }
 0x16e   : > { %12400 = vst [vmem:[#allocation54_spill] sm:$0xff] %v8979_v26  ;;  %v8983_v47 = vpop.eup %6959  ;;  %6975 = vrcp.f32 %v3577_v32  ;;  %v3073_v48 = vadd.f32 1.0, %v6958_v51  ;;  %v5980_v22 = vadd.f32 -1.0, %v3196_v55  ;;  %v3580_v42 = vadd.f32 1.0, %v3196_v55  ;;  %2208 = vmatmul.mubr.bf16.gmra.mrb[140].mxu0 %v8408_v10  ;;  %v7660_v32 = vld [vmem:[%s7948_s29 + $0xc4] ss:$8 sps:$4 sm:$0xff]  }
 0x16f   : > { %12401 = vst [vmem:[#allocation55_spill] sm:$0xff] %v8983_v47  ;;  %v8986_v34 = vpop.eup %6961  ;;  %v3200_v46 = vmul.f32 %v3072_v4, %v3072_v4  ;;  %v5981_v3 = vadd.f32 -1.0, %v3197_v41  ;;  %v3581_v16 = vadd.f32 1.0, %v3197_v41  ;;  %v2876_v60 = vmul.f32 1.442695, %v2696_v14  ;;  %2217 = vmatprep.mubr.bf16.mxu0 %v7660_v32 }
 0x170   : > { %12402 = vst [vmem:[#allocation56_spill] sm:$0xff] %v8986_v34  ;;  %v8990_v23 = vpop.eup %6963  ;;  %v3201_v26 = vmul.f32 %v3073_v48, %v3073_v48  ;;  %v8996_v51 = vmul.f32 %v5980_v22, %v8870_v8  ;;  %6977 = vrcp.f32 %v3580_v42  ;;  %v2878_v32 = vmul.f32 1.442695, %v2697_v62  ;;  %v6762_v22 = vld [vmem:[%s12312_s4 + $0x70] ss:$8 sps:$4 sm:$0xff]  }
 0x171   : > { %12403 = vst [vmem:[#allocation57_spill] sm:$0xff] %v8990_v23  ;;  %v8993_v49 = vpop.eup %6965  ;;  %v5984_v55 = vadd.f32 -1.0, %v3200_v46  ;;  %v3584_v4 = vadd.f32 1.0, %v3200_v46  ;;  %v8999_v34 = vmul.f32 %v5981_v3, %v8878_v29  ;;  %6979 = vrcp.f32 %v3581_v16  ;;  %v9001_v41 = vpop.f32.mrb[36].mxu0 }
 0x172   : > { %12404 = vst [vmem:[#allocation58_spill] sm:$0xff] %v8993_v49  ;;  %12405 = vst [vmem:[#allocation59_spill] sm:$0xff] %v8996_v51  ;;  %v6968_v59 = vpop.eup %6967  ;;  %v5985_v10 = vadd.f32 -1.0, %v3201_v26  ;;  %v3585_v23 = vadd.f32 1.0, %v3201_v26  ;;  %v9006_v8 = vpop.f32.mrb[37].mxu0  ;;  %v2700_v26 = vmin.f32 %v8964_v11, 20.0  ;;  %v9017_v42 = vadd.f32 %v8926_v56, %v8690_v31 }
 0x173   : > { %12406 = vst [vmem:[#allocation60_spill] sm:$0xff] %v8999_v34  ;;  %v9004_v48 = vmul.f32 %v5984_v55, %v8881_v19  ;;  %6981 = vrcp.f32 %v3584_v4  ;;  %v3076_v14 = vadd.f32 1.0, %v6968_v59  ;;  %v9019_v19 = vpop.f32.mrb[38].mxu0  ;;  %v6764_v59 = vld [vmem:[%s12312_s4 + $0x74] ss:$8 sps:$4 sm:$0xff]   ;;  %v9032_v56 = vpop.f32.mrb[9].mxu1  ;;  %v9050_v34 = vadd.f32 %v8966_v2, %v8687_v15 }
 0x174   : > { %v9012_v29 = vmul.f32 %v5985_v10, %v8887_v5  ;;  %6983 = vrcp.f32 %v3585_v23  ;;  %v9026_v10 = vadd.f32 %v8933_v6, %v8687_v15  ;;  %v9030_v5 = vadd.f32 %v8938_v21, %v8690_v31  ;;  %v1809_v23 = vpop.f32.mrb[39].mxu0  ;;  %4526 = vmatprep.subr.bf16.mxu1 %v6764_v59  ;;  %v7661_v51 = vld [vmem:[%s7948_s29 + $0xd4] ss:$8 sps:$4 sm:$0xff]  }
 0x175   : > { %12407 = vst [vmem:[#allocation61_spill] sm:$0xff] %v9004_v48  ;;  %v6970_v46 = vpop.eup %6969  ;;  %v3204_v62 = vmul.f32 %v3076_v14, %v3076_v14  ;;  %6985 = vpow2.f32 %v2876_v60  ;;  %v2884_v55 = vmul.f32 1.442695, %v2700_v26  ;;  %v2701_v4 = vmin.f32 %v9017_v42, 20.0  ;;  %v9037_v60 = vpop.f32.mrb[10].mxu1  ;;  %4527 = vmatpush1.bf16.msra.mxu1 %v6762_v22 }
 0x176   : > { %12408 = vst [vmem:[#allocation62_spill] sm:$0xff] %v9012_v29  ;;  %v9034_v3 = vpop.eup %6971  ;;  %v3077_v16 = vadd.f32 1.0, %v6970_v46  ;;  %6987 = vpow2.f32 %v2878_v32  ;;  %v2704_v21 = vmin.f32 %v9026_v10, 20.0  ;;  %v2705_v48 = vmin.f32 %v9030_v5, 20.0  ;;  %2218 = vmatmul.mubr.bf16.gmra.mrb[144].mxu0 %v8442_v27  ;;  %v9044_v46 = vpop.f32.mrb[11].mxu1 }
 0x177   : > { %12409 = vst [vmem:[#allocation63_spill] sm:$0xff] %v9034_v3  ;;  %v9039_v6 = vpop.eup %6973  ;;  %v5988_v14 = vadd.f32 -1.0, %v3204_v62  ;;  %v3588_v29 = vadd.f32 1.0, %v3204_v62  ;;  %6989 = vpow2.f32 %v2884_v55  ;;  %v2886_v59 = vmul.f32 1.442695, %v2701_v4  ;;  %2227 = vmatprep.mubr.bf16.mxu0 %v7661_v51  ;;  %v9053_v62 = vpop.f32.mrb[12].mxu1 }
 0x178   : > { %12410 = vst [vmem:[#allocation64_spill] sm:$0xff] %v9039_v6  ;;  %v9046_v32 = vpop.eup %6975  ;;  %v3205_v26 = vmul.f32 %v3077_v16, %v3077_v16  ;;  %12412 = vst [vmem:[#allocation66_spill] sm:$0xff] %v9053_v62  ;;  %v2892_v22 = vmul.f32 1.442695, %v2704_v21  ;;  %v2894_v27 = vmul.f32 1.442695, %v2705_v48  ;;  %v9065_v51 = vadd.f32 %v8968_v24, %v8690_v31 }
 0x179   : > { %12411 = vst [vmem:[#allocation65_spill] sm:$0xff] %v9046_v32  ;;  %v9056_v6 = vmul.f32 %v5988_v14, %v8900_v61  ;;  %6991 = vrcp.f32 %v3588_v29  ;;  %v9058_v3 = vpop.f32.mrb[13].mxu1  ;;  %v2708_v55 = vmin.f32 %v9050_v34, 20.0  ;;  %v1813_v4 = vpop.f32.mrb[40].mxu0  ;;  %v9069_v61 = vadd.f32 %v8976_v7, %v8687_v15 }
 0x17a   : > { %12414 = vst [vmem:[#allocation68_spill] sm:$0xff] %v9058_v3  ;;  %v5989_v32 = vadd.f32 -1.0, %v3205_v26  ;;  %v3589_v16 = vadd.f32 1.0, %v3205_v26  ;;  %6993 = vpow2.f32 %v2886_v59  ;;  %v9061_v2 = vpop.eup %6977  ;;  %v9073_v48 = vadd.f32 %v8981_v18, %v8690_v31  ;;  %v9075_v29 = vpop.f32.mrb[41].mxu0 }
 0x17b   : > { %12413 = vst [vmem:[#allocation67_spill] sm:$0xff] %v9056_v6  ;;  %12415 = vst [vmem:[#allocation69_spill] sm:$0xff] %v9061_v2  ;;  %6995 = vpow2.f32 %v2892_v22  ;;  %v9077_v14 = vpop.eup %6979  ;;  %v2900_v26 = vmul.f32 1.442695, %v2708_v55  ;;  %v9084_v24 = vadd.f32 %v9001_v41, %v8687_v15  ;;  %v9086_v59 = vpop.f32.mrb[42].mxu0  ;;  %v2709_v18 = vmin.f32 %v9065_v51, 20.0 }
 0x17c   : > { %12416 = vst [vmem:[#allocation70_spill] sm:$0xff] %v9077_v14  ;;  %v9080_v21 = vmul.f32 %v5989_v32, %v8920_v36  ;;  %6997 = vrcp.f32 %v3589_v16  ;;  %v2712_v22 = vmin.f32 %v9069_v61, 20.0  ;;  %v2713_v6 = vmin.f32 %v9073_v48, 20.0  ;;  %v9093_v14 = vpop.f32.mrb[43].mxu0 }
 0x17d   : > { %v9088_v7 = vpop.eup %6981  ;;  %6999 = vpow2.f32 %v2894_v27  ;;  %v2716_v41 = vmin.f32 %v9084_v24, 20.0  ;;  %v9100_v32 = vadd.f32 %v9006_v8, %v8690_v31  ;;  %v9104_v27 = vadd.f32 %v9019_v19, %v8687_v15 }
 0x17e   : > { %12417 = vst [vmem:[#allocation71_spill] sm:$0xff] %v9080_v21  ;;  %12418 = vst [vmem:[#allocation72_spill] sm:$0xff] %v9088_v7  ;;  %v9095_v36 = vpop.eup %6983  ;;  %7001 = vpow2.f32 %v2900_v26  ;;  %v2902_v55 = vmul.f32 1.442695, %v2709_v18  ;;  %v2908_v21 = vmul.f32 1.442695, %v2712_v22  ;;  %v9107_v2 = vadd.f32 %v1809_v23, %v8690_v31  ;;  %2228 = vmatmul.mubr.bf16.gmra.mrb[148].mxu0 %v8218_v39 }
 0x17f   : > { %12419 = vst [vmem:[#allocation73_spill] sm:$0xff] %v9095_v36  ;;  %v6986_v16 = vpop.eup %6985  ;;  %v2910_v7 = vmul.f32 1.442695, %v2713_v6  ;;  %v2916_v49 = vmul.f32 1.442695, %v2716_v41  ;;  %v2717_v47 = vmin.f32 %v9100_v32, 20.0  ;;  %2237 = vmatprep.mubr.bf16.mxu0 %v7662_v53  ;;  %v9115_v6 = vadd.f32 %v1813_v4, %v8687_v15 }
 0x180   : > { %v6988_v26 = vpop.eup %6987  ;;  %v3080_v36 = vadd.f32 1.0, %v6986_v16  ;;  %v2720_v8 = vmin.f32 %v9104_v27, 20.0  ;;  %7003 = vpow2.f32 %v2902_v55  ;;  %v2721_v18 = vmin.f32 %v9107_v2, 20.0  ;;  %v9117_v23 = vpop.f32.mrb[14].mxu1 }
 0x181   : > { %v3081_v19 = vadd.f32 1.0, %v6988_v26  ;;  %12420 = vst [vmem:[#allocation74_spill] sm:$0xff] %v9117_v23  ;;  %v6990_v22 = vpop.eup %6989  ;;  %7005 = vpow2.f32 %v2908_v21  ;;  %v2918_v16 = vmul.f32 1.442695, %v2717_v47  ;;  %v9119_v35 = vpop.f32.mrb[44].mxu0 }
 0x182   : > { %v3208_v39 = vmul.f32 %v3080_v36, %v3080_v36  ;;  %v2924_v41 = vmul.f32 1.442695, %v2720_v8  ;;  %v3084_v53 = vadd.f32 1.0, %v6990_v22  ;;  %7007 = vpow2.f32 %v2910_v7  ;;  %v9125_v26 = vpop.f32.mrb[45].mxu0  ;;  %v9132_v7 = vpop.f32.mrb[15].mxu1 }
 0x183   : > { %v9121_v57 = vpop.eup %6991  ;;  %v3209_v1 = vmul.f32 %v3081_v19, %v3081_v19  ;;  %v9123_v55 = vmul.f32 1.442695, %v2721_v18  ;;  %7009 = vpow2.f32 %v2916_v49  ;;  %v2724_v36 = vmin.f32 %v9115_v6, 20.0  ;;  %v9128_v21 = vpop.f32.mrb[46].mxu0  ;;  %12422 = vst [vmem:[#allocation76_spill] sm:$0xff] %v9132_v7 }
 0x184   : > { %12421 = vst [vmem:[#allocation75_spill] sm:$0xff] %v9121_v57  ;;  %v6994_v4 = vpop.eup %6993  ;;  %v5992_v12 = vadd.f32 -1.0, %v3208_v39  ;;  %v3592_v25 = vadd.f32 1.0, %v3208_v39  ;;  %v3212_v17 = vmul.f32 %v3084_v53, %v3084_v53  ;;  %v9130_v19 = vpop.f32.mrb[47].mxu0 }
 0x185   : > { %v6996_v47 = vpop.eup %6995  ;;  %v5993_v8 = vadd.f32 -1.0, %v3209_v1  ;;  %v3593_v44 = vadd.f32 1.0, %v3209_v1  ;;  %v3085_v57 = vadd.f32 1.0, %v6994_v4  ;;  %v9139_v49 = vmul.f32 1.442695, %v2724_v36 }
 0x186   : > { %v9134_v18 = vpop.eup %6997  ;;  %v9137_v22 = vmul.f32 %v5992_v12, %v8952_v38  ;;  %7011 = vrcp.f32 %v3592_v25  ;;  %v3088_v39 = vadd.f32 1.0, %v6996_v47  ;;  %v5996_v1 = vadd.f32 -1.0, %v3212_v17  ;;  %2238 = vmatmul.mubr.bf16.gmra.mrb[152].mxu0 %v8245_v58  ;;  %v7663_v12 = vld [vmem:[%s7948_s29 + $0xf4] ss:$8 sps:$4 sm:$0xff]   ;;  %v9146_v25 = vpop.f32.mrb[16].mxu1 }
 0x187   : > { %12423 = vst [vmem:[#allocation77_spill] sm:$0xff] %v9134_v18  ;;  %v7000_v0 = vpop.eup %6999  ;;  %v9142_v23 = vmul.f32 %v5993_v8, %v8961_v45  ;;  %7013 = vrcp.f32 %v3593_v44  ;;  %v3596_v53 = vadd.f32 1.0, %v3212_v17  ;;  %v3213_v7 = vmul.f32 %v3085_v57, %v3085_v57  ;;  %2247 = vmatprep.mubr.bf16.mxu0 %v7663_v12  ;;  %12426 = vst [vmem:[#allocation80_spill] sm:$0xff] %v9146_v25 }
 0x188   : > { %12424 = vst [vmem:[#allocation78_spill] sm:$0xff] %v9137_v22  ;;  %v7002_v4 = vpop.eup %7001  ;;  %v3216_v18 = vmul.f32 %v3088_v39, %v3088_v39  ;;  %v3089_v3 = vadd.f32 1.0, %v7000_v0  ;;  %7015 = vpow2.f32 %v2918_v16  ;;  %v9149_v38 = vmul.f32 %v5996_v1, %v8964_v11  ;;  %v9160_v1 = vpop.f32.mrb[17].mxu1 }
 0x189   : > { %12425 = vst [vmem:[#allocation79_spill] sm:$0xff] %v9142_v23  ;;  %7017 = vrcp.f32 %v3596_v53  ;;  %v3092_v45 = vadd.f32 1.0, %v7002_v4  ;;  %v9153_v44 = vadd.f32 %v9075_v29, %v8690_v31  ;;  %v5997_v17 = vadd.f32 -1.0, %v3213_v7  ;;  %v9155_v8 = vpop.f32.mrb[48].mxu0  ;;  %12428 = vst [vmem:[#allocation82_spill] sm:$0xff] %v9160_v1 }
 0x18a   : > { %12427 = vst [vmem:[#allocation81_spill] sm:$0xff] %v9149_v38  ;;  %v3597_v36 = vadd.f32 1.0, %v3213_v7  ;;  %v6000_v47 = vadd.f32 -1.0, %v3216_v18  ;;  %v3600_v57 = vadd.f32 1.0, %v3216_v18  ;;  %v7004_v0 = vpop.eup %7003  ;;  %v3217_v16 = vmul.f32 %v3089_v3, %v3089_v3  ;;  %v9158_v11 = vpop.f32.mrb[49].mxu0 }
 0x18b   : > { %v3220_v39 = vmul.f32 %v3092_v45, %v3092_v45  ;;  %7019 = vpow2.f32 %v2924_v41  ;;  %v2725_v12 = vmin.f32 %v9153_v44, 20.0  ;;  %v7006_v53 = vpop.eup %7005  ;;  %v9163_v29 = vmul.f32 %v5997_v17, %v9017_v42  ;;  %v9168_v4 = vpop.f32.mrb[50].mxu0 }
 0x18c   : > { %7021 = vrcp.f32 %v3597_v36  ;;  %v9166_v7 = vmul.f32 %v6000_v47, %v9026_v10  ;;  %v3093_v18 = vadd.f32 1.0, %v7004_v0  ;;  %v9170_v3 = vpop.f32.mrb[18].mxu1  ;;  %v7008_v41 = vpop.eup %7007  ;;  %v6001_v45 = vadd.f32 -1.0, %v3217_v16 }
 0x18d   : > { %12429 = vst [vmem:[#allocation83_spill] sm:$0xff] %v9163_v29  ;;  %12431 = vst [vmem:[#allocation85_spill] sm:$0xff] %v9170_v3  ;;  %7023 = vrcp.f32 %v3600_v57  ;;  %v3601_v58 = vadd.f32 1.0, %v3217_v16  ;;  %v6004_v38 = vadd.f32 -1.0, %v3220_v39  ;;  %v9172_v23 = vpop.f32.mrb[51].mxu0  ;;  %v9174_v22 = vpop.f32.mrb[19].mxu1 }
 0x18e   : > { %12430 = vst [vmem:[#allocation84_spill] sm:$0xff] %v9166_v7  ;;  %12432 = vst [vmem:[#allocation86_spill] sm:$0xff] %v9174_v22  ;;  %v7010_v42 = vpop.eup %7009  ;;  %v3604_v17 = vadd.f32 1.0, %v3220_v39  ;;  %v3221_v36 = vmul.f32 %v3093_v18, %v3093_v18  ;;  %v3096_v29 = vadd.f32 1.0, %v7006_v53  ;;  %v3097_v10 = vadd.f32 1.0, %v7008_v41  ;;  %v9176_v47 = vpop.f32.mrb[20].mxu1  ;;  %2248 = vmatmul.mubr.bf16.gmra.mrb[156].mxu0 %v8269_v13 }
 0x18f   : > { %12433 = vst [vmem:[#allocation87_spill] sm:$0xff] %v9176_v47  ;;  %v9179_v0 = vmul.f32 %v6001_v45, %v9030_v5  ;;  %7025 = vrcp.f32 %v3601_v58  ;;  %v9182_v57 = vmul.f32 %v6004_v38, %v9050_v34  ;;  %v3100_v16 = vadd.f32 1.0, %v7010_v42  ;;  %v9185_v7 = vpop.f32.mrb[21].mxu1  ;;  %v6765_v5 = vld [vmem:[%s12312_s4 + $0x80] ss:$8 sps:$4 sm:$0xff]  }
 0x190   : > { %12436 = vst [vmem:[#allocation90_spill] sm:$0xff] %v9185_v7  ;;  %v9187_v22 = vpop.eup %7011  ;;  %7027 = vrcp.f32 %v3604_v17  ;;  %v6005_v39 = vadd.f32 -1.0, %v3221_v36  ;;  %v3605_v53 = vadd.f32 1.0, %v3221_v36  ;;  %v3224_v18 = vmul.f32 %v3096_v29, %v3096_v29  ;;  %v6767_v58 = vld [vmem:[%s12312_s4 + $0x84] ss:$8 sps:$4 sm:$0xff]  }
 0x191   : > { %12434 = vst [vmem:[#allocation88_spill] sm:$0xff] %v9179_v0  ;;  %12435 = vst [vmem:[#allocation89_spill] sm:$0xff] %v9182_v57  ;;  %v7664_v34 = vld [vmem:[%s7948_s29 + $0x4] ss:$8 sps:$4 sm:$0xff]   ;;  %v9196_v38 = vpop.eup %7013  ;;  %v3225_v41 = vmul.f32 %v3097_v10, %v3097_v10  ;;  %v3228_v45 = vmul.f32 %v3100_v16, %v3100_v16  ;;  %7029 = vpow2.f32 %v9123_v55  ;;  %v2934_v42 = vmul.f32 1.442695, %v2725_v12  ;;  %4528 = vmatprep.subr.bf16.mxu1 %v6767_v58 }
 0x192   : > { %12437 = vst [vmem:[#allocation91_spill] sm:$0xff] %v9187_v22  ;;  %2483 = vmatprep.mubr.bf16.mxu0 %v7664_v34  ;;  %12438 = vst [vmem:[#allocation92_spill] sm:$0xff] %v9196_v38  ;;  %v7016_v17 = vpop.eup %7015  ;;  %v9200_v29 = vmul.f32 %v6005_v39, %v9065_v51  ;;  %7031 = vrcp.f32 %v3605_v53  ;;  %v6008_v36 = vadd.f32 -1.0, %v3224_v18  ;;  %v3608_v13 = vadd.f32 1.0, %v3224_v18  ;;  %v9202_v57 = vpop.f32.mrb[52].mxu0  ;;  %4529 = vmatpush1.bf16.msra.mxu1 %v6765_v5 }
 0x193   : > { %v9204_v0 = vpop.eup %7017  ;;  %v6009_v34 = vadd.f32 -1.0, %v3225_v41  ;;  %v3609_v22 = vadd.f32 1.0, %v3225_v41  ;;  %v6012_v38 = vadd.f32 -1.0, %v3228_v45  ;;  %v3612_v10 = vadd.f32 1.0, %v3228_v45  ;;  %v9206_v16 = vpop.f32.mrb[53].mxu0 }
 0x194   : > { %12439 = vst [vmem:[#allocation93_spill] sm:$0xff] %v9200_v29  ;;  %12440 = vst [vmem:[#allocation94_spill] sm:$0xff] %v9204_v0  ;;  %v9209_v55 = vmul.f32 %v6008_v36, %v9069_v61  ;;  %7033 = vrcp.f32 %v3608_v13  ;;  %v3101_v51 = vadd.f32 1.0, %v7016_v17  ;;  %v9213_v12 = vadd.f32 %v9086_v59, %v8687_v15  ;;  %v9215_v39 = vpop.f32.mrb[54].mxu0 }
 0x195   : > { %v7020_v53 = vpop.eup %7019  ;;  %v9218_v18 = vmul.f32 %v6009_v34, %v9073_v48  ;;  %7035 = vrcp.f32 %v3609_v22  ;;  %v9221_v58 = vmul.f32 %v6012_v38, %v9084_v24  ;;  %v9225_v61 = vadd.f32 %v9093_v14, %v8690_v31  ;;  %v9227_v13 = vpop.f32.mrb[55].mxu0 }
 0x196   : > { %12441 = vst [vmem:[#allocation95_spill] sm:$0xff] %v9209_v55  ;;  %v9229_v5 = vpop.eup %7021  ;;  %7037 = vrcp.f32 %v3612_v10  ;;  %v3229_v59 = vmul.f32 %v3101_v51, %v3101_v51  ;;  %v3104_v41 = vadd.f32 1.0, %v7020_v53  ;;  %v2728_v45 = vmin.f32 %v9213_v12, 20.0 }
 0x197   : > { %12442 = vst [vmem:[#allocation96_spill] sm:$0xff] %v9218_v18  ;;  %12443 = vst [vmem:[#allocation97_spill] sm:$0xff] %v9221_v58  ;;  %v9232_v17 = vpop.eup %7023  ;;  %7039 = vpow2.f32 %v9139_v49  ;;  %v2729_v48 = vmin.f32 %v9225_v61, 20.0  ;;  %v9238_v24 = vadd.f32 %v9119_v35, %v8687_v15  ;;  %v9242_v14 = vadd.f32 %v9125_v26, %v8690_v31 }
 0x198   : > { %12444 = vst [vmem:[#allocation98_spill] sm:$0xff] %v9229_v5  ;;  %12445 = vst [vmem:[#allocation99_spill] sm:$0xff] %v9232_v17  ;;  %v6013_v22 = vadd.f32 -1.0, %v3229_v59  ;;  %v3613_v38 = vadd.f32 1.0, %v3229_v59  ;;  %v3232_v36 = vmul.f32 %v3104_v41, %v3104_v41  ;;  %7041 = vpow2.f32 %v2934_v42 }
 0x199   : > { %v9244_v34 = vpop.eup %7025  ;;  %v2940_v10 = vmul.f32 1.442695, %v2728_v45  ;;  %v2942_v51 = vmul.f32 1.442695, %v2729_v48  ;;  %v2732_v49 = vmin.f32 %v9238_v24, 20.0  ;;  %v2733_v53 = vmin.f32 %v9242_v14, 20.0 }
 0x19a   : > { %12446 = vst [vmem:[#allocation100_spill] sm:$0xff] %v9244_v34  ;;  %v9248_v58 = vpop.eup %7027  ;;  %v9251_v35 = vmul.f32 %v6013_v22, %v9100_v32  ;;  %7043 = vrcp.f32 %v3613_v38  ;;  %v6016_v26 = vadd.f32 -1.0, %v3232_v36  ;;  %v3616_v18 = vadd.f32 1.0, %v3232_v36  ;;  %v9253_v55 = vpop.f32.mrb[56].mxu0 }
 0x19b   : > { %12447 = vst [vmem:[#allocation101_spill] sm:$0xff] %v9248_v58  ;;  %v7030_v59 = vpop.eup %7029  ;;  %7045 = vpow2.f32 %v2940_v10  ;;  %v2948_v42 = vmul.f32 1.442695, %v2732_v49  ;;  %v2950_v41 = vmul.f32 1.442695, %v2733_v53  ;;  %v9257_v45 = vadd.f32 %v9128_v21, %v8687_v15  ;;  %v9259_v48 = vpop.f32.mrb[57].mxu0 }
 0x19c   : > { %12448 = vst [vmem:[#allocation102_spill] sm:$0xff] %v9251_v35  ;;  %v9261_v29 = vpop.eup %7031  ;;  %v9264_v32 = vmul.f32 %v6016_v26, %v9104_v27  ;;  %7047 = vrcp.f32 %v3616_v18  ;;  %v3105_v22 = vadd.f32 1.0, %v7030_v59  ;;  %v9268_v38 = vadd.f32 %v9130_v19, %v8690_v31  ;;  %v9270_v36 = vpop.f32.mrb[58].mxu0 }
 0x19d   : > { %12449 = vst [vmem:[#allocation103_spill] sm:$0xff] %v9261_v29  ;;  %7049 = vpow2.f32 %v2942_v51  ;;  %v2736_v10 = vmin.f32 %v9257_v45, 20.0  ;;  %v9275_v21 = vadd.f32 %v9155_v8, %v8687_v15  ;;  %v9279_v49 = vadd.f32 %v9158_v11, %v8690_v31  ;;  %v9281_v27 = vpop.f32.mrb[59].mxu0 }
 0x19e   : > { %12450 = vst [vmem:[#allocation104_spill] sm:$0xff] %v9264_v32  ;;  %v9283_v18 = vpop.eup %7033  ;;  %v3233_v53 = vmul.f32 %v3105_v22, %v3105_v22  ;;  %7051 = vpow2.f32 %v2948_v42  ;;  %v2737_v19 = vmin.f32 %v9268_v38, 20.0  ;;  %v9288_v51 = vadd.f32 %v9168_v4, %v8687_v15 }
 0x19f   : > { %12451 = vst [vmem:[#allocation105_spill] sm:$0xff] %v9283_v18  ;;  %v9290_v26 = vpop.eup %7035  ;;  %7053 = vpow2.f32 %v2950_v41  ;;  %v2956_v8 = vmul.f32 1.442695, %v2736_v10  ;;  %v2740_v59 = vmin.f32 %v9275_v21, 20.0  ;;  %v2741_v11 = vmin.f32 %v9279_v49, 20.0 }
 0x1a0   : > { %12452 = vst [vmem:[#allocation106_spill] sm:$0xff] %v9290_v26  ;;  %v9294_v32 = vpop.eup %7037  ;;  %v6017_v35 = vadd.f32 -1.0, %v3233_v53  ;;  %v3617_v18 = vadd.f32 1.0, %v3233_v53  ;;  %v2958_v22 = vmul.f32 1.442695, %v2737_v19  ;;  %v2744_v42 = vmin.f32 %v9288_v51, 20.0 }
 0x1a1   : > { %12453 = vst [vmem:[#allocation107_spill] sm:$0xff] %v9294_v32  ;;  %v7040_v29 = vpop.eup %7039  ;;  %7055 = vpow2.f32 %v2956_v8  ;;  %v2964_v58 = vmul.f32 1.442695, %v2740_v59  ;;  %v2966_v4 = vmul.f32 1.442695, %v2741_v11  ;;  %v9299_v26 = vadd.f32 %v9172_v23, %v8690_v31  ;;  %v9304_v17 = vpop.f32.mrb[60].mxu0 }
 0x1a2   : > { %v7042_v41 = vpop.eup %7041  ;;  %v9302_v10 = vmul.f32 %v6017_v35, %v9107_v2  ;;  %7057 = vrcp.f32 %v3617_v18  ;;  %v3108_v34 = vadd.f32 1.0, %v7040_v29  ;;  %v2972_v32 = vmul.f32 1.442695, %v2744_v42  ;;  %v9311_v59 = vpop.f32.mrb[61].mxu0  ;;  %v6770_v18 = vld [vmem:[%s12312_s4 + $0x94] ss:$8 sps:$4 sm:$0xff]  }
 0x1a3   : > { %v3109_v53 = vadd.f32 1.0, %v7042_v41  ;;  %7059 = vpow2.f32 %v2958_v22  ;;  %v2745_v19 = vmin.f32 %v9299_v26, 20.0  ;;  %v9309_v8 = vadd.f32 %v9202_v57, %v8687_v15  ;;  %v9323_v35 = vpop.f32.mrb[62].mxu0  ;;  %v6768_v57 = vld [vmem:[%s12312_s4 + $0x90] ss:$8 sps:$4 sm:$0xff]   ;;  %4530 = vmatprep.subr.bf16.mxu1 %v6770_v18 }
 0x1a4   : > { %12454 = vst [vmem:[#allocation108_spill] sm:$0xff] %v9302_v10  ;;  %v9313_v23 = vpop.eup %7043  ;;  %v3236_v11 = vmul.f32 %v3108_v34, %v3108_v34  ;;  %7061 = vpow2.f32 %v2964_v58  ;;  %v9317_v2 = vadd.f32 %v9206_v16, %v8690_v31  ;;  %v9321_v29 = vadd.f32 %v9215_v39, %v8687_v15  ;;  %v9331_v34 = vpop.f32.mrb[22].mxu1  ;;  %4531 = vmatpush1.bf16.msra.mxu1 %v6768_v57 }
 0x1a5   : > { %12455 = vst [vmem:[#allocation109_spill] sm:$0xff] %v9313_v23  ;;  %12456 = vst [vmem:[#allocation110_spill] sm:$0xff] %v9331_v34  ;;  %v7046_v58 = vpop.eup %7045  ;;  %v3237_v22 = vmul.f32 %v3109_v53, %v3109_v53  ;;  %7063 = vpow2.f32 %v2966_v4  ;;  %v2974_v16 = vmul.f32 1.442695, %v2745_v19  ;;  %v2748_v42 = vmin.f32 %v9309_v8, 20.0  ;;  %v9334_v39 = vpop.f32.mrb[63].mxu0 }
 0x1a6   : > { %v9336_v41 = vpop.eup %7047  ;;  %v6020_v10 = vadd.f32 -1.0, %v3236_v11  ;;  %v3620_v23 = vadd.f32 1.0, %v3236_v11  ;;  %v3112_v5 = vadd.f32 1.0, %v7046_v58  ;;  %7065 = vpow2.f32 %v2972_v32  ;;  %v9338_v53 = vpop.f32.mrb[23].mxu1 }
 0x1a7   : > { %12457 = vst [vmem:[#allocation111_spill] sm:$0xff] %v9336_v41  ;;  %v7050_v0 = vpop.eup %7049  ;;  %v6021_v7 = vadd.f32 -1.0, %v3237_v22  ;;  %v3621_v47 = vadd.f32 1.0, %v3237_v22  ;;  %7067 = vpow2.f32 %v2974_v16  ;;  %v2980_v34 = vmul.f32 1.442695, %v2748_v42  ;;  %12458 = vst [vmem:[#allocation112_spill] sm:$0xff] %v9338_v53 }
 0x1a8   : > { %v7052_v4 = vpop.eup %7051  ;;  %v9341_v19 = vmul.f32 %v6020_v10, %v9115_v6  ;;  %7069 = vrcp.f32 %v3620_v23  ;;  %v3240_v3 = vmul.f32 %v3112_v5, %v3112_v5  ;;  %v3113_v41 = vadd.f32 1.0, %v7050_v0  ;;  %v9349_v53 = vpop.f32.mrb[24].mxu1 }
 0x1a9   : > { %v7054_v1 = vpop.eup %7053  ;;  %v9344_v11 = vmul.f32 %v6021_v7, %v9153_v44  ;;  %7071 = vrcp.f32 %v3621_v47  ;;  %v3116_v32 = vadd.f32 1.0, %v7052_v4  ;;  %v2749_v18 = vmin.f32 %v9317_v2, 20.0  ;;  %v9347_v42 = vpop.f32.mrb[64].mxu0  ;;  %12461 = vst [vmem:[#allocation115_spill] sm:$0xff] %v9349_v53 }
 0x1aa   : > { %12459 = vst [vmem:[#allocation113_spill] sm:$0xff] %v9341_v19  ;;  %v6024_v58 = vadd.f32 -1.0, %v3240_v3  ;;  %v3624_v22 = vadd.f32 1.0, %v3240_v3  ;;  %v3241_v57 = vmul.f32 %v3113_v41, %v3113_v41  ;;  %v3117_v16 = vadd.f32 1.0, %v7054_v1  ;;  %v9354_v7 = vpop.f32.mrb[65].mxu0  ;;  %v9363_v41 = vpop.f32.mrb[25].mxu1 }
 0x1ab   : > { %12460 = vst [vmem:[#allocation114_spill] sm:$0xff] %v9344_v11  ;;  %v7056_v6 = vpop.eup %7055  ;;  %v3244_v10 = vmul.f32 %v3116_v32, %v3116_v32  ;;  %7073 = vpow2.f32 %v2980_v34  ;;  %v9351_v0 = vmul.f32 1.442695, %v2749_v18  ;;  %v2752_v44 = vmin.f32 %v9321_v29, 20.0  ;;  %v9361_v23 = vpop.f32.mrb[66].mxu0  ;;  %12464 = vst [vmem:[#allocation118_spill] sm:$0xff] %v9363_v41 }
 0x1ac   : > { %v9356_v47 = vpop.eup %7057  ;;  %v9359_v5 = vmul.f32 %v6024_v58, %v9213_v12  ;;  %7075 = vrcp.f32 %v3624_v22  ;;  %v6025_v1 = vadd.f32 -1.0, %v3241_v57  ;;  %v3625_v3 = vadd.f32 1.0, %v3241_v57  ;;  %v9365_v19 = vpop.f32.mrb[67].mxu0 }
 0x1ad   : > { %12462 = vst [vmem:[#allocation116_spill] sm:$0xff] %v9356_v47  ;;  %v7060_v4 = vpop.eup %7059  ;;  %v6028_v34 = vadd.f32 -1.0, %v3244_v10  ;;  %v3628_v32 = vadd.f32 1.0, %v3244_v10  ;;  %v3245_v18 = vmul.f32 %v3117_v16, %v3117_v16  ;;  %v3120_v11 = vadd.f32 1.0, %v7056_v6  ;;  %v9367_v53 = vpop.f32.mrb[26].mxu1 }
 0x1ae   : > { %12463 = vst [vmem:[#allocation117_spill] sm:$0xff] %v9359_v5  ;;  %12465 = vst [vmem:[#allocation119_spill] sm:$0xff] %v9367_v53  ;;  %v7062_v47 = vpop.eup %7061  ;;  %v9370_v12 = vmul.f32 %v6025_v1, %v9225_v61  ;;  %7077 = vrcp.f32 %v3625_v3  ;;  %v3121_v58 = vadd.f32 1.0, %v7060_v4  ;;  %v9372_v22 = vmul.f32 1.442695, %v2752_v44  ;;  %v9374_v57 = vpop.f32.mrb[27].mxu1 }
 0x1af   : > { %12467 = vst [vmem:[#allocation121_spill] sm:$0xff] %v9374_v57  ;;  %v7064_v5 = vpop.eup %7063  ;;  %v9377_v41 = vmul.f32 %v6028_v34, %v9238_v24  ;;  %7079 = vrcp.f32 %v3628_v32  ;;  %v6029_v16 = vadd.f32 -1.0, %v3245_v18  ;;  %v3629_v6 = vadd.f32 1.0, %v3245_v18  ;;  %v9379_v10 = vpop.f32.mrb[28].mxu1 }
 0x1b0   : > { %12466 = vst [vmem:[#allocation120_spill] sm:$0xff] %v9370_v12  ;;  %12469 = vst [vmem:[#allocation123_spill] sm:$0xff] %v9379_v10  ;;  %v7066_v53 = vpop.eup %7065  ;;  %v3248_v25 = vmul.f32 %v3120_v11, %v3120_v11  ;;  %v3249_v62 = vmul.f32 %v3121_v58, %v3121_v58  ;;  %v3124_v61 = vadd.f32 1.0, %v7062_v47  ;;  %v3125_v1 = vadd.f32 1.0, %v7064_v5  ;;  %v9381_v3 = vpop.f32.mrb[29].mxu1 }
 0x1b1   : > { %12468 = vst [vmem:[#allocation122_spill] sm:$0xff] %v9377_v41  ;;  %12470 = vst [vmem:[#allocation124_spill] sm:$0xff] %v9381_v3  ;;  %v7068_v44 = vpop.eup %7067  ;;  %v9384_v4 = vmul.f32 %v6029_v16, %v9242_v14  ;;  %7081 = vrcp.f32 %v3629_v6  ;;  %v3128_v12 = vadd.f32 1.0, %v7066_v53  ;;  %v9388_v24 = vadd.f32 %v9227_v13, %v8690_v31  ;;  %v9392_v47 = vpop.f32.mrb[68].mxu0 }
 0x1b2   : > { %v9390_v34 = vpop.eup %7069  ;;  %v6032_v32 = vadd.f32 -1.0, %v3248_v25  ;;  %v3632_v18 = vadd.f32 1.0, %v3248_v25  ;;  %v6033_v11 = vadd.f32 -1.0, %v3249_v62  ;;  %v3633_v58 = vadd.f32 1.0, %v3249_v62  ;;  %v9396_v6 = vpop.f32.mrb[69].mxu0 }
 0x1b3   : > { %12471 = vst [vmem:[#allocation125_spill] sm:$0xff] %v9384_v4  ;;  %12472 = vst [vmem:[#allocation126_spill] sm:$0xff] %v9390_v34  ;;  %v9394_v5 = vpop.eup %7071  ;;  %v3252_v41 = vmul.f32 %v3124_v61, %v3124_v61  ;;  %v3253_v3 = vmul.f32 %v3125_v1, %v3125_v1  ;;  %v3256_v14 = vmul.f32 %v3128_v12, %v3128_v12  ;;  %v3129_v16 = vadd.f32 1.0, %v7068_v44  ;;  %v9405_v62 = vpop.f32.mrb[70].mxu0 }
 0x1b4   : > { %12473 = vst [vmem:[#allocation127_spill] sm:$0xff] %v9394_v5  ;;  %v9399_v53 = vmul.f32 %v6032_v32, %v9257_v45  ;;  %7083 = vrcp.f32 %v3632_v18  ;;  %v9402_v13 = vmul.f32 %v6033_v11, %v9268_v38  ;;  %v2753_v25 = vmin.f32 %v9388_v24, 20.0  ;;  %v9407_v12 = vpop.f32.mrb[71].mxu0 }
 0x1b5   : > { %v7074_v4 = vpop.eup %7073  ;;  %7085 = vrcp.f32 %v3633_v58  ;;  %v6036_v5 = vadd.f32 -1.0, %v3252_v41  ;;  %v3636_v61 = vadd.f32 1.0, %v3252_v41  ;;  %v6037_v1 = vadd.f32 -1.0, %v3253_v3 }
 0x1b6   : > { %12474 = vst [vmem:[#allocation128_spill] sm:$0xff] %v9399_v53  ;;  %12475 = vst [vmem:[#allocation129_spill] sm:$0xff] %v9402_v13  ;;  %v9409_v44 = vpop.eup %7075  ;;  %v3637_v34 = vadd.f32 1.0, %v3253_v3  ;;  %v6040_v45 = vadd.f32 -1.0, %v3256_v14  ;;  %v3640_v32 = vadd.f32 1.0, %v3256_v14  ;;  %v3257_v18 = vmul.f32 %v3129_v16, %v3129_v16 }
 0x1b7   : > { %12476 = vst [vmem:[#allocation130_spill] sm:$0xff] %v9409_v44  ;;  %v9412_v38 = vmul.f32 %v6036_v5, %v9275_v21  ;;  %7087 = vrcp.f32 %v3636_v61  ;;  %v9415_v11 = vmul.f32 %v6037_v1, %v9279_v49  ;;  %v3132_v13 = vadd.f32 1.0, %v7074_v4 }
 0x1b8   : > { %v9417_v58 = vpop.eup %7077  ;;  %7089 = vrcp.f32 %v3637_v34  ;;  %v9420_v41 = vmul.f32 %v6040_v45, %v9288_v51  ;;  %v6041_v53 = vadd.f32 -1.0, %v3257_v18  ;;  %v3641_v44 = vadd.f32 1.0, %v3257_v18 }
 0x1b9   : > { %12477 = vst [vmem:[#allocation131_spill] sm:$0xff] %v9412_v38  ;;  %12478 = vst [vmem:[#allocation132_spill] sm:$0xff] %v9415_v11  ;;  %v9422_v3 = vpop.eup %7079  ;;  %7091 = vrcp.f32 %v3640_v32  ;;  %v3260_v14 = vmul.f32 %v3132_v13, %v3132_v13  ;;  %v2990_v16 = vmul.f32 1.442695, %v2753_v25  ;;  %v9426_v21 = vadd.f32 %v9253_v55, %v8687_v15  ;;  %v9439_v34 = vpop.f32.mrb[72].mxu0 }
 0x1ba   : > { %12479 = vst [vmem:[#allocation133_spill] sm:$0xff] %v9417_v58  ;;  %12480 = vst [vmem:[#allocation134_spill] sm:$0xff] %v9420_v41  ;;  %v9429_v49 = vmul.f32 %v6041_v53, %v9299_v26  ;;  %7093 = vrcp.f32 %v3641_v44  ;;  %v9433_v4 = vadd.f32 %v9259_v48, %v8690_v31  ;;  %v9437_v51 = vadd.f32 %v9270_v36, %v8687_v15  ;;  %v9445_v26 = vpop.f32.mrb[73].mxu0 }
 0x1bb   : > { %12481 = vst [vmem:[#allocation135_spill] sm:$0xff] %v9422_v3  ;;  %v9441_v5 = vpop.eup %7081  ;;  %v6044_v13 = vadd.f32 -1.0, %v3260_v14  ;;  %v3644_v25 = vadd.f32 1.0, %v3260_v14  ;;  %7095 = vpow2.f32 %v9351_v0  ;;  %v2756_v55 = vmin.f32 %v9426_v21, 20.0  ;;  %v9454_v61 = vpop.f32.mrb[74].mxu0 }
 0x1bc   : > { %12482 = vst [vmem:[#allocation136_spill] sm:$0xff] %v9429_v49  ;;  %12483 = vst [vmem:[#allocation137_spill] sm:$0xff] %v9441_v5  ;;  %7097 = vpow2.f32 %v9372_v22  ;;  %v2757_v48 = vmin.f32 %v9433_v4, 20.0  ;;  %v2760_v53 = vmin.f32 %v9437_v51, 20.0  ;;  %v9452_v36 = vadd.f32 %v9281_v27, %v8690_v31  ;;  %v9463_v22 = vpop.f32.mrb[75].mxu0 }
 0x1bd   : > { %v9457_v1 = vmul.f32 %v6044_v13, %v9309_v8  ;;  %7099 = vrcp.f32 %v3644_v25  ;;  %v2996_v0 = vmul.f32 1.442695, %v2756_v55  ;;  %v9461_v44 = vadd.f32 %v9304_v17, %v8687_v15 }
 0x1be   : > { %v9465_v45 = vpop.eup %7083  ;;  %7101 = vpow2.f32 %v2990_v16  ;;  %v2998_v32 = vmul.f32 1.442695, %v2757_v48  ;;  %v3004_v18 = vmul.f32 1.442695, %v2760_v53  ;;  %v2761_v27 = vmin.f32 %v9452_v36, 20.0  ;;  %v9484_v48 = vpop.f32.mrb[30].mxu1 }
 0x1bf   : > { %12484 = vst [vmem:[#allocation138_spill] sm:$0xff] %v9457_v1  ;;  %12485 = vst [vmem:[#allocation139_spill] sm:$0xff] %v9465_v45  ;;  %v9468_v14 = vpop.eup %7085  ;;  %7103 = vpow2.f32 %v2996_v0  ;;  %v2764_v8 = vmin.f32 %v9461_v44, 20.0  ;;  %v9473_v13 = vadd.f32 %v9311_v59, %v8690_v31  ;;  %v9477_v17 = vadd.f32 %v9323_v35, %v8687_v15 }
 0x1c0   : > { %12486 = vst [vmem:[#allocation140_spill] sm:$0xff] %v9468_v14  ;;  %7105 = vpow2.f32 %v2998_v32  ;;  %v3006_v25 = vmul.f32 1.442695, %v2761_v27  ;;  %v9481_v16 = vadd.f32 %v9334_v39, %v8690_v31  ;;  %v839_v55 = vsub.s32 2, %v8665_v33  ;;  %12487 = vst [vmem:[#allocation141_spill] sm:$0xff] %v9484_v48  ;;  %v7665_v31 = vld [vmem:[%s12311_s3] sm:$0xff] }
 0x1c1   : > { %v9486_v53 = vpop.eup %7087  ;;  %7107 = vpow2.f32 %v3004_v18  ;;  %v3012_v0 = vmul.f32 1.442695, %v2764_v8  ;;  %v2765_v59 = vmin.f32 %v9473_v13, 20.0  ;;  %v2768_v1 = vmin.f32 %v9477_v17, 20.0  ;;  %v9499_v27 = vpop.f32.mrb[76].mxu0 }
 0x1c2   : > { %12488 = vst [vmem:[#allocation142_spill] sm:$0xff] %v9486_v53  ;;  %v9490_v15 = vpop.eup %7089  ;;  %7109 = vpow2.f32 %v3006_v25  ;;  %v2769_v35 = vmin.f32 %v9481_v16, 20.0  ;;  %v9496_v39 = vrot.slane %v7665_v31, %v839_v55  ;;  %v843_v32 = vsub.s32 3, %v8665_v33  ;;  %v6773_v18 = vld [vmem:[%s12312_s4 + $0xa4] ss:$8 sps:$4 sm:$0xff]   ;;  %v9506_v41 = vpop.f32.mrb[77].mxu0 }
 0x1c3   : > { %12489 = vst [vmem:[#allocation143_spill] sm:$0xff] %v9490_v15  ;;  %v9504_v8 = vpop.eup %7091  ;;  %7111 = vpow2.f32 %v3012_v0  ;;  %v3014_v25 = vmul.f32 1.442695, %v2765_v59  ;;  %v3020_v49 = vmul.f32 1.442695, %v2768_v1  ;;  %v9510_v15 = vmul.f32 %v8790_v50, %v8766_v20  ;;  %v9524_v1 = vpop.f32.mrb[78].mxu0  ;;  %4532 = vmatprep.subr.bf16.mxu1 %v6773_v18 }
 0x1c4   : > { %12490 = vst [vmem:[#allocation144_spill] sm:$0xff] %v9504_v8  ;;  %v9512_v55 = vpop.eup %7093  ;;  %v3022_v11 = vmul.f32 1.442695, %v2769_v35  ;;  %v9516_v53 = vadd.f32 %v9347_v42, %v9496_v39  ;;  %v9518_v38 = vrot.slane %v7665_v31, %v843_v32  ;;  %v9522_v0 = vadd.f32 %v9361_v23, %v9496_v39  ;;  %v6771_v20 = vld [vmem:[%s12312_s4 + $0xa0] ss:$8 sps:$4 sm:$0xff]   ;;  %v9541_v35 = vpop.f32.mrb[79].mxu0 }
 0x1c5   : > { %12491 = vst [vmem:[#allocation145_spill] sm:$0xff] %v9510_v15  ;;  %12492 = vst [vmem:[#allocation146_spill] sm:$0xff] %v9512_v55  ;;  %v7096_v50 = vpop.eup %7095  ;;  %7113 = vpow2.f32 %v3014_v25  ;;  %v9531_v59 = vadd.f32 %v8854_v37, %v9496_v39  ;;  %v9535_v42 = vadd.f32 %v8872_v54, %v9496_v39  ;;  %v9539_v23 = vadd.f32 %v8904_v28, %v9496_v39  ;;  %v9552_v8 = vpop.f32.mrb[31].mxu1 }
 0x1c6   : > { %12493 = vst [vmem:[#allocation147_spill] sm:$0xff] %v9541_v35  ;;  %v7098_v31 = vpop.eup %7097  ;;  %v3133_v32 = vadd.f32 1.0, %v7096_v50  ;;  %7115 = vpow2.f32 %v3020_v49  ;;  %v2646_v18 = vmin.f32 %v9516_v53, 20.0  ;;  %v9546_v25 = vadd.f32 %v9354_v7, %v9518_v38  ;;  %4533 = vmatpush1.bf16.msra.mxu1 %v6771_v20  ;;  %12495 = vst [vmem:[#allocation149_spill] sm:$0xff] %v9552_v8  ;;  %v9575_v35 = vpop.f32.mrb[32].mxu1 }
 0x1c7   : > { %v9548_v37 = vpop.eup %7099  ;;  %v3136_v54 = vadd.f32 1.0, %v7098_v31  ;;  %7117 = vpow2.f32 %v3022_v11  ;;  %v2650_v55 = vmin.f32 %v9522_v0, 20.0  ;;  %v2710_v28 = vmin.f32 %v9531_v59, 20.0 }
 0x1c8   : > { %12494 = vst [vmem:[#allocation148_spill] sm:$0xff] %v9548_v37  ;;  %v7102_v14 = vpop.eup %7101  ;;  %v3261_v50 = vmul.f32 %v3133_v32, %v3133_v32  ;;  %v2776_v49 = vmul.f32 1.442695, %v2646_v18  ;;  %v9557_v7 = vadd.f32 %v9365_v19, %v9518_v38 }
 0x1c9   : > { %v7104_v20 = vpop.eup %7103  ;;  %v3264_v5 = vmul.f32 %v3136_v54, %v3136_v54  ;;  %v3137_v37 = vadd.f32 1.0, %v7102_v14  ;;  %v9559_v31 = vmul.f32 1.442695, %v2650_v55  ;;  %v9561_v11 = vmul.f32 1.442695, %v2710_v28  ;;  %v9563_v32 = vpop.f32.mrb[80].mxu0 }
 0x1ca   : > { %v7106_v3 = vpop.eup %7105  ;;  %v6045_v58 = vadd.f32 -1.0, %v3261_v50  ;;  %v3645_v15 = vadd.f32 1.0, %v3261_v50  ;;  %v3140_v33 = vadd.f32 1.0, %v7104_v20  ;;  %7119 = vpow2.f32 %v2776_v49  ;;  %12496 = vst [vmem:[#allocation150_spill] sm:$0xff] %v9563_v32  ;;  %v9565_v10 = vpop.f32.mrb[81].mxu0 }
 0x1cb   : > { %v7108_v18 = vpop.eup %7107  ;;  %v6048_v45 = vadd.f32 -1.0, %v3264_v5  ;;  %v3648_v8 = vadd.f32 1.0, %v3264_v5  ;;  %v3265_v48 = vmul.f32 %v3137_v37, %v3137_v37  ;;  %v3141_v19 = vadd.f32 1.0, %v7106_v3  ;;  %12497 = vst [vmem:[#allocation151_spill] sm:$0xff] %v9565_v10  ;;  %v9570_v57 = vpop.f32.mrb[82].mxu0 }
 0x1cc   : > { %v7110_v54 = vpop.eup %7109  ;;  %v9568_v14 = vmul.f32 %v6045_v58, %v9317_v2  ;;  %7121 = vrcp.f32 %v3645_v15  ;;  %v3268_v55 = vmul.f32 %v3140_v33, %v3140_v33  ;;  %v3144_v28 = vadd.f32 1.0, %v7108_v18  ;;  %v9580_v18 = vpop.f32.mrb[83].mxu0 }
 0x1cd   : > { %v7112_v50 = vpop.eup %7111  ;;  %v9573_v49 = vmul.f32 %v6048_v45, %v9321_v29  ;;  %7123 = vrcp.f32 %v3648_v8  ;;  %v6049_v20 = vadd.f32 -1.0, %v3265_v48  ;;  %v3649_v5 = vadd.f32 1.0, %v3265_v48 }
 0x1ce   : > { %12498 = vst [vmem:[#allocation152_spill] sm:$0xff] %v9568_v14  ;;  %v6052_v37 = vadd.f32 -1.0, %v3268_v55  ;;  %v3652_v3 = vadd.f32 1.0, %v3268_v55  ;;  %v3269_v32 = vmul.f32 %v3141_v19, %v3141_v19  ;;  %v3272_v10 = vmul.f32 %v3144_v28, %v3144_v28  ;;  %v9585_v19 = vpop.f32.mrb[33].mxu1 }
 0x1cf   : > { %12499 = vst [vmem:[#allocation153_spill] sm:$0xff] %v9573_v49  ;;  %v7114_v2 = vpop.eup %7113  ;;  %v9578_v58 = vmul.f32 %v6049_v20, %v9388_v24  ;;  %7125 = vrcp.f32 %v3649_v5  ;;  %v3145_v33 = vadd.f32 1.0, %v7110_v54  ;;  %v3148_v15 = vadd.f32 1.0, %v7112_v50  ;;  %12502 = vst [vmem:[#allocation156_spill] sm:$0xff] %v9585_v19  ;;  %v9587_v20 = vpop.f32.mrb[34].mxu1 }
 0x1d0   : > { %v7116_v29 = vpop.eup %7115  ;;  %v9583_v45 = vmul.f32 %v6052_v37, %v9426_v21  ;;  %7127 = vrcp.f32 %v3652_v3  ;;  %v6053_v48 = vadd.f32 -1.0, %v3269_v32  ;;  %v3653_v8 = vadd.f32 1.0, %v3269_v32  ;;  %v9592_v21 = vpop.f32.mrb[35].mxu1 }
 0x1d1   : > { %12500 = vst [vmem:[#allocation154_spill] sm:$0xff] %v9578_v58  ;;  %v7118_v55 = vpop.eup %7117  ;;  %v6056_v28 = vadd.f32 -1.0, %v3272_v10  ;;  %v3656_v49 = vadd.f32 1.0, %v3272_v10  ;;  %v3273_v14 = vmul.f32 %v3145_v33, %v3145_v33  ;;  %v3276_v24 = vmul.f32 %v3148_v15, %v3148_v15 }
 0x1d2   : > { %12501 = vst [vmem:[#allocation155_spill] sm:$0xff] %v9583_v45  ;;  %v9590_v54 = vmul.f32 %v6053_v48, %v9433_v4  ;;  %7129 = vrcp.f32 %v3653_v8  ;;  %v3149_v50 = vadd.f32 1.0, %v7114_v2  ;;  %v3152_v5 = vadd.f32 1.0, %v7116_v29  ;;  %v9600_v29 = vpop.f32.mrb[84].mxu0 }
 0x1d3   : > { %v9595_v37 = vmul.f32 %v6056_v28, %v9437_v51  ;;  %7131 = vrcp.f32 %v3656_v49  ;;  %v6057_v32 = vadd.f32 -1.0, %v3273_v14  ;;  %v3657_v3 = vadd.f32 1.0, %v3273_v14  ;;  %v9607_v8 = vpop.f32.mrb[85].mxu0 }
 0x1d4   : > { %12503 = vst [vmem:[#allocation157_spill] sm:$0xff] %v9590_v54  ;;  %v7120_v45 = vpop.eup %7119  ;;  %v6060_v10 = vadd.f32 -1.0, %v3276_v24  ;;  %v3660_v33 = vadd.f32 1.0, %v3276_v24  ;;  %v3277_v15 = vmul.f32 %v3149_v50, %v3149_v50  ;;  %v3280_v58 = vmul.f32 %v3152_v5, %v3152_v5 }
 0x1d5   : > { %12504 = vst [vmem:[#allocation158_spill] sm:$0xff] %v9595_v37  ;;  %v9598_v19 = vmul.f32 %v6057_v32, %v9452_v36  ;;  %7133 = vrcp.f32 %v3657_v3  ;;  %v3153_v4 = vadd.f32 1.0, %v7118_v55  ;;  %v3030_v2 = vadd.f32 1.0, %v7120_v45  ;;  %v9611_v55 = vpop.f32.mrb[86].mxu0  ;;  %v9613_v45 = vpop.f32.mrb[36].mxu1 }
 0x1d6   : > { %v9602_v48 = vpop.eup %7121  ;;  %v9605_v51 = vmul.f32 %v6060_v10, %v9461_v44  ;;  %7135 = vrcp.f32 %v3660_v33  ;;  %v6061_v14 = vadd.f32 -1.0, %v3277_v15  ;;  %v3661_v49 = vadd.f32 1.0, %v3277_v15  ;;  %v9621_v33 = vpop.f32.mrb[87].mxu0 }
 0x1d7   : > { %12505 = vst [vmem:[#allocation159_spill] sm:$0xff] %v9598_v19  ;;  %12506 = vst [vmem:[#allocation160_spill] sm:$0xff] %v9602_v48  ;;  %v9609_v28 = vpop.eup %7123  ;;  %v6064_v24 = vadd.f32 -1.0, %v3280_v58  ;;  %v3664_v36 = vadd.f32 1.0, %v3280_v58  ;;  %v3281_v50 = vmul.f32 %v3153_v4, %v3153_v4  ;;  %v3158_v5 = vmul.f32 %v3030_v2, %v3030_v2  ;;  %v9623_v15 = vpop.f32.mrb[37].mxu1 }
 0x1d8   : > { %12507 = vst [vmem:[#allocation161_spill] sm:$0xff] %v9605_v51  ;;  %12508 = vst [vmem:[#allocation162_spill] sm:$0xff] %v9609_v28  ;;  %v9616_v32 = vmul.f32 %v6061_v14, %v9473_v13  ;;  %7137 = vrcp.f32 %v3661_v49  ;;  %v12510_v44 = vmin.f32 %v9546_v25, 20.0  ;;  %v2651_v10 = vmin.f32 %v9557_v7, 20.0  ;;  %v9630_v13 = vpop.f32.mrb[38].mxu1 }
 0x1d9   : > { %12511 = vst [vmem:[#allocation164_spill] sm:$0xff] %v9621_v33  ;;  %12512 = vst [vmem:[#allocation165_spill] sm:$0xff] %v9623_v15  ;;  %v9625_v58 = vpop.eup %7125  ;;  %v9628_v4 = vmul.f32 %v6064_v24, %v9477_v17  ;;  %7139 = vrcp.f32 %v3664_v36  ;;  %v6065_v2 = vadd.f32 -1.0, %v3281_v50  ;;  %v3665_v51 = vadd.f32 1.0, %v3281_v50  ;;  %v9642_v24 = vpop.f32.mrb[39].mxu1 }
 0x1da   : > { %12509 = vst [vmem:[#allocation163_spill] sm:$0xff] %v9616_v32  ;;  %v2778_v3 = vmul.f32 1.442695, %v12510_v44  ;;  %12513 = vst [vmem:[#allocation166_spill] sm:$0xff] %v9625_v58  ;;  %v9632_v14 = vpop.eup %7127  ;;  %v5942_v49 = vadd.f32 -1.0, %v3158_v5  ;;  %v3542_v44 = vadd.f32 1.0, %v3158_v5  ;;  %v9639_v37 = vadd.f32 %v8867_v30, %v9518_v38 }
 0x1db   : > { %12514 = vst [vmem:[#allocation167_spill] sm:$0xff] %v9628_v4  ;;  %12515 = vst [vmem:[#allocation168_spill] sm:$0xff] %v9630_v13  ;;  %v2786_v32 = vmul.f32 1.442695, %v2651_v10  ;;  %v9635_v19 = vmul.f32 %v6065_v2, %v9481_v16  ;;  %v2714_v17 = vmin.f32 %v9535_v42, 20.0  ;;  %v9651_v5 = vadd.f32 %v8883_v40, %v9518_v38 }
 0x1dc   : > { %12516 = vst [vmem:[#allocation169_spill] sm:$0xff] %v9632_v14  ;;  %7141 = vpow2.f32 %v2778_v3  ;;  %12518 = vst [vmem:[#allocation171_spill] sm:$0xff] %v9642_v24  ;;  %v9644_v36 = vpop.eup %7129  ;;  %v9647_v50 = vmul.f32 %v5942_v49, %v9516_v53  ;;  %v2718_v16 = vmin.f32 %v9539_v23, 20.0  ;;  %v2711_v30 = vmin.f32 %v9639_v37, 20.0 }
 0x1dd   : > { %12517 = vst [vmem:[#allocation170_spill] sm:$0xff] %v9635_v19  ;;  %7143 = vrcp.f32 %v3665_v51  ;;  %12519 = vst [vmem:[#allocation172_spill] sm:$0xff] %v9644_v36  ;;  %v9654_v51 = vpop.eup %7131  ;;  %v2912_v3 = vmul.f32 1.442695, %v2714_v17  ;;  %v9660_v10 = vadd.f32 %v8914_v43, %v9518_v38  ;;  %v2715_v53 = vmin.f32 %v9651_v5, 20.0 }
 0x1de   : > { %7145 = vrcp.f32 %v3542_v44  ;;  %12520 = vst [vmem:[#allocation173_spill] sm:$0xff] %v9654_v51  ;;  %v2920_v2 = vmul.f32 1.442695, %v2718_v16  ;;  %v9666_v40 = vadd.f32 %v9392_v47, %v9496_v39  ;;  %v9673_v17 = vadd.f32 %v8922_v63, %v9496_v39 }
 0x1df   : > { %7147 = vpow2.f32 %v9559_v31  ;;  %v9668_v49 = vpop.eup %7133  ;;  %v2906_v31 = vmul.f32 1.442695, %v2711_v30  ;;  %v2719_v44 = vmin.f32 %v9660_v10, 20.0  ;;  %v9680_v47 = vadd.f32 %v9396_v6, %v9518_v38  ;;  %v6776_v6 = vld [vmem:[%s12312_s4 + $0xb4] ss:$8 sps:$4 sm:$0xff]  }
 0x1e0   : > { %7149 = vpow2.f32 %v9561_v11  ;;  %12521 = vst [vmem:[#allocation174_spill] sm:$0xff] %v9668_v49  ;;  %v9675_v43 = vpop.eup %7135  ;;  %v2914_v11 = vmul.f32 1.442695, %v2715_v53  ;;  %v2654_v16 = vmin.f32 %v9666_v40, 20.0  ;;  %v9685_v30 = vadd.f32 %v8940_v52, %v9518_v38  ;;  %4534 = vmatprep.subr.bf16.mxu1 %v6776_v6  ;;  %v6779_v6 = vld [vmem:[%s12312_s4 + $0xc4] ss:$8 sps:$4 sm:$0xff]  }
 0x1e1   : > { %7151 = vpow2.f32 %v2786_v32  ;;  %12522 = vst [vmem:[#allocation175_spill] sm:$0xff] %v9675_v43  ;;  %v2922_v19 = vmul.f32 1.442695, %v2719_v44  ;;  %v2722_v32 = vmin.f32 %v9673_v17, 20.0  ;;  %v9692_v53 = vadd.f32 %v9405_v62, %v9496_v39  ;;  %v6774_v62 = vld [vmem:[%s12312_s4 + $0xb0] ss:$8 sps:$4 sm:$0xff]  }
 0x1e2   : > { %7153 = vpow2.f32 %v2912_v3  ;;  %v9687_v63 = vpop.eup %7137  ;;  %v2792_v4 = vmul.f32 1.442695, %v2654_v16  ;;  %v2655_v3 = vmin.f32 %v9680_v47, 20.0  ;;  %4535 = vmatpush1.bf16.msra.mxu1 %v6774_v62 }
 0x1e3   : > { %7155 = vpow2.f32 %v2906_v31  ;;  %12523 = vst [vmem:[#allocation176_spill] sm:$0xff] %v9687_v63  ;;  %v9697_v31 = vpop.f32.mrb[88].mxu0  ;;  %v9699_v44 = vpop.eup %7139  ;;  %v2928_v52 = vmul.f32 1.442695, %v2722_v32  ;;  %v2723_v63 = vmin.f32 %v9685_v30, 20.0  ;;  %v2658_v51 = vmin.f32 %v9692_v53, 20.0  ;;  %4536 = vmatprep.subr.bf16.mxu1 %v6779_v6 }
 0x1e4   : > { %7157 = vpow2.f32 %v2914_v11  ;;  %12524 = vst [vmem:[#allocation177_spill] sm:$0xff] %v9697_v31  ;;  %12525 = vst [vmem:[#allocation178_spill] sm:$0xff] %v9699_v44  ;;  %v9704_v11 = vadd.f32 %v8955_v9, %v9496_v39  ;;  %v9709_v16 = vpop.f32.mrb[89].mxu0  ;;  %v2794_v49 = vmul.f32 1.442695, %v2655_v3 }
 0x1e5   : > { %7159 = vpow2.f32 %v2920_v2  ;;  %12526 = vst [vmem:[#allocation179_spill] sm:$0xff] %v9709_v16  ;;  %v9714_v2 = vadd.f32 %v9407_v12, %v9518_v38  ;;  %v9716_v32 = vpop.f32.mrb[90].mxu0  ;;  %v2930_v36 = vmul.f32 1.442695, %v2723_v63  ;;  %v9726_v12 = vadd.f32 %v9032_v56, %v9518_v38 }
 0x1e6   : > { %v7142_v43 = vpop.eup %7141  ;;  %7161 = vpow2.f32 %v2922_v19  ;;  %12527 = vst [vmem:[#allocation180_spill] sm:$0xff] %v9716_v32  ;;  %v2726_v54 = vmin.f32 %v9704_v11, 20.0  ;;  %v2800_v19 = vmul.f32 1.442695, %v2658_v51  ;;  %v6777_v51 = vld [vmem:[%s12312_s4 + $0xc0] ss:$8 sps:$4 sm:$0xff]  }
 0x1e7   : > { %v9718_v9 = vpop.eup %7143  ;;  %v3031_v44 = vadd.f32 1.0, %v7142_v43  ;;  %7163 = vpow2.f32 %v2792_v4  ;;  %v2659_v3 = vmin.f32 %v9714_v2, 20.0  ;;  %v9731_v43 = vpop.f32.mrb[40].mxu1  ;;  %v2727_v28 = vmin.f32 %v9726_v12, 20.0  ;;  %4537 = vmatpush1.bf16.msra.mxu1 %v6777_v51 }
 0x1e8   : > { %12528 = vst [vmem:[#allocation181_spill] sm:$0xff] %v9718_v9  ;;  %v9721_v14 = vpop.eup %7145  ;;  %7165 = vpow2.f32 %v2928_v52  ;;  %12529 = vst [vmem:[#allocation182_spill] sm:$0xff] %v9731_v43  ;;  %v2936_v62 = vmul.f32 1.442695, %v2726_v54  ;;  %v9735_v52 = vadd.f32 %v9037_v60, %v9496_v39  ;;  %v9743_v60 = vpop.f32.mrb[91].mxu0 }
 0x1e9   : > { %v7148_v4 = vpop.eup %7147  ;;  %v3159_v63 = vmul.f32 %v3031_v44, %v3031_v44  ;;  %7167 = vpow2.f32 %v2794_v49  ;;  %v9740_v58 = vmul.f32 1.442695, %v2659_v3  ;;  %12530 = vst [vmem:[#allocation183_spill] sm:$0xff] %v9743_v60  ;;  %v9745_v31 = vmul.f32 1.442695, %v2727_v28  ;;  %v9750_v24 = vpop.f32.mrb[41].mxu1 }
 0x1ea   : > { %v7150_v56 = vpop.eup %7149  ;;  %v3034_v9 = vadd.f32 1.0, %v7148_v4  ;;  %7169 = vpow2.f32 %v2930_v36  ;;  %12531 = vst [vmem:[#allocation184_spill] sm:$0xff] %v9750_v24  ;;  %v9752_v15 = vpop.f32.mrb[42].mxu1 }
 0x1eb   : > { %v7152_v48 = vpop.eup %7151  ;;  %v5943_v44 = vadd.f32 -1.0, %v3159_v63  ;;  %v3543_v49 = vadd.f32 1.0, %v3159_v63  ;;  %v3094_v54 = vadd.f32 1.0, %v7150_v56  ;;  %7171 = vpow2.f32 %v2800_v19  ;;  %12532 = vst [vmem:[#allocation185_spill] sm:$0xff] %v9752_v15  ;;  %v9768_v24 = vpop.f32.mrb[92].mxu0 }
 0x1ec   : > { %v7154_v43 = vpop.eup %7153  ;;  %v3162_v32 = vmul.f32 %v3034_v9, %v3034_v9  ;;  %v3035_v16 = vadd.f32 1.0, %v7152_v48  ;;  %7173 = vpow2.f32 %v2936_v62  ;;  %12536 = vst [vmem:[#allocation189_spill] sm:$0xff] %v9768_v24 }
 0x1ed   : > { %v7156_v36 = vpop.eup %7155  ;;  %v9748_v3 = vmul.f32 %v5943_v44, %v9546_v25  ;;  %7175 = vrcp.f32 %v3543_v49  ;;  %v3222_v6 = vmul.f32 %v3094_v54, %v3094_v54  ;;  %v3098_v4 = vadd.f32 1.0, %v7154_v43  ;;  %v9757_v49 = vpop.f32.mrb[43].mxu1 }
 0x1ee   : > { %v7158_v63 = vpop.eup %7157  ;;  %v5946_v19 = vadd.f32 -1.0, %v3162_v32  ;;  %v3546_v51 = vadd.f32 1.0, %v3162_v32  ;;  %v3163_v56 = vmul.f32 %v3035_v16, %v3035_v16  ;;  %v3095_v60 = vadd.f32 1.0, %v7156_v36  ;;  %12533 = vst [vmem:[#allocation186_spill] sm:$0xff] %v9757_v49 }
 0x1ef   : > { %v7160_v13 = vpop.eup %7159  ;;  %v6006_v9 = vadd.f32 -1.0, %v3222_v6  ;;  %v3606_v48 = vadd.f32 1.0, %v3222_v6  ;;  %v3226_v62 = vmul.f32 %v3098_v4, %v3098_v4  ;;  %v3099_v28 = vadd.f32 1.0, %v7158_v63 }
 0x1f0   : > { %v7162_v33 = vpop.eup %7161  ;;  %v9755_v25 = vmul.f32 %v5946_v19, %v9522_v0  ;;  %7177 = vrcp.f32 %v3546_v51  ;;  %v5947_v43 = vadd.f32 -1.0, %v3163_v56  ;;  %v3547_v44 = vadd.f32 1.0, %v3163_v56 }
 0x1f1   : > { %v7164_v54 = vpop.eup %7163  ;;  %v9760_v16 = vmul.f32 %v6006_v9, %v9531_v59  ;;  %7179 = vrcp.f32 %v3606_v48  ;;  %v3223_v32 = vmul.f32 %v3095_v60, %v3095_v60  ;;  %v6010_v36 = vadd.f32 -1.0, %v3226_v62 }
 0x1f2   : > { %v7166_v6 = vpop.eup %7165  ;;  %v9763_v4 = vmul.f32 %v5947_v43, %v9557_v7  ;;  %7181 = vrcp.f32 %v3547_v44  ;;  %v3610_v63 = vadd.f32 1.0, %v3226_v62  ;;  %v3227_v0 = vmul.f32 %v3099_v28, %v3099_v28 }
 0x1f3   : > { %12534 = vst [vmem:[#allocation187_spill] sm:$0xff] %v9760_v16  ;;  %v7168_v19 = vpop.eup %7167  ;;  %v6007_v51 = vadd.f32 -1.0, %v3223_v32  ;;  %v3607_v15 = vadd.f32 1.0, %v3223_v32  ;;  %v9766_v56 = vmul.f32 %v6010_v36, %v9535_v42  ;;  %v3102_v49 = vadd.f32 1.0, %v7160_v13  ;;  %v9770_v16 = vpop.f32.mrb[93].mxu0 }
 0x1f4   : > { %v7170_v59 = vpop.eup %7169  ;;  %7183 = vrcp.f32 %v3610_v63  ;;  %v6011_v60 = vadd.f32 -1.0, %v3227_v0  ;;  %v3611_v9 = vadd.f32 1.0, %v3227_v0  ;;  %v3103_v48 = vadd.f32 1.0, %v7162_v33  ;;  %12537 = vst [vmem:[#allocation190_spill] sm:$0xff] %v9770_v16  ;;  %v9775_v44 = vpop.f32.mrb[94].mxu0 }
 0x1f5   : > { %12535 = vst [vmem:[#allocation188_spill] sm:$0xff] %v9766_v56  ;;  %v7172_v7 = vpop.eup %7171  ;;  %v9773_v62 = vmul.f32 %v6007_v51, %v9639_v37  ;;  %7185 = vrcp.f32 %v3607_v15  ;;  %v3230_v28 = vmul.f32 %v3102_v49, %v3102_v49  ;;  %v3038_v43 = vadd.f32 1.0, %v7164_v54  ;;  %12539 = vst [vmem:[#allocation192_spill] sm:$0xff] %v9775_v44  ;;  %v9777_v42 = vpop.f32.mrb[44].mxu1 }
 0x1f6   : > { %12540 = vst [vmem:[#allocation193_spill] sm:$0xff] %v9777_v42  ;;  %v7174_v13 = vpop.eup %7173  ;;  %v9780_v32 = vmul.f32 %v6011_v60, %v9651_v5  ;;  %7187 = vrcp.f32 %v3611_v9  ;;  %v3231_v36 = vmul.f32 %v3103_v48, %v3103_v48  ;;  %v3106_v33 = vadd.f32 1.0, %v7166_v6  ;;  %v9782_v63 = vpop.f32.mrb[95].mxu0  ;;  %v6785_v6 = vld [vmem:[%s12312_s4 + $0xd4] ss:$8 sps:$4 sm:$0xff]  }
 0x1f7   : > { %12538 = vst [vmem:[#allocation191_spill] sm:$0xff] %v9773_v62  ;;  %12542 = vst [vmem:[#allocation195_spill] sm:$0xff] %v9782_v63  ;;  %v9784_v0 = vpop.f32.mrb[45].mxu1  ;;  %v9786_v37 = vpop.eup %7175  ;;  %v6014_v15 = vadd.f32 -1.0, %v3230_v28  ;;  %v3614_v49 = vadd.f32 1.0, %v3230_v28  ;;  %v3166_v54 = vmul.f32 %v3038_v43, %v3038_v43  ;;  %v3039_v51 = vadd.f32 1.0, %v7168_v19  ;;  %4538 = vmatprep.subr.bf16.mxu1 %v6785_v6 }
 0x1f8   : > { %12541 = vst [vmem:[#allocation194_spill] sm:$0xff] %v9780_v32  ;;  %12543 = vst [vmem:[#allocation196_spill] sm:$0xff] %v9784_v0  ;;  %v9788_v56 = vpop.f32.mrb[46].mxu1  ;;  %v6015_v62 = vadd.f32 -1.0, %v3231_v36  ;;  %v3615_v42 = vadd.f32 1.0, %v3231_v36  ;;  %v3234_v44 = vmul.f32 %v3106_v33, %v3106_v33  ;;  %v3107_v5 = vadd.f32 1.0, %v7170_v59 }
 0x1f9   : > { %12544 = vst [vmem:[#allocation197_spill] sm:$0xff] %v9788_v56  ;;  %v9793_v60 = vpop.f32.mrb[47].mxu1  ;;  %v9796_v9 = vmul.f32 %v6014_v15, %v9539_v23  ;;  %7189 = vrcp.f32 %v3614_v49  ;;  %v5950_v48 = vadd.f32 -1.0, %v3166_v54  ;;  %v3550_v28 = vadd.f32 1.0, %v3166_v54  ;;  %v6783_v19 = vld [vmem:[%s12312_s4 + $0xd0] ss:$8 sps:$4 sm:$0xff]  }
 0x1fa   : > { %12545 = vst [vmem:[#allocation198_spill] sm:$0xff] %v9793_v60  ;;  %v9801_v43 = vpop.eup %7177  ;;  %v9804_v59 = vmul.f32 %v6015_v62, %v9660_v10  ;;  %7191 = vrcp.f32 %v3615_v42  ;;  %v6018_v36 = vadd.f32 -1.0, %v3234_v44  ;;  %v3618_v33 = vadd.f32 1.0, %v3234_v44  ;;  %4539 = vmatpush1.bf16.msra.mxu1 %v6783_v19  ;;  %v6780_v44 = vld [vmem:[%s12310_s2 + $0x20] ss:$40 sps:$4 sm:$0xff]   ;;  %v9946_v16 = vpop.f32.mrb[48].mxu1 }
 0x1fb   : > { %12546 = vst [vmem:[#allocation199_spill] sm:$0xff] %v9796_v9  ;;  %v9806_v32 = vpop.eup %7179  ;;  %v9809_v23 = vmul.f32 %v5950_v48, %v9666_v40  ;;  %7193 = vrcp.f32 %v3550_v28  ;;  %v3167_v15 = vmul.f32 %v3039_v51, %v3039_v51  ;;  %v3235_v49 = vmul.f32 %v3107_v5, %v3107_v5  ;;  %v6782_v40 = vld [vmem:[%s12310_s2 + $0x24] ss:$40 sps:$4 sm:$0xff]   ;;  %12573 = vst [vmem:[#allocation212_spill] sm:$0xff] %v9946_v16 }
 0x1fc   : > { %12547 = vst [vmem:[#allocation200_spill] sm:$0xff] %v9804_v59  ;;  %12548 = vst [vmem:[#allocation201_spill] sm:$0xff] %v9806_v32  ;;  %v9811_v54 = vpop.eup %7181  ;;  %v9814_v9 = vmul.f32 %v6018_v36, %v9673_v17  ;;  %7195 = vrcp.f32 %v3618_v33  ;;  %v3042_v10 = vadd.f32 1.0, %v7172_v7  ;;  %v3110_v62 = vadd.f32 1.0, %v7174_v13  ;;  %v6789_v17 = vld [vmem:[%s12312_s4 + $0xe0] ss:$8 sps:$4 sm:$0xff]   ;;  %2451 = vmatprep.subr.bf16.mxu0 %v6782_v40 }
 0x1fd   : > { %v5951_v42 = vadd.f32 -1.0, %v3167_v15  ;;  %v3551_v51 = vadd.f32 1.0, %v3167_v15  ;;  %v6019_v5 = vadd.f32 -1.0, %v3235_v49  ;;  %v3619_v6 = vadd.f32 1.0, %v3235_v49  ;;  %v6791_v19 = vld [vmem:[%s12312_s4 + $0xe4] ss:$8 sps:$4 sm:$0xff]   ;;  %2452 = vmatpush1.bf16.msra.mxu0 %v6780_v44 }
 0x1fe   : > { %12549 = vst [vmem:[#allocation202_spill] sm:$0xff] %v9814_v9  ;;  %v9825_v48 = vpop.eup %7183  ;;  %v3170_v7 = vmul.f32 %v3042_v10, %v3042_v10  ;;  %v3238_v13 = vmul.f32 %v3110_v62, %v3110_v62  ;;  %7197 = vpow2.f32 %v9740_v58  ;;  %v2730_v28 = vmin.f32 %v9735_v52, 20.0  ;;  %v9832_v36 = vpop.f32.mrb[96].mxu0  ;;  %4540 = vmatprep.subr.bf16.mxu1 %v6791_v19 }
 0x1ff   : > { %12550 = vst [vmem:[#allocation203_spill] sm:$0xff] %v9825_v48  ;;  %12551 = vst [vmem:[#allocation204_spill] sm:$0xff] %v9832_v36  ;;  %v9834_v33 = vpop.eup %7185  ;;  %v9837_v15 = vmul.f32 %v5951_v42, %v9680_v47  ;;  %7199 = vrcp.f32 %v3551_v51  ;;  %v9840_v49 = vmul.f32 %v6019_v5, %v9685_v30  ;;  %v9844_v58 = vadd.f32 %v9044_v46, %v9518_v38  ;;  %v9846_v10 = vpop.f32.mrb[97].mxu0  ;;  %v12558_v51 = vld [vmem:[#allocation66_spill] sm:$0xff] }
 0x200   : > { %12552 = vst [vmem:[#allocation205_spill] sm:$0xff] %v9834_v33  ;;  %12554 = vst [vmem:[#allocation207_spill] sm:$0xff] %v9846_v10  ;;  %v9848_v62 = vpop.eup %7187  ;;  %7201 = vrcp.f32 %v3619_v6  ;;  %v5954_v40 = vadd.f32 -1.0, %v3170_v7  ;;  %v3554_v9 = vadd.f32 1.0, %v3170_v7  ;;  %v6022_v59 = vadd.f32 -1.0, %v3238_v13  ;;  %4541 = vmatpush1.bf16.msra.mxu1 %v6789_v17 }
 0x201   : > { %12553 = vst [vmem:[#allocation206_spill] sm:$0xff] %v9840_v49  ;;  %12555 = vst [vmem:[#allocation208_spill] sm:$0xff] %v9848_v62  ;;  %v3622_v47 = vadd.f32 1.0, %v3238_v13  ;;  %7203 = vpow2.f32 %v9745_v31  ;;  %v2944_v42 = vmul.f32 1.442695, %v2730_v28  ;;  %v2731_v30 = vmin.f32 %v9844_v58, 20.0 }
 0x202   : > { %v9853_v46 = vmul.f32 %v5954_v40, %v9692_v53  ;;  %7205 = vrcp.f32 %v3554_v9  ;;  %v9856_v44 = vmul.f32 %v6022_v59, %v9704_v11  ;;  %v9860_v5 = vadd.f32 %v12558_v51, %v9496_v39  ;;  %v12560_v31 = vld [vmem:[#allocation68_spill] sm:$0xff]  ;;  %v12562_v59 = vld [vmem:[#allocation74_spill] sm:$0xff] }
 0x203   : > { %v9862_v6 = vpop.eup %7189  ;;  %7207 = vrcp.f32 %v3622_v47  ;;  %v2946_v7 = vmul.f32 1.442695, %v2731_v30  ;;  %v9866_v13 = vadd.f32 %v12560_v31, %v9518_v38  ;;  %v9870_v53 = vadd.f32 %v9439_v34, %v9496_v39  ;;  %v12563_v47 = vld [vmem:[#allocation76_spill] sm:$0xff] }
 0x204   : > { %12556 = vst [vmem:[#allocation209_spill] sm:$0xff] %v9853_v46  ;;  %12557 = vst [vmem:[#allocation210_spill] sm:$0xff] %v9856_v44  ;;  %v9872_v9 = vpop.eup %7191  ;;  %7209 = vpow2.f32 %v2944_v42  ;;  %v2734_v11 = vmin.f32 %v9860_v5, 20.0  ;;  %v9877_v17 = vadd.f32 %v12562_v59, %v9496_v39  ;;  %v9881_v28 = vadd.f32 %v9445_v26, %v9518_v38 }
 0x205   : > { %12559 = vst [vmem:[#allocation66_spill] sm:$0xff] %v9862_v6  ;;  %12561 = vst [vmem:[#allocation68_spill] sm:$0xff] %v9872_v9  ;;  %v9883_v19 = vpop.eup %7193  ;;  %7211 = vpow2.f32 %v2946_v7  ;;  %v2735_v40 = vmin.f32 %v9866_v13, 20.0  ;;  %v2662_v34 = vmin.f32 %v9870_v53, 20.0  ;;  %v9889_v42 = vadd.f32 %v12563_v47, %v9518_v38  ;;  %v12565_v9 = vld [vmem:[#allocation80_spill] sm:$0xff] }
 0x206   : > { %v9891_v30 = vpop.eup %7195  ;;  %v2952_v51 = vmul.f32 1.442695, %v2734_v11  ;;  %v2738_v31 = vmin.f32 %v9877_v17, 20.0  ;;  %v2663_v59 = vmin.f32 %v9881_v28, 20.0  ;;  %v9897_v26 = vadd.f32 %v9454_v61, %v9496_v39 }
 0x207   : > { %12564 = vst [vmem:[#allocation74_spill] sm:$0xff] %v9891_v30  ;;  %v2954_v7 = vmul.f32 1.442695, %v2735_v40  ;;  %v2808_v44 = vmul.f32 1.442695, %v2662_v34  ;;  %v2739_v49 = vmin.f32 %v9889_v42, 20.0  ;;  %v9902_v6 = vadd.f32 %v12565_v9, %v9496_v39 }
 0x208   : > { %v7198_v47 = vpop.eup %7197  ;;  %7213 = vpow2.f32 %v2952_v51  ;;  %v2960_v30 = vmul.f32 1.442695, %v2738_v31  ;;  %v2810_v11 = vmul.f32 1.442695, %v2663_v59  ;;  %v2666_v62 = vmin.f32 %v9897_v26, 20.0  ;;  %v12567_v31 = vld [vmem:[#allocation82_spill] sm:$0xff] }
 0x209   : > { %v9905_v48 = vpop.eup %7199  ;;  %v3043_v33 = vadd.f32 1.0, %v7198_v47  ;;  %7215 = vpow2.f32 %v2954_v7  ;;  %v2962_v61 = vmul.f32 1.442695, %v2739_v49  ;;  %v2742_v40 = vmin.f32 %v9902_v6, 20.0  ;;  %v6786_v34 = vld [vmem:[%s12310_s2 + $0x70] ss:$40 sps:$4 sm:$0xff]  }
 0x20a   : > { %v9911_v32 = vpop.eup %7201  ;;  %7217 = vpow2.f32 %v2808_v44  ;;  %v2816_v9 = vmul.f32 1.442695, %v2666_v62  ;;  %v9915_v51 = vadd.f32 %v9463_v22, %v9518_v38  ;;  %v9919_v59 = vadd.f32 %v12567_v31, %v9518_v38  ;;  %v6788_v49 = vld [vmem:[%s12310_s2 + $0x74] ss:$40 sps:$4 sm:$0xff]  }
 0x20b   : > { %12566 = vst [vmem:[#allocation76_spill] sm:$0xff] %v9911_v32  ;;  %v7204_v7 = vpop.eup %7203  ;;  %v3171_v47 = vmul.f32 %v3043_v33, %v3043_v33  ;;  %7219 = vpow2.f32 %v2960_v30  ;;  %v2968_v10 = vmul.f32 1.442695, %v2742_v40  ;;  %v12568_v32 = vld [vmem:[#allocation85_spill] sm:$0xff]  ;;  %2453 = vmatprep.subr.bf16.mxu0 %v6788_v49  ;;  %v9938_v30 = vpop.f32.mrb[98].mxu0 }
 0x20c   : > { %v9926_v44 = vadd.f32 %v12568_v32, %v9496_v39  ;;  %v9928_v62 = vpop.eup %7205  ;;  %v3111_v22 = vadd.f32 1.0, %v7204_v7  ;;  %7221 = vpow2.f32 %v2810_v11  ;;  %v2667_v36 = vmin.f32 %v9915_v51, 20.0  ;;  %2454 = vmatpush1.bf16.msra.mxu0 %v6786_v34  ;;  %v6792_v32 = vld [vmem:[%s12310_s2 + $0xc0] ss:$40 sps:$4 sm:$0xff]   ;;  %12571 = vst [vmem:[#allocation85_spill] sm:$0xff] %v9938_v30  ;;  %v9948_v24 = vpop.f32.mrb[99].mxu0 }
 0x20d   : > { %12569 = vst [vmem:[#allocation80_spill] sm:$0xff] %v9928_v62  ;;  %v2743_v31 = vmin.f32 %v9919_v59, 20.0  ;;  %v9932_v60 = vpop.eup %7207  ;;  %v5955_v56 = vadd.f32 -1.0, %v3171_v47  ;;  %v3555_v0 = vadd.f32 1.0, %v3171_v47  ;;  %7223 = vpow2.f32 %v2962_v61  ;;  %v6794_v49 = vld [vmem:[%s12310_s2 + $0xc4] ss:$40 sps:$4 sm:$0xff]  }
 0x20e   : > { %12570 = vst [vmem:[#allocation82_spill] sm:$0xff] %v9932_v60  ;;  %v2746_v33 = vmin.f32 %v9926_v44, 20.0  ;;  %v7210_v11 = vpop.eup %7209  ;;  %v3239_v40 = vmul.f32 %v3111_v22, %v3111_v22  ;;  %7225 = vpow2.f32 %v2816_v9  ;;  %v2818_v7 = vmul.f32 1.442695, %v2667_v36  ;;  %12574 = vst [vmem:[#allocation213_spill] sm:$0xff] %v9948_v24  ;;  %2455 = vmatprep.subr.bf16.mxu0 %v6794_v49  ;;  %v9950_v36 = vpop.f32.mrb[49].mxu1 }
 0x20f   : > { %v2970_v63 = vmul.f32 1.442695, %v2743_v31  ;;  %v7212_v47 = vpop.eup %7211  ;;  %v9944_v61 = vmul.f32 %v5955_v56, %v9714_v2  ;;  %7227 = vrcp.f32 %v3555_v0  ;;  %v3114_v34 = vadd.f32 1.0, %v7210_v11  ;;  %12575 = vst [vmem:[#allocation214_spill] sm:$0xff] %v9950_v36  ;;  %v6795_v31 = vld [vmem:[%s12312_s4 + $0xf0] ss:$8 sps:$4 sm:$0xff]  }
 0x210   : > { %v2976_v60 = vmul.f32 1.442695, %v2746_v33  ;;  %v6023_v30 = vadd.f32 -1.0, %v3239_v40  ;;  %v3623_v22 = vadd.f32 1.0, %v3239_v40  ;;  %v3115_v9 = vadd.f32 1.0, %v7212_v47  ;;  %v12576_v56 = vld [vmem:[#allocation86_spill] sm:$0xff]  ;;  %2456 = vmatpush1.bf16.msra.mxu0 %v6792_v32 }
 0x211   : > { %12572 = vst [vmem:[#allocation211_spill] sm:$0xff] %v9944_v61  ;;  %7229 = vpow2.f32 %v2968_v10  ;;  %v3242_v2 = vmul.f32 %v3114_v34, %v3114_v34  ;;  %v9957_v0 = vadd.f32 %v12576_v56, %v9518_v38  ;;  %v12577_v33 = vld [vmem:[#allocation87_spill] sm:$0xff]  ;;  %v9966_v40 = vpop.f32.mrb[50].mxu1  ;;  %v9968_v49 = vpop.f32.mrb[100].mxu0  ;;  %v12581_v32 = vld [vmem:[#allocation90_spill] sm:$0xff] }
 0x212   : > { %7231 = vpow2.f32 %v2818_v7  ;;  %v9961_v11 = vadd.f32 %v12577_v33, %v9496_v39  ;;  %v6797_v10 = vld [vmem:[%s12312_s4 + $0xf4] ss:$8 sps:$4 sm:$0xff]   ;;  %12578 = vst [vmem:[#allocation86_spill] sm:$0xff] %v9966_v40  ;;  %12579 = vst [vmem:[#allocation87_spill] sm:$0xff] %v9968_v49  ;;  %v6798_v7 = vld [vmem:[%s12310_s2 + $0x110] ss:$40 sps:$4 sm:$0xff]   ;;  %v7214_v47 = vpop.eup %7213  ;;  %v9974_v34 = vmul.f32 %v6023_v30, %v9726_v12  ;;  %v3243_v56 = vmul.f32 %v3115_v9, %v3115_v9 }
 0x213   : > { %7233 = vrcp.f32 %v3623_v22  ;;  %v9978_v33 = vadd.f32 %v12581_v32, %v9518_v38  ;;  %v9980_v36 = vpop.f32.mrb[51].mxu1  ;;  %v9982_v24 = vpop.f32.mrb[101].mxu0  ;;  %v6800_v49 = vld [vmem:[%s12310_s2 + $0x114] ss:$40 sps:$4 sm:$0xff]   ;;  %v6026_v16 = vadd.f32 -1.0, %v3242_v2  ;;  %v3626_v61 = vadd.f32 1.0, %v3242_v2  ;;  %4542 = vmatprep.subr.bf16.mxu1 %v6797_v10 }
 0x214   : > { %12580 = vst [vmem:[#allocation215_spill] sm:$0xff] %v9974_v34  ;;  %12582 = vst [vmem:[#allocation90_spill] sm:$0xff] %v9980_v36  ;;  %v7216_v40 = vpop.eup %7215  ;;  %v3118_v62 = vadd.f32 1.0, %v7214_v47  ;;  %7235 = vpow2.f32 %v2970_v63  ;;  %v9987_v12 = vpop.f32.mrb[102].mxu0  ;;  %v6027_v9 = vadd.f32 -1.0, %v3243_v56  ;;  %v3627_v32 = vadd.f32 1.0, %v3243_v56  ;;  %4543 = vmatpush1.bf16.msra.mxu1 %v6795_v31  ;;  %2457 = vmatprep.subr.bf16.mxu0 %v6800_v49 }
 0x215   : > { %12583 = vst [vmem:[#allocation216_spill] sm:$0xff] %v9982_v24  ;;  %12584 = vst [vmem:[#allocation217_spill] sm:$0xff] %v9987_v12  ;;  %v9989_v30 = vpop.f32.mrb[52].mxu1  ;;  %v7218_v22 = vpop.eup %7217  ;;  %v3119_v34 = vadd.f32 1.0, %v7216_v40  ;;  %7237 = vpow2.f32 %v2976_v60  ;;  %v9996_v2 = vmul.f32 %v6026_v16, %v9735_v52  ;;  %2458 = vmatpush1.bf16.msra.mxu0 %v6798_v7  ;;  %v6803_v47 = vld [vmem:[%s12312_s4 + $0x104] ss:$8 sps:$4 sm:$0xff]  }
 0x216   : > { %12585 = vst [vmem:[#allocation218_spill] sm:$0xff] %v9989_v30  ;;  %v9991_v24 = vpop.f32.mrb[103].mxu0  ;;  %v9993_v36 = vpop.f32.mrb[53].mxu1  ;;  %7239 = vrcp.f32 %v3626_v61  ;;  %v3246_v63 = vmul.f32 %v3118_v62, %v3118_v62  ;;  %v3046_v10 = vadd.f32 1.0, %v7218_v22  ;;  %v10006_v49 = vmul.f32 %v6027_v9, %v9844_v58  ;;  %v6804_v61 = vld [vmem:[%s12310_s2 + $0x160] ss:$40 sps:$4 sm:$0xff]   ;;  %4705 = vmatprep.subr.bf16.mxu1 %v6803_v47 }
 0x217   : > { %12586 = vst [vmem:[#allocation219_spill] sm:$0xff] %v9991_v24  ;;  %12587 = vst [vmem:[#allocation220_spill] sm:$0xff] %v9993_v36  ;;  %v7220_v46 = vpop.eup %7219  ;;  %v10001_v40 = vpop.f32.mrb[54].mxu1  ;;  %7241 = vrcp.f32 %v3627_v32  ;;  %v3247_v56 = vmul.f32 %v3119_v34, %v3119_v34  ;;  %v6806_v58 = vld [vmem:[%s12310_s2 + $0x164] ss:$40 sps:$4 sm:$0xff]  }
 0x218   : > { %12588 = vst [vmem:[#allocation221_spill] sm:$0xff] %v9996_v2  ;;  %12589 = vst [vmem:[#allocation222_spill] sm:$0xff] %v10001_v40  ;;  %v10003_v60 = vpop.f32.mrb[104].mxu0  ;;  %v7222_v31 = vpop.eup %7221  ;;  %v3122_v52 = vadd.f32 1.0, %v7220_v46  ;;  %v6030_v22 = vadd.f32 -1.0, %v3246_v63  ;;  %v3630_v2 = vadd.f32 1.0, %v3246_v63  ;;  %v3174_v40 = vmul.f32 %v3046_v10, %v3046_v10  ;;  %2459 = vmatprep.subr.bf16.mxu0 %v6806_v58 }
 0x219   : > { %12590 = vst [vmem:[#allocation223_spill] sm:$0xff] %v10003_v60  ;;  %12591 = vst [vmem:[#allocation224_spill] sm:$0xff] %v10006_v49  ;;  %v10008_v16 = vpop.f32.mrb[55].mxu1  ;;  %v10010_v62 = vpop.f32.mrb[105].mxu0  ;;  %v3047_v60 = vadd.f32 1.0, %v7222_v31  ;;  %v6031_v9 = vadd.f32 -1.0, %v3247_v56  ;;  %2460 = vmatpush1.bf16.msra.mxu0 %v6804_v61 }
 0x21a   : > { %12592 = vst [vmem:[#allocation225_spill] sm:$0xff] %v10008_v16  ;;  %12593 = vst [vmem:[#allocation226_spill] sm:$0xff] %v10010_v62  ;;  %v7224_v7 = vpop.eup %7223  ;;  %v10018_v34 = vpop.f32.mrb[106].mxu0  ;;  %v3631_v32 = vadd.f32 1.0, %v3247_v56  ;;  %v3250_v49 = vmul.f32 %v3122_v52, %v3122_v52  ;;  %v10027_v63 = vmul.f32 %v6030_v22, %v9860_v5  ;;  %7243 = vrcp.f32 %v3630_v2 }
 0x21b   : > { %12594 = vst [vmem:[#allocation227_spill] sm:$0xff] %v10018_v34  ;;  %v7226_v46 = vpop.eup %7225  ;;  %v3123_v62 = vadd.f32 1.0, %v7224_v7  ;;  %v10020_v16 = vpop.f32.mrb[56].mxu1  ;;  %v5958_v10 = vadd.f32 -1.0, %v3174_v40  ;;  %v3558_v47 = vadd.f32 1.0, %v3174_v40  ;;  %v10034_v52 = vmul.f32 %v6031_v9, %v9866_v13 }
 0x21c   : > { %12595 = vst [vmem:[#allocation228_spill] sm:$0xff] %v10020_v16  ;;  %v10022_v36 = vpop.f32.mrb[107].mxu0  ;;  %v10024_v24 = vpop.eup %7227  ;;  %12598 = vst [vmem:[#allocation231_spill] sm:$0xff] %v10027_v63  ;;  %7245 = vrcp.f32 %v3631_v32  ;;  %v6034_v7 = vadd.f32 -1.0, %v3250_v49  ;;  %v3175_v22 = vmul.f32 %v3047_v60, %v3047_v60  ;;  %v6810_v13 = vld [vmem:[%s12310_s2 + $0x1b0] ss:$40 sps:$4 sm:$0xff]  }
 0x21d   : > { %12596 = vst [vmem:[#allocation229_spill] sm:$0xff] %v10022_v36  ;;  %12597 = vst [vmem:[#allocation230_spill] sm:$0xff] %v10024_v24  ;;  %v10029_v31 = vpop.f32.mrb[57].mxu1  ;;  %v10031_v34 = vpop.f32.mrb[108].mxu0  ;;  %v3634_v36 = vadd.f32 1.0, %v3250_v49  ;;  %v10041_v40 = vmul.f32 %v5958_v10, %v9870_v53  ;;  %7247 = vrcp.f32 %v3558_v47  ;;  %v3251_v58 = vmul.f32 %v3123_v62, %v3123_v62 }
 0x21e   : > { %12599 = vst [vmem:[#allocation232_spill] sm:$0xff] %v10029_v31  ;;  %12600 = vst [vmem:[#allocation233_spill] sm:$0xff] %v10031_v34  ;;  %v7230_v56 = vpop.eup %7229  ;;  %v10036_v16 = vpop.f32.mrb[58].mxu1  ;;  %v6812_v49 = vld [vmem:[%s12310_s2 + $0x1b4] ss:$40 sps:$4 sm:$0xff]   ;;  %v10056_v53 = vmul.f32 %v6034_v7, %v9877_v17  ;;  %v3050_v60 = vadd.f32 1.0, %v7226_v46 }
 0x21f   : > { %12601 = vst [vmem:[#allocation234_spill] sm:$0xff] %v10034_v52  ;;  %12602 = vst [vmem:[#allocation235_spill] sm:$0xff] %v10036_v16  ;;  %v10038_v5 = vpop.f32.mrb[109].mxu0  ;;  %v7232_v2 = vpop.eup %7231  ;;  %7249 = vrcp.f32 %v3634_v36  ;;  %v3126_v62 = vadd.f32 1.0, %v7230_v56  ;;  %v5959_v47 = vadd.f32 -1.0, %v3175_v22  ;;  %v3559_v52 = vadd.f32 1.0, %v3175_v22  ;;  %2461 = vmatprep.subr.bf16.mxu0 %v6812_v49 }
 0x220   : > { %12603 = vst [vmem:[#allocation236_spill] sm:$0xff] %v10038_v5  ;;  %12604 = vst [vmem:[#allocation237_spill] sm:$0xff] %v10041_v40  ;;  %v10043_v63 = vpop.f32.mrb[59].mxu1  ;;  %v10051_v61 = vpop.f32.mrb[110].mxu0  ;;  %v6035_v5 = vadd.f32 -1.0, %v3251_v58  ;;  %v3635_v34 = vadd.f32 1.0, %v3251_v58  ;;  %2462 = vmatpush1.bf16.msra.mxu0 %v6810_v13 }
 0x221   : > { %12605 = vst [vmem:[#allocation238_spill] sm:$0xff] %v10043_v63  ;;  %12606 = vst [vmem:[#allocation239_spill] sm:$0xff] %v10051_v61  ;;  %v10053_v9 = vpop.eup %7233  ;;  %v10058_v32 = vpop.f32.mrb[60].mxu1  ;;  %v3254_v31 = vmul.f32 %v3126_v62, %v3126_v62  ;;  %v3051_v17 = vadd.f32 1.0, %v7232_v2  ;;  %v10067_v46 = vmul.f32 %v5959_v47, %v9881_v28  ;;  %7251 = vrcp.f32 %v3559_v52 }
 0x222   : > { %12607 = vst [vmem:[#allocation240_spill] sm:$0xff] %v10053_v9  ;;  %12608 = vst [vmem:[#allocation241_spill] sm:$0xff] %v10056_v53  ;;  %v7236_v10 = vpop.eup %7235  ;;  %v10060_v63 = vpop.f32.mrb[111].mxu0  ;;  %v3178_v9 = vmul.f32 %v3050_v60, %v3050_v60  ;;  %v10070_v56 = vmul.f32 %v6035_v5, %v9889_v42  ;;  %7253 = vrcp.f32 %v3635_v34  ;;  %v2747_v52 = vmin.f32 %v9957_v0, 20.0 }
 0x223   : > { %12609 = vst [vmem:[#allocation242_spill] sm:$0xff] %v10058_v32  ;;  %12610 = vst [vmem:[#allocation243_spill] sm:$0xff] %v10060_v63  ;;  %v10062_v16 = vpop.f32.mrb[61].mxu1  ;;  %v7238_v61 = vpop.eup %7237  ;;  %v3127_v7 = vadd.f32 1.0, %v7236_v10  ;;  %v6038_v60 = vadd.f32 -1.0, %v3254_v31  ;;  %v3638_v62 = vadd.f32 1.0, %v3254_v31  ;;  %v3179_v2 = vmul.f32 %v3051_v17, %v3051_v17 }
 0x224   : > { %12611 = vst [vmem:[#allocation244_spill] sm:$0xff] %v10062_v16  ;;  %v10064_v36 = vpop.eup %7239  ;;  %12613 = vst [vmem:[#allocation246_spill] sm:$0xff] %v10067_v46  ;;  %v3130_v22 = vadd.f32 1.0, %v7238_v61  ;;  %v5962_v49 = vadd.f32 -1.0, %v3178_v9  ;;  %v3562_v53 = vadd.f32 1.0, %v3178_v9  ;;  %v10074_v16 = vpop.f32.mrb[62].mxu1 }
 0x225   : > { %12612 = vst [vmem:[#allocation245_spill] sm:$0xff] %v10064_v36  ;;  %12614 = vst [vmem:[#allocation247_spill] sm:$0xff] %v10070_v56  ;;  %v10072_v58 = vpop.eup %7241  ;;  %v3255_v10 = vmul.f32 %v3127_v7, %v3127_v7  ;;  %v10080_v42 = vmul.f32 %v6038_v60, %v9902_v6  ;;  %v10083_v5 = vpop.f32.mrb[63].mxu1  ;;  %v5963_v31 = vadd.f32 -1.0, %v3179_v2  ;;  %v3563_v9 = vadd.f32 1.0, %v3179_v2 }
 0x226   : > { %12615 = vst [vmem:[#allocation248_spill] sm:$0xff] %v10072_v58  ;;  %v3258_v13 = vmul.f32 %v3130_v22, %v3130_v22  ;;  %12616 = vst [vmem:[#allocation249_spill] sm:$0xff] %v10074_v16  ;;  %v10077_v28 = vmul.f32 %v5962_v49, %v9897_v26  ;;  %7255 = vrcp.f32 %v3562_v53  ;;  %v10085_v34 = vpop.f32.mrb[112].mxu0  ;;  %v10087_v61 = vpop.eup %7243  ;;  %v2978_v49 = vmul.f32 1.442695, %v2747_v52 }
 0x227   : > { %12618 = vst [vmem:[#allocation251_spill] sm:$0xff] %v10080_v42  ;;  %12619 = vst [vmem:[#allocation252_spill] sm:$0xff] %v10083_v5  ;;  %7257 = vrcp.f32 %v3638_v62  ;;  %v6039_v47 = vadd.f32 -1.0, %v3255_v10  ;;  %v10089_v17 = vpop.f32.mrb[64].mxu1  ;;  %v10091_v26 = vpop.f32.mrb[113].mxu0  ;;  %v3639_v6 = vadd.f32 1.0, %v3255_v10  ;;  %v10100_v56 = vmul.f32 %v5963_v31, %v9915_v51 }
 0x228   : > { %12617 = vst [vmem:[#allocation250_spill] sm:$0xff] %v10077_v28  ;;  %12620 = vst [vmem:[#allocation253_spill] sm:$0xff] %v10085_v34  ;;  %v10093_v53 = vpop.eup %7245  ;;  %v6042_v7 = vadd.f32 -1.0, %v3258_v13  ;;  %v3642_v22 = vadd.f32 1.0, %v3258_v13  ;;  %v10095_v60 = vpop.f32.mrb[65].mxu1  ;;  %7259 = vrcp.f32 %v3563_v9  ;;  %v2750_v2 = vmin.f32 %v9961_v11, 20.0 }
 0x229   : > { %12621 = vst [vmem:[#allocation254_spill] sm:$0xff] %v10087_v61  ;;  %12622 = vst [vmem:[#allocation255_spill] sm:$0xff] %v10089_v17  ;;  %v10097_v42 = vpop.eup %7247  ;;  %v10103_v62 = vmul.f32 %v6039_v47, %v9919_v59  ;;  %v6816_v10 = vld [vmem:[%s12310_s2 + $0x200] ss:$40 sps:$4 sm:$0xff]   ;;  %v6818_v13 = vld [vmem:[%s12310_s2 + $0x204] ss:$40 sps:$4 sm:$0xff]   ;;  %7261 = vrcp.f32 %v3639_v6  ;;  %v10122_v31 = vadd.f32 %v9499_v27, %v9496_v39 }
 0x22a   : > { %12623 = vst [vmem:[#allocation256_spill] sm:$0xff] %v10091_v26  ;;  %12624 = vst [vmem:[#allocation257_spill] sm:$0xff] %v10093_v53  ;;  %v10112_v52 = vpop.f32.mrb[114].mxu0  ;;  %v10114_v53 = vpop.eup %7249  ;;  %v10117_v51 = vmul.f32 %v6042_v7, %v9926_v44  ;;  %v2751_v59 = vmin.f32 %v9978_v33, 20.0  ;;  %7263 = vrcp.f32 %v3642_v22  ;;  %v12634_v61 = vld [vmem:[#allocation110_spill] sm:$0xff]  ;;  %v10134_v44 = vadd.f32 %v9506_v41, %v9518_v38  ;;  %2463 = vmatprep.subr.bf16.mxu0 %v6818_v13 }
 0x22b   : > { %12625 = vst [vmem:[#allocation258_spill] sm:$0xff] %v10095_v60  ;;  %12626 = vst [vmem:[#allocation259_spill] sm:$0xff] %v10097_v42  ;;  %v10124_v9 = vpop.f32.mrb[66].mxu1  ;;  %v10126_v47 = vpop.f32.mrb[115].mxu0  ;;  %v10130_v58 = vadd.f32 %v12634_v61, %v9496_v39  ;;  %7265 = vpow2.f32 %v2978_v49  ;;  %v2670_v7 = vmin.f32 %v10122_v31, 20.0  ;;  %2464 = vmatpush1.bf16.msra.mxu0 %v6816_v10 }
 0x22c   : > { %12627 = vst [vmem:[#allocation260_spill] sm:$0xff] %v10100_v56  ;;  %12628 = vst [vmem:[#allocation261_spill] sm:$0xff] %v10103_v62  ;;  %v2984_v62 = vmul.f32 1.442695, %v2750_v2  ;;  %v10136_v6 = vpop.f32.mrb[67].mxu1  ;;  %v10143_v22 = vpop.eup %7251  ;;  %v2671_v41 = vmin.f32 %v10134_v44, 20.0  ;;  %v10149_v2 = vadd.f32 %v9524_v1, %v9496_v39 }
 0x22d   : > { %12629 = vst [vmem:[#allocation262_spill] sm:$0xff] %v10112_v52  ;;  %12630 = vst [vmem:[#allocation263_spill] sm:$0xff] %v10114_v53  ;;  %v2986_v27 = vmul.f32 1.442695, %v2751_v59  ;;  %v2754_v61 = vmin.f32 %v10130_v58, 20.0  ;;  %v10151_v49 = vpop.eup %7253  ;;  %v10158_v36 = vpop.f32.mrb[116].mxu0 }
 0x22e   : > { %12631 = vst [vmem:[#allocation264_spill] sm:$0xff] %v10117_v51  ;;  %12632 = vst [vmem:[#allocation265_spill] sm:$0xff] %v10124_v9  ;;  %v12636_v51 = vld [vmem:[#allocation112_spill] sm:$0xff]  ;;  %7267 = vpow2.f32 %v2984_v62  ;;  %v2824_v13 = vmul.f32 1.442695, %v2670_v7  ;;  %v10160_v62 = vpop.f32.mrb[68].mxu1 }
 0x22f   : > { %12633 = vst [vmem:[#allocation266_spill] sm:$0xff] %v10126_v47  ;;  %12635 = vst [vmem:[#allocation110_spill] sm:$0xff] %v10136_v6  ;;  %v10141_v53 = vadd.f32 %v12636_v51, %v9518_v38  ;;  %7269 = vpow2.f32 %v2986_v27  ;;  %v12639_v51 = vld [vmem:[#allocation115_spill] sm:$0xff]  ;;  %v2992_v6 = vmul.f32 1.442695, %v2754_v61  ;;  %v2674_v9 = vmin.f32 %v10149_v2, 20.0 }
 0x230   : > { %12637 = vst [vmem:[#allocation112_spill] sm:$0xff] %v10143_v22  ;;  %12638 = vst [vmem:[#allocation267_spill] sm:$0xff] %v10151_v49  ;;  %v10156_v10 = vadd.f32 %v12639_v51, %v9496_v39  ;;  %v2826_v47 = vmul.f32 1.442695, %v2671_v41  ;;  %v12642_v1 = vld [vmem:[#allocation147_spill] sm:$0xff]  ;;  %v10167_v27 = vpop.f32.mrb[117].mxu0  ;;  %v10169_v7 = vpop.eup %7255  ;;  %7271 = vpow2.f32 %v2824_v13 }
 0x231   : > { %v2755_v59 = vmin.f32 %v10141_v53, 20.0  ;;  %12640 = vst [vmem:[#allocation115_spill] sm:$0xff] %v10158_v36  ;;  %12641 = vst [vmem:[#allocation268_spill] sm:$0xff] %v10160_v62  ;;  %v10165_v52 = vadd.f32 %v12642_v1, %v9518_v38  ;;  %v12645_v36 = vld [vmem:[#allocation118_spill] sm:$0xff]  ;;  %v10176_v61 = vpop.f32.mrb[69].mxu1  ;;  %v10181_v1 = vpop.eup %7257  ;;  %7273 = vpow2.f32 %v2992_v6  ;;  %v12648_v13 = vld [vmem:[#allocation119_spill] sm:$0xff] }
 0x232   : > { %12643 = vst [vmem:[#allocation147_spill] sm:$0xff] %v10167_v27  ;;  %12644 = vst [vmem:[#allocation269_spill] sm:$0xff] %v10169_v7  ;;  %v2758_v51 = vmin.f32 %v10156_v10, 20.0  ;;  %v10174_v60 = vadd.f32 %v12645_v36, %v9518_v38  ;;  %v6822_v41 = vld [vmem:[%s12310_s2 + $0x250] ss:$40 sps:$4 sm:$0xff]   ;;  %v10191_v26 = vpop.f32.mrb[118].mxu0  ;;  %7275 = vpow2.f32 %v2826_v47 }
 0x233   : > { %v2994_v49 = vmul.f32 1.442695, %v2755_v59  ;;  %12646 = vst [vmem:[#allocation118_spill] sm:$0xff] %v10176_v61  ;;  %12647 = vst [vmem:[#allocation270_spill] sm:$0xff] %v10181_v1  ;;  %v2832_v27 = vmul.f32 1.442695, %v2674_v9  ;;  %v10186_v59 = vadd.f32 %v12648_v13, %v9496_v39  ;;  %v10202_v13 = vpop.eup %7259 }
 0x234   : > { %v2675_v62 = vmin.f32 %v10165_v52, 20.0  ;;  %v6824_v36 = vld [vmem:[%s12310_s2 + $0x254] ss:$40 sps:$4 sm:$0xff]   ;;  %12649 = vst [vmem:[#allocation119_spill] sm:$0xff] %v10191_v26  ;;  %v3000_v61 = vmul.f32 1.442695, %v2758_v51  ;;  %v10211_v63 = vpop.eup %7261 }
 0x235   : > { %v2759_v17 = vmin.f32 %v10174_v60, 20.0  ;;  %v12650_v1 = vld [vmem:[#allocation121_spill] sm:$0xff]  ;;  %v10198_v9 = vpop.f32.mrb[70].mxu1  ;;  %v10200_v34 = vpop.f32.mrb[119].mxu0  ;;  %12653 = vst [vmem:[#allocation272_spill] sm:$0xff] %v10202_v13  ;;  %7277 = vpow2.f32 %v2994_v49  ;;  %v2762_v16 = vmin.f32 %v10186_v59, 20.0  ;;  %2465 = vmatprep.subr.bf16.mxu0 %v6824_v36 }
 0x236   : > { %v10196_v6 = vadd.f32 %v12650_v1, %v9518_v38  ;;  %12651 = vst [vmem:[#allocation121_spill] sm:$0xff] %v10198_v9  ;;  %12652 = vst [vmem:[#allocation271_spill] sm:$0xff] %v10200_v34  ;;  %v2834_v5 = vmul.f32 1.442695, %v2675_v62  ;;  %v12654_v26 = vld [vmem:[#allocation123_spill] sm:$0xff]  ;;  %v10209_v51 = vpop.f32.mrb[71].mxu1  ;;  %7279 = vpow2.f32 %v2832_v27  ;;  %2466 = vmatpush1.bf16.msra.mxu0 %v6822_v41  ;;  %v10218_v49 = vpop.eup %7263 }
 0x237   : > { %v10207_v47 = vadd.f32 %v12654_v26, %v9496_v39  ;;  %12655 = vst [vmem:[#allocation123_spill] sm:$0xff] %v10209_v51  ;;  %12656 = vst [vmem:[#allocation273_spill] sm:$0xff] %v10211_v63  ;;  %v3002_v1 = vmul.f32 1.442695, %v2759_v17  ;;  %v12657_v34 = vld [vmem:[#allocation124_spill] sm:$0xff]  ;;  %7281 = vpow2.f32 %v3000_v61  ;;  %v12659_v36 = vld [vmem:[#allocation150_spill] sm:$0xff]  ;;  %v7266_v17 = vpop.eup %7265 }
 0x238   : > { %v2763_v9 = vmin.f32 %v10196_v6, 20.0  ;;  %v10216_v32 = vadd.f32 %v12657_v34, %v9518_v38  ;;  %12658 = vst [vmem:[#allocation124_spill] sm:$0xff] %v10218_v49  ;;  %v3008_v62 = vmul.f32 1.442695, %v2762_v16  ;;  %v10223_v51 = vadd.f32 %v12659_v36, %v9496_v39  ;;  %v10225_v63 = vpop.f32.mrb[120].mxu0  ;;  %v12661_v34 = vld [vmem:[#allocation141_spill] sm:$0xff]  ;;  %v7268_v16 = vpop.eup %7267 }
 0x239   : > { %v2766_v26 = vmin.f32 %v10207_v47, 20.0  ;;  %12660 = vst [vmem:[#allocation150_spill] sm:$0xff] %v10225_v63  ;;  %7283 = vpow2.f32 %v2834_v5  ;;  %v10230_v41 = vadd.f32 %v12661_v34, %v9496_v39  ;;  %v10232_v49 = vpop.f32.mrb[72].mxu1  ;;  %v3131_v61 = vadd.f32 1.0, %v7266_v17  ;;  %v10235_v13 = vpop.f32.mrb[121].mxu0 }
 0x23a   : > { %v3010_v27 = vmul.f32 1.442695, %v2763_v9  ;;  %v2767_v30 = vmin.f32 %v10216_v32, 20.0  ;;  %12663 = vst [vmem:[#allocation274_spill] sm:$0xff] %v10232_v49  ;;  %7285 = vpow2.f32 %v3002_v1  ;;  %v2678_v36 = vmin.f32 %v10223_v51, 20.0  ;;  %12664 = vst [vmem:[#allocation275_spill] sm:$0xff] %v10235_v13  ;;  %v7270_v5 = vpop.eup %7269 }
 0x23b   : > { %12662 = vst [vmem:[#allocation141_spill] sm:$0xff] %v10230_v41  ;;  %v3016_v12 = vmul.f32 1.442695, %v2766_v26  ;;  %v10237_v63 = vpop.f32.mrb[73].mxu1  ;;  %v3134_v9 = vadd.f32 1.0, %v7268_v16  ;;  %7287 = vpow2.f32 %v3008_v62  ;;  %v2770_v7 = vmin.f32 %v10230_v41, 20.0  ;;  %v7272_v16 = vpop.eup %7271 }
 0x23c   : > { %12665 = vst [vmem:[#allocation276_spill] sm:$0xff] %v10237_v63  ;;  %v3018_v56 = vmul.f32 1.442695, %v2767_v30  ;;  %v6828_v34 = vld [vmem:[%s12310_s2 + $0x2a0] ss:$40 sps:$4 sm:$0xff]   ;;  %v3259_v49 = vmul.f32 %v3131_v61, %v3131_v61  ;;  %v3135_v17 = vadd.f32 1.0, %v7270_v5  ;;  %7289 = vpow2.f32 %v3010_v27 }
 0x23d   : > { %v10243_v1 = vmul.f32 1.442695, %v2678_v36  ;;  %v6830_v26 = vld [vmem:[%s12310_s2 + $0x2a4] ss:$40 sps:$4 sm:$0xff]   ;;  %v10248_v63 = vpop.f32.mrb[122].mxu0  ;;  %v3262_v62 = vmul.f32 %v3134_v9, %v3134_v9  ;;  %7291 = vpow2.f32 %v3016_v12  ;;  %v12667_v13 = vld [vmem:[#allocation151_spill] sm:$0xff]  ;;  %v7274_v36 = vpop.eup %7273 }
 0x23e   : > { %12666 = vst [vmem:[#allocation277_spill] sm:$0xff] %v10248_v63  ;;  %v10250_v30 = vmul.f32 1.442695, %v2770_v7  ;;  %v10254_v28 = vadd.f32 %v12667_v13, %v9518_v38  ;;  %v10256_v61 = vpop.f32.mrb[74].mxu1  ;;  %v10258_v27 = vpop.f32.mrb[123].mxu0  ;;  %v6043_v5 = vadd.f32 -1.0, %v3259_v49  ;;  %v3263_v46 = vmul.f32 %v3135_v17, %v3135_v17  ;;  %2467 = vmatprep.subr.bf16.mxu0 %v6830_v26 }
 0x23f   : > { %12668 = vst [vmem:[#allocation151_spill] sm:$0xff] %v10256_v61  ;;  %12669 = vst [vmem:[#allocation278_spill] sm:$0xff] %v10258_v27  ;;  %v3643_v22 = vadd.f32 1.0, %v3259_v49  ;;  %v3054_v42 = vadd.f32 1.0, %v7272_v16  ;;  %v10260_v63 = vpop.f32.mrb[75].mxu1  ;;  %v7276_v9 = vpop.eup %7275  ;;  %v6046_v12 = vadd.f32 -1.0, %v3262_v62  ;;  %7293 = vpow2.f32 %v3018_v56  ;;  %2468 = vmatpush1.bf16.msra.mxu0 %v6828_v34 }
 0x240   : > { %v3646_v7 = vadd.f32 1.0, %v3262_v62  ;;  %v3138_v40 = vadd.f32 1.0, %v7274_v36  ;;  %v7278_v13 = vpop.eup %7277  ;;  %v10263_v24 = vmul.f32 %v6043_v5, %v9957_v0  ;;  %v6047_v27 = vadd.f32 -1.0, %v3263_v46  ;;  %v10268_v16 = vpop.f32.mrb[124].mxu0  ;;  %v6834_v56 = vld [vmem:[%s12310_s2 + $0x2f0] ss:$40 sps:$4 sm:$0xff]  }
 0x241   : > { %7295 = vrcp.f32 %v3643_v22  ;;  %v3647_v61 = vadd.f32 1.0, %v3263_v46  ;;  %v7280_v41 = vpop.eup %7279  ;;  %v10266_v49 = vmul.f32 %v6046_v12, %v9961_v11  ;;  %v3182_v17 = vmul.f32 %v3054_v42, %v3054_v42  ;;  %12672 = vst [vmem:[#allocation281_spill] sm:$0xff] %v10268_v16  ;;  %v10270_v62 = vpop.f32.mrb[76].mxu1  ;;  %v6836_v0 = vld [vmem:[%s12310_s2 + $0x2f4] ss:$40 sps:$4 sm:$0xff]  }
 0x242   : > { %12670 = vst [vmem:[#allocation279_spill] sm:$0xff] %v10263_v24  ;;  %7297 = vrcp.f32 %v3646_v7  ;;  %v3266_v26 = vmul.f32 %v3138_v40, %v3138_v40  ;;  %12673 = vst [vmem:[#allocation282_spill] sm:$0xff] %v10270_v62  ;;  %v7282_v46 = vpop.eup %7281  ;;  %v10279_v22 = vmul.f32 %v6047_v27, %v9978_v33  ;;  %v3055_v11 = vadd.f32 1.0, %v7276_v9  ;;  %v10281_v40 = vpop.f32.mrb[125].mxu0  ;;  %2469 = vmatprep.subr.bf16.mxu0 %v6836_v0 }
 0x243   : > { %12671 = vst [vmem:[#allocation280_spill] sm:$0xff] %v10266_v49  ;;  %7299 = vrcp.f32 %v3647_v61  ;;  %v3139_v42 = vadd.f32 1.0, %v7278_v13  ;;  %12675 = vst [vmem:[#allocation284_spill] sm:$0xff] %v10281_v40  ;;  %v10283_v34 = vpop.f32.mrb[77].mxu1  ;;  %v7284_v36 = vpop.eup %7283  ;;  %v5966_v5 = vadd.f32 -1.0, %v3182_v17  ;;  %v3566_v12 = vadd.f32 1.0, %v3182_v17  ;;  %2470 = vmatpush1.bf16.msra.mxu0 %v6834_v56 }
 0x244   : > { %12674 = vst [vmem:[#allocation283_spill] sm:$0xff] %v10279_v22  ;;  %12676 = vst [vmem:[#allocation285_spill] sm:$0xff] %v10283_v34  ;;  %v6050_v7 = vadd.f32 -1.0, %v3266_v26  ;;  %v3650_v49 = vadd.f32 1.0, %v3266_v26  ;;  %v10285_v24 = vpop.f32.mrb[126].mxu0  ;;  %v10287_v62 = vpop.f32.mrb[78].mxu1  ;;  %v3183_v33 = vmul.f32 %v3055_v11, %v3055_v11 }
 0x245   : > { %12677 = vst [vmem:[#allocation286_spill] sm:$0xff] %v10285_v24  ;;  %12678 = vst [vmem:[#allocation287_spill] sm:$0xff] %v10287_v62  ;;  %v7286_v16 = vpop.eup %7285  ;;  %v3267_v27 = vmul.f32 %v3139_v42, %v3139_v42  ;;  %v3058_v61 = vadd.f32 1.0, %v7280_v41  ;;  %v3142_v9 = vadd.f32 1.0, %v7282_v46  ;;  %v10289_v13 = vpop.f32.mrb[127].mxu0  ;;  %v10294_v17 = vmul.f32 %v5966_v5, %v10122_v31 }
 0x246   : > { %12679 = vst [vmem:[#allocation288_spill] sm:$0xff] %v10289_v13  ;;  %v10291_v22 = vpop.f32.mrb[79].mxu1  ;;  %v7288_v34 = vpop.eup %7287  ;;  %7301 = vrcp.f32 %v3566_v12  ;;  %v10297_v26 = vmul.f32 %v6050_v7, %v10130_v58  ;;  %v3059_v0 = vadd.f32 1.0, %v7284_v36  ;;  %v5967_v11 = vadd.f32 -1.0, %v3183_v33 }
 0x247   : > { %12680 = vst [vmem:[#allocation289_spill] sm:$0xff] %v10291_v22  ;;  %v7290_v62 = vpop.eup %7289  ;;  %7303 = vrcp.f32 %v3650_v49  ;;  %v3567_v42 = vadd.f32 1.0, %v3183_v33  ;;  %v6051_v41 = vadd.f32 -1.0, %v3267_v27  ;;  %v3651_v56 = vadd.f32 1.0, %v3267_v27  ;;  %v10305_v5 = vpop.f32.mrb[128].mxu0 }
 0x248   : > { %12681 = vst [vmem:[#allocation290_spill] sm:$0xff] %v10297_v26  ;;  %v7292_v46 = vpop.eup %7291  ;;  %v3186_v24 = vmul.f32 %v3058_v61, %v3058_v61  ;;  %v3270_v13 = vmul.f32 %v3142_v9, %v3142_v9  ;;  %v3187_v40 = vmul.f32 %v3059_v0, %v3059_v0  ;;  %v10300_v22 = vmul.f32 %v5967_v11, %v10134_v44  ;;  %v10307_v33 = vpop.f32.mrb[80].mxu1 }
 0x249   : > { %7305 = vrcp.f32 %v3567_v42  ;;  %v10303_v31 = vmul.f32 %v6051_v41, %v10141_v53  ;;  %v3143_v58 = vadd.f32 1.0, %v7286_v16  ;;  %v7294_v36 = vpop.eup %7293  ;;  %v10309_v27 = vpop.f32.mrb[129].mxu0  ;;  %v6840_v16 = vld [vmem:[%s12310_s2 + $0x340] ss:$40 sps:$4 sm:$0xff]  }
 0x24a   : > { %7307 = vrcp.f32 %v3651_v56  ;;  %v5970_v49 = vadd.f32 -1.0, %v3186_v24  ;;  %v3570_v12 = vadd.f32 1.0, %v3186_v24  ;;  %v6054_v7 = vadd.f32 -1.0, %v3270_v13  ;;  %v10313_v53 = vpop.f32.mrb[81].mxu1 }
 0x24b   : > { %12682 = vst [vmem:[#allocation291_spill] sm:$0xff] %v10303_v31  ;;  %v10311_v61 = vpop.eup %7295  ;;  %v3654_v44 = vadd.f32 1.0, %v3270_v13  ;;  %v5971_v9 = vadd.f32 -1.0, %v3187_v40  ;;  %v3571_v0 = vadd.f32 1.0, %v3187_v40  ;;  %v3271_v11 = vmul.f32 %v3143_v58, %v3143_v58  ;;  %v6842_v40 = vld [vmem:[%s12310_s2 + $0x344] ss:$40 sps:$4 sm:$0xff]  }
 0x24c   : > { %12683 = vst [vmem:[#allocation292_spill] sm:$0xff] %v10311_v61  ;;  %v10318_v42 = vpop.eup %7297  ;;  %v10321_v24 = vmul.f32 %v5970_v49, %v10149_v2  ;;  %7309 = vrcp.f32 %v3570_v12  ;;  %v10324_v41 = vmul.f32 %v6054_v7, %v10156_v10  ;;  %v3146_v56 = vadd.f32 1.0, %v7288_v34  ;;  %v10329_v13 = vpop.f32.mrb[130].mxu0  ;;  %2471 = vmatprep.subr.bf16.mxu0 %v6842_v40 }
 0x24d   : > { %12684 = vst [vmem:[#allocation293_spill] sm:$0xff] %v10318_v42  ;;  %v10331_v58 = vpop.f32.mrb[82].mxu1  ;;  %v10333_v31 = vpop.eup %7299  ;;  %7311 = vrcp.f32 %v3654_v44  ;;  %v10336_v26 = vmul.f32 %v5971_v9, %v10165_v52  ;;  %v6055_v2 = vadd.f32 -1.0, %v3271_v11  ;;  %v3655_v49 = vadd.f32 1.0, %v3271_v11  ;;  %2472 = vmatpush1.bf16.msra.mxu0 %v6840_v16 }
 0x24e   : > { %12685 = vst [vmem:[#allocation294_spill] sm:$0xff] %v10324_v41  ;;  %12686 = vst [vmem:[#allocation295_spill] sm:$0xff] %v10333_v31  ;;  %v10338_v12 = vpop.f32.mrb[131].mxu0  ;;  %v10340_v10 = vpop.f32.mrb[83].mxu1  ;;  %7313 = vrcp.f32 %v3571_v0  ;;  %v3274_v34 = vmul.f32 %v3146_v56, %v3146_v56  ;;  %v3147_v7 = vadd.f32 1.0, %v7290_v62  ;;  %v3150_v41 = vadd.f32 1.0, %v7292_v46 }
 0x24f   : > { %12687 = vst [vmem:[#allocation296_spill] sm:$0xff] %v10338_v12  ;;  %12688 = vst [vmem:[#allocation297_spill] sm:$0xff] %v10340_v10  ;;  %v10343_v42 = vmul.f32 %v6055_v2, %v10174_v60  ;;  %7315 = vrcp.f32 %v3655_v49  ;;  %v3151_v31 = vadd.f32 1.0, %v7294_v36  ;;  %v2679_v44 = vmin.f32 %v10254_v28, 20.0  ;;  %v12691_v60 = vld [vmem:[#allocation149_spill] sm:$0xff]  ;;  %v10358_v40 = vpop.f32.mrb[132].mxu0 }
 0x250   : > { %v10346_v52 = vpop.eup %7301  ;;  %v6058_v9 = vadd.f32 -1.0, %v3274_v34  ;;  %v3658_v11 = vadd.f32 1.0, %v3274_v34  ;;  %v3275_v61 = vmul.f32 %v3147_v7, %v3147_v7  ;;  %v3278_v12 = vmul.f32 %v3150_v41, %v3150_v41  ;;  %v10360_v2 = vpop.f32.mrb[84].mxu1 }
 0x251   : > { %12689 = vst [vmem:[#allocation298_spill] sm:$0xff] %v10343_v42  ;;  %v10348_v10 = vpop.eup %7303  ;;  %v3279_v0 = vmul.f32 %v3151_v31, %v3151_v31  ;;  %7317 = vpow2.f32 %v10243_v1  ;;  %v2842_v62 = vmul.f32 1.442695, %v2679_v44  ;;  %v10353_v46 = vadd.f32 %v12691_v60, %v9518_v38  ;;  %v6846_v31 = vld [vmem:[%s12310_s2 + $0x390] ss:$40 sps:$4 sm:$0xff]   ;;  %v10367_v44 = vpop.f32.mrb[133].mxu0 }
 0x252   : > { %12690 = vst [vmem:[#allocation299_spill] sm:$0xff] %v10348_v10  ;;  %v10356_v36 = vmul.f32 %v6058_v9, %v10186_v59  ;;  %7319 = vrcp.f32 %v3658_v11  ;;  %v6059_v16 = vadd.f32 -1.0, %v3275_v61  ;;  %v3659_v56 = vadd.f32 1.0, %v3275_v61  ;;  %v10369_v59 = vpop.f32.mrb[85].mxu1 }
 0x253   : > { %v10365_v1 = vpop.eup %7305  ;;  %v6062_v41 = vadd.f32 -1.0, %v3278_v12  ;;  %v3662_v49 = vadd.f32 1.0, %v3278_v12  ;;  %v6063_v34 = vadd.f32 -1.0, %v3279_v0  ;;  %v3663_v7 = vadd.f32 1.0, %v3279_v0  ;;  %v6848_v12 = vld [vmem:[%s12310_s2 + $0x394] ss:$40 sps:$4 sm:$0xff]  }
 0x254   : > { %12692 = vst [vmem:[#allocation149_spill] sm:$0xff] %v10356_v36  ;;  %v10371_v9 = vpop.eup %7307  ;;  %v10374_v61 = vmul.f32 %v6059_v16, %v10196_v6  ;;  %7321 = vrcp.f32 %v3659_v56  ;;  %v2771_v11 = vmin.f32 %v10353_v46, 20.0  ;;  %v10379_v60 = vadd.f32 %v9570_v57, %v9496_v39  ;;  %v10384_v0 = vpop.f32.mrb[134].mxu0  ;;  %v12698_v16 = vld [vmem:[#allocation21_spill] sm:$0xff]  ;;  %2473 = vmatprep.subr.bf16.mxu0 %v6848_v12 }
 0x255   : > { %12693 = vst [vmem:[#allocation300_spill] sm:$0xff] %v10371_v9  ;;  %12695 = vst [vmem:[#allocation302_spill] sm:$0xff] %v10384_v0  ;;  %v10386_v36 = vpop.f32.mrb[86].mxu1  ;;  %v10389_v42 = vmul.f32 %v6062_v41, %v10207_v47  ;;  %7323 = vrcp.f32 %v3662_v49  ;;  %v10392_v6 = vmul.f32 %v6063_v34, %v10216_v32  ;;  %v855_v56 = vsub.s32 6, %v12698_v16  ;;  %v10410_v32 = vld [vmem:[%s12311_s3] sm:$0xff]  ;;  %2474 = vmatpush1.bf16.msra.mxu0 %v6846_v31 }
 0x256   : > { %12694 = vst [vmem:[#allocation301_spill] sm:$0xff] %v10374_v61  ;;  %v10395_v61 = vpop.f32.mrb[135].mxu0  ;;  %v10397_v57 = vpop.f32.mrb[87].mxu1  ;;  %7325 = vrcp.f32 %v3663_v7  ;;  %v3026_v10 = vmul.f32 1.442695, %v2771_v11  ;;  %v2682_v0 = vmin.f32 %v10379_v60, 20.0  ;;  %v3798_v47 = vmul.f32 %v9721_v14, %v9647_v50 }
 0x257   : > { %12696 = vst [vmem:[#allocation303_spill] sm:$0xff] %v10389_v42  ;;  %12697 = vst [vmem:[#allocation304_spill] sm:$0xff] %v10392_v6  ;;  %v10399_v9 = vpop.eup %7309  ;;  %7327 = vpow2.f32 %v10250_v30  ;;  %v10413_v49 = vrot.slane %v10410_v32, %v855_v56  ;;  %v10417_v34 = vadd.f32 %v9580_v18, %v9518_v38  ;;  %v859_v7 = vsub.s32 7, %v12698_v16  ;;  %v10434_v6 = vpop.f32.mrb[136].mxu0 }
 0x258   : > { %12699 = vst [vmem:[#allocation21_spill] sm:$0xff] %v10397_v57  ;;  %v10404_v41 = vpop.eup %7311  ;;  %7329 = vpow2.f32 %v2842_v62  ;;  %v2848_v50 = vmul.f32 1.442695, %v2682_v0  ;;  %v3799_v30 = vmul.f32 %v9786_v37, %v9748_v3  ;;  %v3802_v11 = vmul.f32 %v9801_v43, %v9755_v25  ;;  %12702 = vst [vmem:[#allocation307_spill] sm:$0xff] %v10434_v6  ;;  %v10444_v43 = vpop.f32.mrb[88].mxu1 }
 0x259   : > { %12700 = vst [vmem:[#allocation305_spill] sm:$0xff] %v10404_v41  ;;  %v10420_v14 = vpop.eup %7313  ;;  %7331 = vpow2.f32 %v3026_v10  ;;  %v2293_v18 = vadd.f32 %v9575_v35, %v10413_v49  ;;  %v2683_v56 = vmin.f32 %v10417_v34, 20.0  ;;  %v10432_v31 = vrot.slane %v10410_v32, %v859_v7  ;;  %12703 = vst [vmem:[#allocation308_spill] sm:$0xff] %v10444_v43  ;;  %v10446_v35 = vpop.f32.mrb[137].mxu0  ;;  %v6852_v10 = vld [vmem:[%s12310_s2 + $0x3e0] ss:$40 sps:$4 sm:$0xff]  }
 0x25a   : > { %v10426_v12 = vpop.eup %7315  ;;  %7333 = vpow2.f32 %v2848_v50  ;;  %v2297_v3 = vadd.f32 %v9587_v20, %v10413_v49  ;;  %v3803_v25 = vmul.f32 %v9811_v54, %v9763_v4  ;;  %v10442_v37 = vadd.f32 %v9600_v29, %v9496_v39  ;;  %12704 = vst [vmem:[#allocation309_spill] sm:$0xff] %v10446_v35  ;;  %v6854_v62 = vld [vmem:[%s12310_s2 + $0x3e4] ss:$40 sps:$4 sm:$0xff]   ;;  %v12706_v54 = vld [vmem:[#allocation156_spill] sm:$0xff]  ;;  %v10460_v50 = vpop.f32.mrb[89].mxu1 }
 0x25b   : > { %12701 = vst [vmem:[#allocation306_spill] sm:$0xff] %v10426_v12  ;;  %v7318_v20 = vpop.eup %7317  ;;  %v10454_v0 = vmul.f32 %v3798_v47, %v2293_v18  ;;  %v2850_v4 = vmul.f32 1.442695, %v2683_v56  ;;  %v2295_v29 = vadd.f32 %v12706_v54, %v10432_v31  ;;  %v2299_v7 = vadd.f32 %v9592_v21, %v10432_v31  ;;  %12707 = vst [vmem:[#allocation156_spill] sm:$0xff] %v10460_v50  ;;  %v10462_v42 = vpop.f32.mrb[138].mxu0 }
 0x25c   : > { %12708 = vst [vmem:[#allocation311_spill] sm:$0xff] %v10462_v42  ;;  %v10464_v12 = vpop.eup %7319  ;;  %v3062_v35 = vadd.f32 1.0, %v7318_v20  ;;  %v10466_v41 = vmul.f32 %v3802_v11, %v2297_v3  ;;  %v2686_v43 = vmin.f32 %v10442_v37, 20.0  ;;  %v10471_v47 = vadd.f32 %v9607_v8, %v9518_v38  ;;  %2475 = vmatprep.subr.bf16.mxu0 %v6854_v62  ;;  %v10473_v18 = vpop.f32.mrb[90].mxu1 }
 0x25d   : > { %12705 = vst [vmem:[#allocation310_spill] sm:$0xff] %v10454_v0  ;;  %12709 = vst [vmem:[#allocation312_spill] sm:$0xff] %v10464_v12  ;;  %v10475_v56 = vpop.f32.mrb[139].mxu0  ;;  %7335 = vpow2.f32 %v2850_v4  ;;  %v10477_v21 = vmul.f32 %v3799_v30, %v2295_v29  ;;  %v10479_v54 = vmul.f32 %v3803_v25, %v2299_v7  ;;  %v10483_v11 = vadd.f32 %v9611_v55, %v9496_v39  ;;  %v10485_v3 = vpop.f32.mrb[91].mxu1  ;;  %v12718_v29 = vld [vmem:[#allocation164_spill] sm:$0xff] }
 0x25e   : > { %12710 = vst [vmem:[#allocation313_spill] sm:$0xff] %v10466_v41  ;;  %12711 = vst [vmem:[#allocation314_spill] sm:$0xff] %v10473_v18  ;;  %2476 = vmatpush1.bf16.msra.mxu0 %v6852_v10  ;;  %v10487_v20 = vpop.eup %7321  ;;  %v3190_v8 = vmul.f32 %v3062_v35, %v3062_v35  ;;  %v2856_v12 = vmul.f32 1.442695, %v2686_v43  ;;  %v2687_v4 = vmin.f32 %v10471_v47, 20.0  ;;  %v2303_v55 = vadd.f32 %v9613_v45, %v10413_v49  ;;  %v12721_v45 = vld [vmem:[#allocation165_spill] sm:$0xff] }
 0x25f   : > { %12712 = vst [vmem:[#allocation315_spill] sm:$0xff] %v10475_v56  ;;  %12713 = vst [vmem:[#allocation316_spill] sm:$0xff] %v10477_v21  ;;  %v10492_v30 = vpop.eup %7323  ;;  %v2690_v25 = vmin.f32 %v10483_v11, 20.0  ;;  %v3806_v10 = vmul.f32 %v9883_v19, %v9809_v23  ;;  %v10501_v7 = vadd.f32 %v12718_v29, %v9518_v38  ;;  %v10510_v23 = vpop.f32.mrb[140].mxu0 }
 0x260   : > { %12714 = vst [vmem:[#allocation317_spill] sm:$0xff] %v10479_v54  ;;  %12715 = vst [vmem:[#allocation318_spill] sm:$0xff] %v10485_v3  ;;  %v10503_v35 = vpop.eup %7325  ;;  %v5974_v62 = vadd.f32 -1.0, %v3190_v8  ;;  %v3574_v43 = vadd.f32 1.0, %v3190_v8  ;;  %7337 = vpow2.f32 %v2856_v12  ;;  %v2858_v0 = vmul.f32 1.442695, %v2687_v4 }
 0x261   : > { %12716 = vst [vmem:[#allocation319_spill] sm:$0xff] %v10487_v20  ;;  %12717 = vst [vmem:[#allocation320_spill] sm:$0xff] %v10492_v30  ;;  %v7328_v41 = vpop.eup %7327  ;;  %v2864_v54 = vmul.f32 1.442695, %v2690_v25  ;;  %v10505_v21 = vmul.f32 %v3806_v10, %v2303_v55  ;;  %v2691_v30 = vmin.f32 %v10501_v7, 20.0  ;;  %v2305_v20 = vadd.f32 %v12721_v45, %v10432_v31  ;;  %v10517_v8 = vpop.f32.mrb[92].mxu1 }
 0x262   : > { %12719 = vst [vmem:[#allocation164_spill] sm:$0xff] %v10503_v35  ;;  %12722 = vst [vmem:[#allocation165_spill] sm:$0xff] %v10510_v23  ;;  %v7330_v19 = vpop.eup %7329  ;;  %v10513_v29 = vmul.f32 %v5974_v62, %v10223_v51  ;;  %7339 = vrcp.f32 %v3574_v43  ;;  %v3154_v35 = vadd.f32 1.0, %v7328_v41  ;;  %v3807_v12 = vmul.f32 %v9905_v48, %v9837_v15  ;;  %v10519_v4 = vpop.f32.mrb[141].mxu0  ;;  %v12725_v45 = vld [vmem:[#allocation168_spill] sm:$0xff] }
 0x263   : > { %12720 = vst [vmem:[#allocation321_spill] sm:$0xff] %v10505_v21  ;;  %12723 = vst [vmem:[#allocation322_spill] sm:$0xff] %v10517_v8  ;;  %v7332_v25 = vpop.eup %7331  ;;  %v3063_v55 = vadd.f32 1.0, %v7330_v19  ;;  %7341 = vpow2.f32 %v2858_v0  ;;  %v2866_v10 = vmul.f32 1.442695, %v2691_v30  ;;  %v2307_v21 = vadd.f32 %v12725_v45, %v10413_v49  ;;  %v10523_v23 = vpop.f32.mrb[93].mxu1 }
 0x264   : > { %12724 = vst [vmem:[#allocation323_spill] sm:$0xff] %v10519_v4  ;;  %12726 = vst [vmem:[#allocation168_spill] sm:$0xff] %v10523_v23  ;;  %v6858_v51 = vld [vmem:[%s12310_s2 + $0x430] ss:$40 sps:$4 sm:$0xff]   ;;  %v7334_v41 = vpop.eup %7333  ;;  %v3282_v62 = vmul.f32 %v3154_v35, %v3154_v35  ;;  %v3155_v48 = vadd.f32 1.0, %v7332_v25  ;;  %7343 = vpow2.f32 %v2864_v54  ;;  %v10528_v15 = vmul.f32 %v3807_v12, %v2305_v20  ;;  %v10533_v30 = vpop.f32.mrb[142].mxu0 }
 0x265   : > { %v6860_v0 = vld [vmem:[%s12310_s2 + $0x434] ss:$40 sps:$4 sm:$0xff]   ;;  %12728 = vst [vmem:[#allocation325_spill] sm:$0xff] %v10533_v30  ;;  %v10535_v43 = vpop.f32.mrb[94].mxu1  ;;  %v3191_v19 = vmul.f32 %v3063_v55, %v3063_v55  ;;  %v3066_v45 = vadd.f32 1.0, %v7334_v41  ;;  %7345 = vpow2.f32 %v2866_v10  ;;  %v12730_v23 = vld [vmem:[#allocation209_spill] sm:$0xff] }
 0x266   : > { %12727 = vst [vmem:[#allocation324_spill] sm:$0xff] %v10528_v15  ;;  %12729 = vst [vmem:[#allocation326_spill] sm:$0xff] %v10535_v43  ;;  %v12731_v4 = vld [vmem:[#allocation80_spill] sm:$0xff]  ;;  %v10539_v3 = vpop.f32.mrb[143].mxu0  ;;  %v10541_v35 = vpop.f32.mrb[95].mxu1  ;;  %v6066_v54 = vadd.f32 -1.0, %v3282_v62  ;;  %v3283_v12 = vmul.f32 %v3155_v48, %v3155_v48  ;;  %2477 = vmatprep.subr.bf16.mxu0 %v6860_v0 }
 0x267   : > { %v3810_v8 = vmul.f32 %v12731_v4, %v12730_v23  ;;  %12732 = vst [vmem:[#allocation209_spill] sm:$0xff] %v10539_v3  ;;  %12733 = vst [vmem:[#allocation80_spill] sm:$0xff] %v10541_v35  ;;  %v3666_v20 = vadd.f32 1.0, %v3282_v62  ;;  %v12734_v25 = vld [vmem:[#allocation171_spill] sm:$0xff]  ;;  %v7336_v30 = vpop.eup %7335  ;;  %v5975_v56 = vadd.f32 -1.0, %v3191_v19  ;;  %v3575_v43 = vadd.f32 1.0, %v3191_v19  ;;  %2478 = vmatpush1.bf16.msra.mxu0 %v6858_v51 }
 0x268   : > { %v2309_v15 = vadd.f32 %v12734_v25, %v10432_v31  ;;  %v3194_v55 = vmul.f32 %v3066_v45, %v3066_v45  ;;  %v12736_v10 = vld [vmem:[#allocation141_spill] sm:$0xff]  ;;  %v6067_v4 = vadd.f32 -1.0, %v3283_v12  ;;  %v3667_v35 = vadd.f32 1.0, %v3283_v12  ;;  %v12740_v51 = vld [vmem:[#allocation230_spill] sm:$0xff]  ;;  %v10558_v45 = vpop.f32.mrb[144].mxu0 }
 0x269   : > { %v10545_v41 = vmul.f32 %v3810_v8, %v2307_v21  ;;  %v10548_v23 = vmul.f32 %v6066_v54, %v12736_v10  ;;  %7347 = vrcp.f32 %v3666_v20  ;;  %v10551_v62 = vmul.f32 %v5975_v56, %v10254_v28  ;;  %v12739_v8 = vld [vmem:[#allocation211_spill] sm:$0xff]  ;;  %v6864_v54 = vld [vmem:[%s12310_s2 + $0x480] ss:$40 sps:$4 sm:$0xff]   ;;  %v6866_v28 = vld [vmem:[%s12310_s2 + $0x484] ss:$40 sps:$4 sm:$0xff]  }
 0x26a   : > { %7349 = vrcp.f32 %v3575_v43  ;;  %v5978_v48 = vadd.f32 -1.0, %v3194_v55  ;;  %v3578_v25 = vadd.f32 1.0, %v3194_v55  ;;  %v7338_v0 = vpop.eup %7337  ;;  %v10554_v3 = vmul.f32 %v6067_v4, %v10353_v46  ;;  %12741 = vst [vmem:[#allocation211_spill] sm:$0xff] %v10558_v45  ;;  %v12745_v10 = vld [vmem:[#allocation179_spill] sm:$0xff]  ;;  %2479 = vmatprep.subr.bf16.mxu0 %v6866_v28 }
 0x26b   : > { %12735 = vst [vmem:[#allocation171_spill] sm:$0xff] %v10545_v41  ;;  %12737 = vst [vmem:[#allocation141_spill] sm:$0xff] %v10548_v23  ;;  %7351 = vrcp.f32 %v3667_v35  ;;  %v3067_v21 = vadd.f32 1.0, %v7336_v30  ;;  %v3811_v19 = vmul.f32 %v12740_v51, %v12739_v8  ;;  %v3070_v46 = vadd.f32 1.0, %v7338_v0  ;;  %v12742_v30 = vld [vmem:[#allocation177_spill] sm:$0xff]  ;;  %v10573_v35 = vpop.f32.mrb[145].mxu0  ;;  %2480 = vmatpush1.bf16.msra.mxu0 %v6864_v54 }
 0x26c   : > { %12738 = vst [vmem:[#allocation327_spill] sm:$0xff] %v10554_v3  ;;  %v10567_v56 = vmul.f32 %v5978_v48, %v10379_v60  ;;  %7353 = vrcp.f32 %v3578_v25  ;;  %v10571_v43 = vadd.f32 %v12742_v30, %v9496_v39  ;;  %12743 = vst [vmem:[#allocation230_spill] sm:$0xff] %v10573_v35  ;;  %v10575_v20 = vpop.eup %7339  ;;  %v10581_v4 = vadd.f32 %v12745_v10, %v9518_v38  ;;  %v12746_v60 = vld [vmem:[#allocation180_spill] sm:$0xff]  ;;  %v10587_v25 = vpop.f32.mrb[146].mxu0  ;;  %v12748_v30 = vld [vmem:[#allocation182_spill] sm:$0xff] }
 0x26d   : > { %v3195_v12 = vmul.f32 %v3067_v21, %v3067_v21  ;;  %v10577_v55 = vmul.f32 %v3811_v19, %v2309_v15  ;;  %v10585_v48 = vadd.f32 %v12746_v60, %v9496_v39  ;;  %12747 = vst [vmem:[#allocation179_spill] sm:$0xff] %v10587_v25  ;;  %v7342_v0 = vpop.eup %7341  ;;  %v3198_v8 = vmul.f32 %v3070_v46, %v3070_v46  ;;  %v12749_v15 = vld [vmem:[#allocation237_spill] sm:$0xff]  ;;  %v12750_v19 = vld [vmem:[#allocation259_spill] sm:$0xff]  ;;  %v10594_v10 = vpop.f32.mrb[147].mxu0 }
 0x26e   : > { %v2694_v51 = vmin.f32 %v10571_v43, 20.0  ;;  %v2313_v21 = vadd.f32 %v12748_v30, %v10413_v49  ;;  %v3814_v41 = vmul.f32 %v12750_v19, %v12749_v15  ;;  %12751 = vst [vmem:[#allocation180_spill] sm:$0xff] %v10594_v10  ;;  %v3071_v45 = vadd.f32 1.0, %v7342_v0 }
 0x26f   : > { %12744 = vst [vmem:[#allocation177_spill] sm:$0xff] %v10577_v55  ;;  %v7344_v55 = vpop.eup %7343  ;;  %v5979_v35 = vadd.f32 -1.0, %v3195_v12  ;;  %v3579_v60 = vadd.f32 1.0, %v3195_v12  ;;  %v2695_v28 = vmin.f32 %v10581_v4, 20.0  ;;  %v5982_v3 = vadd.f32 -1.0, %v3198_v8 }
 0x270   : > { %v7346_v25 = vpop.eup %7345  ;;  %v3582_v46 = vadd.f32 1.0, %v3198_v8  ;;  %v3074_v23 = vadd.f32 1.0, %v7344_v55  ;;  %v2872_v18 = vmul.f32 1.442695, %v2694_v51  ;;  %v3199_v30 = vmul.f32 %v3071_v45, %v3071_v45  ;;  %v10605_v55 = vpop.f32.mrb[148].mxu0 }
 0x271   : > { %v10598_v42 = vmul.f32 %v5979_v35, %v10417_v34  ;;  %7355 = vrcp.f32 %v3579_v60  ;;  %v3075_v15 = vadd.f32 1.0, %v7346_v25  ;;  %v10601_v54 = vmul.f32 %v5982_v3, %v10442_v37  ;;  %12753 = vst [vmem:[#allocation237_spill] sm:$0xff] %v10605_v55  ;;  %v6870_v34 = vld [vmem:[%s12310_s2 + $0x4d0] ss:$40 sps:$4 sm:$0xff]   ;;  %v6872_v25 = vld [vmem:[%s12310_s2 + $0x4d4] ss:$40 sps:$4 sm:$0xff]  }
 0x272   : > { %7357 = vrcp.f32 %v3582_v46  ;;  %v3202_v19 = vmul.f32 %v3074_v23, %v3074_v23  ;;  %v2874_v12 = vmul.f32 1.442695, %v2695_v28  ;;  %v5983_v10 = vadd.f32 -1.0, %v3199_v30  ;;  %v10613_v23 = vpop.f32.mrb[149].mxu0  ;;  %2481 = vmatprep.subr.bf16.mxu0 %v6872_v25  ;;  %v12765_v25 = vld [vmem:[#allocation269_spill] sm:$0xff] }
 0x273   : > { %v10603_v0 = vpop.eup %7347  ;;  %v3583_v50 = vadd.f32 1.0, %v3199_v30  ;;  %v3203_v6 = vmul.f32 %v3075_v15, %v3075_v15  ;;  %7359 = vpow2.f32 %v2872_v18  ;;  %v2698_v3 = vmin.f32 %v10585_v48, 20.0  ;;  %12754 = vst [vmem:[#allocation259_spill] sm:$0xff] %v10613_v23  ;;  %v10623_v28 = vpop.f32.mrb[150].mxu0  ;;  %2482 = vmatpush1.bf16.msra.mxu0 %v6870_v34  ;;  %v12769_v34 = vld [vmem:[#allocation189_spill] sm:$0xff] }
 0x274   : > { %12752 = vst [vmem:[#allocation182_spill] sm:$0xff] %v10603_v0  ;;  %v10610_v45 = vpop.eup %7349  ;;  %v5986_v35 = vadd.f32 -1.0, %v3202_v19  ;;  %v3586_v37 = vadd.f32 1.0, %v3202_v19  ;;  %7361 = vpow2.f32 %v2874_v12  ;;  %v10621_v8 = vmul.f32 %v5983_v10, %v10471_v47  ;;  %12756 = vst [vmem:[#allocation329_spill] sm:$0xff] %v10623_v28  ;;  %v10632_v12 = vpop.f32.mrb[151].mxu0  ;;  %v12760_v10 = vld [vmem:[#allocation184_spill] sm:$0xff] }
 0x275   : > { %v10618_v18 = vpop.eup %7351  ;;  %7363 = vrcp.f32 %v3583_v50  ;;  %v5987_v51 = vadd.f32 -1.0, %v3203_v6  ;;  %v3587_v60 = vadd.f32 1.0, %v3203_v6  ;;  %v2880_v15 = vmul.f32 1.442695, %v2698_v3  ;;  %12758 = vst [vmem:[#allocation331_spill] sm:$0xff] %v10632_v12  ;;  %v12759_v6 = vld [vmem:[#allocation183_spill] sm:$0xff] }
 0x276   : > { %12755 = vst [vmem:[#allocation328_spill] sm:$0xff] %v10618_v18  ;;  %v10625_v46 = vpop.eup %7353  ;;  %v10628_v30 = vmul.f32 %v5986_v35, %v10483_v11  ;;  %7365 = vrcp.f32 %v3586_v37  ;;  %v10630_v19 = vmul.f32 %v3814_v41, %v2313_v21  ;;  %v10639_v50 = vadd.f32 %v12759_v6, %v9518_v38  ;;  %v12761_v11 = vld [vmem:[#allocation246_spill] sm:$0xff]  ;;  %v12762_v35 = vld [vmem:[#allocation112_spill] sm:$0xff]  ;;  %v12763_v21 = vld [vmem:[#allocation185_spill] sm:$0xff]  ;;  %v10671_v55 = vpop.f32.mrb[152].mxu0 }
 0x277   : > { %v10635_v47 = vmul.f32 %v5987_v51, %v10501_v7  ;;  %7367 = vrcp.f32 %v3587_v60  ;;  %v2315_v28 = vadd.f32 %v12760_v10, %v10432_v31  ;;  %v3815_v41 = vmul.f32 %v12762_v35, %v12761_v11  ;;  %v12764_v3 = vld [vmem:[#allocation250_spill] sm:$0xff]  ;;  %v12768_v12 = vld [vmem:[#allocation272_spill] sm:$0xff]  ;;  %12775 = vst [vmem:[#allocation246_spill] sm:$0xff] %v10671_v55 }
 0x278   : > { %12757 = vst [vmem:[#allocation330_spill] sm:$0xff] %v10630_v19  ;;  %7369 = vpow2.f32 %v2880_v15  ;;  %v2317_v37 = vadd.f32 %v12763_v21, %v10413_v49  ;;  %v3818_v7 = vmul.f32 %v12765_v25, %v12764_v3  ;;  %v2699_v51 = vmin.f32 %v10639_v50, 20.0  ;;  %v12766_v60 = vld [vmem:[#allocation186_spill] sm:$0xff]  ;;  %v12767_v19 = vld [vmem:[#allocation260_spill] sm:$0xff] }
 0x279   : > { %v2319_v6 = vadd.f32 %v12766_v60, %v10432_v31  ;;  %v3819_v10 = vmul.f32 %v12768_v12, %v12767_v19  ;;  %v10656_v15 = vadd.f32 %v12769_v34, %v9496_v39  ;;  %v10658_v11 = vmul.f32 %v3815_v41, %v2315_v28  ;;  %v12772_v21 = vld [vmem:[#allocation190_spill] sm:$0xff]  ;;  %v12773_v25 = vld [vmem:[#allocation192_spill] sm:$0xff]  ;;  %v12774_v60 = vld [vmem:[#allocation5_spill] sm:$0xff] }
 0x27a   : > { %v10660_v35 = vmul.f32 %v3818_v7, %v2317_v37  ;;  %v10664_v3 = vadd.f32 %v12772_v21, %v9518_v38  ;;  %v10668_v23 = vadd.f32 %v12773_v25, %v9496_v39  ;;  %2484 = vmatmul.mubr.bf16.vlgmr.msra.gmra.mrb[160].mxu0 %v12774_v60  ;;  %v2882_v12 = vmul.f32 1.442695, %v2699_v51  ;;  %v12777_v41 = vld [vmem:[#allocation193_spill] sm:$0xff]  ;;  %v10680_v7 = vpop.f32.mrb[153].mxu0  ;;  %v7667_v21 = vld [vmem:[%s7948_s29 + $0x14] ss:$8 sps:$4 sm:$0xff]  }
 0x27b   : > { %12770 = vst [vmem:[#allocation183_spill] sm:$0xff] %v10658_v11  ;;  %v10673_v19 = vpop.eup %7355  ;;  %v10675_v34 = vmul.f32 %v3819_v10, %v2319_v6  ;;  %v2702_v28 = vmin.f32 %v10656_v15, 20.0  ;;  %v2323_v37 = vadd.f32 %v12777_v41, %v10413_v49  ;;  %12778 = vst [vmem:[#allocation185_spill] sm:$0xff] %v10680_v7  ;;  %2493 = vmatprep.mubr.bf16.mxu0 %v7667_v21  ;;  %v12779_v6 = vld [vmem:[#allocation195_spill] sm:$0xff]  ;;  %v12781_v21 = vld [vmem:[#allocation196_spill] sm:$0xff] }
 0x27c   : > { %12771 = vst [vmem:[#allocation184_spill] sm:$0xff] %v10660_v35  ;;  %v10683_v39 = vpop.eup %7357  ;;  %v2703_v25 = vmin.f32 %v10664_v3, 20.0  ;;  %v2706_v60 = vmin.f32 %v10668_v23, 20.0  ;;  %v3822_v51 = vmul.f32 %v10346_v52, %v10294_v17  ;;  %v10691_v10 = vadd.f32 %v12779_v6, %v9518_v38  ;;  %v10693_v35 = vpop.f32.mrb[154].mxu0 }
 0x27d   : > { %12776 = vst [vmem:[#allocation112_spill] sm:$0xff] %v10675_v34  ;;  %12780 = vst [vmem:[#allocation250_spill] sm:$0xff] %v10693_v35  ;;  %v7360_v41 = vpop.eup %7359  ;;  %7371 = vpow2.f32 %v2882_v12  ;;  %v2888_v34 = vmul.f32 1.442695, %v2702_v28  ;;  %v2325_v11 = vadd.f32 %v12781_v21, %v10432_v31  ;;  %v3823_v7 = vmul.f32 %v10365_v1, %v10300_v22  ;;  %v10699_v55 = vpop.f32.mrb[155].mxu0  ;;  %v12784_v22 = vld [vmem:[#allocation197_spill] sm:$0xff] }
 0x27e   : > { %v7362_v18 = vpop.eup %7361  ;;  %v3078_v0 = vadd.f32 1.0, %v7360_v41  ;;  %v2890_v17 = vmul.f32 1.442695, %v2703_v25  ;;  %v2896_v52 = vmul.f32 1.442695, %v2706_v60  ;;  %v10701_v57 = vmul.f32 %v3822_v51, %v2323_v37 }
 0x27f   : > { %v10703_v38 = vpop.eup %7363  ;;  %v3079_v6 = vadd.f32 1.0, %v7362_v18  ;;  %7373 = vpow2.f32 %v2888_v34  ;;  %v2707_v12 = vmin.f32 %v10691_v10, 20.0  ;;  %v10706_v28 = vmul.f32 %v3823_v7, %v2325_v11  ;;  %v12785_v34 = vld [vmem:[#allocation198_spill] sm:$0xff] }
 0x280   : > { %12782 = vst [vmem:[#allocation269_spill] sm:$0xff] %v10701_v57  ;;  %v10708_v21 = vpop.eup %7365  ;;  %v3206_v35 = vmul.f32 %v3078_v0, %v3078_v0  ;;  %7375 = vpow2.f32 %v2890_v17  ;;  %v2327_v1 = vadd.f32 %v12784_v22, %v10413_v49  ;;  %v3826_v25 = vmul.f32 %v10399_v9, %v10321_v24  ;;  %v12787_v22 = vld [vmem:[#allocation6_spill] sm:$0xff] }
 0x281   : > { %12783 = vst [vmem:[#allocation186_spill] sm:$0xff] %v10706_v28  ;;  %v10714_v37 = vpop.eup %7367  ;;  %v3207_v60 = vmul.f32 %v3079_v6, %v3079_v6  ;;  %7377 = vpow2.f32 %v2896_v52  ;;  %v2898_v18 = vmul.f32 1.442695, %v2707_v12  ;;  %v2329_v11 = vadd.f32 %v12785_v34, %v10432_v31  ;;  %v10723_v6 = vpop.f32.mrb[156].mxu0  ;;  %v7668_v52 = vld [vmem:[%s7948_s29 + $0x24] ss:$8 sps:$4 sm:$0xff]  }
 0x282   : > { %v7370_v7 = vpop.eup %7369  ;;  %v5990_v51 = vadd.f32 -1.0, %v3206_v35  ;;  %v3590_v41 = vadd.f32 1.0, %v3206_v35  ;;  %v10718_v0 = vmul.f32 %v3826_v25, %v2327_v1  ;;  %v3827_v17 = vmul.f32 %v10420_v14, %v10336_v26  ;;  %2494 = vmatmul.mubr.bf16.gmra.mrb[164].mxu0 %v12787_v22  ;;  %12788 = vst [vmem:[#allocation272_spill] sm:$0xff] %v10723_v6  ;;  %v10732_v25 = vpop.f32.mrb[157].mxu0  ;;  %v12796_v22 = vld [vmem:[#allocation212_spill] sm:$0xff] }
 0x283   : > { %v5991_v24 = vadd.f32 -1.0, %v3207_v60  ;;  %v3591_v9 = vadd.f32 1.0, %v3207_v60  ;;  %v3082_v57 = vadd.f32 1.0, %v7370_v7  ;;  %7379 = vpow2.f32 %v2898_v18  ;;  %2503 = vmatprep.mubr.bf16.mxu0 %v7668_v52  ;;  %12790 = vst [vmem:[#allocation190_spill] sm:$0xff] %v10732_v25  ;;  %v10738_v18 = vpop.f32.mrb[158].mxu0  ;;  %v12793_v7 = vld [vmem:[#allocation30_spill] sm:$0xff] }
 0x284   : > { %12786 = vst [vmem:[#allocation260_spill] sm:$0xff] %v10718_v0  ;;  %v10727_v12 = vmul.f32 %v5990_v51, %v10571_v43  ;;  %7381 = vrcp.f32 %v3590_v41  ;;  %v10729_v35 = vmul.f32 %v3827_v17, %v2329_v11  ;;  %v847_v1 = vsub.s32 4, %v12698_v16  ;;  %12791 = vst [vmem:[#allocation192_spill] sm:$0xff] %v10738_v18  ;;  %v12792_v43 = vld [vmem:[#allocation24_spill] sm:$0xff]  ;;  %v12794_v51 = vld [vmem:[#allocation25_spill] sm:$0xff] }
 0x285   : > { %v10735_v26 = vmul.f32 %v5991_v24, %v10581_v4  ;;  %7383 = vrcp.f32 %v3591_v9  ;;  %v3210_v14 = vmul.f32 %v3082_v57, %v3082_v57  ;;  %v851_v60 = vsub.s32 5, %v12698_v16  ;;  %v12795_v41 = vld [vmem:[#allocation32_spill] sm:$0xff]  ;;  %v10749_v4 = vpop.f32.mrb[159].mxu0  ;;  %v12804_v18 = vld [vmem:[#allocation145_spill] sm:$0xff] }
 0x286   : > { %12789 = vst [vmem:[#allocation189_spill] sm:$0xff] %v10729_v35  ;;  %v10741_v34 = vrot.slane %v10410_v32, %v847_v1  ;;  %v3797_v11 = vmul.f32 %v12793_v7, %v12792_v43  ;;  %v3800_v17 = vmul.f32 %v12795_v41, %v12794_v51  ;;  %v2333_v52 = vadd.f32 %v12796_v22, %v10413_v49  ;;  %v12798_v43 = vld [vmem:[#allocation204_spill] sm:$0xff]  ;;  %v12799_v51 = vld [vmem:[#allocation85_spill] sm:$0xff]  ;;  %v12800_v35 = vld [vmem:[#allocation26_spill] sm:$0xff] }
 0x287   : > { %12797 = vst [vmem:[#allocation5_spill] sm:$0xff] %v10749_v4  ;;  %v7372_v24 = vpop.eup %7371  ;;  %v5994_v57 = vadd.f32 -1.0, %v3210_v14  ;;  %v3594_v9 = vadd.f32 1.0, %v3210_v14  ;;  %v10752_v16 = vrot.slane %v10410_v32, %v851_v60  ;;  %v3830_v1 = vmul.f32 %v10575_v20, %v10513_v29  ;;  %v12801_v22 = vld [vmem:[#allocation33_spill] sm:$0xff]  ;;  %v12802_v32 = vld [vmem:[#allocation207_spill] sm:$0xff] }
 0x288   : > { %v3083_v0 = vadd.f32 1.0, %v7372_v24  ;;  %v2100_v7 = vadd.f32 %v12798_v43, %v10741_v34  ;;  %v2104_v41 = vadd.f32 %v12799_v51, %v10741_v34  ;;  %v3801_v28 = vmul.f32 %v12801_v22, %v12800_v35  ;;  %v12805_v35 = vld [vmem:[#allocation8_spill] sm:$0xff] }
 0x289   : > { %v7374_v4 = vpop.eup %7373  ;;  %v10763_v14 = vmul.f32 %v5994_v57, %v10585_v48  ;;  %7385 = vrcp.f32 %v3594_v9  ;;  %v2102_v60 = vadd.f32 %v12802_v32, %v10752_v16  ;;  %v10767_v29 = vmul.f32 %v3830_v1, %v2333_v52  ;;  %v12806_v57 = vld [vmem:[#allocation213_spill] sm:$0xff]  ;;  %v12807_v52 = vld [vmem:[#allocation214_spill] sm:$0xff]  ;;  %v7669_v32 = vld [vmem:[%s7948_s29 + $0x34] ss:$8 sps:$4 sm:$0xff]  }
 0x28a   : > { %v7376_v20 = vpop.eup %7375  ;;  %v3211_v24 = vmul.f32 %v3083_v0, %v3083_v0  ;;  %v3086_v43 = vadd.f32 1.0, %v7374_v4  ;;  %v10770_v25 = vmul.f32 %v12804_v18, %v2100_v7  ;;  %v10772_v51 = vmul.f32 %v3800_v17, %v2104_v41  ;;  %2504 = vmatmul.mubr.bf16.gmra.mrb[168].mxu0 %v12805_v35 }
 0x28b   : > { %12803 = vst [vmem:[#allocation193_spill] sm:$0xff] %v10767_v29  ;;  %v7378_v22 = vpop.eup %7377  ;;  %v3087_v6 = vadd.f32 1.0, %v7376_v20  ;;  %v10775_v48 = vmul.f32 %v3797_v11, %v2102_v60  ;;  %v2106_v9 = vadd.f32 %v12806_v57, %v10752_v16  ;;  %v2335_v1 = vadd.f32 %v12807_v52, %v10432_v31  ;;  %2513 = vmatprep.mubr.bf16.mxu0 %v7669_v32 }
 0x28c   : > { %v5995_v0 = vadd.f32 -1.0, %v3211_v24  ;;  %v3595_v4 = vadd.f32 1.0, %v3211_v24  ;;  %v3214_v18 = vmul.f32 %v3086_v43, %v3086_v43  ;;  %v3090_v7 = vadd.f32 1.0, %v7378_v22 }
 0x28d   : > { %v7380_v17 = vpop.eup %7379  ;;  %v3215_v41 = vmul.f32 %v3087_v6, %v3087_v6  ;;  %v3929_v20 = vmul.f32 %v3801_v28, %v2106_v9  ;;  %v3831_v11 = vmul.f32 %v10610_v45, %v10551_v62  ;;  %v12808_v62 = vld [vmem:[#allocation86_spill] sm:$0xff] }
 0x28e   : > { %v10786_v60 = vpop.eup %7381  ;;  %v10789_v57 = vmul.f32 %v5995_v0, %v10639_v50  ;;  %7387 = vrcp.f32 %v3595_v4  ;;  %v5998_v52 = vadd.f32 -1.0, %v3214_v18  ;;  %v3598_v32 = vadd.f32 1.0, %v3214_v18 }
 0x28f   : > { %v10791_v24 = vpop.eup %7383  ;;  %v5999_v43 = vadd.f32 -1.0, %v3215_v41  ;;  %v3599_v22 = vadd.f32 1.0, %v3215_v41  ;;  %v3218_v6 = vmul.f32 %v3090_v7, %v3090_v7  ;;  %v3091_v29 = vadd.f32 1.0, %v7380_v17  ;;  %v12810_v17 = vld [vmem:[#allocation11_spill] sm:$0xff] }
 0x290   : > { %v10794_v35 = vmul.f32 %v5998_v52, %v10656_v15  ;;  %7389 = vrcp.f32 %v3598_v32  ;;  %v10796_v28 = vmul.f32 %v3831_v11, %v2335_v1  ;;  %v2337_v45 = vadd.f32 %v12808_v62, %v10413_v49  ;;  %v12809_v15 = vld [vmem:[#allocation90_spill] sm:$0xff]  ;;  %v12811_v11 = vld [vmem:[#allocation87_spill] sm:$0xff] }
 0x291   : > { %v10801_v50 = vmul.f32 %v5999_v43, %v10664_v3  ;;  %7391 = vrcp.f32 %v3599_v22  ;;  %v6002_v9 = vadd.f32 -1.0, %v3218_v6  ;;  %v3602_v0 = vadd.f32 1.0, %v3218_v6  ;;  %v12812_v52 = vld [vmem:[#allocation27_spill] sm:$0xff] }
 0x292   : > { %v3219_v4 = vmul.f32 %v3091_v29, %v3091_v29  ;;  %v3834_v18 = vmul.f32 %v10625_v46, %v10567_v56  ;;  %v2339_v7 = vadd.f32 %v12809_v15, %v10432_v31  ;;  %v3835_v1 = vmul.f32 %v10673_v19, %v10598_v42  ;;  %2514 = vmatmul.mubr.bf16.gmra.mrb[172].mxu0 %v12810_v17  ;;  %v12813_v32 = vld [vmem:[#allocation35_spill] sm:$0xff]  ;;  %v7670_v46 = vld [vmem:[%s7948_s29 + $0x44] ss:$8 sps:$4 sm:$0xff]  }
 0x293   : > { %v10810_v41 = vpop.eup %7385  ;;  %v10813_v3 = vmul.f32 %v6002_v9, %v10668_v23  ;;  %7393 = vrcp.f32 %v3602_v0  ;;  %v2110_v29 = vadd.f32 %v12811_v11, %v10741_v34  ;;  %v3804_v56 = vmul.f32 %v12813_v32, %v12812_v52  ;;  %2523 = vmatprep.mubr.bf16.mxu0 %v7670_v46  ;;  %v12814_v23 = vld [vmem:[#allocation216_spill] sm:$0xff]  ;;  %v12817_v17 = vld [vmem:[#allocation217_spill] sm:$0xff]  ;;  %v12821_v46 = vld [vmem:[#allocation219_spill] sm:$0xff] }
 0x294   : > { %v6003_v43 = vadd.f32 -1.0, %v3219_v4  ;;  %v3603_v22 = vadd.f32 1.0, %v3219_v4  ;;  %v10820_v6 = vmul.f32 %v3834_v18, %v2337_v45  ;;  %v10822_v42 = vmul.f32 %v3835_v1, %v2339_v7  ;;  %v12815_v9 = vld [vmem:[#allocation28_spill] sm:$0xff]  ;;  %v12818_v4 = vld [vmem:[#allocation29_spill] sm:$0xff]  ;;  %v12820_v7 = vld [vmem:[#allocation218_spill] sm:$0xff] }
 0x295   : > { %v10824_v19 = vmul.f32 %v3804_v56, %v2110_v29  ;;  %v2112_v62 = vadd.f32 %v12814_v23, %v10752_v16  ;;  %v12816_v0 = vld [vmem:[#allocation36_spill] sm:$0xff]  ;;  %v2114_v11 = vadd.f32 %v12817_v17, %v10741_v34  ;;  %v12819_v45 = vld [vmem:[#allocation37_spill] sm:$0xff]  ;;  %v2343_v1 = vadd.f32 %v12820_v7, %v10413_v49 }
 0x296   : > { %v3805_v15 = vmul.f32 %v12816_v0, %v12815_v9  ;;  %v10833_v52 = vmul.f32 %v6003_v43, %v10691_v10  ;;  %7395 = vrcp.f32 %v3603_v22  ;;  %v3808_v18 = vmul.f32 %v12819_v45, %v12818_v4  ;;  %v6801_v10 = vld [vmem:[%s12312_s4 + $0x100] ss:$8 sps:$4 sm:$0xff]   ;;  %v12822_v9 = vld [vmem:[#allocation31_spill] sm:$0xff]  ;;  %v12824_v4 = vld [vmem:[#allocation220_spill] sm:$0xff] }
 0x297   : > { %v3838_v32 = vmul.f32 %v10683_v39, %v10601_v54  ;;  %v4053_v56 = vpack.c.bf16 %v3929_v20, %v10775_v48  ;;  %v2116_v23 = vadd.f32 %v12821_v46, %v10752_v16  ;;  %v12823_v0 = vld [vmem:[#allocation38_spill] sm:$0xff]  ;;  %v3839_v54 = vmul.f32 %v10703_v38, %v10621_v8  ;;  %v6809_v39 = vld [vmem:[%s12312_s4 + $0x114] ss:$8 sps:$4 sm:$0xff]   ;;  %v12826_v45 = vld [vmem:[#allocation225_spill] sm:$0xff] }
 0x298   : > { %v3933_v29 = vmul.f32 %v3805_v15, %v2112_v62  ;;  %v7388_v43 = vpop.eup %7387  ;;  %v3936_v22 = vmul.f32 %v3808_v18, %v2114_v11  ;;  %v3809_v17 = vmul.f32 %v12823_v0, %v12822_v9  ;;  %v2345_v62 = vadd.f32 %v12824_v4, %v10432_v31  ;;  %v12825_v20 = vld [vmem:[#allocation222_spill] sm:$0xff] }
 0x299   : > { %v10856_v48 = vmul.f32 %v3838_v32, %v2343_v1  ;;  %4544 = vmatprep.mubr.bf16.mxu1 %v4053_v56  ;;  %v2347_v15 = vadd.f32 %v12825_v20, %v10413_v49  ;;  %v3842_v11 = vmul.f32 %v10708_v21, %v10628_v30  ;;  %v2349_v18 = vadd.f32 %v12826_v45, %v10432_v31  ;;  %v12828_v1 = vld [vmem:[#allocation223_spill] sm:$0xff]  ;;  %v12829_v30 = vld [vmem:[#allocation34_spill] sm:$0xff]  ;;  %v12835_v20 = vld [vmem:[#allocation40_spill] sm:$0xff] }
 0x29a   : > { %v7390_v7 = vpop.eup %7389  ;;  %v3937_v46 = vmul.f32 %v3809_v17, %v2116_v23  ;;  %v10864_v9 = vmul.f32 %v3839_v54, %v2345_v62  ;;  %v12827_v8 = vpack.c.bf16 %v10772_v51, %v10770_v25  ;;  %v3843_v38 = vmul.f32 %v10714_v37, %v10635_v47  ;;  %v12830_v21 = vld [vmem:[#allocation42_spill] sm:$0xff]  ;;  %v12832_v62 = vld [vmem:[#allocation39_spill] sm:$0xff]  ;;  %v12833_v54 = vld [vmem:[#allocation44_spill] sm:$0xff] }
 0x29b   : > { %v2120_v32 = vadd.f32 %v12828_v1, %v10741_v34  ;;  %v7392_v56 = vpop.eup %7391  ;;  %v10873_v0 = vmul.f32 %v3842_v11, %v2347_v15  ;;  %v3812_v4 = vmul.f32 %v12830_v21, %v12829_v30  ;;  %v12831_v23 = vld [vmem:[#allocation226_spill] sm:$0xff]  ;;  %v3813_v25 = vmul.f32 %v12833_v54, %v12832_v62  ;;  %v12834_v47 = vld [vmem:[#allocation227_spill] sm:$0xff]  ;;  %v12836_v45 = vld [vmem:[#allocation45_spill] sm:$0xff] }
 0x29c   : > { %4545 = vmatmul.mubr.bf16.vlgmr.msra.gmra.mrb[96].mxu1 %v12827_v8  ;;  %v2122_v17 = vadd.f32 %v12831_v23, %v10752_v16  ;;  %v10881_v51 = vmul.f32 %v3843_v38, %v2349_v18  ;;  %v2124_v37 = vadd.f32 %v12834_v47, %v10741_v34  ;;  %v3816_v15 = vmul.f32 %v12836_v45, %v12835_v20  ;;  %v6807_v8 = vld [vmem:[%s12312_s4 + $0x110] ss:$8 sps:$4 sm:$0xff]   ;;  %v6815_v23 = vld [vmem:[%s12312_s4 + $0x124] ss:$8 sps:$4 sm:$0xff]  }
 0x29d   : > { %4706 = vmatpush1.bf16.msra.mxu1 %v6801_v10  ;;  %v12837_v10 = vld [vmem:[#allocation228_spill] sm:$0xff]  ;;  %v7394_v1 = vpop.eup %7393  ;;  %v10892_v30 = vmul.f32 %v3812_v4, %v2120_v32  ;;  %v3846_v38 = vmul.f32 %v10786_v60, %v10727_v12  ;;  %v4057_v21 = vpack.c.bf16 %v3937_v46, %v3933_v29  ;;  %v12838_v62 = vld [vmem:[#allocation13_spill] sm:$0xff]  ;;  %v12841_v45 = vld [vmem:[#allocation46_spill] sm:$0xff]  ;;  %v3847_v60 = vmul.f32 %v10791_v24, %v10735_v26 }
 0x29e   : > { %v2353_v11 = vadd.f32 %v12837_v10, %v10413_v49  ;;  %4707 = vmatprep.subr.bf16.mxu1 %v6809_v39  ;;  %v3941_v18 = vmul.f32 %v3813_v25, %v2122_v17  ;;  %2524 = vmatmul.mubr.bf16.gmra.mrb[176].mxu0 %v12838_v62  ;;  %v10900_v54 = vmul.f32 %v3816_v15, %v2124_v37  ;;  %v12839_v47 = vld [vmem:[#allocation229_spill] sm:$0xff]  ;;  %v12842_v4 = vld [vmem:[#allocation232_spill] sm:$0xff]  ;;  %v12843_v46 = vld [vmem:[#allocation235_spill] sm:$0xff] }
 0x29f   : > { %v2126_v20 = vadd.f32 %v12839_v47, %v10752_v16  ;;  %v12840_v39 = vld [vmem:[#allocation41_spill] sm:$0xff]  ;;  %v2355_v17 = vadd.f32 %v12842_v4, %v10432_v31  ;;  %v7671_v25 = vld [vmem:[%s7948_s29 + $0x54] ss:$8 sps:$4 sm:$0xff]   ;;  %4554 = vmatprep.mubr.bf16.mxu1 %v4057_v21  ;;  %v4056_v29 = vpack.c.bf16 %v3936_v22, %v10824_v19  ;;  %v2357_v37 = vadd.f32 %v12843_v46, %v10413_v49  ;;  %v12844_v47 = vld [vmem:[#allocation238_spill] sm:$0xff] }
 0x2a0   : > { %v3817_v32 = vmul.f32 %v12841_v45, %v12840_v39  ;;  %2533 = vmatprep.mubr.bf16.mxu0 %v7671_v25  ;;  %v10909_v12 = vmul.f32 %v3846_v38, %v2353_v11  ;;  %v7396_v15 = vpop.eup %7395  ;;  %v3850_v62 = vmul.f32 %v10810_v41, %v10763_v14  ;;  %v2359_v39 = vadd.f32 %v12844_v47, %v10432_v31  ;;  %v6813_v26 = vld [vmem:[%s12312_s4 + $0x120] ss:$8 sps:$4 sm:$0xff]   ;;  %v12846_v38 = vld [vmem:[#allocation43_spill] sm:$0xff]  ;;  %v12848_v14 = vld [vmem:[#allocation236_spill] sm:$0xff] }
 0x2a1   : > { %4708 = vmatpush1.bf16.msra.mxu1 %v6807_v8  ;;  %v3851_v11 = vmul.f32 %v7388_v43, %v10789_v57  ;;  %v10924_v24 = vmul.f32 %v3847_v60, %v2355_v17  ;;  %v12845_v19 = vld [vmem:[#allocation233_spill] sm:$0xff]  ;;  %v12847_v21 = vld [vmem:[#allocation51_spill] sm:$0xff]  ;;  %v2132_v41 = vadd.f32 %v12848_v14, %v10752_v16  ;;  %v12852_v46 = vld [vmem:[#allocation48_spill] sm:$0xff] }
 0x2a2   : > { %v3945_v10 = vmul.f32 %v3817_v32, %v2126_v20  ;;  %v2130_v22 = vadd.f32 %v12845_v19, %v10741_v34  ;;  %v3820_v20 = vmul.f32 %v12847_v21, %v12846_v38  ;;  %4709 = vmatprep.subr.bf16.mxu1 %v6815_v23  ;;  %v6821_v57 = vld [vmem:[%s12312_s4 + $0x134] ss:$8 sps:$4 sm:$0xff]   ;;  %v10935_v43 = vmul.f32 %v3850_v62, %v2357_v37  ;;  %v12854_v19 = vld [vmem:[#allocation242_spill] sm:$0xff]  ;;  %v12856_v21 = vld [vmem:[#allocation49_spill] sm:$0xff] }
 0x2a3   : > { %v10937_v8 = vmul.f32 %v3851_v11, %v2359_v39  ;;  %v12849_v45 = vld [vmem:[#allocation47_spill] sm:$0xff]  ;;  %v12853_v47 = vld [vmem:[#allocation56_spill] sm:$0xff]  ;;  %v2363_v38 = vadd.f32 %v12854_v19, %v10413_v49  ;;  %v12857_v14 = vld [vmem:[#allocation57_spill] sm:$0xff] }
 0x2a4   : > { %4555 = vmatmul.mubr.bf16.gmra.mrb[100].mxu1 %v4056_v29  ;;  %v12850_v32 = vld [vmem:[#allocation55_spill] sm:$0xff]  ;;  %v10943_v60 = vmul.f32 %v3820_v20, %v2130_v22  ;;  %v3824_v23 = vmul.f32 %v12853_v47, %v12852_v46  ;;  %v3854_v29 = vmul.f32 %v7390_v7, %v10794_v35  ;;  %v4061_v62 = vpack.c.bf16 %v3945_v10, %v3941_v18  ;;  %v6827_v18 = vld [vmem:[%s12312_s4 + $0x144] ss:$8 sps:$4 sm:$0xff]   ;;  %v12860_v47 = vld [vmem:[#allocation252_spill] sm:$0xff] }
 0x2a5   : > { %v3821_v4 = vmul.f32 %v12850_v32, %v12849_v45  ;;  %v12851_v17 = vld [vmem:[#allocation239_spill] sm:$0xff]  ;;  %v3825_v45 = vmul.f32 %v12857_v14, %v12856_v21  ;;  %4710 = vmatpush1.bf16.msra.mxu1 %v6813_v26  ;;  %v3855_v7 = vmul.f32 %v7392_v56, %v10801_v50  ;;  %v4060_v26 = vpack.c.bf16 %v10900_v54, %v10892_v30  ;;  %v12863_v30 = vld [vmem:[#allocation50_spill] sm:$0xff]  ;;  %v12868_v21 = vld [vmem:[#allocation256_spill] sm:$0xff] }
 0x2a6   : > { %v2134_v25 = vadd.f32 %v12851_v17, %v10741_v34  ;;  %v12855_v39 = vld [vmem:[#allocation243_spill] sm:$0xff]  ;;  %v10959_v32 = vmul.f32 %v3854_v29, %v2363_v38  ;;  %v12858_v17 = vld [vmem:[#allocation244_spill] sm:$0xff]  ;;  %4711 = vmatprep.subr.bf16.mxu1 %v6821_v57  ;;  %4564 = vmatprep.mubr.bf16.mxu1 %v4061_v62  ;;  %v2369_v50 = vadd.f32 %v12860_v47, %v10432_v31  ;;  %v12861_v57 = vld [vmem:[#allocation253_spill] sm:$0xff] }
 0x2a7   : > { %v3949_v37 = vmul.f32 %v3821_v4, %v2132_v41  ;;  %v2136_v11 = vadd.f32 %v12855_v39, %v10752_v16  ;;  %v6819_v22 = vld [vmem:[%s12312_s4 + $0x130] ss:$8 sps:$4 sm:$0xff]   ;;  %v2365_v35 = vadd.f32 %v12858_v17, %v10432_v31  ;;  %v12859_v41 = vld [vmem:[#allocation249_spill] sm:$0xff]  ;;  %v3859_v56 = vmul.f32 %v7396_v15, %v10833_v52  ;;  %v12864_v54 = vld [vmem:[#allocation58_spill] sm:$0xff] }
 0x2a8   : > { %v10957_v20 = vmul.f32 %v3824_v23, %v2134_v25  ;;  %v2367_v4 = vadd.f32 %v12859_v41, %v10413_v49  ;;  %v3858_v25 = vmul.f32 %v7394_v1, %v10813_v3  ;;  %v2140_v23 = vadd.f32 %v12861_v57, %v10741_v34  ;;  %v12862_v19 = vld [vmem:[#allocation15_spill] sm:$0xff]  ;;  %v12867_v39 = vld [vmem:[#allocation201_spill] sm:$0xff]  ;;  %v12874_v57 = vld [vmem:[#allocation262_spill] sm:$0xff] }
 0x2a9   : > { %v3953_v10 = vmul.f32 %v3825_v45, %v2136_v11  ;;  %v10972_v46 = vmul.f32 %v3855_v7, %v2365_v35  ;;  %2534 = vmatmul.mubr.bf16.gmra.mrb[180].mxu0 %v12862_v19  ;;  %v3828_v29 = vmul.f32 %v12864_v54, %v12863_v30  ;;  %v12865_v62 = vld [vmem:[#allocation255_spill] sm:$0xff]  ;;  %4712 = vmatpush1.bf16.msra.mxu1 %v6819_v22  ;;  %v6825_v52 = vld [vmem:[%s12312_s4 + $0x140] ss:$8 sps:$4 sm:$0xff]   ;;  %v12869_v45 = vld [vmem:[#allocation52_spill] sm:$0xff] }
 0x2aa   : > { %v10980_v38 = vmul.f32 %v3858_v25, %v2367_v4  ;;  %v2373_v3 = vadd.f32 %v12865_v62, %v10413_v49  ;;  %v12866_v1 = vld [vmem:[#allocation187_spill] sm:$0xff]  ;;  %v10991_v15 = vmul.f32 %v3859_v56, %v2369_v50  ;;  %v2142_v14 = vadd.f32 %v12868_v21, %v10752_v16  ;;  %v12871_v7 = vld [vmem:[#allocation258_spill] sm:$0xff]  ;;  %4713 = vmatprep.subr.bf16.mxu1 %v6827_v18  ;;  %v12873_v50 = vld [vmem:[#allocation205_spill] sm:$0xff] }
 0x2ab   : > { %v3862_v11 = vmul.f32 %v12867_v39, %v12866_v1  ;;  %v12870_v17 = vld [vmem:[#allocation63_spill] sm:$0xff]  ;;  %v2375_v41 = vadd.f32 %v12871_v7, %v10432_v31  ;;  %v11002_v4 = vmul.f32 %v3828_v29, %v2140_v23  ;;  %v2144_v19 = vadd.f32 %v12874_v57, %v10741_v34  ;;  %v12875_v54 = vld [vmem:[#allocation53_spill] sm:$0xff]  ;;  %v12876_v62 = vld [vmem:[#allocation64_spill] sm:$0xff] }
 0x2ac   : > { %v3829_v35 = vmul.f32 %v12870_v17, %v12869_v45  ;;  %v6833_v22 = vld [vmem:[%s12312_s4 + $0x154] ss:$8 sps:$4 sm:$0xff]   ;;  %4565 = vmatmul.mubr.bf16.gmra.mrb[104].mxu1 %v4060_v26  ;;  %v3832_v1 = vmul.f32 %v12876_v62, %v12875_v54  ;;  %v12877_v18 = vld [vmem:[#allocation265_spill] sm:$0xff]  ;;  %v12881_v7 = vld [vmem:[#allocation54_spill] sm:$0xff] }
 0x2ad   : > { %v11004_v25 = vmul.f32 %v3862_v11, %v2373_v3  ;;  %v12872_v47 = vld [vmem:[#allocation191_spill] sm:$0xff]  ;;  %v2377_v39 = vadd.f32 %v12877_v18, %v10413_v49  ;;  %v12878_v21 = vld [vmem:[#allocation188_spill] sm:$0xff]  ;;  %v7672_v23 = vld [vmem:[%s7948_s29 + $0x64] ss:$8 sps:$4 sm:$0xff]   ;;  %v4065_v3 = vpack.c.bf16 %v3953_v10, %v3949_v37  ;;  %4714 = vmatpush1.bf16.msra.mxu1 %v6825_v52  ;;  %v4064_v18 = vpack.c.bf16 %v10957_v20, %v10943_v60 }
 0x2ae   : > { %v3863_v56 = vmul.f32 %v12873_v50, %v12872_v47  ;;  %v3957_v30 = vmul.f32 %v3829_v35, %v2142_v14  ;;  %v12879_v45 = vld [vmem:[#allocation203_spill] sm:$0xff]  ;;  %2543 = vmatprep.mubr.bf16.mxu0 %v7672_v23  ;;  %v12880_v11 = vld [vmem:[#allocation266_spill] sm:$0xff]  ;;  %v12882_v47 = vld [vmem:[#allocation65_spill] sm:$0xff]  ;;  %v11026_v50 = vmul.f32 %v3832_v1, %v2144_v19  ;;  %4715 = vmatprep.subr.bf16.mxu1 %v6833_v22 }
 0x2af   : > { %v3866_v26 = vmul.f32 %v12879_v45, %v12878_v21  ;;  %v2146_v17 = vadd.f32 %v12880_v11, %v10752_v16  ;;  %v3833_v14 = vmul.f32 %v12882_v47, %v12881_v7  ;;  %v6831_v35 = vld [vmem:[%s12312_s4 + $0x150] ss:$8 sps:$4 sm:$0xff]   ;;  %v12883_v54 = vld [vmem:[#allocation110_spill] sm:$0xff]  ;;  %4574 = vmatprep.mubr.bf16.mxu1 %v4065_v3  ;;  %v12888_v21 = vld [vmem:[#allocation69_spill] sm:$0xff] }
 0x2b0   : > { %v11017_v29 = vmul.f32 %v3863_v56, %v2375_v41  ;;  %v2379_v41 = vadd.f32 %v12883_v54, %v10432_v31  ;;  %v12884_v56 = vld [vmem:[#allocation194_spill] sm:$0xff]  ;;  %v12885_v37 = vld [vmem:[#allocation208_spill] sm:$0xff]  ;;  %v12886_v19 = vld [vmem:[#allocation115_spill] sm:$0xff] }
 0x2b1   : > { %v11028_v57 = vmul.f32 %v3866_v26, %v2377_v39  ;;  %v3867_v10 = vmul.f32 %v12885_v37, %v12884_v56  ;;  %v6839_v62 = vld [vmem:[%s12312_s4 + $0x164] ss:$8 sps:$4 sm:$0xff]   ;;  %v3961_v52 = vmul.f32 %v3833_v14, %v2146_v17  ;;  %v2150_v1 = vadd.f32 %v12886_v19, %v10741_v34  ;;  %v12887_v39 = vld [vmem:[#allocation59_spill] sm:$0xff]  ;;  %v12889_v23 = vld [vmem:[#allocation268_spill] sm:$0xff]  ;;  %4716 = vmatpush1.bf16.msra.mxu1 %v6831_v35 }
 0x2b2   : > { %v3836_v45 = vmul.f32 %v12888_v21, %v12887_v39  ;;  %v2383_v22 = vadd.f32 %v12889_v23, %v10413_v49  ;;  %v12890_v11 = vld [vmem:[#allocation199_spill] sm:$0xff]  ;;  %v12891_v7 = vld [vmem:[#allocation66_spill] sm:$0xff]  ;;  %v12893_v14 = vld [vmem:[#allocation17_spill] sm:$0xff]  ;;  %4717 = vmatprep.subr.bf16.mxu1 %v6839_v62 }
 0x2b3   : > { %v11043_v26 = vmul.f32 %v3867_v10, %v2379_v41  ;;  %v3870_v47 = vmul.f32 %v12891_v7, %v12890_v11  ;;  %v12892_v3 = vld [vmem:[#allocation147_spill] sm:$0xff]  ;;  %2544 = vmatmul.mubr.bf16.gmra.mrb[184].mxu0 %v12893_v14  ;;  %v12894_v20 = vld [vmem:[#allocation60_spill] sm:$0xff]  ;;  %v12895_v54 = vld [vmem:[#allocation70_spill] sm:$0xff] }
 0x2b4   : > { %v2152_v17 = vadd.f32 %v12892_v3, %v10752_v16  ;;  %v11052_v60 = vmul.f32 %v3836_v45, %v2150_v1  ;;  %v3837_v56 = vmul.f32 %v12895_v54, %v12894_v20  ;;  %v12896_v37 = vld [vmem:[#allocation118_spill] sm:$0xff]  ;;  %v12897_v10 = vld [vmem:[#allocation200_spill] sm:$0xff]  ;;  %v12900_v23 = vld [vmem:[#allocation119_spill] sm:$0xff]  ;;  %4575 = vmatmul.mubr.bf16.gmra.mrb[108].mxu1 %v4064_v18 }
 0x2b5   : > { %v2385_v41 = vadd.f32 %v12896_v37, %v10432_v31  ;;  %v12898_v19 = vld [vmem:[#allocation68_spill] sm:$0xff]  ;;  %v11060_v21 = vmul.f32 %v3870_v47, %v2383_v22  ;;  %v2154_v11 = vadd.f32 %v12900_v23, %v10741_v34  ;;  %v12901_v7 = vld [vmem:[#allocation61_spill] sm:$0xff]  ;;  %v12905_v22 = vld [vmem:[#allocation202_spill] sm:$0xff] }
 0x2b6   : > { %v3871_v39 = vmul.f32 %v12898_v19, %v12897_v10  ;;  %v12902_v3 = vld [vmem:[#allocation72_spill] sm:$0xff]  ;;  %v12903_v45 = vld [vmem:[#allocation121_spill] sm:$0xff]  ;;  %v3965_v54 = vmul.f32 %v3837_v56, %v2152_v17  ;;  %v12906_v47 = vld [vmem:[#allocation74_spill] sm:$0xff]  ;;  %v4069_v10 = vpack.c.bf16 %v3961_v52, %v3957_v30 }
 0x2b7   : > { %12899 = vst [vmem:[#allocation195_spill] sm:$0xff] %v11060_v21  ;;  %v3840_v1 = vmul.f32 %v12902_v3, %v12901_v7  ;;  %v2387_v14 = vadd.f32 %v12903_v45, %v10413_v49  ;;  %v6837_v20 = vld [vmem:[%s12312_s4 + $0x160] ss:$8 sps:$4 sm:$0xff]   ;;  %v3874_v37 = vmul.f32 %v12906_v47, %v12905_v22  ;;  %v6845_v19 = vld [vmem:[%s12312_s4 + $0x174] ss:$8 sps:$4 sm:$0xff]  }
 0x2b8   : > { %v11071_v35 = vmul.f32 %v3871_v39, %v2385_v41  ;;  %v12907_v7 = vld [vmem:[#allocation271_spill] sm:$0xff]  ;;  %v12908_v45 = vld [vmem:[#allocation62_spill] sm:$0xff]  ;;  %v12909_v21 = vld [vmem:[#allocation73_spill] sm:$0xff]  ;;  %4584 = vmatprep.mubr.bf16.mxu1 %v4069_v10  ;;  %4718 = vmatpush1.bf16.msra.mxu1 %v6837_v20 }
 0x2b9   : > { %v11078_v23 = vmul.f32 %v3840_v1, %v2154_v11  ;;  %v2156_v3 = vadd.f32 %v12907_v7, %v10752_v16  ;;  %v3841_v62 = vmul.f32 %v12909_v21, %v12908_v45  ;;  %v12910_v18 = vld [vmem:[#allocation123_spill] sm:$0xff]  ;;  %v11087_v41 = vmul.f32 %v3874_v37, %v2387_v14  ;;  %v12912_v30 = vld [vmem:[#allocation206_spill] sm:$0xff]  ;;  %v12913_v52 = vld [vmem:[#allocation76_spill] sm:$0xff]  ;;  %4719 = vmatprep.subr.bf16.mxu1 %v6845_v19 }
 0x2ba   : > { %12904 = vst [vmem:[#allocation196_spill] sm:$0xff] %v11071_v35  ;;  %v2389_v17 = vadd.f32 %v12910_v18, %v10432_v31  ;;  %v7673_v56 = vld [vmem:[%s7948_s29 + $0x74] ss:$8 sps:$4 sm:$0xff]   ;;  %v3875_v39 = vmul.f32 %v12913_v52, %v12912_v30  ;;  %v4068_v11 = vpack.c.bf16 %v11026_v50, %v11002_v4  ;;  %v12914_v1 = vld [vmem:[#allocation150_spill] sm:$0xff]  ;;  %v6843_v10 = vld [vmem:[%s12312_s4 + $0x170] ss:$8 sps:$4 sm:$0xff]  }
 0x2bb   : > { %2553 = vmatprep.mubr.bf16.mxu0 %v7673_v56  ;;  %12911 = vst [vmem:[#allocation197_spill] sm:$0xff] %v11087_v41  ;;  %v2160_v22 = vadd.f32 %v12914_v1, %v10741_v34  ;;  %v3969_v47 = vmul.f32 %v3841_v62, %v2156_v3  ;;  %v12915_v7 = vld [vmem:[#allocation67_spill] sm:$0xff]  ;;  %v12917_v18 = vld [vmem:[#allocation274_spill] sm:$0xff]  ;;  %v12923_v30 = vld [vmem:[#allocation77_spill] sm:$0xff] }
 0x2bc   : > { %v12916_v21 = vld [vmem:[#allocation75_spill] sm:$0xff]  ;;  %v2393_v35 = vadd.f32 %v12917_v18, %v10413_v49  ;;  %v12918_v56 = vld [vmem:[#allocation210_spill] sm:$0xff]  ;;  %v11104_v4 = vmul.f32 %v3875_v39, %v2389_v17  ;;  %v12924_v1 = vld [vmem:[#allocation276_spill] sm:$0xff]  ;;  %4720 = vmatpush1.bf16.msra.mxu1 %v6843_v10 }
 0x2bd   : > { %v3844_v45 = vmul.f32 %v12916_v21, %v12915_v7  ;;  %v12919_v14 = vld [vmem:[#allocation82_spill] sm:$0xff]  ;;  %v12921_v50 = vld [vmem:[#allocation275_spill] sm:$0xff]  ;;  %v2395_v7 = vadd.f32 %v12924_v1, %v10432_v31  ;;  %v12928_v17 = vld [vmem:[#allocation277_spill] sm:$0xff]  ;;  %4585 = vmatmul.mubr.bf16.gmra.mrb[112].mxu1 %v4068_v11 }
 0x2be   : > { %v3878_v37 = vmul.f32 %v12919_v14, %v12918_v56  ;;  %12920 = vst [vmem:[#allocation198_spill] sm:$0xff] %v11104_v4  ;;  %v2162_v3 = vadd.f32 %v12921_v50, %v10752_v16  ;;  %v12922_v62 = vld [vmem:[#allocation71_spill] sm:$0xff]  ;;  %v12927_v56 = vld [vmem:[#allocation240_spill] sm:$0xff]  ;;  %v2164_v39 = vadd.f32 %v12928_v17, %v10741_v34  ;;  %v12930_v4 = vld [vmem:[#allocation78_spill] sm:$0xff] }
 0x2bf   : > { %v3845_v52 = vmul.f32 %v12923_v30, %v12922_v62  ;;  %v11112_v21 = vmul.f32 %v3844_v45, %v2160_v22  ;;  %v12926_v18 = vld [vmem:[#allocation215_spill] sm:$0xff]  ;;  %v12933_v22 = vld [vmem:[#allocation221_spill] sm:$0xff] }
 0x2c0   : > { %v11114_v20 = vmul.f32 %v3878_v37, %v2393_v35  ;;  %v3879_v14 = vmul.f32 %v12927_v56, %v12926_v18  ;;  %v12929_v41 = vld [vmem:[#allocation19_spill] sm:$0xff]  ;;  %v12934_v45 = vld [vmem:[#allocation245_spill] sm:$0xff] }
 0x2c1   : > { %2554 = vmatmul.mubr.bf16.gmra.mrb[188].mxu0 %v12929_v41  ;;  %v11121_v50 = vmul.f32 %v3845_v52, %v2162_v3  ;;  %v12931_v62 = vld [vmem:[#allocation91_spill] sm:$0xff]  ;;  %v3882_v35 = vmul.f32 %v12934_v45, %v12933_v22  ;;  %v6851_v37 = vld [vmem:[%s12312_s4 + $0x184] ss:$8 sps:$4 sm:$0xff]   ;;  %v4073_v41 = vpack.c.bf16 %v3969_v47, %v3965_v54  ;;  %v12940_v54 = vld [vmem:[#allocation224_spill] sm:$0xff] }
 0x2c2   : > { %12925 = vst [vmem:[#allocation6_spill] sm:$0xff] %v11114_v20  ;;  %v3848_v30 = vmul.f32 %v12931_v62, %v12930_v4  ;;  %v12932_v1 = vld [vmem:[#allocation151_spill] sm:$0xff]  ;;  %v7674_v18 = vld [vmem:[%s7948_s29 + $0x84] ss:$8 sps:$4 sm:$0xff]   ;;  %v11133_v56 = vmul.f32 %v3879_v14, %v2395_v7  ;;  %v12938_v4 = vld [vmem:[#allocation92_spill] sm:$0xff]  ;;  %v2399_v7 = vadd.f32 %v10260_v63, %v10432_v31  ;;  %4721 = vmatprep.subr.bf16.mxu1 %v6851_v37 }
 0x2c3   : > { %v2397_v19 = vadd.f32 %v12932_v1, %v10413_v49  ;;  %2563 = vmatprep.mubr.bf16.mxu0 %v7674_v18  ;;  %v12936_v3 = vld [vmem:[#allocation278_spill] sm:$0xff]  ;;  %v12937_v17 = vld [vmem:[#allocation79_spill] sm:$0xff]  ;;  %v12941_v47 = vld [vmem:[#allocation248_spill] sm:$0xff]  ;;  %4594 = vmatprep.mubr.bf16.mxu1 %v4073_v41 }
 0x2c4   : > { %12935 = vst [vmem:[#allocation24_spill] sm:$0xff] %v11133_v56  ;;  %v2166_v52 = vadd.f32 %v12936_v3, %v10752_v16  ;;  %v3849_v62 = vmul.f32 %v12938_v4, %v12937_v17  ;;  %v6849_v1 = vld [vmem:[%s12312_s4 + $0x180] ss:$8 sps:$4 sm:$0xff]   ;;  %v11142_v22 = vmul.f32 %v3848_v30, %v2164_v39  ;;  %v3883_v14 = vmul.f32 %v12941_v47, %v12940_v54  ;;  %v6857_v18 = vld [vmem:[%s12312_s4 + $0x194] ss:$8 sps:$4 sm:$0xff]  }
 0x2c5   : > { %v11144_v45 = vmul.f32 %v3882_v35, %v2397_v19  ;;  %v4072_v3 = vpack.c.bf16 %v11078_v23, %v11052_v60  ;;  %v12942_v11 = vld [vmem:[#allocation281_spill] sm:$0xff]  ;;  %v12944_v19 = vld [vmem:[#allocation94_spill] sm:$0xff]  ;;  %v12947_v54 = vld [vmem:[#allocation231_spill] sm:$0xff]  ;;  %4722 = vmatpush1.bf16.msra.mxu1 %v6849_v1 }
 0x2c6   : > { %v3977_v10 = vmul.f32 %v3849_v62, %v2166_v52  ;;  %v2170_v39 = vadd.f32 %v12942_v11, %v10741_v34  ;;  %v12943_v30 = vld [vmem:[#allocation81_spill] sm:$0xff]  ;;  %v11159_v17 = vmul.f32 %v3883_v14, %v2399_v7  ;;  %v12946_v63 = vld [vmem:[#allocation282_spill] sm:$0xff]  ;;  %v12949_v41 = vld [vmem:[#allocation284_spill] sm:$0xff]  ;;  %4723 = vmatprep.subr.bf16.mxu1 %v6857_v18 }
 0x2c7   : > { %12939 = vst [vmem:[#allocation30_spill] sm:$0xff] %v11144_v45  ;;  %v3852_v35 = vmul.f32 %v12944_v19, %v12943_v30  ;;  %v2403_v4 = vadd.f32 %v12946_v63, %v10413_v49  ;;  %v12948_v47 = vld [vmem:[#allocation254_spill] sm:$0xff]  ;;  %v2172_v52 = vadd.f32 %v12949_v41, %v10752_v16  ;;  %v12950_v60 = vld [vmem:[#allocation83_spill] sm:$0xff]  ;;  %v12952_v20 = vld [vmem:[#allocation285_spill] sm:$0xff]  ;;  %4595 = vmatmul.mubr.bf16.gmra.mrb[116].mxu1 %v4072_v3 }
 0x2c8   : > { %12945 = vst [vmem:[#allocation25_spill] sm:$0xff] %v11159_v17  ;;  %v3886_v45 = vmul.f32 %v12948_v47, %v12947_v54  ;;  %v12951_v23 = vld [vmem:[#allocation98_spill] sm:$0xff]  ;;  %v2405_v30 = vadd.f32 %v12952_v20, %v10432_v31  ;;  %v12954_v14 = vld [vmem:[#allocation257_spill] sm:$0xff]  ;;  %v6855_v63 = vld [vmem:[%s12312_s4 + $0x190] ss:$8 sps:$4 sm:$0xff]  }
 0x2c9   : > { %v11167_v62 = vmul.f32 %v3852_v35, %v2170_v39  ;;  %v3853_v11 = vmul.f32 %v12951_v23, %v12950_v60  ;;  %v12953_v7 = vld [vmem:[#allocation234_spill] sm:$0xff]  ;;  %v12957_v35 = vld [vmem:[#allocation84_spill] sm:$0xff]  ;;  %v12958_v47 = vld [vmem:[#allocation99_spill] sm:$0xff]  ;;  %4724 = vmatpush1.bf16.msra.mxu1 %v6855_v63 }
 0x2ca   : > { %v3887_v19 = vmul.f32 %v12954_v14, %v12953_v7  ;;  %v11178_v54 = vmul.f32 %v3886_v45, %v2403_v4  ;;  %v12956_v37 = vld [vmem:[#allocation286_spill] sm:$0xff]  ;;  %v3856_v41 = vmul.f32 %v12958_v47, %v12957_v35  ;;  %v12959_v60 = vld [vmem:[#allocation287_spill] sm:$0xff]  ;;  %v12960_v7 = vld [vmem:[#allocation241_spill] sm:$0xff]  ;;  %v4077_v45 = vpack.c.bf16 %v3977_v10, %v11121_v50 }
 0x2cb   : > { %v2174_v39 = vadd.f32 %v12956_v37, %v10741_v34  ;;  %v2407_v20 = vadd.f32 %v12959_v60, %v10413_v49  ;;  %v11186_v23 = vmul.f32 %v3853_v11, %v2172_v52  ;;  %v12961_v14 = vld [vmem:[#allocation263_spill] sm:$0xff]  ;;  %v12962_v4 = vld [vmem:[#allocation12_spill] sm:$0xff]  ;;  %v12966_v18 = vld [vmem:[#allocation289_spill] sm:$0xff] }
 0x2cc   : > { %12955 = vst [vmem:[#allocation32_spill] sm:$0xff] %v11178_v54  ;;  %v11188_v1 = vmul.f32 %v3887_v19, %v2405_v30  ;;  %v3890_v17 = vmul.f32 %v12961_v14, %v12960_v7  ;;  %2564 = vmatmul.mubr.bf16.gmra.mrb[192].mxu0 %v12962_v4  ;;  %v12963_v37 = vld [vmem:[#allocation288_spill] sm:$0xff]  ;;  %v2409_v52 = vadd.f32 %v12966_v18, %v10432_v31  ;;  %v6863_v11 = vld [vmem:[%s12312_s4 + $0x1a4] ss:$8 sps:$4 sm:$0xff]   ;;  %v12967_v10 = vld [vmem:[#allocation247_spill] sm:$0xff] }
 0x2cd   : > { %v11194_v54 = vmul.f32 %v3856_v41, %v2174_v39  ;;  %v2176_v35 = vadd.f32 %v12963_v37, %v10752_v16  ;;  %v12964_v47 = vld [vmem:[#allocation88_spill] sm:$0xff]  ;;  %v12968_v19 = vld [vmem:[#allocation267_spill] sm:$0xff]  ;;  %v4076_v41 = vpack.c.bf16 %v11142_v22, %v11112_v21  ;;  %v6861_v7 = vld [vmem:[%s12312_s4 + $0x1a0] ss:$8 sps:$4 sm:$0xff]   ;;  %4604 = vmatprep.mubr.bf16.mxu1 %v4077_v45  ;;  %v2182_v22 = vadd.f32 %v10309_v27, %v10752_v16 }
 0x2ce   : > { %v12965_v56 = vld [vmem:[#allocation100_spill] sm:$0xff]  ;;  %v11206_v50 = vmul.f32 %v3890_v17, %v2407_v20  ;;  %v3891_v39 = vmul.f32 %v12968_v19, %v12967_v10  ;;  %v12969_v4 = vld [vmem:[#allocation89_spill] sm:$0xff]  ;;  %v2413_v20 = vadd.f32 %v10307_v33, %v10413_v49  ;;  %v12972_v18 = vld [vmem:[#allocation270_spill] sm:$0xff]  ;;  %v2184_v45 = vadd.f32 %v10329_v13, %v10741_v34  ;;  %4725 = vmatprep.subr.bf16.mxu1 %v6863_v11 }
 0x2cf   : > { %v3857_v60 = vmul.f32 %v12965_v56, %v12964_v47  ;;  %v7675_v30 = vld [vmem:[%s7948_s29 + $0x94] ss:$8 sps:$4 sm:$0xff]   ;;  %v2180_v56 = vadd.f32 %v10305_v5, %v10741_v34  ;;  %v12970_v37 = vld [vmem:[#allocation101_spill] sm:$0xff]  ;;  %4726 = vmatpush1.bf16.msra.mxu1 %v6861_v7 }
 0x2d0   : > { %2573 = vmatprep.mubr.bf16.mxu0 %v7675_v30  ;;  %v3860_v17 = vmul.f32 %v12970_v37, %v12969_v4  ;;  %v12971_v47 = vld [vmem:[#allocation251_spill] sm:$0xff]  ;;  %v11226_v21 = vmul.f32 %v3891_v39, %v2409_v52  ;;  %v12973_v3 = vld [vmem:[#allocation93_spill] sm:$0xff]  ;;  %v12981_v11 = vld [vmem:[#allocation296_spill] sm:$0xff]  ;;  %4605 = vmatmul.mubr.bf16.gmra.mrb[120].mxu1 %v4076_v41 }
 0x2d1   : > { %v3985_v14 = vmul.f32 %v3857_v60, %v2176_v35  ;;  %v3894_v30 = vmul.f32 %v12972_v18, %v12971_v47  ;;  %v6869_v5 = vld [vmem:[%s12312_s4 + $0x1b4] ss:$8 sps:$4 sm:$0xff]   ;;  %v2415_v60 = vadd.f32 %v10313_v53, %v10432_v31  ;;  %v12975_v19 = vld [vmem:[#allocation261_spill] sm:$0xff]  ;;  %v2417_v18 = vadd.f32 %v10331_v58, %v10413_v49  ;;  %v12997_v41 = vld [vmem:[#allocation302_spill] sm:$0xff] }
 0x2d2   : > { %v12974_v63 = vld [vmem:[#allocation103_spill] sm:$0xff]  ;;  %v11234_v33 = vmul.f32 %v3860_v17, %v2180_v56  ;;  %v12976_v4 = vld [vmem:[#allocation273_spill] sm:$0xff]  ;;  %v12979_v53 = vld [vmem:[#allocation264_spill] sm:$0xff]  ;;  %4727 = vmatprep.subr.bf16.mxu1 %v6869_v5  ;;  %v2190_v5 = vadd.f32 %v10358_v40, %v10741_v34  ;;  %v2192_v40 = vadd.f32 %v10367_v44, %v10752_v16 }
 0x2d3   : > { %v3861_v35 = vmul.f32 %v12974_v63, %v12973_v3  ;;  %v11236_v10 = vmul.f32 %v3894_v30, %v2413_v20  ;;  %v3895_v37 = vmul.f32 %v12976_v4, %v12975_v19  ;;  %v12977_v27 = vld [vmem:[#allocation95_spill] sm:$0xff]  ;;  %v12978_v39 = vld [vmem:[#allocation105_spill] sm:$0xff]  ;;  %v12980_v56 = vld [vmem:[#allocation124_spill] sm:$0xff]  ;;  %v4081_v13 = vpack.c.bf16 %v3985_v14, %v11186_v23 }
 0x2d4   : > { %v3864_v47 = vmul.f32 %v12978_v39, %v12977_v27  ;;  %v3898_v17 = vmul.f32 %v12980_v56, %v12979_v53  ;;  %v6867_v20 = vld [vmem:[%s12312_s4 + $0x1b0] ss:$8 sps:$4 sm:$0xff]   ;;  %v12983_v63 = vld [vmem:[#allocation106_spill] sm:$0xff]  ;;  %v12984_v7 = vld [vmem:[#allocation297_spill] sm:$0xff]  ;;  %v4080_v14 = vpack.c.bf16 %v11194_v54, %v11167_v62 }
 0x2d5   : > { %v11242_v52 = vmul.f32 %v3861_v35, %v2182_v22  ;;  %v11253_v30 = vmul.f32 %v3895_v37, %v2415_v60  ;;  %v2186_v22 = vadd.f32 %v12981_v11, %v10752_v16  ;;  %v12982_v3 = vld [vmem:[#allocation96_spill] sm:$0xff]  ;;  %v2419_v4 = vadd.f32 %v12984_v7, %v10432_v31  ;;  %v12985_v27 = vld [vmem:[#allocation279_spill] sm:$0xff]  ;;  %v12987_v37 = vld [vmem:[#allocation14_spill] sm:$0xff]  ;;  %4728 = vmatpush1.bf16.msra.mxu1 %v6867_v20 }
 0x2d6   : > { %v3865_v35 = vmul.f32 %v12983_v63, %v12982_v3  ;;  %v11260_v58 = vmul.f32 %v3864_v47, %v2184_v45  ;;  %v11262_v19 = vmul.f32 %v3898_v17, %v2417_v18  ;;  %v12986_v39 = vld [vmem:[#allocation292_spill] sm:$0xff]  ;;  %2574 = vmatmul.mubr.bf16.gmra.mrb[196].mxu0 %v12987_v37  ;;  %v12988_v45 = vld [vmem:[#allocation97_spill] sm:$0xff]  ;;  %v12989_v47 = vld [vmem:[#allocation107_spill] sm:$0xff]  ;;  %v2423_v11 = vadd.f32 %v10360_v2, %v10413_v49 }
 0x2d7   : > { %v3899_v60 = vmul.f32 %v12986_v39, %v12985_v27  ;;  %v3868_v18 = vmul.f32 %v12989_v47, %v12988_v45  ;;  %v6875_v53 = vld [vmem:[%s12312_s4 + $0x1c4] ss:$8 sps:$4 sm:$0xff]   ;;  %v6873_v54 = vld [vmem:[%s12312_s4 + $0x1c0] ss:$8 sps:$4 sm:$0xff]   ;;  %v2425_v2 = vadd.f32 %v10369_v59, %v10432_v31  ;;  %v12994_v27 = vld [vmem:[#allocation283_spill] sm:$0xff]  ;;  %4614 = vmatprep.mubr.bf16.mxu1 %v4081_v13  ;;  %v2194_v37 = vadd.f32 %v12997_v41, %v10741_v34 }
 0x2d8   : > { %v11269_v23 = vmul.f32 %v3865_v35, %v2186_v22  ;;  %v7676_v56 = vld [vmem:[%s7948_s29 + $0xa4] ss:$8 sps:$4 sm:$0xff]   ;;  %v12990_v22 = vld [vmem:[#allocation280_spill] sm:$0xff]  ;;  %v12995_v39 = vld [vmem:[#allocation295_spill] sm:$0xff]  ;;  %4729 = vmatprep.subr.bf16.mxu1 %v6875_v53  ;;  %4615 = vmatmul.mubr.bf16.gmra.mrb[124].mxu1 %v4080_v14 }
 0x2d9   : > { %2583 = vmatprep.mubr.bf16.mxu0 %v7676_v56  ;;  %v11281_v17 = vmul.f32 %v3899_v60, %v2419_v4  ;;  %v12991_v3 = vld [vmem:[#allocation293_spill] sm:$0xff]  ;;  %v11292_v63 = vmul.f32 %v3868_v18, %v2190_v5  ;;  %v12992_v35 = vld [vmem:[#allocation102_spill] sm:$0xff]  ;;  %v3903_v60 = vmul.f32 %v12995_v39, %v12994_v27  ;;  %v6878_v44 = vld [vmem:[%s12312_s4 + $0x1d4] ss:$8 sps:$4 sm:$0xff]   ;;  %v2427_v18 = vadd.f32 %v10386_v36, %v10413_v49 }
 0x2da   : > { %v3902_v62 = vmul.f32 %v12991_v3, %v12990_v22  ;;  %v12993_v7 = vld [vmem:[#allocation109_spill] sm:$0xff]  ;;  %v12998_v5 = vld [vmem:[#allocation104_spill] sm:$0xff]  ;;  %v12999_v45 = vld [vmem:[#allocation111_spill] sm:$0xff]  ;;  %v4085_v13 = vpack.c.bf16 %v11269_v23, %v11242_v52  ;;  %4730 = vmatpush1.bf16.msra.mxu1 %v6873_v54 }
 0x2db   : > { %v3869_v4 = vmul.f32 %v12993_v7, %v12992_v35  ;;  %v3872_v47 = vmul.f32 %v12999_v45, %v12998_v5  ;;  %v11313_v56 = vmul.f32 %v3903_v60, %v2425_v2  ;;  %v13000_v22 = vld [vmem:[#allocation290_spill] sm:$0xff]  ;;  %v13001_v3 = vld [vmem:[#allocation299_spill] sm:$0xff]  ;;  %v13002_v7 = vld [vmem:[#allocation108_spill] sm:$0xff]  ;;  %4731 = vmatprep.subr.bf16.mxu1 %v6878_v44 }
 0x2dc   : > { %v11303_v20 = vmul.f32 %v3902_v62, %v2423_v11  ;;  %v3906_v35 = vmul.f32 %v13001_v3, %v13000_v22  ;;  %v2196_v62 = vadd.f32 %v10395_v61, %v10752_v16  ;;  %v13003_v27 = vld [vmem:[#allocation116_spill] sm:$0xff]  ;;  %v13004_v36 = vld [vmem:[#allocation21_spill] sm:$0xff]  ;;  %v13006_v52 = vld [vmem:[#allocation291_spill] sm:$0xff]  ;;  %4624 = vmatprep.mubr.bf16.mxu1 %v4085_v13 }
 0x2dd   : > { %v11311_v59 = vmul.f32 %v3869_v4, %v2192_v40  ;;  %v11319_v11 = vmul.f32 %v3872_v47, %v2194_v37  ;;  %v3873_v39 = vmul.f32 %v13003_v27, %v13002_v7  ;;  %v2429_v40 = vadd.f32 %v13004_v36, %v10432_v31  ;;  %v6876_v4 = vld [vmem:[%s12312_s4 + $0x1d0] ss:$8 sps:$4 sm:$0xff]   ;;  %v13009_v54 = vld [vmem:[#allocation113_spill] sm:$0xff]  ;;  %v13010_v5 = vld [vmem:[#allocation126_spill] sm:$0xff] }
 0x2de   : > { %12996 = vst [vmem:[#allocation212_spill] sm:$0xff] %v11303_v20  ;;  %v11330_v2 = vmul.f32 %v3906_v35, %v2427_v18  ;;  %v13007_v23 = vld [vmem:[#allocation300_spill] sm:$0xff]  ;;  %v13008_v60 = vld [vmem:[#allocation307_spill] sm:$0xff]  ;;  %v3876_v45 = vmul.f32 %v13010_v5, %v13009_v54  ;;  %v13012_v18 = vld [vmem:[#allocation294_spill] sm:$0xff]  ;;  %4732 = vmatpush1.bf16.msra.mxu1 %v6876_v4 }
 0x2df   : > { %v3907_v53 = vmul.f32 %v13007_v23, %v13006_v52  ;;  %v2200_v41 = vadd.f32 %v13008_v60, %v10741_v34  ;;  %v11338_v37 = vmul.f32 %v3873_v39, %v2196_v62  ;;  %v13011_v47 = vld [vmem:[#allocation308_spill] sm:$0xff]  ;;  %v13013_v3 = vld [vmem:[#allocation305_spill] sm:$0xff]  ;;  %v13016_v23 = vld [vmem:[#allocation114_spill] sm:$0xff] }
 0x2e0   : > { %13005 = vst [vmem:[#allocation204_spill] sm:$0xff] %v11330_v2  ;;  %v2433_v22 = vadd.f32 %v13011_v47, %v10413_v49  ;;  %v3910_v35 = vmul.f32 %v13013_v3, %v13012_v18  ;;  %v13014_v7 = vld [vmem:[#allocation16_spill] sm:$0xff]  ;;  %v13015_v36 = vld [vmem:[#allocation309_spill] sm:$0xff]  ;;  %v13017_v44 = vld [vmem:[#allocation127_spill] sm:$0xff] }
 0x2e1   : > { %2584 = vmatmul.mubr.bf16.gmra.mrb[200].mxu0 %v13014_v7  ;;  %v11347_v27 = vmul.f32 %v3907_v53, %v2429_v40  ;;  %v2202_v52 = vadd.f32 %v13015_v36, %v10752_v16  ;;  %v3877_v62 = vmul.f32 %v13017_v44, %v13016_v23  ;;  %v13018_v39 = vld [vmem:[#allocation156_spill] sm:$0xff]  ;;  %v6881_v54 = vld [vmem:[%s12312_s4 + $0x1e4] ss:$8 sps:$4 sm:$0xff]   ;;  %v11359_v47 = vmul.f32 %v3876_v45, %v2200_v41  ;;  %v13022_v7 = vld [vmem:[#allocation311_spill] sm:$0xff] }
 0x2e2   : > { %v2435_v60 = vadd.f32 %v13018_v39, %v10432_v31  ;;  %v7677_v5 = vld [vmem:[%s7948_s29 + $0xb4] ss:$8 sps:$4 sm:$0xff]   ;;  %v11361_v18 = vmul.f32 %v3910_v35, %v2433_v22  ;;  %v13020_v40 = vld [vmem:[#allocation298_spill] sm:$0xff]  ;;  %v2204_v36 = vadd.f32 %v13022_v7, %v10741_v34  ;;  %v13023_v39 = vld [vmem:[#allocation117_spill] sm:$0xff]  ;;  %v4089_v14 = vpack.c.bf16 %v11338_v37, %v11311_v59  ;;  %4733 = vmatprep.subr.bf16.mxu1 %v6881_v54 }
 0x2e3   : > { %2593 = vmatprep.mubr.bf16.mxu0 %v7677_v5  ;;  %v13021_v53 = vld [vmem:[#allocation306_spill] sm:$0xff]  ;;  %v11370_v44 = vmul.f32 %v3877_v62, %v2202_v52  ;;  %v13026_v35 = vld [vmem:[#allocation149_spill] sm:$0xff]  ;;  %v13027_v61 = vld [vmem:[#allocation312_spill] sm:$0xff] }
 0x2e4   : > { %13019 = vst [vmem:[#allocation85_spill] sm:$0xff] %v11361_v18  ;;  %v3911_v3 = vmul.f32 %v13021_v53, %v13020_v40  ;;  %v6879_v23 = vld [vmem:[%s12312_s4 + $0x1e0] ss:$8 sps:$4 sm:$0xff]   ;;  %v3914_v40 = vmul.f32 %v13027_v61, %v13026_v35  ;;  %v6884_v4 = vld [vmem:[%s12312_s4 + $0x1f4] ss:$8 sps:$4 sm:$0xff]  }
 0x2e5   : > { %v13024_v5 = vld [vmem:[#allocation130_spill] sm:$0xff]  ;;  %v13029_v52 = vld [vmem:[#allocation315_spill] sm:$0xff]  ;;  %v13030_v7 = vld [vmem:[#allocation120_spill] sm:$0xff]  ;;  %4734 = vmatpush1.bf16.msra.mxu1 %v6879_v23 }
 0x2e6   : > { %v3880_v41 = vmul.f32 %v13024_v5, %v13023_v39  ;;  %v13025_v45 = vld [vmem:[#allocation314_spill] sm:$0xff]  ;;  %v11381_v53 = vmul.f32 %v3911_v3, %v2435_v60  ;;  %v2206_v62 = vadd.f32 %v13029_v52, %v10752_v16  ;;  %v13031_v39 = vld [vmem:[#allocation133_spill] sm:$0xff]  ;;  %v13035_v13 = vld [vmem:[#allocation319_spill] sm:$0xff]  ;;  %4735 = vmatprep.subr.bf16.mxu1 %v6884_v4 }
 0x2e7   : > { %v2437_v22 = vadd.f32 %v13025_v45, %v10413_v49  ;;  %v3881_v5 = vmul.f32 %v13031_v39, %v13030_v7  ;;  %v13033_v61 = vld [vmem:[#allocation318_spill] sm:$0xff]  ;;  %v13034_v2 = vld [vmem:[#allocation301_spill] sm:$0xff]  ;;  %v13042_v39 = vld [vmem:[#allocation320_spill] sm:$0xff] }
 0x2e8   : > { %13028 = vst [vmem:[#allocation26_spill] sm:$0xff] %v11381_v53  ;;  %v11389_v45 = vmul.f32 %v3880_v41, %v2204_v36  ;;  %v2439_v35 = vadd.f32 %v13033_v61, %v10432_v31  ;;  %v3915_v60 = vmul.f32 %v13035_v13, %v13034_v2  ;;  %v13036_v37 = vld [vmem:[#allocation165_spill] sm:$0xff]  ;;  %v13037_v7 = vld [vmem:[#allocation122_spill] sm:$0xff]  ;;  %v13038_v36 = vld [vmem:[#allocation135_spill] sm:$0xff] }
 0x2e9   : > { %v11391_v18 = vmul.f32 %v3914_v40, %v2437_v22  ;;  %v11397_v3 = vmul.f32 %v3881_v5, %v2206_v62  ;;  %v2210_v52 = vadd.f32 %v13036_v37, %v10741_v34  ;;  %v3884_v41 = vmul.f32 %v13038_v36, %v13037_v7  ;;  %v6882_v22 = vld [vmem:[%s12312_s4 + $0x1f0] ss:$8 sps:$4 sm:$0xff]   ;;  %v13040_v2 = vld [vmem:[#allocation322_spill] sm:$0xff]  ;;  %v13044_v23 = vld [vmem:[#allocation125_spill] sm:$0xff] }
 0x2ea   : > { %v11408_v40 = vmul.f32 %v3915_v60, %v2439_v35  ;;  %v2443_v54 = vadd.f32 %v13040_v2, %v10413_v49  ;;  %v13041_v62 = vld [vmem:[#allocation303_spill] sm:$0xff]  ;;  %v13045_v7 = vld [vmem:[#allocation137_spill] sm:$0xff]  ;;  %v13046_v59 = vld [vmem:[#allocation168_spill] sm:$0xff]  ;;  %4736 = vmatpush1.bf16.msra.mxu1 %v6882_v22 }
 0x2eb   : > { %13032 = vst [vmem:[#allocation33_spill] sm:$0xff] %v11391_v18  ;;  %v3918_v5 = vmul.f32 %v13042_v39, %v13041_v62  ;;  %v13043_v61 = vld [vmem:[#allocation323_spill] sm:$0xff]  ;;  %v11416_v37 = vmul.f32 %v3884_v41, %v2210_v52  ;;  %v3885_v36 = vmul.f32 %v13045_v7, %v13044_v23  ;;  %v2445_v18 = vadd.f32 %v13046_v59, %v10432_v31  ;;  %v13047_v35 = vld [vmem:[#allocation304_spill] sm:$0xff]  ;;  %v13049_v53 = vld [vmem:[#allocation18_spill] sm:$0xff] }
 0x2ec   : > { %13039 = vst [vmem:[#allocation207_spill] sm:$0xff] %v11408_v40  ;;  %v2212_v13 = vadd.f32 %v13043_v61, %v10752_v16  ;;  %v13048_v60 = vld [vmem:[#allocation164_spill] sm:$0xff]  ;;  %2594 = vmatmul.mubr.bf16.gmra.mrb[204].mxu0 %v13049_v53  ;;  %v13051_v62 = vld [vmem:[#allocation325_spill] sm:$0xff]  ;;  %v13053_v4 = vld [vmem:[#allocation139_spill] sm:$0xff] }
 0x2ed   : > { %v3919_v40 = vmul.f32 %v13048_v60, %v13047_v35  ;;  %v11425_v2 = vmul.f32 %v3918_v5, %v2443_v54  ;;  %v2214_v39 = vadd.f32 %v13051_v62, %v10741_v34  ;;  %v13052_v61 = vld [vmem:[#allocation128_spill] sm:$0xff]  ;;  %v13054_v41 = vld [vmem:[#allocation326_spill] sm:$0xff]  ;;  %v13056_v35 = vld [vmem:[#allocation141_spill] sm:$0xff]  ;;  %v4093_v54 = vpack.c.bf16 %v11397_v3, %v11370_v44 }
 0x2ee   : > { %v3888_v52 = vmul.f32 %v13053_v4, %v13052_v61  ;;  %v2447_v20 = vadd.f32 %v13054_v41, %v10413_v49  ;;  %v7678_v23 = vld [vmem:[%s7948_s29 + $0xc4] ss:$8 sps:$4 sm:$0xff]   ;;  %v11434_v7 = vmul.f32 %v3885_v36, %v2212_v13  ;;  %v13058_v5 = vpack.c.bf16 %v11260_v58, %v11234_v33  ;;  %v13061_v36 = vld [vmem:[#allocation140_spill] sm:$0xff]  ;;  %v13064_v44 = vld [vmem:[#allocation327_spill] sm:$0xff] }
 0x2ef   : > { %13050 = vst [vmem:[#allocation145_spill] sm:$0xff] %v11425_v2  ;;  %2603 = vmatprep.mubr.bf16.mxu0 %v7678_v23  ;;  %v11436_v59 = vmul.f32 %v3919_v40, %v2445_v18  ;;  %v13057_v60 = vld [vmem:[#allocation182_spill] sm:$0xff]  ;;  %v13059_v49 = vld [vmem:[#allocation209_spill] sm:$0xff]  ;;  %v13062_v40 = vld [vmem:[#allocation80_spill] sm:$0xff] }
 0x2f0   : > { %v3922_v53 = vmul.f32 %v13057_v60, %v13056_v35  ;;  %4625 = vmatmul.mubr.bf16.gmra.mrb[128].mxu1 %v13058_v5  ;;  %v11445_v62 = vmul.f32 %v3888_v52, %v2214_v39  ;;  %v2216_v61 = vadd.f32 %v13059_v49, %v10752_v16  ;;  %v13060_v13 = vld [vmem:[#allocation129_spill] sm:$0xff]  ;;  %v2449_v4 = vadd.f32 %v13062_v40, %v10432_v31  ;;  %v13065_v3 = vld [vmem:[#allocation328_spill] sm:$0xff]  ;;  %v13066_v58 = vld [vmem:[#allocation211_spill] sm:$0xff] }
 0x2f1   : > { %13055 = vst [vmem:[#allocation8_spill] sm:$0xff] %v11436_v59  ;;  %v3889_v18 = vmul.f32 %v13061_v36, %v13060_v13  ;;  %4634 = vmatprep.mubr.bf16.mxu1 %v4089_v14  ;;  %v3923_v22 = vmul.f32 %v13065_v3, %v13064_v44  ;;  %v2220_v39 = vadd.f32 %v13066_v58, %v10741_v34  ;;  %v13067_v23 = vld [vmem:[#allocation131_spill] sm:$0xff]  ;;  %v13068_v35 = vld [vmem:[#allocation142_spill] sm:$0xff]  ;;  %v13070_v14 = vld [vmem:[#allocation132_spill] sm:$0xff] }
 0x2f2   : > { %v11453_v41 = vmul.f32 %v3922_v53, %v2447_v20  ;;  %v3892_v60 = vmul.f32 %v13068_v35, %v13067_v23  ;;  %v13069_v5 = vld [vmem:[#allocation230_spill] sm:$0xff]  ;;  %v13071_v20 = vld [vmem:[#allocation143_spill] sm:$0xff]  ;;  %v13075_v44 = vld [vmem:[#allocation144_spill] sm:$0xff] }
 0x2f3   : > { %v11461_v52 = vmul.f32 %v3889_v18, %v2216_v61  ;;  %v2222_v31 = vadd.f32 %v13069_v5, %v10752_v16  ;;  %v3893_v53 = vmul.f32 %v13071_v20, %v13070_v14  ;;  %v11469_v49 = vmul.f32 %v3923_v22, %v2449_v4  ;;  %v13073_v13 = vld [vmem:[#allocation179_spill] sm:$0xff]  ;;  %v13074_v40 = vld [vmem:[#allocation134_spill] sm:$0xff]  ;;  %v13076_v61 = vld [vmem:[#allocation180_spill] sm:$0xff] }
 0x2f4   : > { %13063 = vst [vmem:[#allocation213_spill] sm:$0xff] %v11453_v41  ;;  %v2224_v36 = vadd.f32 %v13073_v13, %v10741_v34  ;;  %v3896_v3 = vmul.f32 %v13075_v44, %v13074_v40  ;;  %v2226_v18 = vadd.f32 %v13076_v61, %v10752_v16  ;;  %v11477_v58 = vmul.f32 %v3892_v60, %v2220_v39  ;;  %v13078_v5 = vld [vmem:[#allocation136_spill] sm:$0xff]  ;;  %v13079_v4 = vld [vmem:[#allocation146_spill] sm:$0xff]  ;;  %v13081_v13 = vld [vmem:[#allocation237_spill] sm:$0xff] }
 0x2f5   : > { %13072 = vst [vmem:[#allocation214_spill] sm:$0xff] %v11469_v49  ;;  %v11479_v23 = vmul.f32 %v3893_v53, %v2222_v31  ;;  %v4097_v35 = vpack.c.bf16 %v11461_v52, %v11434_v7  ;;  %v3897_v22 = vmul.f32 %v13079_v4, %v13078_v5  ;;  %v2230_v40 = vadd.f32 %v13081_v13, %v10741_v34  ;;  %v13082_v44 = vld [vmem:[#allocation138_spill] sm:$0xff]  ;;  %v13083_v61 = vld [vmem:[#allocation148_spill] sm:$0xff]  ;;  %v13085_v7 = vld [vmem:[#allocation259_spill] sm:$0xff] }
 0x2f6   : > { %13077 = vst [vmem:[#allocation86_spill] sm:$0xff] %v11477_v58  ;;  %v11485_v14 = vmul.f32 %v3896_v3, %v2224_v36  ;;  %v3900_v39 = vmul.f32 %v13083_v61, %v13082_v44  ;;  %v13084_v60 = vld [vmem:[#allocation20_spill] sm:$0xff]  ;;  %v2232_v52 = vadd.f32 %v13085_v7, %v10752_v16  ;;  %v13088_v3 = vld [vmem:[#allocation329_spill] sm:$0xff]  ;;  %v13090_v41 = vld [vmem:[#allocation162_spill] sm:$0xff]  ;;  %v13094_v7 = vpack.c.bf16 %v11319_v11, %v11292_v63 }
 0x2f7   : > { %2604 = vmatmul.mubr.bf16.gmra.mrb[208].mxu0 %v13084_v60  ;;  %v11494_v31 = vmul.f32 %v3897_v22, %v2226_v18  ;;  %v13086_v53 = vld [vmem:[#allocation152_spill] sm:$0xff]  ;;  %v2234_v4 = vadd.f32 %v13088_v3, %v10741_v34  ;;  %v13089_v13 = vld [vmem:[#allocation153_spill] sm:$0xff]  ;;  %v13091_v61 = vld [vmem:[#allocation331_spill] sm:$0xff] }
 0x2f8   : > { %13080 = vst [vmem:[#allocation90_spill] sm:$0xff] %v11485_v14  ;;  %v13087_v5 = vld [vmem:[#allocation160_spill] sm:$0xff]  ;;  %v11503_v33 = vmul.f32 %v3900_v39, %v2230_v40  ;;  %v3904_v44 = vmul.f32 %v13090_v41, %v13089_v13  ;;  %v2236_v18 = vadd.f32 %v13091_v61, %v10752_v16  ;;  %v13092_v22 = vld [vmem:[#allocation154_spill] sm:$0xff]  ;;  %4635 = vmatmul.mubr.bf16.gmra.mrb[132].mxu1 %v13094_v7  ;;  %v13096_v13 = vld [vmem:[#allocation155_spill] sm:$0xff] }
 0x2f9   : > { %v3901_v36 = vmul.f32 %v13087_v5, %v13086_v53  ;;  %v7679_v20 = vld [vmem:[%s7948_s29 + $0xd4] ss:$8 sps:$4 sm:$0xff]   ;;  %v13093_v60 = vld [vmem:[#allocation166_spill] sm:$0xff]  ;;  %4644 = vmatprep.mubr.bf16.mxu1 %v4093_v54  ;;  %v13097_v61 = vld [vmem:[#allocation169_spill] sm:$0xff]  ;;  %v2246_v54 = vadd.f32 %v10699_v55, %v10752_v16 }
 0x2fa   : > { %2613 = vmatprep.mubr.bf16.mxu0 %v7679_v20  ;;  %v3905_v2 = vmul.f32 %v13093_v60, %v13092_v22  ;;  %v13095_v41 = vld [vmem:[#allocation246_spill] sm:$0xff]  ;;  %v11522_v5 = vmul.f32 %v3904_v44, %v2234_v4  ;;  %v3908_v63 = vmul.f32 %v13097_v61, %v13096_v13  ;;  %v13098_v11 = vld [vmem:[#allocation185_spill] sm:$0xff]  ;;  %v13100_v22 = vld [vmem:[#allocation172_spill] sm:$0xff] }
 0x2fb   : > { %v11514_v53 = vmul.f32 %v3901_v36, %v2232_v52  ;;  %v2240_v39 = vadd.f32 %v13095_v41, %v10741_v34  ;;  %v2242_v52 = vadd.f32 %v13098_v11, %v10752_v16  ;;  %v13099_v36 = vld [vmem:[#allocation157_spill] sm:$0xff]  ;;  %v13101_v7 = vld [vmem:[#allocation250_spill] sm:$0xff]  ;;  %v13104_v44 = vld [vmem:[#allocation159_spill] sm:$0xff] }
 0x2fc   : > { %v11524_v3 = vmul.f32 %v3905_v2, %v2236_v18  ;;  %v3909_v60 = vmul.f32 %v13100_v22, %v13099_v36  ;;  %v2244_v40 = vadd.f32 %v13101_v7, %v10741_v34  ;;  %v13102_v20 = vld [vmem:[#allocation158_spill] sm:$0xff]  ;;  %v13103_v49 = vld [vmem:[#allocation173_spill] sm:$0xff]  ;;  %v4104_v61 = vpack.c.bf16 %v11522_v5, %v11503_v33  ;;  %v13108_v55 = vld [vmem:[#allocation175_spill] sm:$0xff] }
 0x2fd   : > { %v3912_v41 = vmul.f32 %v13103_v49, %v13102_v20  ;;  %v11538_v2 = vmul.f32 %v3908_v63, %v2240_v39  ;;  %v13105_v18 = vld [vmem:[#allocation174_spill] sm:$0xff]  ;;  %v13106_v49 = vld [vmem:[#allocation272_spill] sm:$0xff]  ;;  %v13107_v22 = vld [vmem:[#allocation161_spill] sm:$0xff] }
 0x2fe   : > { %v4105_v4 = vpack.c.bf16 %v11524_v3, %v11514_v53  ;;  %v3913_v13 = vmul.f32 %v13105_v18, %v13104_v44  ;;  %v4037_v11 = vmul.f32 %v3909_v60, %v2242_v52  ;;  %v2250_v20 = vadd.f32 %v13106_v49, %v10741_v34  ;;  %v13109_v7 = vld [vmem:[#allocation190_spill] sm:$0xff]  ;;  %v13110_v3 = vld [vmem:[#allocation163_spill] sm:$0xff]  ;;  %v13111_v59 = vld [vmem:[#allocation176_spill] sm:$0xff] }
 0x2ff   : > { %v11546_v36 = vmul.f32 %v3912_v41, %v2244_v40  ;;  %v3916_v39 = vmul.f32 %v13108_v55, %v13107_v22  ;;  %v2252_v53 = vadd.f32 %v13109_v7, %v10752_v16  ;;  %v3917_v58 = vmul.f32 %v13111_v59, %v13110_v3  ;;  %v13112_v44 = vld [vmem:[#allocation192_spill] sm:$0xff]  ;;  %v13113_v33 = vld [vmem:[#allocation7_spill] sm:$0xff]  ;;  %v13115_v52 = vld [vmem:[#allocation178_spill] sm:$0xff] }
 0x300   : > { %v4041_v63 = vmul.f32 %v3913_v13, %v2246_v54  ;;  %v2254_v18 = vadd.f32 %v13112_v44, %v10741_v34  ;;  %2614 = vmatmul.mubr.bf16.gmra.mrb[212].mxu0 %v13113_v33  ;;  %v13114_v5 = vld [vmem:[#allocation167_spill] sm:$0xff]  ;;  %v13116_v41 = vld [vmem:[#allocation5_spill] sm:$0xff]  ;;  %v13117_v22 = vld [vmem:[#allocation170_spill] sm:$0xff] }
 0x301   : > { %v4044_v40 = vmul.f32 %v3916_v39, %v2250_v20  ;;  %v3920_v60 = vmul.f32 %v13115_v52, %v13114_v5  ;;  %v2256_v49 = vadd.f32 %v13116_v41, %v10752_v16  ;;  %v13118_v54 = vld [vmem:[#allocation181_spill] sm:$0xff]  ;;  %v4045_v7 = vmul.f32 %v3917_v58, %v2252_v53  ;;  %v13119_v34 = vld [vmem:[#allocation316_spill] sm:$0xff]  ;;  %v13126_v58 = vld [vmem:[#allocation183_spill] sm:$0xff] }
 0x302   : > { %v3921_v13 = vmul.f32 %v13118_v54, %v13117_v22  ;;  %v7680_v55 = vld [vmem:[%s7948_s29 + $0xe4] ss:$8 sps:$4 sm:$0xff]   ;;  %v4109_v14 = vpack.c.bf16 %v4041_v63, %v4037_v11  ;;  %v4108_v59 = vpack.c.bf16 %v11546_v36, %v11538_v2  ;;  %v13121_v20 = vpack.c.bf16 %v11389_v45, %v11359_v47  ;;  %v13122_v16 = vld [vmem:[#allocation324_spill] sm:$0xff]  ;;  %v13125_v22 = vld [vmem:[#allocation171_spill] sm:$0xff] }
 0x303   : > { %2623 = vmatprep.mubr.bf16.mxu0 %v7680_v55  ;;  %v13120_v3 = vld [vmem:[#allocation317_spill] sm:$0xff]  ;;  %v4048_v39 = vmul.f32 %v3920_v60, %v2254_v18  ;;  %v13127_v11 = vld [vmem:[#allocation112_spill] sm:$0xff]  ;;  %v13128_v2 = vld [vmem:[#allocation330_spill] sm:$0xff] }
 0x304   : > { %v4055_v44 = vpack.c.bf16 %v13120_v3, %v13119_v34  ;;  %4645 = vmatmul.mubr.bf16.gmra.mrb[136].mxu1 %v13121_v20  ;;  %v4049_v33 = vmul.f32 %v3921_v13, %v2256_v49  ;;  %v13123_v5 = vld [vmem:[#allocation177_spill] sm:$0xff]  ;;  %v4063_v63 = vpack.c.bf16 %v13127_v11, %v13126_v58  ;;  %v13129_v36 = vld [vmem:[#allocation184_spill] sm:$0xff]  ;;  %v13130_v55 = vld [vmem:[#allocation186_spill] sm:$0xff]  ;;  %v4071_v13 = vpack.c.bf16 %v10822_v42, %v10796_v28 }
 0x305   : > { %v4059_v52 = vpack.c.bf16 %v13123_v5, %v13122_v16  ;;  %v13124_v41 = vld [vmem:[#allocation321_spill] sm:$0xff]  ;;  %4654 = vmatprep.mubr.bf16.mxu1 %v4097_v35  ;;  %v4062_v53 = vpack.c.bf16 %v13129_v36, %v13128_v2  ;;  %v13133_v45 = vld [vmem:[#allocation260_spill] sm:$0xff]  ;;  %v4112_v49 = vpack.c.bf16 %v4048_v39, %v4044_v40  ;;  %v4075_v16 = vpack.c.bf16 %v10881_v51, %v10864_v9  ;;  %v13137_v51 = vld [vmem:[#allocation195_spill] sm:$0xff] }
 0x306   : > { %v4058_v54 = vpack.c.bf16 %v13125_v22, %v13124_v41  ;;  %v13131_v34 = vld [vmem:[#allocation189_spill] sm:$0xff]  ;;  %v4113_v60 = vpack.c.bf16 %v4049_v33, %v4045_v7  ;;  %v4074_v5 = vpack.c.bf16 %v10873_v0, %v10856_v48  ;;  %v4079_v41 = vpack.c.bf16 %v10937_v8, %v10924_v24  ;;  %v13135_v9 = vld [vmem:[#allocation196_spill] sm:$0xff]  ;;  %v13136_v48 = vld [vmem:[#allocation198_spill] sm:$0xff] }
 0x307   : > { %v4067_v3 = vpack.c.bf16 %v13131_v34, %v13130_v55  ;;  %v13132_v47 = vld [vmem:[#allocation269_spill] sm:$0xff]  ;;  %v4078_v7 = vpack.c.bf16 %v10935_v43, %v10909_v12  ;;  %v4083_v40 = vpack.c.bf16 %v10991_v15, %v10972_v46  ;;  %v4082_v28 = vpack.c.bf16 %v10980_v38, %v10959_v32  ;;  %v13139_v39 = vld [vmem:[#allocation24_spill] sm:$0xff]  ;;  %v13141_v33 = vld [vmem:[#allocation6_spill] sm:$0xff] }
 0x308   : > { %v4066_v18 = vpack.c.bf16 %v13133_v45, %v13132_v47  ;;  %v13134_v20 = vld [vmem:[#allocation193_spill] sm:$0xff]  ;;  %v4086_v42 = vpack.c.bf16 %v11028_v57, %v11004_v25  ;;  %v4091_v0 = vpack.c.bf16 %v13136_v48, %v13135_v9  ;;  %v13142_v46 = vld [vmem:[#allocation30_spill] sm:$0xff]  ;;  %v4099_v32 = vpack.c.bf16 %v11226_v21, %v11188_v1  ;;  %v13144_v38 = vld [vmem:[#allocation32_spill] sm:$0xff] }
 0x309   : > { %v4070_v35 = vpack.c.bf16 %v10820_v6, %v13134_v20  ;;  %v4087_v6 = vpack.c.bf16 %v11043_v26, %v11017_v29  ;;  %v13138_v24 = vld [vmem:[#allocation197_spill] sm:$0xff]  ;;  %v4094_v15 = vpack.c.bf16 %v13142_v46, %v13141_v33  ;;  %v4098_v25 = vpack.c.bf16 %v11206_v50, %v13144_v38  ;;  %v7681_v29 = vld [vmem:[%s7948_s29 + $0xf4] ss:$8 sps:$4 sm:$0xff]   ;;  %v13147_v1 = vld [vmem:[#allocation10_spill] sm:$0xff]  ;;  %s12097_s29 = scalar_lea.vmem (%p7883_p5), %s12314_s6, %s6202_s17  }
 0x30a   : > { %v4090_v8 = vpack.c.bf16 %v13138_v24, %v13137_v51  ;;  %v13140_v12 = vld [vmem:[#allocation25_spill] sm:$0xff]  ;;  %v4103_v57 = vpack.c.bf16 %v11281_v17, %v11253_v30  ;;  %v4102_v26 = vpack.c.bf16 %v11262_v19, %v11236_v10  ;;  %v13145_v58 = vpack.c.bf16 %v11445_v62, %v11416_v37  ;;  %v13148_v21 = vld [vmem:[#allocation212_spill] sm:$0xff]  ;;  %v13150_v30 = vld [vmem:[#allocation90_spill] sm:$0xff] }
 0x30b   : > { %v4095_v43 = vpack.c.bf16 %v13140_v12, %v13139_v39  ;;  %v13143_v22 = vld [vmem:[#allocation9_spill] sm:$0xff]  ;;  %v13146_v11 = vpack.c.bf16 %v11494_v31, %v11479_v23  ;;  %v4107_v50 = vpack.c.bf16 %v11347_v27, %v11313_v56  ;;  %v13149_v2 = vld [vmem:[#allocation204_spill] sm:$0xff]  ;;  %v13151_v17 = vld [vmem:[#allocation86_spill] sm:$0xff] }
 0x30c   : > { %2624 = vmatmul.mubr.bf16.gmra.mrb[216].mxu0 %v13143_v22  ;;  %4655 = vmatmul.mubr.bf16.gmra.mrb[140].mxu1 %v13145_v58  ;;  %v4106_v36 = vpack.c.bf16 %v13149_v2, %v13148_v21  ;;  %v13152_v55 = vpack.c.bf16 %v13150_v30, %v13151_v17  ;;  %v13153_v10 = vld [vmem:[#allocation26_spill] sm:$0xff]  ;;  %v13154_v19 = vld [vmem:[#allocation207_spill] sm:$0xff]  ;;  %v13155_v62 = vld [vmem:[#allocation85_spill] sm:$0xff] }
 0x30d   : > { %2633 = vmatprep.mubr.bf16.mxu0 %v7681_v29  ;;  %4664 = vmatprep.mubr.bf16.mxu1 %v13146_v11  ;;  %v4111_v37 = vpack.c.bf16 %v13154_v19, %v13153_v10  ;;  %v13156_v34 = vld [vmem:[#allocation33_spill] sm:$0xff]  ;;  %v13157_v31 = vld [vmem:[#allocation8_spill] sm:$0xff]  ;;  %v13158_v47 = vld [vmem:[#allocation214_spill] sm:$0xff] }
 0x30e   : > { %v4110_v23 = vpack.c.bf16 %v13156_v34, %v13155_v62  ;;  %v4115_v45 = vpack.c.bf16 %v13158_v47, %v13157_v31  ;;  %v13159_v56 = vld [vmem:[#allocation145_spill] sm:$0xff]  ;;  %v826_v62 = vld [vmem:[%s12311_s3 + $0x8] sm:$0x3] }
 0x30f   : > { %v13160_v27 = vld [vmem:[#allocation213_spill] sm:$0xff]  ;;  %v13167_v34 = vld [vmem:[#allocation22_spill] sm:$0xff] }
 0x310   : > { %v4114_v20 = vpack.c.bf16 %v13160_v27, %v13159_v56  ;;  %v13161_v9 = vld [vmem:[#allocation313_spill] sm:$0xff] }
 0x314   : > { %2634 = vmatmul.mubr.bf16.gmra.mrb[220].mxu0 %v13147_v1  ;;  %4665 = vmatmul.mubr.bf16.gmra.mrb[144].mxu1 %v13152_v55 }
 0x315   : > { %4674 = vmatprep.mubr.bf16.mxu1 %v4105_v4  ;;  %v13162_v4 = vld [vmem:[#allocation310_spill] sm:$0xff] }
 0x316   : > { %v13163_v48 = vpack.c.bf16 %v13161_v9, %v13162_v4 }
 0x31c   : > { %4675 = vmatmul.mubr.bf16.gmra.mrb[148].mxu1 %v4104_v61 }
 0x31d   : > { %4684 = vmatprep.mubr.bf16.mxu1 %v4109_v14 }
 0x324   : > { %4685 = vmatmul.mubr.bf16.gmra.mrb[152].mxu1 %v4108_v59 }
 0x325   : > { %4694 = vmatprep.mubr.bf16.mxu1 %v4113_v60 }
 0x32c   : > { %4695 = vmatmul.mubr.bf16.gmra.mrb[156].mxu1 %v4112_v49 }
 0x32d   : > { %4737 = vmatprep.mubr.bf16.mxu1 %v4055_v44 }
 0x334   : > { %4738 = vmatmul.mubr.bf16.vlgmr.msra.gmra.mrb[96].mxu1 %v13163_v48 }
 0x335   : > { %4747 = vmatprep.mubr.bf16.mxu1 %v4059_v52 }
 0x33c   : > { %4748 = vmatmul.mubr.bf16.gmra.mrb[100].mxu1 %v4058_v54 }
 0x33d   : > { %4757 = vmatprep.mubr.bf16.mxu1 %v4063_v63 }
 0x344   : > { %4758 = vmatmul.mubr.bf16.gmra.mrb[104].mxu1 %v4062_v53 }
 0x345   : > { %4767 = vmatprep.mubr.bf16.mxu1 %v4067_v3 }
 0x34c   : > { %4768 = vmatmul.mubr.bf16.gmra.mrb[108].mxu1 %v4066_v18 }
 0x34d   : > { %4777 = vmatprep.mubr.bf16.mxu1 %v4071_v13  ;;  %v11648_v14 = vpop.f32.mrb[160].mxu0 }
 0x34e   : > { %v11650_v61 = vpop.f32.mrb[161].mxu0 }
 0x34f   : > { %v11652_v59 = vpop.f32.mrb[162].mxu0 }
 0x350   : > { %v11654_v44 = vpop.f32.mrb[163].mxu0 }
 0x354   : > { %4778 = vmatmul.mubr.bf16.gmra.mrb[112].mxu1 %v4070_v35 }
 0x355   : > { %4787 = vmatprep.mubr.bf16.mxu1 %v4075_v16  ;;  %v11656_v52 = vpop.f32.mrb[164].mxu0 }
 0x356   : > { %v11658_v54 = vpop.f32.mrb[165].mxu0 }
 0x357   : > { %v11660_v63 = vpop.f32.mrb[166].mxu0 }
 0x358   : > { %v11662_v53 = vpop.f32.mrb[167].mxu0 }
 0x35c   : > { %4788 = vmatmul.mubr.bf16.gmra.mrb[116].mxu1 %v4074_v5 }
 0x35d   : > { %4797 = vmatprep.mubr.bf16.mxu1 %v4079_v41  ;;  %v11664_v3 = vpop.f32.mrb[168].mxu0 }
 0x35e   : > { %v11666_v18 = vpop.f32.mrb[169].mxu0 }
 0x35f   : > { %v11668_v60 = vpop.f32.mrb[170].mxu0 }
 0x360   : > { %v11670_v49 = vpop.f32.mrb[171].mxu0 }
 0x364   : > { %4798 = vmatmul.mubr.bf16.gmra.mrb[120].mxu1 %v4078_v7 }
 0x365   : > { %4807 = vmatprep.mubr.bf16.mxu1 %v4083_v40  ;;  %v11672_v13 = vpop.f32.mrb[172].mxu0 }
 0x366   : > { %v11674_v35 = vpop.f32.mrb[173].mxu0 }
 0x367   : > { %v11676_v16 = vpop.f32.mrb[174].mxu0 }
 0x368   : > { %v11678_v5 = vpop.f32.mrb[175].mxu0 }
 0x36c   : > { %4808 = vmatmul.mubr.bf16.gmra.mrb[124].mxu1 %v4082_v28 }
 0x36d   : > { %4817 = vmatprep.mubr.bf16.mxu1 %v4087_v6 }
 0x371   : > { %v11680_v41 = vpop.f32.mrb[176].mxu0 }
 0x372   : > { %v11682_v7 = vpop.f32.mrb[177].mxu0 }
 0x373   : > { %v11684_v40 = vpop.f32.mrb[178].mxu0 }
 0x374   : > { %4818 = vmatmul.mubr.bf16.gmra.mrb[128].mxu1 %v4086_v42  ;;  %v11686_v28 = vpop.f32.mrb[179].mxu0 }
 0x375   : > { %4827 = vmatprep.mubr.bf16.mxu1 %v4091_v0 }
 0x37c   : > { %4828 = vmatmul.mubr.bf16.gmra.mrb[132].mxu1 %v4090_v8  ;;  %v11688_v6 = vpop.f32.mrb[180].mxu0 }
 0x37d   : > { %4837 = vmatprep.mubr.bf16.mxu1 %v4095_v43  ;;  %v11690_v42 = vpop.f32.mrb[181].mxu0 }
 0x37e   : > { %v11692_v0 = vpop.f32.mrb[182].mxu0 }
 0x37f   : > { %v11694_v51 = vpop.f32.mrb[183].mxu0 }
 0x384   : > { %4838 = vmatmul.mubr.bf16.gmra.mrb[136].mxu1 %v4094_v15 }
 0x385   : > { %4847 = vmatprep.mubr.bf16.mxu1 %v4099_v32 }
 0x386   : > { %v11696_v24 = vpop.f32.mrb[184].mxu0 }
 0x387   : > { %v11698_v8 = vpop.f32.mrb[185].mxu0 }
 0x388   : > { %v11700_v39 = vpop.f32.mrb[186].mxu0 }
 0x389   : > { %v11702_v12 = vpop.f32.mrb[187].mxu0 }
 0x38c   : > { %4848 = vmatmul.mubr.bf16.gmra.mrb[140].mxu1 %v4098_v25 }
 0x38d   : > { %4857 = vmatprep.mubr.bf16.mxu1 %v4103_v57 }
 0x394   : > { %4858 = vmatmul.mubr.bf16.gmra.mrb[144].mxu1 %v4102_v26  ;;  %v11707_v43 = vpop.f32.mrb[188].mxu0 }
 0x395   : > { %4867 = vmatprep.mubr.bf16.mxu1 %v4107_v50  ;;  %v11709_v33 = vpop.f32.mrb[189].mxu0 }
 0x396   : > { %v11711_v46 = vpop.f32.mrb[190].mxu0 }
 0x397   : > { %v11713_v15 = vpop.f32.mrb[191].mxu0 }
 0x39c   : > { %4868 = vmatmul.mubr.bf16.gmra.mrb[148].mxu1 %v4106_v36 }
 0x39d   : > { %4877 = vmatprep.mubr.bf16.mxu1 %v4111_v37 }
 0x39f   : > { %v11718_v22 = vpop.f32.mrb[192].mxu0 }
 0x3a0   : > { %v11720_v32 = vpop.f32.mrb[193].mxu0 }
 0x3a1   : > { %v11722_v38 = vpop.f32.mrb[194].mxu0 }
 0x3a2   : > { %v11724_v25 = vpop.f32.mrb[195].mxu0 }
 0x3a4   : > { %4878 = vmatmul.mubr.bf16.gmra.mrb[152].mxu1 %v4110_v23  ;;  %v11762_v23 = vrot.slane %v826_v62, %v13167_v34 }
 0x3a5   : > { %4887 = vmatprep.mubr.bf16.mxu1 %v4115_v45  ;;  %v13170_v45 = vld [vmem:[#allocation23_spill] sm:$0xff] }
 0x3a6   : > { %v11769_v56 = vrot.slane %v826_v62, %v13170_v45 }
 0x3a8   : > { %v2488_v4 = vadd.f32 %v11650_v61, %v11769_v56  ;;  %v2492_v62 = vadd.f32 %v11654_v44, %v11769_v56  ;;  %v2496_v61 = vadd.f32 %v11656_v52, %v11762_v23  ;;  %v2500_v44 = vadd.f32 %v11660_v63, %v11762_v23 }
 0x3a9   : > { %v11726_v29 = vpop.f32.mrb[196].mxu0  ;;  %v2506_v52 = vadd.f32 %v11664_v3, %v11762_v23 }
 0x3aa   : > { %v11728_v57 = vpop.f32.mrb[197].mxu0 }
 0x3ab   : > { %v11730_v26 = vpop.f32.mrb[198].mxu0 }
 0x3ac   : > { %4888 = vmatmul.mubr.bf16.gmra.mrb[156].mxu1 %v4114_v20  ;;  %v11732_v58 = vpop.f32.mrb[199].mxu0  ;;  %v2486_v20 = vadd.f32 %v11648_v14, %v11762_v23 }
 0x3ae   : > { %v6132_v48 = vmul.f32 -1.442695, %v2486_v20 }
 0x3b0   : > { %7397 = vpow2.f32 %v6132_v48 }
 0x3b4   : > { %v11734_v11 = vpop.f32.mrb[200].mxu0 }
 0x3b5   : > { %v11736_v1 = vpop.f32.mrb[201].mxu0 }
 0x3b6   : > { %v11738_v50 = vpop.f32.mrb[202].mxu0 }
 0x3b7   : > { %v11740_v21 = vpop.f32.mrb[203].mxu0 }
 0x3bf   : > { %v11742_v2 = vpop.f32.mrb[204].mxu0 }
 0x3c0   : > { %v11744_v36 = vpop.f32.mrb[205].mxu0 }
 0x3c1   : > { %v11746_v30 = vpop.f32.mrb[206].mxu0 }
 0x3c2   : > { %v11748_v17 = vpop.f32.mrb[207].mxu0 }
 0x3ca   : > { %v11750_v55 = vpop.f32.mrb[208].mxu0 }
 0x3cb   : > { %v11752_v10 = vpop.f32.mrb[209].mxu0 }
 0x3cc   : > { %13164 = vst [vmem:[#allocation11_spill] sm:$0xff] %v11752_v10  ;;  %v11754_v19 = vpop.f32.mrb[210].mxu0  ;;  %v6135_v10 = vmul.f32 -1.442695, %v2492_v62 }
 0x3cd   : > { %13165 = vst [vmem:[#allocation87_spill] sm:$0xff] %v11754_v19  ;;  %v11756_v37 = vpop.f32.mrb[211].mxu0 }
 0x3ce   : > { %13166 = vst [vmem:[#allocation27_spill] sm:$0xff] %v11756_v37  ;;  %v2490_v37 = vadd.f32 %v11652_v59, %v11762_v23  ;;  %v2498_v59 = vadd.f32 %v11658_v54, %v11769_v56  ;;  %v6138_v54 = vmul.f32 -1.442695, %v2500_v44  ;;  %v2512_v44 = vadd.f32 %v11670_v49, %v11769_v56 }
 0x3d0   : > { %v6134_v14 = vmul.f32 -1.442695, %v2490_v37  ;;  %v2502_v37 = vadd.f32 %v11662_v53, %v11769_v56  ;;  %v6137_v62 = vmul.f32 -1.442695, %v2498_v59  ;;  %v2510_v53 = vadd.f32 %v11668_v60, %v11762_v23 }
 0x3d1   : > { %v2518_v60 = vadd.f32 %v11674_v35, %v11769_v56 }
 0x3d2   : > { %v6139_v63 = vmul.f32 -1.442695, %v2502_v37 }
 0x3d3   : > { %v11764_v31 = vpop.f32.mrb[212].mxu0 }
 0x3d4   : > { %13168 = vst [vmem:[#allocation35_spill] sm:$0xff] %v11764_v31  ;;  %v11766_v47 = vpop.f32.mrb[213].mxu0 }
 0x3d5   : > { %13169 = vst [vmem:[#allocation216_spill] sm:$0xff] %v11766_v47  ;;  %v11771_v27 = vpop.f32.mrb[214].mxu0 }
 0x3d6   : > { %13171 = vst [vmem:[#allocation28_spill] sm:$0xff] %v11771_v27  ;;  %v11775_v9 = vpop.f32.mrb[215].mxu0  ;;  %v6133_v27 = vmul.f32 -1.442695, %v2488_v4  ;;  %v6136_v4 = vmul.f32 -1.442695, %v2496_v61 }
 0x3d7   : > { %13172 = vst [vmem:[#allocation36_spill] sm:$0xff] %v11775_v9  ;;  %v6140_v61 = vmul.f32 -1.442695, %v2506_v52  ;;  %v2520_v52 = vadd.f32 %v11676_v16, %v11762_v23 }
 0x3d8   : > { %7399 = vpow2.f32 %v6133_v27 }
 0x3d9   : > { %7401 = vpow2.f32 %v6134_v14 }
 0x3da   : > { %7403 = vpow2.f32 %v6135_v10  ;;  %v2508_v10 = vadd.f32 %v11666_v18, %v11769_v56  ;;  %v2516_v18 = vadd.f32 %v11672_v13, %v11762_v23  ;;  %v6146_v13 = vmul.f32 -1.442695, %v2520_v52 }
 0x3db   : > { %7405 = vpow2.f32 %v6136_v4  ;;  %v6142_v4 = vmul.f32 -1.442695, %v2510_v53  ;;  %v2530_v52 = vadd.f32 %v11684_v40, %v11762_v23 }
 0x3dc   : > { %7407 = vpow2.f32 %v6137_v62 }
 0x3dd   : > { %7409 = vpow2.f32 %v6138_v54  ;;  %v6150_v40 = vmul.f32 -1.442695, %v2530_v52 }
 0x3de   : > { %7411 = vpow2.f32 %v6139_v63  ;;  %v6144_v63 = vmul.f32 -1.442695, %v2516_v18 }
 0x3df   : > { %v11781_v31 = vpop.f32.mrb[216].mxu0  ;;  %7413 = vpow2.f32 %v6140_v61  ;;  %v6145_v61 = vmul.f32 -1.442695, %v2518_v60 }
 0x3e0   : > { %v11785_v47 = vpop.f32.mrb[217].mxu0 }
 0x3e1   : > { %v11787_v19 = vpop.f32.mrb[218].mxu0 }
 0x3e2   : > { %v11789_v9 = vpop.f32.mrb[219].mxu0 }
 0x3e3   : > { %13173 = vst [vmem:[#allocation217_spill] sm:$0xff] %v11789_v9  ;;  %v7398_v9 = vpop.eup %7397 }
 0x3e4   : > { %v7400_v59 = vpop.eup %7399 }
 0x3e5   : > { %v7402_v3 = vpop.eup %7401 }
 0x3e6   : > { %v7404_v37 = vpop.eup %7403  ;;  %v5092_v62 = vadd.f32 1.0, %v7402_v3 }
 0x3e7   : > { %v11797_v20 = vpop.f32.mrb[220].mxu0  ;;  %v5093_v54 = vadd.f32 1.0, %v7404_v37  ;;  %v7406_v49 = vpop.eup %7405 }
 0x3e8   : > { %v11801_v48 = vpop.f32.mrb[221].mxu0  ;;  %v5094_v35 = vadd.f32 1.0, %v7406_v49  ;;  %v2532_v49 = vadd.f32 %v11686_v28, %v11769_v56 }
 0x3e9   : > { %13174 = vst [vmem:[#allocation29_spill] sm:$0xff] %v11801_v48  ;;  %v11805_v27 = vpop.f32.mrb[222].mxu0  ;;  %v5090_v48 = vadd.f32 1.0, %v7398_v9  ;;  %v6143_v9 = vmul.f32 -1.442695, %v2512_v44 }
 0x3ea   : > { %13175 = vst [vmem:[#allocation37_spill] sm:$0xff] %v11805_v27  ;;  %v11807_v14 = vpop.f32.mrb[223].mxu0  ;;  %v6141_v27 = vmul.f32 -1.442695, %v2508_v10  ;;  %v7408_v10 = vpop.eup %7407  ;;  %v6151_v28 = vmul.f32 -1.442695, %v2532_v49 }
 0x3eb   : > { %13176 = vst [vmem:[#allocation218_spill] sm:$0xff] %v11807_v14  ;;  %v5091_v14 = vadd.f32 1.0, %v7400_v59  ;;  %7415 = vrcp.f32 %v5090_v48  ;;  %v7410_v53 = vpop.eup %7409  ;;  %v2522_v48 = vadd.f32 %v11678_v5, %v11769_v56  ;;  %v5095_v59 = vadd.f32 1.0, %v7408_v10  ;;  %v4180_v10 = vld [vmem:[%s12313_s5] sm:$0x3] }
 0x3ec   : > { %7417 = vpow2.f32 %v6141_v27  ;;  %v7412_v27 = vpop.eup %7411  ;;  %v5096_v3 = vadd.f32 1.0, %v7410_v53 }
 0x3ed   : > { %7419 = vpow2.f32 %v6142_v4  ;;  %v7414_v16 = vpop.eup %7413  ;;  %v6147_v44 = vmul.f32 -1.442695, %v2522_v48  ;;  %v2528_v4 = vadd.f32 %v11682_v7, %v11769_v56  ;;  %v5097_v18 = vadd.f32 1.0, %v7412_v27 }
 0x3ee   : > { %7421 = vrcp.f32 %v5091_v14  ;;  %v2526_v14 = vadd.f32 %v11680_v41, %v11762_v23 }
 0x3ef   : > { %7423 = vrcp.f32 %v5092_v62  ;;  %v5098_v62 = vadd.f32 1.0, %v7414_v16  ;;  %v6149_v41 = vmul.f32 -1.442695, %v2528_v4  ;;  %v11839_v16 = vrot.slane %v4180_v10, %v13170_v45 }
 0x3f0   : > { %7425 = vpow2.f32 %v6143_v9  ;;  %v6148_v9 = vmul.f32 -1.442695, %v2526_v14  ;;  %v2536_v14 = vadd.f32 %v11688_v6, %v11762_v23 }
 0x3f1   : > { %7427 = vrcp.f32 %v5093_v54 }
 0x3f2   : > { %7429 = vpow2.f32 %v6144_v63 }
 0x3f3   : > { %7431 = vpow2.f32 %v6145_v61 }
 0x3f4   : > { %7433 = vpow2.f32 %v6146_v13 }
 0x3f5   : > { %v7416_v37 = vpop.eup %7415  ;;  %7435 = vrcp.f32 %v5094_v35  ;;  %v11836_v35 = vrot.slane %v4180_v10, %v13167_v34  ;;  %v2538_v34 = vadd.f32 %v11690_v42, %v11769_v56 }
 0x3f6   : > { %v7418_v5 = vpop.eup %7417  ;;  %7437 = vrcp.f32 %v5095_v59 }
 0x3f7   : > { %v7420_v60 = vpop.eup %7419  ;;  %7439 = vrcp.f32 %v5096_v3  ;;  %v5099_v63 = vadd.f32 1.0, %v7418_v5 }
 0x3f8   : > { %v7422_v54 = vpop.eup %7421  ;;  %7441 = vpow2.f32 %v6147_v44  ;;  %v5100_v53 = vadd.f32 1.0, %v7420_v60 }
 0x3f9   : > { %v7424_v7 = vpop.eup %7423  ;;  %7443 = vrcp.f32 %v5097_v18 }
 0x3fa   : > { %v7426_v61 = vpop.eup %7425  ;;  %7445 = vrcp.f32 %v5098_v62 }
 0x3fb   : > { %v7428_v13 = vpop.eup %7427  ;;  %7447 = vpow2.f32 %v6148_v9  ;;  %v5101_v59 = vadd.f32 1.0, %v7426_v61  ;;  %v2540_v9 = vadd.f32 %v11692_v0, %v11762_v23 }
 0x3fc   : > { %v7430_v48 = vpop.eup %7429  ;;  %7449 = vpow2.f32 %v6149_v41 }
 0x3fd   : > { %v7432_v27 = vpop.eup %7431  ;;  %7451 = vrcp.f32 %v5099_v63  ;;  %v5102_v4 = vadd.f32 1.0, %v7430_v48 }
 0x3fe   : > { %v7434_v3 = vpop.eup %7433  ;;  %7453 = vrcp.f32 %v5100_v53  ;;  %v5103_v62 = vadd.f32 1.0, %v7432_v27  ;;  %v6152_v53 = vmul.f32 -1.442695, %v2536_v14  ;;  %v6153_v27 = vmul.f32 -1.442695, %v2538_v34 }
 0x3ff   : > { %v7436_v44 = vpop.eup %7435  ;;  %7455 = vpow2.f32 %v6150_v40  ;;  %v5104_v41 = vadd.f32 1.0, %v7434_v3  ;;  %v2542_v40 = vadd.f32 %v11694_v51, %v11769_v56  ;;  %v6154_v3 = vmul.f32 -1.442695, %v2540_v9 }
 0x400   : > { %v7438_v5 = vpop.eup %7437  ;;  %7457 = vpow2.f32 %v6151_v28  ;;  %v2546_v34 = vadd.f32 %v11696_v24, %v11762_v23 }
 0x401   : > { %v7440_v52 = vpop.eup %7439  ;;  %7459 = vrcp.f32 %v5101_v59 }
 0x402   : > { %v7442_v63 = vpop.eup %7441  ;;  %7461 = vrcp.f32 %v5102_v4 }
 0x403   : > { %v7444_v48 = vpop.eup %7443  ;;  %7463 = vrcp.f32 %v5103_v62  ;;  %v5105_v51 = vadd.f32 1.0, %v7442_v63 }
 0x404   : > { %v11855_v59 = vpop.eup %7445  ;;  %7465 = vrcp.f32 %v5104_v41 }
 0x405   : > { %v7448_v14 = vpop.eup %7447  ;;  %7467 = vpow2.f32 %v6152_v53 }
 0x406   : > { %v7450_v4 = vpop.eup %7449  ;;  %7469 = vpow2.f32 %v6153_v27  ;;  %v5106_v9 = vadd.f32 1.0, %v7448_v14  ;;  %v2552_v14 = vadd.f32 %v11702_v12, %v11769_v56 }
 0x407   : > { %v4739_v18 = vpop.f32.mrb[96].mxu1  ;;  %v11865_v62 = vpop.eup %7451  ;;  %7471 = vpow2.f32 %v6154_v3 }
 0x408   : > { %v6251_v60 = vadd.f32 %v4739_v18, %v11836_v35  ;;  %v4741_v45 = vpop.f32.mrb[97].mxu1  ;;  %v6155_v18 = vmul.f32 -1.442695, %v2542_v40  ;;  %7473 = vrcp.f32 %v5105_v51 }
 0x409   : > { %v6252_v6 = vadd.f32 %v4741_v45, %v11839_v16  ;;  %v4743_v49 = vpop.f32.mrb[98].mxu1  ;;  %v11870_v45 = vpop.eup %7453 }
 0x40a   : > { %v5282_v10 = vmul.f32 %v7416_v37, %v6251_v60  ;;  %v6253_v42 = vadd.f32 %v4743_v49, %v11836_v35  ;;  %v4745_v61 = vpop.f32.mrb[99].mxu1  ;;  %v5107_v49 = vadd.f32 1.0, %v7450_v4  ;;  %7475 = vpow2.f32 %v6155_v18 }
 0x40b   : > { %v5283_v28 = vmul.f32 %v7422_v54, %v6252_v6  ;;  %v6254_v0 = vadd.f32 %v4745_v61, %v11839_v16  ;;  %v7456_v6 = vpop.eup %7455  ;;  %7477 = vrcp.f32 %v5106_v9  ;;  %v2556_v4 = vadd.f32 %v11707_v43, %v11762_v23 }
 0x40c   : > { %5346 = vst [vmem:[%s11858_s21] sm:$0xff] %v5282_v10  ;;  %v5284_v37 = vmul.f32 %v7424_v7, %v6253_v42  ;;  %v2548_v7 = vadd.f32 %v11698_v8, %v11769_v56  ;;  %v7458_v10 = vpop.eup %7457  ;;  %v6156_v8 = vmul.f32 -1.442695, %v2546_v34  ;;  %v5108_v3 = vadd.f32 1.0, %v7456_v6 }
 0x40d   : > { %5347 = vst [vmem:[%s11858_s21 + $0x8] sm:$0xff] %v5283_v28  ;;  %v5285_v54 = vmul.f32 %v7428_v13, %v6254_v0  ;;  %v7460_v40 = vpop.eup %7459  ;;  %7479 = vrcp.f32 %v5107_v49  ;;  %v6159_v9 = vmul.f32 -1.442695, %v2552_v14  ;;  %v6160_v6 = vmul.f32 -1.442695, %v2556_v4 }
 0x40e   : > { %5348 = vst [vmem:[%s11858_s21 + $0x10] sm:$0xff] %v5284_v37  ;;  %v6157_v27 = vmul.f32 -1.442695, %v2548_v7  ;;  %v2550_v37 = vadd.f32 %v11700_v39, %v11762_v23  ;;  %v11881_v51 = vpop.eup %7461  ;;  %7481 = vpow2.f32 %v6156_v8  ;;  %v2558_v39 = vadd.f32 %v11709_v33, %v11769_v56 }
 0x40f   : > { %5349 = vst [vmem:[%s11858_s21 + $0x18] sm:$0xff] %v5285_v54  ;;  %v4749_v60 = vpop.f32.mrb[100].mxu1  ;;  %v5109_v54 = vadd.f32 1.0, %v7458_v10  ;;  %v11886_v18 = vpop.eup %7463 }
 0x410   : > { %v6255_v13 = vadd.f32 %v4749_v60, %v11836_v35  ;;  %v4751_v41 = vpop.f32.mrb[101].mxu1  ;;  %7483 = vpow2.f32 %v6157_v27  ;;  %v6158_v34 = vmul.f32 -1.442695, %v2550_v37  ;;  %v6161_v10 = vmul.f32 -1.442695, %v2558_v39 }
 0x411   : > { %v6256_v24 = vadd.f32 %v4751_v41, %v11839_v16  ;;  %v4753_v63 = vpop.f32.mrb[102].mxu1  ;;  %7485 = vrcp.f32 %v5108_v3  ;;  %v2562_v37 = vadd.f32 %v11713_v15, %v11769_v56 }
 0x412   : > { %v5286_v42 = vmul.f32 %v7436_v44, %v6255_v13  ;;  %v6257_v61 = vadd.f32 %v4753_v63, %v11836_v35  ;;  %v4755_v53 = vpop.f32.mrb[103].mxu1  ;;  %7487 = vrcp.f32 %v5109_v54 }
 0x413   : > { %v5287_v28 = vmul.f32 %v7438_v5, %v6256_v24  ;;  %v6258_v0 = vadd.f32 %v4755_v53, %v11839_v16  ;;  %7489 = vpow2.f32 %v6158_v34  ;;  %v6163_v39 = vmul.f32 -1.442695, %v2562_v37 }
 0x414   : > { %5350 = vst [vmem:[%s11858_s21 + $0x20] sm:$0xff] %v5286_v42  ;;  %v5288_v44 = vmul.f32 %v7440_v52, %v6257_v61  ;;  %v11891_v52 = vpop.eup %7465  ;;  %v2560_v42 = vadd.f32 %v11711_v46, %v11762_v23  ;;  %7491 = vpow2.f32 %v6159_v9 }
 0x415   : > { %5351 = vst [vmem:[%s11858_s21 + $0x28] sm:$0xff] %v5287_v28  ;;  %v5289_v5 = vmul.f32 %v7444_v48, %v6258_v0  ;;  %v7468_v60 = vpop.eup %7467  ;;  %7493 = vpow2.f32 %v6160_v6 }
 0x416   : > { %5352 = vst [vmem:[%s11858_s21 + $0x30] sm:$0xff] %v5288_v44  ;;  %v7470_v43 = vpop.eup %7469  ;;  %v5110_v53 = vadd.f32 1.0, %v7468_v60  ;;  %7495 = vpow2.f32 %v6161_v10  ;;  %v6162_v14 = vmul.f32 -1.442695, %v2560_v42 }
 0x417   : > { %5353 = vst [vmem:[%s11858_s21 + $0x38] sm:$0xff] %v5289_v5  ;;  %v4759_v12 = vpop.f32.mrb[104].mxu1  ;;  %v7472_v33 = vpop.eup %7471  ;;  %v5111_v27 = vadd.f32 1.0, %v7470_v43 }
 0x418   : > { %v6259_v48 = vadd.f32 %v4759_v12, %v11836_v35  ;;  %v4761_v7 = vpop.f32.mrb[105].mxu1  ;;  %v7474_v61 = vpop.eup %7473  ;;  %v5112_v3 = vadd.f32 1.0, %v7472_v33  ;;  %7497 = vrcp.f32 %v5110_v53 }
 0x419   : > { %v6260_v13 = vadd.f32 %v4761_v7, %v11839_v16  ;;  %v4763_v41 = vpop.f32.mrb[106].mxu1  ;;  %v7476_v0 = vpop.eup %7475  ;;  %7499 = vrcp.f32 %v5111_v27 }
 0x41a   : > { %v5290_v49 = vmul.f32 %v11855_v59, %v6259_v48  ;;  %v6261_v24 = vadd.f32 %v4763_v41, %v11836_v35  ;;  %v4765_v63 = vpop.f32.mrb[107].mxu1  ;;  %v11909_v44 = vpop.eup %7477  ;;  %v5113_v15 = vadd.f32 1.0, %v7476_v0  ;;  %7501 = vrcp.f32 %v5112_v3 }
 0x41b   : > { %v5291_v8 = vmul.f32 %v11865_v62, %v6260_v13  ;;  %v6262_v28 = vadd.f32 %v4765_v63, %v11839_v16  ;;  %v2566_v62 = vadd.f32 %v11718_v22, %v11762_v23  ;;  %v11912_v54 = vpop.eup %7479  ;;  %v2568_v48 = vadd.f32 %v11720_v32, %v11769_v56 }
 0x41c   : > { %5354 = vst [vmem:[%s11858_s21 + $0x40] sm:$0xff] %v5290_v49  ;;  %v5292_v59 = vmul.f32 %v11870_v45, %v6261_v24  ;;  %v7482_v5 = vpop.eup %7481  ;;  %7503 = vpow2.f32 %v6162_v14  ;;  %v2570_v41 = vadd.f32 %v11722_v38, %v11762_v23  ;;  %v2572_v32 = vadd.f32 %v11724_v25, %v11769_v56 }
 0x41d   : > { %5355 = vst [vmem:[%s11858_s21 + $0x48] sm:$0xff] %v5291_v8  ;;  %v5293_v46 = vmul.f32 %v7460_v40, %v6262_v28  ;;  %v7484_v12 = vpop.eup %7483  ;;  %v6164_v60 = vmul.f32 -1.442695, %v2566_v62  ;;  %v5114_v33 = vadd.f32 1.0, %v7482_v5  ;;  %7505 = vpow2.f32 %v6163_v39 }
 0x41e   : > { %5356 = vst [vmem:[%s11858_s21 + $0x50] sm:$0xff] %v5292_v59  ;;  %v7486_v7 = vpop.eup %7485  ;;  %v5115_v63 = vadd.f32 1.0, %v7484_v12  ;;  %v6165_v38 = vmul.f32 -1.442695, %v2568_v48  ;;  %v6167_v25 = vmul.f32 -1.442695, %v2572_v32  ;;  %v2578_v14 = vadd.f32 %v11728_v57, %v11769_v56 }
 0x41f   : > { %5357 = vst [vmem:[%s11858_s21 + $0x58] sm:$0xff] %v5293_v46  ;;  %v4769_v45 = vpop.f32.mrb[108].mxu1  ;;  %v7488_v6 = vpop.eup %7487  ;;  %7507 = vpow2.f32 %v6164_v60 }
 0x420   : > { %v6263_v4 = vadd.f32 %v4769_v45, %v11836_v35  ;;  %v4771_v40 = vpop.f32.mrb[109].mxu1  ;;  %v7490_v10 = vpop.eup %7489  ;;  %7509 = vrcp.f32 %v5113_v15 }
 0x421   : > { %v6264_v22 = vadd.f32 %v4771_v40, %v11839_v16  ;;  %v4773_v34 = vpop.f32.mrb[110].mxu1  ;;  %v7492_v53 = vpop.eup %7491  ;;  %7511 = vrcp.f32 %v5114_v33  ;;  %v5116_v27 = vadd.f32 1.0, %v7490_v10  ;;  %v2582_v33 = vadd.f32 %v11732_v58, %v11769_v56 }
 0x422   : > { %v5294_v9 = vmul.f32 %v11881_v51, %v6263_v4  ;;  %v6265_v43 = vadd.f32 %v4773_v34, %v11836_v35  ;;  %v4775_v13 = vpop.f32.mrb[111].mxu1  ;;  %v7494_v8 = vpop.eup %7493  ;;  %7513 = vrcp.f32 %v5115_v63  ;;  %v5117_v3 = vadd.f32 1.0, %v7492_v53 }
 0x423   : > { %v5295_v49 = vmul.f32 %v11886_v18, %v6264_v22  ;;  %v6266_v24 = vadd.f32 %v4775_v13, %v11839_v16  ;;  %v6166_v18 = vmul.f32 -1.442695, %v2570_v41  ;;  %v7496_v0 = vpop.eup %7495  ;;  %7515 = vpow2.f32 %v6165_v38 }
 0x424   : > { %5358 = vst [vmem:[%s11858_s21 + $0x60] sm:$0xff] %v5294_v9  ;;  %v5296_v51 = vmul.f32 %v11891_v52, %v6265_v43  ;;  %v7498_v37 = vpop.eup %7497  ;;  %v5118_v5 = vadd.f32 1.0, %v7494_v8  ;;  %v5119_v39 = vadd.f32 1.0, %v7496_v0  ;;  %v6169_v9 = vmul.f32 -1.442695, %v2578_v14 }
 0x425   : > { %5359 = vst [vmem:[%s11858_s21 + $0x68] sm:$0xff] %v5295_v49  ;;  %v5297_v42 = vmul.f32 %v7474_v61, %v6266_v24  ;;  %v2576_v61 = vadd.f32 %v11726_v29, %v11762_v23  ;;  %v7500_v45 = vpop.eup %7499  ;;  %7517 = vpow2.f32 %v6166_v18 }
 0x426   : > { %5360 = vst [vmem:[%s11858_s21 + $0x70] sm:$0xff] %v5296_v51  ;;  %v7502_v29 = vpop.eup %7501  ;;  %7519 = vpow2.f32 %v6167_v25 }
 0x427   : > { %5361 = vst [vmem:[%s11858_s21 + $0x78] sm:$0xff] %v5297_v42  ;;  %v4779_v28 = vpop.f32.mrb[112].mxu1  ;;  %v7504_v34 = vpop.eup %7503  ;;  %7521 = vrcp.f32 %v5116_v27  ;;  %v6168_v60 = vmul.f32 -1.442695, %v2576_v61  ;;  %v2588_v42 = vadd.f32 %v11736_v1, %v11769_v56  ;;  %v6171_v27 = vmul.f32 -1.442695, %v2582_v33 }
 0x428   : > { %v6267_v52 = vadd.f32 %v4779_v28, %v11836_v35  ;;  %v4781_v59 = vpop.f32.mrb[113].mxu1  ;;  %7523 = vrcp.f32 %v5117_v3  ;;  %v7506_v43 = vpop.eup %7505  ;;  %v5120_v13 = vadd.f32 1.0, %v7504_v34 }
 0x429   : > { %v6268_v46 = vadd.f32 %v4781_v59, %v11839_v16  ;;  %v4783_v62 = vpop.f32.mrb[114].mxu1  ;;  %7525 = vrcp.f32 %v5118_v5  ;;  %v5121_v63 = vadd.f32 1.0, %v7506_v43  ;;  %v6173_v3 = vmul.f32 -1.442695, %v2588_v42 }
 0x42a   : > { %v5298_v15 = vmul.f32 %v11909_v44, %v6267_v52  ;;  %v6269_v4 = vadd.f32 %v4783_v62, %v11836_v35  ;;  %v4785_v40 = vpop.f32.mrb[115].mxu1  ;;  %v2580_v44 = vadd.f32 %v11730_v26, %v11762_v23  ;;  %7527 = vrcp.f32 %v5119_v39 }
 0x42b   : > { %v5299_v12 = vmul.f32 %v11912_v54, %v6268_v46  ;;  %v6270_v22 = vadd.f32 %v4785_v40, %v11839_v16  ;;  %v7508_v54 = vpop.eup %7507  ;;  %7529 = vpow2.f32 %v6168_v60  ;;  %v2596_v5 = vadd.f32 %v11742_v2, %v11762_v23 }
 0x42c   : > { %5362 = vst [vmem:[%s11858_s21 + $0x80] sm:$0xff] %v5298_v15  ;;  %v5300_v57 = vmul.f32 %v7486_v7, %v6269_v4  ;;  %v7510_v7 = vpop.eup %7509  ;;  %v6170_v26 = vmul.f32 -1.442695, %v2580_v44  ;;  %7531 = vpow2.f32 %v6169_v9  ;;  %v5122_v38 = vadd.f32 1.0, %v7508_v54 }
 0x42d   : > { %5363 = vst [vmem:[%s11858_s21 + $0x88] sm:$0xff] %v5299_v12  ;;  %v5301_v48 = vmul.f32 %v7488_v6, %v6270_v22  ;;  %v2586_v6 = vadd.f32 %v11734_v11, %v11762_v23  ;;  %v7512_v32 = vpop.eup %7511  ;;  %v2590_v11 = vadd.f32 %v11738_v50, %v11762_v23  ;;  %7533 = vrcp.f32 %v5120_v13 }
 0x42e   : > { %5364 = vst [vmem:[%s11858_s21 + $0x90] sm:$0xff] %v5300_v57  ;;  %v7514_v58 = vpop.eup %7513  ;;  %7535 = vpow2.f32 %v6170_v26  ;;  %v2592_v50 = vadd.f32 %v11740_v21, %v11769_v56  ;;  %v6176_v54 = vmul.f32 -1.442695, %v2596_v5  ;;  %v2598_v13 = vadd.f32 %v11744_v36, %v11769_v56  ;;  %v13178_v5 = vld [vmem:[#allocation87_spill] sm:$0xff] }
 0x42f   : > { %5365 = vst [vmem:[%s11858_s21 + $0x98] sm:$0xff] %v5301_v48  ;;  %v4789_v41 = vpop.f32.mrb[116].mxu1  ;;  %v7516_v28 = vpop.eup %7515  ;;  %v6172_v59 = vmul.f32 -1.442695, %v2586_v6  ;;  %7537 = vrcp.f32 %v5121_v63  ;;  %v6174_v62 = vmul.f32 -1.442695, %v2590_v11 }
 0x430   : > { %v6271_v49 = vadd.f32 %v4789_v41, %v11836_v35  ;;  %v4791_v24 = vpop.f32.mrb[117].mxu1  ;;  %v7518_v52 = vpop.eup %7517  ;;  %7539 = vrcp.f32 %v5122_v38  ;;  %v5123_v4 = vadd.f32 1.0, %v7516_v28  ;;  %v6175_v22 = vmul.f32 -1.442695, %v2592_v50 }
 0x431   : > { %v6272_v51 = vadd.f32 %v4791_v24, %v11839_v16  ;;  %v4793_v10 = vpop.f32.mrb[118].mxu1  ;;  %v7520_v61 = vpop.eup %7519  ;;  %7541 = vpow2.f32 %v6171_v27  ;;  %v5124_v57 = vadd.f32 1.0, %v7518_v52  ;;  %v2606_v50 = vadd.f32 %v11750_v55, %v11762_v23 }
 0x432   : > { %v5302_v53 = vmul.f32 %v7498_v37, %v6271_v49  ;;  %v6273_v18 = vadd.f32 %v4793_v10, %v11836_v35  ;;  %v4795_v8 = vpop.f32.mrb[119].mxu1  ;;  %v7522_v46 = vpop.eup %7521  ;;  %7543 = vpow2.f32 %v6172_v59  ;;  %v5125_v41 = vadd.f32 1.0, %v7520_v61 }
 0x433   : > { %v5303_v25 = vmul.f32 %v7500_v45, %v6272_v51  ;;  %v6274_v0 = vadd.f32 %v4795_v8, %v11839_v16  ;;  %v7524_v14 = vpop.eup %7523  ;;  %7545 = vpow2.f32 %v6173_v3  ;;  %v6177_v51 = vmul.f32 -1.442695, %v2598_v13 }
 0x434   : > { %5366 = vst [vmem:[%s11858_s21 + $0xa0] sm:$0xff] %v5302_v53  ;;  %v5304_v1 = vmul.f32 %v7502_v29, %v6273_v18  ;;  %v7526_v15 = vpop.eup %7525  ;;  %7547 = vpow2.f32 %v6174_v62  ;;  %v2602_v10 = vadd.f32 %v11748_v17, %v11769_v56 }
 0x435   : > { %5367 = vst [vmem:[%s11858_s21 + $0xa8] sm:$0xff] %v5303_v25  ;;  %v5305_v37 = vmul.f32 %v7510_v7, %v6274_v0  ;;  %v7528_v39 = vpop.eup %7527  ;;  %7549 = vrcp.f32 %v5123_v4 }
 0x436   : > { %5368 = vst [vmem:[%s11858_s21 + $0xb0] sm:$0xff] %v5304_v1  ;;  %v7530_v34 = vpop.eup %7529  ;;  %7551 = vpow2.f32 %v6175_v22  ;;  %v6179_v59 = vmul.f32 -1.442695, %v2602_v10 }
 0x437   : > { %5369 = vst [vmem:[%s11858_s21 + $0xb8] sm:$0xff] %v5305_v37  ;;  %v4799_v45 = vpop.f32.mrb[120].mxu1  ;;  %v7532_v48 = vpop.eup %7531  ;;  %v5126_v49 = vadd.f32 1.0, %v7530_v34  ;;  %7553 = vrcp.f32 %v5124_v57  ;;  %v6180_v34 = vmul.f32 -1.442695, %v2606_v50 }
 0x438   : > { %v6275_v40 = vadd.f32 %v4799_v45, %v11836_v35  ;;  %v4801_v29 = vpop.f32.mrb[121].mxu1  ;;  %v7534_v7 = vpop.eup %7533  ;;  %v5127_v6 = vadd.f32 1.0, %v7532_v48  ;;  %7555 = vpow2.f32 %v6176_v54 }
 0x439   : > { %v6276_v21 = vadd.f32 %v4801_v29, %v11839_v16  ;;  %v4803_v12 = vpop.f32.mrb[122].mxu1  ;;  %v7536_v26 = vpop.eup %7535  ;;  %7557 = vrcp.f32 %v5125_v41 }
 0x43a   : > { %v5306_v60 = vmul.f32 %v7512_v32, %v6275_v40  ;;  %v6277_v44 = vadd.f32 %v4803_v12, %v11836_v35  ;;  %v4805_v2 = vpop.f32.mrb[123].mxu1  ;;  %v2600_v32 = vadd.f32 %v11746_v30, %v11762_v23  ;;  %v7538_v63 = vpop.eup %7537  ;;  %7559 = vrcp.f32 %v5126_v49 }
 0x43b   : > { %v5307_v9 = vmul.f32 %v7514_v58, %v6276_v21  ;;  %v6278_v43 = vadd.f32 %v4805_v2, %v11839_v16  ;;  %v7540_v42 = vpop.eup %7539  ;;  %v5128_v18 = vadd.f32 1.0, %v7536_v26  ;;  %7561 = vrcp.f32 %v5127_v6  ;;  %v13180_v6 = vld [vmem:[#allocation35_spill] sm:$0xff] }
 0x43c   : > { %5370 = vst [vmem:[%s11858_s21 + $0xc0] sm:$0xff] %v5306_v60  ;;  %v5308_v33 = vmul.f32 %v7522_v46, %v6277_v44  ;;  %v7542_v53 = vpop.eup %7541  ;;  %v6178_v17 = vmul.f32 -1.442695, %v2600_v32  ;;  %7563 = vpow2.f32 %v6177_v51  ;;  %v13177_v46 = vld [vmem:[#allocation11_spill] sm:$0xff]  ;;  %v2616_v32 = vadd.f32 %v13180_v6, %v11762_v23 }
 0x43d   : > { %5371 = vst [vmem:[%s11858_s21 + $0xc8] sm:$0xff] %v5307_v9  ;;  %v5309_v24 = vmul.f32 %v7524_v14, %v6278_v43  ;;  %v7544_v11 = vpop.eup %7543  ;;  %v5129_v37 = vadd.f32 1.0, %v7542_v53  ;;  %v2608_v62 = vadd.f32 %v13177_v46, %v11769_v56  ;;  %7565 = vrcp.f32 %v5128_v18  ;;  %v13179_v9 = vld [vmem:[#allocation27_spill] sm:$0xff]  ;;  %v13182_v18 = vld [vmem:[#allocation28_spill] sm:$0xff] }
 0x43e   : > { %5372 = vst [vmem:[%s11858_s21 + $0xd0] sm:$0xff] %v5308_v33  ;;  %v7546_v27 = vpop.eup %7545  ;;  %v5130_v14 = vadd.f32 1.0, %v7544_v11  ;;  %7567 = vpow2.f32 %v6178_v17  ;;  %v2612_v43 = vadd.f32 %v13179_v9, %v11769_v56 }
 0x43f   : > { %5373 = vst [vmem:[%s11858_s21 + $0xd8] sm:$0xff] %v5309_v24  ;;  %v4809_v36 = vpop.f32.mrb[124].mxu1  ;;  %v7548_v61 = vpop.eup %7547  ;;  %v5131_v40 = vadd.f32 1.0, %v7546_v27  ;;  %7569 = vpow2.f32 %v6179_v59  ;;  %v6181_v57 = vmul.f32 -1.442695, %v2608_v62 }
 0x440   : > { %v6279_v58 = vadd.f32 %v4809_v36, %v11836_v35  ;;  %v4811_v38 = vpop.f32.mrb[125].mxu1  ;;  %v7550_v4 = vpop.eup %7549  ;;  %7571 = vrcp.f32 %v5129_v37  ;;  %v13183_v37 = vld [vmem:[#allocation36_spill] sm:$0xff] }
 0x441   : > { %v6280_v8 = vadd.f32 %v4811_v38, %v11839_v16  ;;  %v4813_v30 = vpop.f32.mrb[126].mxu1  ;;  %v7552_v29 = vpop.eup %7551  ;;  %7573 = vrcp.f32 %v5130_v14  ;;  %v13181_v38 = vld [vmem:[#allocation216_spill] sm:$0xff] }
 0x442   : > { %v5310_v28 = vmul.f32 %v7526_v15, %v6279_v58  ;;  %v6281_v25 = vadd.f32 %v4813_v30, %v11836_v35  ;;  %v4815_v0 = vpop.f32.mrb[127].mxu1  ;;  %v2610_v15 = vadd.f32 %v13178_v5, %v11762_v23  ;;  %v7554_v55 = vpop.eup %7553  ;;  %7575 = vrcp.f32 %v5131_v40 }
 0x443   : > { %v5311_v52 = vmul.f32 %v7528_v39, %v6280_v8  ;;  %v6282_v1 = vadd.f32 %v4815_v0, %v11839_v16  ;;  %v5132_v39 = vadd.f32 1.0, %v7548_v61  ;;  %v7556_v60 = vpop.eup %7555  ;;  %v5133_v13 = vadd.f32 1.0, %v7552_v29 }
 0x444   : > { %5374 = vst [vmem:[%s11858_s21 + $0xe0] sm:$0xff] %v5310_v28  ;;  %v5312_v3 = vmul.f32 %v7534_v7, %v6281_v25  ;;  %v6182_v48 = vmul.f32 -1.442695, %v2610_v15  ;;  %v7558_v54 = vpop.eup %7557  ;;  %v5134_v36 = vadd.f32 1.0, %v7556_v60  ;;  %v6183_v58 = vmul.f32 -1.442695, %v2612_v43 }
 0x445   : > { %5375 = vst [vmem:[%s11858_s21 + $0xe8] sm:$0xff] %v5311_v52  ;;  %v5313_v45 = vmul.f32 %v7538_v63, %v6282_v1  ;;  %v7560_v49 = vpop.eup %7559  ;;  %7577 = vrcp.f32 %v5132_v39  ;;  %v2618_v53 = vadd.f32 %v13181_v38, %v11769_v56  ;;  %v2620_v8 = vadd.f32 %v13182_v18, %v11762_v23 }
 0x446   : > { %5376 = vst [vmem:[%s11858_s21 + $0xf0] sm:$0xff] %v5312_v3  ;;  %v7562_v63 = vpop.eup %7561  ;;  %7579 = vpow2.f32 %v6180_v34  ;;  %v6184_v28 = vmul.f32 -1.442695, %v2616_v32  ;;  %v2622_v3 = vadd.f32 %v13183_v37, %v11769_v56  ;;  %v2626_v5 = vadd.f32 %v11781_v31, %v11762_v23  ;;  %v13186_v37 = vld [vmem:[#allocation37_spill] sm:$0xff] }
 0x447   : > { %5377 = vst [vmem:[%s11858_s21 + $0xf8] sm:$0xff] %v5313_v45  ;;  %v4819_v21 = vpop.f32.mrb[128].mxu1  ;;  %v7564_v10 = vpop.eup %7563  ;;  %7581 = vpow2.f32 %v6181_v57  ;;  %v6185_v61 = vmul.f32 -1.442695, %v2618_v53  ;;  %v6186_v45 = vmul.f32 -1.442695, %v2620_v8 }
 0x448   : > { %v6283_v12 = vadd.f32 %v4819_v21, %v11836_v35  ;;  %v4821_v22 = vpop.f32.mrb[129].mxu1  ;;  %7583 = vpow2.f32 %v6182_v48  ;;  %v7566_v30 = vpop.eup %7565  ;;  %v5135_v0 = vadd.f32 1.0, %v7564_v10  ;;  %v6187_v31 = vmul.f32 -1.442695, %v2622_v3 }
 0x449   : > { %v6284_v44 = vadd.f32 %v4821_v22, %v11839_v16  ;;  %v4823_v2 = vpop.f32.mrb[130].mxu1  ;;  %7585 = vrcp.f32 %v5133_v13  ;;  %v7568_v25 = vpop.eup %7567  ;;  %v6188_v60 = vmul.f32 -1.442695, %v2626_v5  ;;  %v2640_v3 = vadd.f32 %v13186_v37, %v11762_v23 }
 0x44a   : > { %v5314_v41 = vmul.f32 %v7540_v42, %v6283_v12  ;;  %v6285_v33 = vadd.f32 %v4823_v2, %v11836_v35  ;;  %v4825_v7 = vpop.f32.mrb[131].mxu1  ;;  %7587 = vrcp.f32 %v5134_v36  ;;  %v7570_v52 = vpop.eup %7569  ;;  %v2628_v12 = vadd.f32 %v11785_v47, %v11769_v56 }
 0x44b   : > { %v5315_v24 = vmul.f32 %v7550_v4, %v6284_v44  ;;  %v6286_v26 = vadd.f32 %v4825_v7, %v11839_v16  ;;  %7589 = vpow2.f32 %v6183_v58  ;;  %v7572_v50 = vpop.eup %7571  ;;  %v5136_v4 = vadd.f32 1.0, %v7568_v25 }
 0x44c   : > { %5378 = vst [vmem:[%s11858_s21 + $0x100] sm:$0xff] %v5314_v41  ;;  %v5316_v51 = vmul.f32 %v7554_v55, %v6285_v33  ;;  %v7574_v15 = vpop.eup %7573  ;;  %7591 = vpow2.f32 %v6184_v28  ;;  %v5137_v21 = vadd.f32 1.0, %v7570_v52  ;;  %v2630_v47 = vadd.f32 %v11787_v19, %v11762_v23 }
 0x44d   : > { %5379 = vst [vmem:[%s11858_s21 + $0x108] sm:$0xff] %v5315_v24  ;;  %v5317_v42 = vmul.f32 %v7558_v54, %v6286_v26  ;;  %v7576_v39 = vpop.eup %7575  ;;  %7593 = vrcp.f32 %v5135_v0  ;;  %v6189_v54 = vmul.f32 -1.442695, %v2628_v12  ;;  %v2636_v58 = vadd.f32 %v11797_v20, %v11762_v23 }
 0x44e   : > { %5380 = vst [vmem:[%s11858_s21 + $0x110] sm:$0xff] %v5316_v51  ;;  %7595 = vpow2.f32 %v6185_v61  ;;  %v6190_v53 = vmul.f32 -1.442695, %v2630_v47 }
 0x44f   : > { %5381 = vst [vmem:[%s11858_s21 + $0x118] sm:$0xff] %v5317_v42  ;;  %v4829_v11 = vpop.f32.mrb[132].mxu1  ;;  %v7578_v22 = vpop.eup %7577  ;;  %7597 = vpow2.f32 %v6186_v45  ;;  %v13187_v45 = vld [vmem:[#allocation218_spill] sm:$0xff] }
 0x450   : > { %v6287_v17 = vadd.f32 %v4829_v11, %v11836_v35  ;;  %v4831_v27 = vpop.f32.mrb[133].mxu1  ;;  %v7580_v57 = vpop.eup %7579  ;;  %7599 = vrcp.f32 %v5136_v4  ;;  %v13185_v11 = vld [vmem:[#allocation29_spill] sm:$0xff]  ;;  %v2642_v5 = vadd.f32 %v13187_v45, %v11769_v56 }
 0x451   : > { %v6288_v1 = vadd.f32 %v4831_v27, %v11839_v16  ;;  %v4833_v59 = vpop.f32.mrb[134].mxu1  ;;  %v7582_v44 = vpop.eup %7581  ;;  %7601 = vrcp.f32 %v5137_v21  ;;  %v5138_v41 = vadd.f32 1.0, %v7580_v57  ;;  %v2638_v28 = vadd.f32 %v13185_v11, %v11769_v56 }
 0x452   : > { %v5318_v46 = vmul.f32 %v7560_v49, %v6287_v17  ;;  %v6289_v62 = vadd.f32 %v4833_v59, %v11836_v35  ;;  %v4835_v14 = vpop.f32.mrb[135].mxu1  ;;  %v7584_v48 = vpop.eup %7583  ;;  %7603 = vpow2.f32 %v6187_v31  ;;  %v13184_v49 = vld [vmem:[#allocation217_spill] sm:$0xff]  ;;  %v5139_v6 = vadd.f32 1.0, %v7582_v44 }
 0x453   : > { %v5319_v40 = vmul.f32 %v7562_v63, %v6288_v1  ;;  %v6290_v29 = vadd.f32 %v4835_v14, %v11839_v16  ;;  %v7586_v13 = vpop.eup %7585  ;;  %v2632_v24 = vadd.f32 %v13184_v49, %v11769_v56  ;;  %7605 = vpow2.f32 %v6188_v60 }
 0x454   : > { %5382 = vst [vmem:[%s11858_s21 + $0x120] sm:$0xff] %v5318_v46  ;;  %v5320_v55 = vmul.f32 %v7566_v30, %v6289_v62  ;;  %v7588_v26 = vpop.eup %7587  ;;  %v5140_v19 = vadd.f32 1.0, %v7584_v48  ;;  %7607 = vpow2.f32 %v6189_v54  ;;  %v6192_v27 = vmul.f32 -1.442695, %v2636_v58 }
 0x455   : > { %5383 = vst [vmem:[%s11858_s21 + $0x128] sm:$0xff] %v5319_v40  ;;  %v5321_v34 = vmul.f32 %v7572_v50, %v6290_v29  ;;  %v7590_v51 = vpop.eup %7589  ;;  %7609 = vrcp.f32 %v5138_v41  ;;  %v6191_v30 = vmul.f32 -1.442695, %v2632_v24  ;;  %v6193_v14 = vmul.f32 -1.442695, %v2638_v28 }
 0x456   : > { %5384 = vst [vmem:[%s11858_s21 + $0x130] sm:$0xff] %v5320_v55  ;;  %v7592_v18 = vpop.eup %7591  ;;  %7611 = vrcp.f32 %v5139_v6  ;;  %v5141_v0 = vadd.f32 1.0, %v7590_v51  ;;  %v6195_v57 = vmul.f32 -1.442695, %v2642_v5 }
 0x457   : > { %5385 = vst [vmem:[%s11858_s21 + $0x138] sm:$0xff] %v5321_v34  ;;  %v4839_v2 = vpop.f32.mrb[136].mxu1  ;;  %v7594_v25 = vpop.eup %7593  ;;  %7613 = vrcp.f32 %v5140_v19  ;;  %v5142_v1 = vadd.f32 1.0, %v7592_v18  ;;  %v6194_v34 = vmul.f32 -1.442695, %v2640_v3 }
 0x458   : > { %v6291_v9 = vadd.f32 %v4839_v2, %v11836_v35  ;;  %v4841_v43 = vpop.f32.mrb[137].mxu1  ;;  %v7596_v17 = vpop.eup %7595  ;;  %7615 = vpow2.f32 %v6190_v53 }
 0x459   : > { %v6292_v33 = vadd.f32 %v4841_v43, %v11839_v16  ;;  %v4843_v7 = vpop.f32.mrb[138].mxu1  ;;  %v7598_v52 = vpop.eup %7597  ;;  %7617 = vpow2.f32 %v6191_v30  ;;  %v5143_v4 = vadd.f32 1.0, %v7596_v17 }
 0x45a   : > { %v5322_v32 = vmul.f32 %v7574_v15, %v6291_v9  ;;  %v6293_v63 = vadd.f32 %v4843_v7, %v11836_v35  ;;  %v4845_v36 = vpop.f32.mrb[139].mxu1  ;;  %v7600_v50 = vpop.eup %7599  ;;  %7619 = vrcp.f32 %v5141_v0  ;;  %v5144_v23 = vadd.f32 1.0, %v7598_v52 }
 0x45b   : > { %v5323_v10 = vmul.f32 %v7576_v39, %v6292_v33  ;;  %v6294_v42 = vadd.f32 %v4845_v36, %v11839_v16  ;;  %v7602_v15 = vpop.eup %7601  ;;  %7621 = vpow2.f32 %v6192_v27 }
 0x45c   : > { %5386 = vst [vmem:[%s11858_s21 + $0x140] sm:$0xff] %v5322_v32  ;;  %v5324_v38 = vmul.f32 %v7578_v22, %v6293_v63  ;;  %v7604_v21 = vpop.eup %7603  ;;  %7623 = vrcp.f32 %v5142_v1 }
 0x45d   : > { %5387 = vst [vmem:[%s11858_s21 + $0x148] sm:$0xff] %v5323_v10  ;;  %v5325_v8 = vmul.f32 %v7586_v13, %v6294_v42  ;;  %v7606_v22 = vpop.eup %7605  ;;  %7625 = vpow2.f32 %v6193_v14  ;;  %v5145_v44 = vadd.f32 1.0, %v7604_v21 }
 0x45e   : > { %5388 = vst [vmem:[%s11858_s21 + $0x150] sm:$0xff] %v5324_v38  ;;  %v7608_v60 = vpop.eup %7607  ;;  %7627 = vrcp.f32 %v5143_v4  ;;  %v5146_v13 = vadd.f32 1.0, %v7606_v22 }
 0x45f   : > { %5389 = vst [vmem:[%s11858_s21 + $0x158] sm:$0xff] %v5325_v8  ;;  %v4849_v20 = vpop.f32.mrb[140].mxu1  ;;  %v7610_v2 = vpop.eup %7609  ;;  %7629 = vrcp.f32 %v5144_v23  ;;  %v5147_v49 = vadd.f32 1.0, %v7608_v60 }
 0x460   : > { %v6295_v59 = vadd.f32 %v4849_v20, %v11836_v35  ;;  %v4851_v61 = vpop.f32.mrb[141].mxu1  ;;  %v7612_v9 = vpop.eup %7611  ;;  %7631 = vpow2.f32 %v6194_v34 }
 0x461   : > { %v6296_v46 = vadd.f32 %v4851_v61, %v11839_v16  ;;  %v4853_v62 = vpop.f32.mrb[142].mxu1  ;;  %v7614_v47 = vpop.eup %7613  ;;  %7633 = vpow2.f32 %v6195_v57 }
 0x462   : > { %v5326_v40 = vmul.f32 %v7588_v26, %v6295_v59  ;;  %v6297_v29 = vadd.f32 %v4853_v62, %v11836_v35  ;;  %v4855_v39 = vpop.f32.mrb[143].mxu1  ;;  %v7616_v7 = vpop.eup %7615  ;;  %7635 = vrcp.f32 %v5145_v44 }
 0x463   : > { %v5327_v55 = vmul.f32 %v7594_v25, %v6296_v46  ;;  %v6298_v12 = vadd.f32 %v4855_v39, %v11839_v16  ;;  %v7618_v32 = vpop.eup %7617  ;;  %7637 = vrcp.f32 %v5146_v13  ;;  %v5148_v42 = vadd.f32 1.0, %v7616_v7 }
 0x464   : > { %5390 = vst [vmem:[%s11858_s21 + $0x160] sm:$0xff] %v5326_v40  ;;  %v5328_v56 = vmul.f32 %v7600_v50, %v6297_v29  ;;  %v7620_v51 = vpop.eup %7619  ;;  %7639 = vrcp.f32 %v5147_v49  ;;  %v5149_v53 = vadd.f32 1.0, %v7618_v32 }
 0x465   : > { %5391 = vst [vmem:[%s11858_s21 + $0x168] sm:$0xff] %v5327_v55  ;;  %v5329_v31 = vmul.f32 %v7602_v15, %v6298_v12  ;;  %v7622_v10 = vpop.eup %7621  ;;  %7641 = vrcp.f32 %v5148_v42 }
 0x466   : > { %5392 = vst [vmem:[%s11858_s21 + $0x170] sm:$0xff] %v5328_v56  ;;  %v7624_v38 = vpop.eup %7623  ;;  %v5150_v0 = vadd.f32 1.0, %v7622_v10  ;;  %7643 = vrcp.f32 %v5149_v53 }
 0x467   : > { %5393 = vst [vmem:[%s11858_s21 + $0x178] sm:$0xff] %v5329_v31  ;;  %v4859_v48 = vpop.f32.mrb[144].mxu1  ;;  %v7626_v18 = vpop.eup %7625 }
 0x468   : > { %v6299_v43 = vadd.f32 %v4859_v48, %v11836_v35  ;;  %v4861_v54 = vpop.f32.mrb[145].mxu1  ;;  %v7628_v30 = vpop.eup %7627  ;;  %v5151_v52 = vadd.f32 1.0, %v7626_v18  ;;  %7645 = vrcp.f32 %v5150_v0 }
 0x469   : > { %v6300_v41 = vadd.f32 %v4861_v54, %v11839_v16  ;;  %v4863_v33 = vpop.f32.mrb[146].mxu1  ;;  %v7630_v25 = vpop.eup %7629 }
 0x46a   : > { %v5330_v24 = vmul.f32 %v7610_v2, %v6299_v43  ;;  %v6301_v26 = vadd.f32 %v4863_v33, %v11836_v35  ;;  %v4865_v6 = vpop.f32.mrb[147].mxu1  ;;  %v7632_v27 = vpop.eup %7631  ;;  %7647 = vrcp.f32 %v5151_v52 }
 0x46b   : > { %v5331_v63 = vmul.f32 %v7612_v9, %v6300_v41  ;;  %v6302_v36 = vadd.f32 %v4865_v6, %v11839_v16  ;;  %v7634_v37 = vpop.eup %7633  ;;  %v5152_v14 = vadd.f32 1.0, %v7632_v27 }
 0x46c   : > { %5394 = vst [vmem:[%s11858_s21 + $0x180] sm:$0xff] %v5330_v24  ;;  %v5332_v19 = vmul.f32 %v7614_v47, %v6301_v26  ;;  %v7636_v46 = vpop.eup %7635  ;;  %v5153_v5 = vadd.f32 1.0, %v7634_v37 }
 0x46d   : > { %5395 = vst [vmem:[%s11858_s21 + $0x188] sm:$0xff] %v5331_v63  ;;  %v5333_v58 = vmul.f32 %v7620_v51, %v6302_v36  ;;  %v7638_v15 = vpop.eup %7637  ;;  %7649 = vrcp.f32 %v5152_v14 }
 0x46e   : > { %5396 = vst [vmem:[%s11858_s21 + $0x190] sm:$0xff] %v5332_v19  ;;  %v7640_v40 = vpop.eup %7639  ;;  %7651 = vrcp.f32 %v5153_v5 }
 0x46f   : > { %5397 = vst [vmem:[%s11858_s21 + $0x198] sm:$0xff] %v5333_v58  ;;  %v4869_v8 = vpop.f32.mrb[148].mxu1  ;;  %v7642_v56 = vpop.eup %7641 }
 0x470   : > { %v6303_v11 = vadd.f32 %v4869_v8, %v11836_v35  ;;  %v4871_v28 = vpop.f32.mrb[149].mxu1  ;;  %v7644_v57 = vpop.eup %7643 }
 0x471   : > { %v6304_v17 = vadd.f32 %v4871_v28, %v11839_v16  ;;  %v4873_v20 = vpop.f32.mrb[150].mxu1 }
 0x472   : > { %v5334_v1 = vmul.f32 %v7624_v38, %v6303_v11  ;;  %v6305_v59 = vadd.f32 %v4873_v20, %v11836_v35  ;;  %v4875_v61 = vpop.f32.mrb[151].mxu1  ;;  %v7646_v2 = vpop.eup %7645 }
 0x473   : > { %v5335_v3 = vmul.f32 %v7628_v30, %v6304_v17  ;;  %v6306_v50 = vadd.f32 %v4875_v61, %v11839_v16 }
 0x474   : > { %5398 = vst [vmem:[%s11858_s21 + $0x1a0] sm:$0xff] %v5334_v1  ;;  %v5336_v62 = vmul.f32 %v7630_v25, %v6305_v59  ;;  %v7648_v9 = vpop.eup %7647 }
 0x475   : > { %5399 = vst [vmem:[%s11858_s21 + $0x1a8] sm:$0xff] %v5335_v3  ;;  %v5337_v45 = vmul.f32 %v7636_v46, %v6306_v50 }
 0x476   : > { %5400 = vst [vmem:[%s11858_s21 + $0x1b0] sm:$0xff] %v5336_v62 }
 0x477   : > { %5401 = vst [vmem:[%s11858_s21 + $0x1b8] sm:$0xff] %v5337_v45  ;;  %v4879_v4 = vpop.f32.mrb[152].mxu1  ;;  %v7650_v49 = vpop.eup %7649 }
 0x478   : > { %v6307_v29 = vadd.f32 %v4879_v4, %v11836_v35  ;;  %v4881_v39 = vpop.f32.mrb[153].mxu1  ;;  %v7652_v6 = vpop.eup %7651 }
 0x479   : > { %v6308_v21 = vadd.f32 %v4881_v39, %v11839_v16  ;;  %v4883_v23 = vpop.f32.mrb[154].mxu1 }
 0x47a   : > { %v5338_v55 = vmul.f32 %v7638_v15, %v6307_v29  ;;  %v6309_v12 = vadd.f32 %v4883_v23, %v11836_v35  ;;  %v4885_v22 = vpop.f32.mrb[155].mxu1 }
 0x47b   : > { %v5339_v34 = vmul.f32 %v7640_v40, %v6308_v21  ;;  %v6310_v31 = vadd.f32 %v4885_v22, %v11839_v16 }
 0x47c   : > { %5402 = vst [vmem:[%s11858_s21 + $0x1c0] sm:$0xff] %v5338_v55  ;;  %v5340_v60 = vmul.f32 %v7642_v56, %v6309_v12 }
 0x47d   : > { %5403 = vst [vmem:[%s11858_s21 + $0x1c8] sm:$0xff] %v5339_v34  ;;  %v5341_v44 = vmul.f32 %v7644_v57, %v6310_v31 }
 0x47e   : > { %5404 = vst [vmem:[%s11858_s21 + $0x1d0] sm:$0xff] %v5340_v60 }
 0x47f   : > { %5405 = vst [vmem:[%s11858_s21 + $0x1d8] sm:$0xff] %v5341_v44  ;;  %v4889_v48 = vpop.f32.mrb[156].mxu1 }
 0x480   : > { %v6311_v43 = vadd.f32 %v4889_v48, %v11836_v35  ;;  %v4891_v54 = vpop.f32.mrb[157].mxu1 }
 0x481   : > { %v6312_v47 = vadd.f32 %v4891_v54, %v11839_v16  ;;  %v4893_v13 = vpop.f32.mrb[158].mxu1  ;;  %5416 = sbr.rel (!%p7883_p5) target bundleno = 1232 (0x4d0), region = 48 }
 0x482   : > { %v5342_v41 = vmul.f32 %v7646_v2, %v6311_v43  ;;  %v6313_v33 = vadd.f32 %v4893_v13, %v11836_v35  ;;  %v4895_v7 = vpop.f32.mrb[159].mxu1 }
 0x483   : > { %v5343_v24 = vmul.f32 %v7648_v9, %v6312_v47  ;;  %v6314_v26 = vadd.f32 %v4895_v7, %v11839_v16 }
 0x484   : > { %5406 = vst [vmem:[%s11858_s21 + $0x1e0] sm:$0xff] %v5342_v41  ;;  %v5344_v32 = vmul.f32 %v7650_v49, %v6313_v33 }
 0x485   : > { %5407 = vst [vmem:[%s11858_s21 + $0x1e8] sm:$0xff] %v5343_v24  ;;  %v5345_v63 = vmul.f32 %v7652_v6, %v6314_v26 }
 0x486   : > { %5408 = vst [vmem:[%s11858_s21 + $0x1f0] sm:$0xff] %v5344_v32 }
 0x487   : > { %5409 = vst [vmem:[%s11858_s21 + $0x1f8] sm:$0xff] %v5345_v63 }
 0x488   : > { %s13208_s30 = smov (!%p5419_p12, %s5418_s30), 32 }
 0x489   : > { %s6215_s10 = sshll.u32 %s13208_s30, 8 }
 0x48a   : > { %p6203_p13 = scmp.eq.s32.totalorder %s6215_s10, 0 }
 0x48b   : > { %s12100_s8 = sshrl.u32 (!%p6203_p13), %s13208_s30, 5 }
 0x48c   : > { %5431 = sbr.rel (%p6203_p13) target bundleno = 1232 (0x4d0), region = 52  ;;  %p6204_p0 = scmp.le.s32.totalorder (!%p6203_p13), %s12100_s8, 0 }
 0x493   : > { %5676 = sbr.rel (%p6204_p0) target bundleno = 1211 (0x4bb), region = 103  ;;  %s13188_s23 = smov (!%p6204_p0), %s12097_s29 }
 0x494   : > { %s13189_s24 = smov (!%p6204_p0), %s11858_s21  ;;  %s12109_s15 = smov (!%p6204_p0), 0  }
 0x495   : > { %s12111_s18 = smov (!%p6204_p0), 0  }
 0x49a LB: >> { %v5444_v35 = vld [vmem:[%s7776_s24] sm:$0xff]  ;;  %v5446_v16 = vld [vmem:[%s7776_s24 + $0x10] sm:$0xff]  ;;  %s5572_s11 = sadd.s32 1, %s7780_s15  ;;  %v5508_v15 = vld [vmem:[%s7776_s24 + $0x8] sm:$0xff]  ;;  %s5438_s18 = sadd.s32 1, %s7784_s18   ;;  %s7784_s18 = sphi %s12111_s18, %s5438_s18   ;;  %s7780_s15 = sphi %s12109_s15, %s13192_s15   ;;  %s7776_s24 = sphi %s13189_s24, %s13191_s24   ;;  %s7772_s23 = sphi %s13188_s23, %s13190_s23  }
 0x49b   : >> { %v5448_v36 = vld [vmem:[%s7776_s24 + $0x20] sm:$0xff]  ;;  %5445 = vst [vmem:[%s7772_s23] sm:$0xff] %v5444_v35  ;;  %5447 = vst [vmem:[%s7772_s23 + $0x10] sm:$0xff] %v5446_v16  ;;  %v5450_v51 = vld [vmem:[%s7776_s24 + $0x30] sm:$0xff]  ;;  %p5573_p1 = scmp.ge.s32.totalorder %s5572_s11, %s12100_s8  ;;  %p5437_p2 = scmp.ge.s32.totalorder %s5438_s18, %s12100_s8 }
 0x49c   : >> { %5449 = vst [vmem:[%s7772_s23 + $0x20] sm:$0xff] %v5448_v36  ;;  %v5452_v19 = vld [vmem:[%s7776_s24 + $0x40] sm:$0xff]  ;;  %v5454_v10 = vld [vmem:[%s7776_s24 + $0x50] sm:$0xff]  ;;  %5451 = vst [vmem:[%s7772_s23 + $0x30] sm:$0xff] %v5450_v51 }
 0x49d   : >> { %5453 = vst [vmem:[%s7772_s23 + $0x40] sm:$0xff] %v5452_v19  ;;  %5455 = vst [vmem:[%s7772_s23 + $0x50] sm:$0xff] %v5454_v10  ;;  %v5456_v42 = vld [vmem:[%s7776_s24 + $0x60] sm:$0xff]  ;;  %v5458_v58 = vld [vmem:[%s7776_s24 + $0x70] sm:$0xff]  ;;  %s13210_s11 = smov (%p5573_p1, %s5572_s11), 0 }
 0x49e   : >> { %v5460_v38 = vld [vmem:[%s7776_s24 + $0x80] sm:$0xff]  ;;  %5457 = vst [vmem:[%s7772_s23 + $0x60] sm:$0xff] %v5456_v42  ;;  %5459 = vst [vmem:[%s7772_s23 + $0x70] sm:$0xff] %v5458_v58  ;;  %v5462_v53 = vld [vmem:[%s7776_s24 + $0x90] sm:$0xff]  ;;  %s6205_s13 = sshll.u32 %s13210_s11, 9  ;;  %s13192_s15 = smov %s13210_s11 }
 0x49f   : >> { %5461 = vst [vmem:[%s7772_s23 + $0x80] sm:$0xff] %v5460_v38  ;;  %v5464_v18 = vld [vmem:[%s7776_s24 + $0xa0] sm:$0xff]  ;;  %v5466_v8 = vld [vmem:[%s7776_s24 + $0xb0] sm:$0xff]  ;;  %5463 = vst [vmem:[%s7772_s23 + $0x90] sm:$0xff] %v5462_v53  ;;  %s12167_s16 = scalar_lea.vmem %s11858_s21, %s6205_s13 [#allocation2]   ;;  %s12170_s19 = scalar_lea.vmem %s12097_s29, %s6205_s13  }
 0x4a0   : >> { %5465 = vst [vmem:[%s7772_s23 + $0xa0] sm:$0xff] %v5464_v18  ;;  %5467 = vst [vmem:[%s7772_s23 + $0xb0] sm:$0xff] %v5466_v8  ;;  %v5468_v30 = vld [vmem:[%s7776_s24 + $0xc0] sm:$0xff]  ;;  %v5470_v11 = vld [vmem:[%s7776_s24 + $0xd0] sm:$0xff] }
 0x4a1   : >> { %v5472_v28 = vld [vmem:[%s7776_s24 + $0xe0] sm:$0xff]  ;;  %5469 = vst [vmem:[%s7772_s23 + $0xc0] sm:$0xff] %v5468_v30  ;;  %5471 = vst [vmem:[%s7772_s23 + $0xd0] sm:$0xff] %v5470_v11  ;;  %v5474_v25 = vld [vmem:[%s7776_s24 + $0xf0] sm:$0xff] }
 0x4a2   : >> { %5473 = vst [vmem:[%s7772_s23 + $0xe0] sm:$0xff] %v5472_v28  ;;  %v5476_v0 = vld [vmem:[%s7776_s24 + $0x100] sm:$0xff]  ;;  %v5478_v17 = vld [vmem:[%s7776_s24 + $0x110] sm:$0xff]  ;;  %5475 = vst [vmem:[%s7772_s23 + $0xf0] sm:$0xff] %v5474_v25 }
 0x4a3   : >> { %5477 = vst [vmem:[%s7772_s23 + $0x100] sm:$0xff] %v5476_v0  ;;  %5479 = vst [vmem:[%s7772_s23 + $0x110] sm:$0xff] %v5478_v17  ;;  %v5480_v20 = vld [vmem:[%s7776_s24 + $0x120] sm:$0xff]  ;;  %v5482_v27 = vld [vmem:[%s7776_s24 + $0x130] sm:$0xff] }
 0x4a4   : >> { %v5484_v52 = vld [vmem:[%s7776_s24 + $0x140] sm:$0xff]  ;;  %5481 = vst [vmem:[%s7772_s23 + $0x120] sm:$0xff] %v5480_v20  ;;  %5483 = vst [vmem:[%s7772_s23 + $0x130] sm:$0xff] %v5482_v27  ;;  %v5486_v1 = vld [vmem:[%s7776_s24 + $0x150] sm:$0xff] }
 0x4a5   : >> { %5485 = vst [vmem:[%s7772_s23 + $0x140] sm:$0xff] %v5484_v52  ;;  %v5488_v59 = vld [vmem:[%s7776_s24 + $0x160] sm:$0xff]  ;;  %v5490_v61 = vld [vmem:[%s7776_s24 + $0x170] sm:$0xff]  ;;  %5487 = vst [vmem:[%s7772_s23 + $0x150] sm:$0xff] %v5486_v1 }
 0x4a6   : >> { %5489 = vst [vmem:[%s7772_s23 + $0x160] sm:$0xff] %v5488_v59  ;;  %5491 = vst [vmem:[%s7772_s23 + $0x170] sm:$0xff] %v5490_v61  ;;  %v5492_v37 = vld [vmem:[%s7776_s24 + $0x180] sm:$0xff]  ;;  %v5494_v3 = vld [vmem:[%s7776_s24 + $0x190] sm:$0xff] }
 0x4a7   : >> { %v5496_v50 = vld [vmem:[%s7776_s24 + $0x1a0] sm:$0xff]  ;;  %5493 = vst [vmem:[%s7772_s23 + $0x180] sm:$0xff] %v5492_v37  ;;  %5495 = vst [vmem:[%s7772_s23 + $0x190] sm:$0xff] %v5494_v3  ;;  %v5498_v46 = vld [vmem:[%s7776_s24 + $0x1b0] sm:$0xff] }
 0x4a8   : >> { %5497 = vst [vmem:[%s7772_s23 + $0x1a0] sm:$0xff] %v5496_v50  ;;  %v5500_v62 = vld [vmem:[%s7776_s24 + $0x1c0] sm:$0xff]  ;;  %v5502_v14 = vld [vmem:[%s7776_s24 + $0x1d0] sm:$0xff]  ;;  %5499 = vst [vmem:[%s7772_s23 + $0x1b0] sm:$0xff] %v5498_v46 }
 0x4a9   : >> { %5501 = vst [vmem:[%s7772_s23 + $0x1c0] sm:$0xff] %v5500_v62  ;;  %5503 = vst [vmem:[%s7772_s23 + $0x1d0] sm:$0xff] %v5502_v14  ;;  %v5504_v45 = vld [vmem:[%s7776_s24 + $0x1e0] sm:$0xff]  ;;  %v5506_v5 = vld [vmem:[%s7776_s24 + $0x1f0] sm:$0xff] }
 0x4aa   : >> { %5505 = vst [vmem:[%s7772_s23 + $0x1e0] sm:$0xff] %v5504_v45  ;;  %5507 = vst [vmem:[%s7772_s23 + $0x1f0] sm:$0xff] %v5506_v5  ;;  %v5510_v4 = vld [vmem:[%s7776_s24 + $0x18] sm:$0xff]  ;;  %v5512_v40 = vld [vmem:[%s7776_s24 + $0x28] sm:$0xff] }
 0x4ab   : >> { %5509 = vst [vmem:[%s7772_s23 + $0x8] sm:$0xff] %v5508_v15  ;;  %v5514_v29 = vld [vmem:[%s7776_s24 + $0x38] sm:$0xff]  ;;  %5511 = vst [vmem:[%s7772_s23 + $0x18] sm:$0xff] %v5510_v4  ;;  %v5516_v39 = vld [vmem:[%s7776_s24 + $0x48] sm:$0xff] }
 0x4ac   : >> { %5513 = vst [vmem:[%s7772_s23 + $0x28] sm:$0xff] %v5512_v40  ;;  %5515 = vst [vmem:[%s7772_s23 + $0x38] sm:$0xff] %v5514_v29  ;;  %v5518_v21 = vld [vmem:[%s7776_s24 + $0x58] sm:$0xff]  ;;  %v5520_v23 = vld [vmem:[%s7776_s24 + $0x68] sm:$0xff] }
 0x4ad   : >> { %5517 = vst [vmem:[%s7772_s23 + $0x48] sm:$0xff] %v5516_v39  ;;  %5519 = vst [vmem:[%s7772_s23 + $0x58] sm:$0xff] %v5518_v21  ;;  %v5522_v55 = vld [vmem:[%s7776_s24 + $0x78] sm:$0xff]  ;;  %v5524_v12 = vld [vmem:[%s7776_s24 + $0x88] sm:$0xff] }
 0x4ae   : >> { %5521 = vst [vmem:[%s7772_s23 + $0x68] sm:$0xff] %v5520_v23  ;;  %v5526_v22 = vld [vmem:[%s7776_s24 + $0x98] sm:$0xff]  ;;  %5523 = vst [vmem:[%s7772_s23 + $0x78] sm:$0xff] %v5522_v55  ;;  %v5528_v56 = vld [vmem:[%s7776_s24 + $0xa8] sm:$0xff] }
 0x4af   : >> { %5525 = vst [vmem:[%s7772_s23 + $0x88] sm:$0xff] %v5524_v12  ;;  %5527 = vst [vmem:[%s7772_s23 + $0x98] sm:$0xff] %v5526_v22  ;;  %v5530_v34 = vld [vmem:[%s7776_s24 + $0xb8] sm:$0xff]  ;;  %v5532_v31 = vld [vmem:[%s7776_s24 + $0xc8] sm:$0xff] }
 0x4b0   : >> { %5529 = vst [vmem:[%s7772_s23 + $0xa8] sm:$0xff] %v5528_v56  ;;  %5531 = vst [vmem:[%s7772_s23 + $0xb8] sm:$0xff] %v5530_v34  ;;  %v5534_v57 = vld [vmem:[%s7776_s24 + $0xd8] sm:$0xff]  ;;  %v5536_v60 = vld [vmem:[%s7776_s24 + $0xe8] sm:$0xff] }
 0x4b1   : >> { %5533 = vst [vmem:[%s7772_s23 + $0xc8] sm:$0xff] %v5532_v31  ;;  %v5538_v44 = vld [vmem:[%s7776_s24 + $0xf8] sm:$0xff]  ;;  %5535 = vst [vmem:[%s7772_s23 + $0xd8] sm:$0xff] %v5534_v57  ;;  %v5540_v2 = vld [vmem:[%s7776_s24 + $0x108] sm:$0xff] }
 0x4b2   : >> { %5537 = vst [vmem:[%s7772_s23 + $0xe8] sm:$0xff] %v5536_v60  ;;  %5539 = vst [vmem:[%s7772_s23 + $0xf8] sm:$0xff] %v5538_v44  ;;  %v5542_v48 = vld [vmem:[%s7776_s24 + $0x118] sm:$0xff]  ;;  %v5544_v9 = vld [vmem:[%s7776_s24 + $0x128] sm:$0xff] }
 0x4b3   : >> { %5541 = vst [vmem:[%s7772_s23 + $0x108] sm:$0xff] %v5540_v2  ;;  %5543 = vst [vmem:[%s7772_s23 + $0x118] sm:$0xff] %v5542_v48  ;;  %v5546_v43 = vld [vmem:[%s7776_s24 + $0x138] sm:$0xff]  ;;  %v5548_v54 = vld [vmem:[%s7776_s24 + $0x148] sm:$0xff] }
 0x4b4   : >> { %5545 = vst [vmem:[%s7772_s23 + $0x128] sm:$0xff] %v5544_v9  ;;  %v5550_v47 = vld [vmem:[%s7776_s24 + $0x158] sm:$0xff]  ;;  %5547 = vst [vmem:[%s7772_s23 + $0x138] sm:$0xff] %v5546_v43  ;;  %v5552_v13 = vld [vmem:[%s7776_s24 + $0x168] sm:$0xff]  ;;  %5440 = sbr.rel (!%p5437_p2) target bundleno = 1178 (0x49a), region = 109 }
 0x4b5   : >> { %5549 = vst [vmem:[%s7772_s23 + $0x148] sm:$0xff] %v5548_v54  ;;  %5551 = vst [vmem:[%s7772_s23 + $0x158] sm:$0xff] %v5550_v47  ;;  %v5554_v41 = vld [vmem:[%s7776_s24 + $0x178] sm:$0xff]  ;;  %v5556_v33 = vld [vmem:[%s7776_s24 + $0x188] sm:$0xff] }
 0x4b6   : >> { %5553 = vst [vmem:[%s7772_s23 + $0x168] sm:$0xff] %v5552_v13  ;;  %5555 = vst [vmem:[%s7772_s23 + $0x178] sm:$0xff] %v5554_v41  ;;  %v5558_v7 = vld [vmem:[%s7776_s24 + $0x198] sm:$0xff]  ;;  %v5560_v49 = vld [vmem:[%s7776_s24 + $0x1a8] sm:$0xff] }
 0x4b7   : >> { %5557 = vst [vmem:[%s7772_s23 + $0x188] sm:$0xff] %v5556_v33  ;;  %v5562_v24 = vld [vmem:[%s7776_s24 + $0x1b8] sm:$0xff]  ;;  %5559 = vst [vmem:[%s7772_s23 + $0x198] sm:$0xff] %v5558_v7  ;;  %v5564_v26 = vld [vmem:[%s7776_s24 + $0x1c8] sm:$0xff] }
 0x4b8   : >> { %5561 = vst [vmem:[%s7772_s23 + $0x1a8] sm:$0xff] %v5560_v49  ;;  %5563 = vst [vmem:[%s7772_s23 + $0x1b8] sm:$0xff] %v5562_v24  ;;  %v5566_v6 = vld [vmem:[%s7776_s24 + $0x1d8] sm:$0xff]  ;;  %v5568_v32 = vld [vmem:[%s7776_s24 + $0x1e8] sm:$0xff] }
 0x4b9   : >> { %5565 = vst [vmem:[%s7772_s23 + $0x1c8] sm:$0xff] %v5564_v26  ;;  %5567 = vst [vmem:[%s7772_s23 + $0x1d8] sm:$0xff] %v5566_v6  ;;  %v5570_v63 = vld [vmem:[%s7776_s24 + $0x1f8] sm:$0xff]  ;;  %s13191_s24 = smov %s12167_s16 }
 0x4ba   : >> { %5569 = vst [vmem:[%s7772_s23 + $0x1e8] sm:$0xff] %v5568_v32  ;;  %5571 = vst [vmem:[%s7772_s23 + $0x1f8] sm:$0xff] %v5570_v63  ;;  %s13190_s23 = smov %s12170_s19 }
 0x4bb PF: > { %s12275_s9 = sand.u32 31, %s13208_s30   ;;  %s6217_s28 = sshll.u32 %s12100_s8, 9 }
 0x4bc   : > { %s12279_s14 = scalar_lea.vmem %s11858_s21, %s6217_s28 [#allocation2]   ;;  %s5585_s10 = scalar_lea.vmem %s12097_s29, %s6217_s28  }
 0x4bd   : > { %p6210_p3 = scmp.le.s32.totalorder %s12275_s9, 0 }
 0x4be   : > { %s7786_s17 = smov (!%p6210_p3), %s5585_s10   ;;  %s7790_s7 = smov (!%p6210_p3), %s12279_s14  }
 0x4bf   : > { %5690 = sbr.rel (%p6210_p3) target bundleno = 1232 (0x4d0), region = 114  ;;  %s7794_s20 = smov (!%p6210_p3), 0  }
 0x4c0   : > { %s7798_s18 = smov (!%p6210_p3), 0  }
 0x4c6 LB: >> { %v5595_v35 = vld [vmem:[%s7792_s7] sm:$0xff]  ;;  %v5597_v16 = vld [vmem:[%s7792_s7 + $0x8] sm:$0xff]  ;;  %s5599_s21 = sadd.s32 1, %s7796_s20  ;;  %s5589_s18 = sadd.s32 1, %s7800_s18   ;;  %s7800_s18 = sphi %s7798_s18, %s5589_s18   ;;  %s7796_s20 = sphi %s7794_s20, %s7795_s20   ;;  %s7792_s7 = sphi %s7790_s7, %s5604_s7   ;;  %s7788_s17 = sphi %s7786_s17, %s5605_s17  }
 0x4c7   : >> { %5596 = vst [vmem:[%s7788_s17] sm:$0xff] %v5595_v35  ;;  %5598 = vst [vmem:[%s7788_s17 + $0x8] sm:$0xff] %v5597_v16  ;;  %p5600_p4 = scmp.ge.s32.totalorder %s5599_s21, %s12275_s9  ;;  %p5588_p5 = scmp.ge.s32.totalorder %s5589_s18, %s12275_s9 }
 0x4c9   : >> { %s13212_s21 = smov (%p5600_p4, %s5599_s21), 0  ;;  %5591 = sbr.rel (!%p5588_p5) target bundleno = 1222 (0x4c6), region = 120 }
 0x4ca   : >> { %s6211_s30 = sshll.u32 %s13212_s21, 4  ;;  %s7795_s20 = smov %s13212_s21  }
 0x4cb   : >> { %s5604_s7 = scalar_lea.vmem %s12279_s14, %s6211_s30 [#allocation2]   ;;  %s5605_s17 = scalar_lea.vmem %s5585_s10, %s6211_s30  }
 0x4d0 PF: > { %s16_s27 = sadd.s32 1, %s7768_s27   ;;  %s13193_s29 = sld [smem:[#allocation3_spill]] }
 0x4d1   : > { %p13_p6 = scmp.ge.s32.totalorder %s16_s27, 6   ;;  %s13194_s8 = sld [smem:[#allocation4_spill]] }
 0x4d2   : > { %s13195_s21 = smov %s7748_s22  ;;  %s13196_s22 = smov %s7894_s12 }
 0x4d3   : > { %s13197_s23 = smov %s7760_s25  ;;  %s13198_s24 = smov %s7764_s26 }
 0x4d4   :  { %15 = sbr.rel (!%p13_p6) target bundleno = 4 (0x4), region = 131 }
 0x4d6   : > { %s13199_s25 = smov %s13193_s29 }
 0x4d7   : > { %s13200_s26 = smov %s13194_s8 }

</bundles_post_ra>
